<compile_context>
chip_gen: v7x
topology: tpu7x:2x2x1
jax: 0.10.0
libtpu: 0.0.40
codegen_flags: <defaults>
</compile_context>

<pallas_src>
import functools

import numpy as np
import jax
import jax.numpy as jnp
from jax.experimental import pallas as pl
from jax.experimental.pallas import tpu as pltpu


# --------------------------------------------------------------------------
# Fused forward kernel (one batch tile of TB images per grid step)
# --------------------------------------------------------------------------
def _cnn_kernel(x_ref, w1_ref, b1_ref, w2_ref, b2_ref,
                wf1_ref, bf1_ref, wf2_ref, bf2_ref, wf3_ref, bf3_ref,
                out_ref, p1_ref, p2_ref, *, tb):
    f32 = jnp.float32
    bf16 = jnp.bfloat16

    # Hoisted bias broadcasts (JAX does not CSE broadcast_in_dim).
    b1 = jnp.broadcast_to(b1_ref[...], (tb, 128))
    b2 = jnp.broadcast_to(b2_ref[...], (tb, 128))

    # ---------------- conv1 + bias + ReLU + 2x2 max-pool -------------------
    # x_ref: (32*tb, 128) bf16, rows = h*tb + b, lanes = c*32 + w (96 used).
    # For each pooled output row j, the two conv rows oh=2j,2j+1 are computed
    # together as a (2*tb, 256) value summed over the 5 kh taps (K=128 each);
    # the 256 lanes are [even-ow half | odd-ow half], each half = ow_half*6+cout.
    for j in range(14):
        acc = jnp.dot(x_ref[(2 * j) * tb:(2 * j + 2) * tb, :], w1_ref[0],
                      preferred_element_type=f32)
        for kh in range(1, 5):
            acc = acc + jnp.dot(
                x_ref[(2 * j + kh) * tb:(2 * j + kh + 2) * tb, :],
                w1_ref[kh], preferred_element_type=f32)
        a = jnp.maximum(acc[:tb, :128], acc[:tb, 128:])      # W pool, oh = 2j
        b = jnp.maximum(acc[tb:, :128], acc[tb:, 128:])      # W pool, oh = 2j+1
        z = jnp.maximum(jnp.maximum(a, b) + b1, 0.0)         # H pool + bias + ReLU
        p1_ref[j * tb:(j + 1) * tb, :] = z.astype(bf16)      # rows (hp1,b), lanes wp1*6+c

    # ---------------- conv2 + bias + ReLU + 2x2 max-pool -------------------
    # p1_ref: (14*tb, 128) bf16.  Same chunked-accumulation structure (K=128).
    for j in range(5):
        acc = jnp.dot(p1_ref[(2 * j) * tb:(2 * j + 2) * tb, :], w2_ref[0],
                      preferred_element_type=f32)
        for kh in range(1, 5):
            acc = acc + jnp.dot(
                p1_ref[(2 * j + kh) * tb:(2 * j + kh + 2) * tb, :],
                w2_ref[kh], preferred_element_type=f32)
        a = jnp.maximum(acc[:tb, :128], acc[:tb, 128:])
        b = jnp.maximum(acc[tb:, :128], acc[tb:, 128:])
        z = jnp.maximum(jnp.maximum(a, b) + b2, 0.0)
        # pooled2 stored lane-concatenated: lane = hp2*128 + (wp2*16 + cout)
        p2_ref[:, j * 128:(j + 1) * 128] = z.astype(bf16)

    # ---------------- fc1 -> fc2 -> fc3 (fc1 as ONE K=640 matmul) ----------
    h = jnp.maximum(
        jnp.dot(p2_ref[...], wf1_ref[...], preferred_element_type=f32)
        + bf1_ref[...], 0.0)
    h = jnp.maximum(
        jnp.dot(h.astype(bf16), wf2_ref[...], preferred_element_type=f32)
        + bf2_ref[...], 0.0)
    h = (jnp.dot(h.astype(bf16), wf3_ref[...], preferred_element_type=f32)
         + bf3_ref[...])
    out_ref[...] = h                                         # (tb, 128) f32, lane-dense


# --------------------------------------------------------------------------
# One-time host-side weight packing (banded conv weights, padded/permuted FCs)
# --------------------------------------------------------------------------
def pack_params(params, num_classes=10, dtype=jnp.bfloat16):
    assert num_classes <= 128
    f32 = np.float32
    w1 = np.asarray(params["conv1_w"], f32); b1 = np.asarray(params["conv1_b"], f32)
    w2 = np.asarray(params["conv2_w"], f32); b2 = np.asarray(params["conv2_b"], f32)
    f1w = np.asarray(params["fc1_w"], f32);  f1b = np.asarray(params["fc1_b"], f32)
    f2w = np.asarray(params["fc2_w"], f32);  f2b = np.asarray(params["fc2_b"], f32)
    f3w = np.asarray(params["fc3_w"], f32);  f3b = np.asarray(params["fc3_b"], f32)

    # conv1: 5 taps over kh only (cin merged into the K axis).
    # input lane = c*32 + w_in ; output lane = par*128 + j*6 + cout, ow = 2j+par.
    W1 = np.zeros((5, 128, 256), f32)
    for kh in range(5):
        for c in range(3):
            for par in range(2):
                for j in range(14):
                    ow = 2 * j + par
                    for kw in range(5):
                        col = par * 128 + j * 6
                        W1[kh, c * 32 + ow + kw, col:col + 6] = w1[:, c, kh, kw]
    b1p = np.zeros((1, 128), f32)
    for j in range(14):
        b1p[0, j * 6:j * 6 + 6] = b1

    # conv2: 5 taps over kh; input lanes are pooled1's (w*6 + cin) layout.
    W2 = np.zeros((5, 128, 256), f32)
    for kh in range(5):
        for par in range(2):
            for j in range(5):
                ow = 2 * j + par
                for kw in range(5):
                    w_in = ow + kw
                    for c in range(6):
                        col = par * 128 + j * 16
                        W2[kh, w_in * 6 + c, col:col + 16] = w2[:, c, kh, kw]
    b2p = np.zeros((1, 128), f32)
    for j in range(5):
        b2p[0, j * 16:j * 16 + 16] = b2

    # fc1: pooled2 lane = hp2*128 + wp2*16 + c ; torch flatten index of (16,5,5)
    # is c*25 + h*5 + w -> folded into the Wf1 row permutation.
    Wf1 = np.zeros((640, 128), f32)
    for h in range(5):
        for w in range(5):
            for c in range(16):
                Wf1[h * 128 + w * 16 + c, :120] = f1w[:, c * 25 + h * 5 + w]
    bf1 = np.zeros((1, 128), f32); bf1[0, :120] = f1b
    Wf2 = np.zeros((128, 128), f32); Wf2[:120, :84] = f2w.T
    bf2 = np.zeros((1, 128), f32); bf2[0, :84] = f2b
    Wf3 = np.zeros((128, 128), f32); Wf3[:84, :num_classes] = f3w.T
    bf3 = np.zeros((1, 128), f32); bf3[0, :num_classes] = f3b

    return {
        "W1": jnp.asarray(W1, dtype), "b1": jnp.asarray(b1p, jnp.float32),
        "W2": jnp.asarray(W2, dtype), "b2": jnp.asarray(b2p, jnp.float32),
        "Wf1": jnp.asarray(Wf1, dtype), "bf1": jnp.asarray(bf1, jnp.float32),
        "Wf2": jnp.asarray(Wf2, dtype), "bf2": jnp.asarray(bf2, jnp.float32),
        "Wf3": jnp.asarray(Wf3, dtype), "bf3": jnp.asarray(bf3, jnp.float32),
    }


def _choose_tiling(batch):
    """TB: multiple of 16 (sublane/bf16-pack aligned), up to 256; batch is padded
    to a multiple of 16.  When the padded batch allows it, keep >= 2 grid steps
    so ("parallel",) can use both TensorCores on v7x."""
    b_pad = ((batch + 15) // 16) * 16
    cap = 256 if b_pad < 32 else min(256, b_pad // 2)
    tb = 16
    for cand in range(16, cap + 1, 16):
        if b_pad % cand == 0:
            tb = cand
    return tb, b_pad


# --------------------------------------------------------------------------
# Forward wrapper
# --------------------------------------------------------------------------
def cnn_cifar_forward(x, packed, *, num_classes=10):
    B = x.shape[0]
    tb, b_pad = _choose_tiling(B)
    G = b_pad // tb

    if b_pad != B:
        x = jnp.concatenate(
            [x, jnp.zeros((b_pad - B,) + x.shape[1:], x.dtype)], axis=0)

    # One cheap input repack: rows = h*TB + b (h-major within each batch tile),
    # lanes = c*32 + w (96 of 128, zero-padded; W1 rows 96..127 are zero).
    xp = (x.astype(jnp.bfloat16)
           .reshape(G, tb, 3, 32, 32)       # (g, b, c, h, w)
           .transpose(0, 3, 1, 2, 4)        # (g, h, b, c, w)
           .reshape(G, 32 * tb, 96))
    xp = jnp.pad(xp, ((0, 0), (0, 0), (0, 32)))

    kernel = functools.partial(_cnn_kernel, tb=tb)
    w3 = lambda i: (0, 0, 0)
    w2d = lambda i: (0, 0)

    out = pl.pallas_call(
        kernel,
        out_shape=jax.ShapeDtypeStruct((G, tb, 128), jnp.float32),
        grid=(G,),
        in_specs=[
            pl.BlockSpec((None, 32 * tb, 128), lambda i: (i, 0, 0)),  # x tile
            pl.BlockSpec((5, 128, 256), w3),   # W1 (resident across grid steps)
            pl.BlockSpec((1, 128), w2d),       # b1
            pl.BlockSpec((5, 128, 256), w3),   # W2
            pl.BlockSpec((1, 128), w2d),       # b2
            pl.BlockSpec((640, 128), w2d),     # Wf1
            pl.BlockSpec((1, 128), w2d),       # bf1
            pl.BlockSpec((128, 128), w2d),     # Wf2
            pl.BlockSpec((1, 128), w2d),       # bf2
            pl.BlockSpec((128, 128), w2d),     # Wf3
            pl.BlockSpec((1, 128), w2d),       # bf3
        ],
        out_specs=pl.BlockSpec((None, tb, 128), lambda i: (i, 0, 0)),
        scratch_shapes=[
            pltpu.VMEM((14 * tb, 128), jnp.bfloat16),   # pooled1
            pltpu.VMEM((tb, 640), jnp.bfloat16),        # pooled2 (lane-concat)
        ],
        compiler_params=pltpu.CompilerParams(
            dimension_semantics=("parallel",),
            vmem_limit_bytes=32 * 1024 * 1024,
        ),
    )(xp, packed["W1"], packed["b1"], packed["W2"], packed["b2"],
      packed["Wf1"], packed["bf1"], packed["Wf2"], packed["bf2"],
      packed["Wf3"], packed["bf3"])

    return out.reshape(b_pad, 128)[:B, :num_classes]


# --------------------------------------------------------------------------
# Torch-like init + pure-JAX reference
# --------------------------------------------------------------------------
def init_params(key, num_classes=10):
    def uinit(k, shape, fan_in):
        bound = 1.0 / jnp.sqrt(jnp.float32(fan_in))
        return jax.random.uniform(k, shape, jnp.float32, -bound, bound)

    ks = jax.random.split(key, 10)
    return {
        "conv1_w": uinit(ks[0], (6, 3, 5, 5), 3 * 25),
        "conv1_b": uinit(ks[1], (6,), 3 * 25),
        "conv2_w": uinit(ks[2], (16, 6, 5, 5), 6 * 25),
        "conv2_b": uinit(ks[3], (16,), 6 * 25),
        "fc1_w": uinit(ks[4], (120, 400), 400),
        "fc1_b": uinit(ks[5], (120,), 400),
        "fc2_w": uinit(ks[6], (84, 120), 120),
        "fc2_b": uinit(ks[7], (84,), 120),
        "fc3_w": uinit(ks[8], (num_classes, 84), 84),
        "fc3_b": uinit(ks[9], (num_classes,), 84),
    }


def reference_forward(x, params):
    def conv(x, w, b):
        y = jax.lax.conv_general_dilated(x, w, (1, 1), "VALID")
        return jax.nn.relu(y + b[None, :, None, None])

    def pool(x):
        return jax.lax.reduce_window(
            x, -jnp.inf, jax.lax.max, (1, 1, 2, 2), (1, 1, 2, 2), "VALID")

    x = pool(conv(x, params["conv1_w"], params["conv1_b"]))
    x = pool(conv(x, params["conv2_w"], params["conv2_b"]))
    x = x.reshape(x.shape[0], 400)
    x = jax.nn.relu(x @ params["fc1_w"].T + params["fc1_b"])
    x = jax.nn.relu(x @ params["fc2_w"].T + params["fc2_b"])
    return x @ params["fc3_w"].T + params["fc3_b"]


if __name__ == "__main__":
    key = jax.random.PRNGKey(0)
    pkey, xkey = jax.random.split(key)
    num_classes = 10

    params = init_params(pkey, num_classes=num_classes)
    packed = pack_params(params, num_classes=num_classes)

    # The module's 16*5*5 flatten requires 32x32 inputs; small batch of 2
    # (padded to TB=16 inside the wrapper).
    x = jax.random.normal(xkey, (2, 3, 32, 32), jnp.float32)

    fwd = jax.jit(functools.partial(cnn_cifar_forward, num_classes=num_classes))
    out = jax.block_until_ready(fwd(x, packed))

    assert out.shape == (2, num_classes)
    ref = reference_forward(x, params)
    assert jnp.all(jnp.isfinite(out))
    # bf16 MXU operands with f32 accumulation -> small drift vs the f32 reference.
    assert jnp.allclose(out, ref, atol=5e-2, rtol=5e-2)

    print("KERNEL_OK")
</pallas_src>

<mosaic_0001>
module attributes {stable_mosaic.version = 11 : i64} {
  func.func @_cnn_kernel(%arg0: i32, %arg1: memref<1x512x128xbf16, #tpu.memory_space<vmem>>, %arg2: memref<5x128x256xbf16, #tpu.memory_space<vmem>>, %arg3: memref<1x128xf32, #tpu.memory_space<vmem>>, %arg4: memref<5x128x256xbf16, #tpu.memory_space<vmem>>, %arg5: memref<1x128xf32, #tpu.memory_space<vmem>>, %arg6: memref<640x128xbf16, #tpu.memory_space<vmem>>, %arg7: memref<1x128xf32, #tpu.memory_space<vmem>>, %arg8: memref<128x128xbf16, #tpu.memory_space<vmem>>, %arg9: memref<1x128xf32, #tpu.memory_space<vmem>>, %arg10: memref<128x128xbf16, #tpu.memory_space<vmem>>, %arg11: memref<1x128xf32, #tpu.memory_space<vmem>>, %arg12: memref<1x16x128xf32, #tpu.memory_space<vmem>>, %arg13: memref<224x128xbf16, #tpu.memory_space<vmem>>, %arg14: memref<16x640xbf16, #tpu.memory_space<vmem>>) attributes {dimension_semantics = [#tpu.dimension_semantics<parallel>], iteration_bounds = array<i64: 1>, scalar_prefetch = 0 : i64, scratch_operands = 2 : i64, tpu.core_type = #tpu.core_type<tc>, window_params = [{transform_indices = @transform_0, window_bounds = array<i64: 1, 512, 128>}, {pipeline_mode = #tpu.pipeline_mode<synchronous>, transform_indices = @transform_1, window_bounds = array<i64: 5, 128, 256>}, {pipeline_mode = #tpu.pipeline_mode<synchronous>, transform_indices = @transform_2, window_bounds = array<i64: 1, 128>}, {pipeline_mode = #tpu.pipeline_mode<synchronous>, transform_indices = @transform_3, window_bounds = array<i64: 5, 128, 256>}, {pipeline_mode = #tpu.pipeline_mode<synchronous>, transform_indices = @transform_4, window_bounds = array<i64: 1, 128>}, {pipeline_mode = #tpu.pipeline_mode<synchronous>, transform_indices = @transform_5, window_bounds = array<i64: 640, 128>}, {pipeline_mode = #tpu.pipeline_mode<synchronous>, transform_indices = @transform_6, window_bounds = array<i64: 1, 128>}, {pipeline_mode = #tpu.pipeline_mode<synchronous>, transform_indices = @transform_7, window_bounds = array<i64: 128, 128>}, {pipeline_mode = #tpu.pipeline_mode<synchronous>, transform_indices = @transform_8, window_bounds = array<i64: 1, 128>}, {pipeline_mode = #tpu.pipeline_mode<synchronous>, transform_indices = @transform_9, window_bounds = array<i64: 128, 128>}, {pipeline_mode = #tpu.pipeline_mode<synchronous>, transform_indices = @transform_10, window_bounds = array<i64: 1, 128>}, {transform_indices = @transform_11, window_bounds = array<i64: 1, 16, 128>}]} {
    %c0 = arith.constant 0 : index
    %c0_0 = arith.constant 0 : index
    %0 = vector.load %arg3[%c0, %c0_0] : memref<1x128xf32, #tpu.memory_space<vmem>>, vector<1x128xf32>
    %1 = vector.shape_cast %0 : vector<1x128xf32> to vector<1x128xf32>
    %2 = vector.broadcast %1 : vector<1x128xf32> to vector<16x128xf32>
    %c0_1 = arith.constant 0 : index
    %c0_2 = arith.constant 0 : index
    %3 = vector.load %arg5[%c0_1, %c0_2] : memref<1x128xf32, #tpu.memory_space<vmem>>, vector<1x128xf32>
    %4 = vector.shape_cast %3 : vector<1x128xf32> to vector<1x128xf32>
    %5 = vector.broadcast %4 : vector<1x128xf32> to vector<16x128xf32>
    %c0_3 = arith.constant 0 : index
    %c0_4 = arith.constant 0 : index
    %c0_5 = arith.constant 0 : index
    %6 = vector.load %arg1[%c0_3, %c0_4, %c0_5] : memref<1x512x128xbf16, #tpu.memory_space<vmem>>, vector<1x32x128xbf16>
    %7 = vector.shape_cast %6 : vector<1x32x128xbf16> to vector<32x128xbf16>
    %c0_6 = arith.constant 0 : index
    %c0_7 = arith.constant 0 : index
    %c0_8 = arith.constant 0 : index
    %8 = vector.load %arg2[%c0_6, %c0_7, %c0_8] : memref<5x128x256xbf16, #tpu.memory_space<vmem>>, vector<1x128x256xbf16>
    %9 = vector.shape_cast %8 : vector<1x128x256xbf16> to vector<128x256xbf16>
    %cst = arith.constant dense<0.000000e+00> : vector<32x256xf32>
    %10 = tpu.matmul %7, %9, %cst {dimension_numbers = #tpu.dot_dimension_numbers<[1], [0], [0], [1], [0, 0, 1, 1], [], []>} : vector<32x128xbf16>, vector<128x256xbf16>, vector<32x256xf32> -> vector<32x256xf32>
    %c0_9 = arith.constant 0 : index
    %c16 = arith.constant 16 : index
    %c0_10 = arith.constant 0 : index
    %11 = vector.load %arg1[%c0_9, %c16, %c0_10] : memref<1x512x128xbf16, #tpu.memory_space<vmem>>, vector<1x32x128xbf16>
    %12 = vector.shape_cast %11 : vector<1x32x128xbf16> to vector<32x128xbf16>
    %c1 = arith.constant 1 : index
    %c0_11 = arith.constant 0 : index
    %c0_12 = arith.constant 0 : index
    %13 = vector.load %arg2[%c1, %c0_11, %c0_12] : memref<5x128x256xbf16, #tpu.memory_space<vmem>>, vector<1x128x256xbf16>
    %14 = vector.shape_cast %13 : vector<1x128x256xbf16> to vector<128x256xbf16>
    %cst_13 = arith.constant dense<0.000000e+00> : vector<32x256xf32>
    %15 = tpu.matmul %12, %14, %cst_13 {dimension_numbers = #tpu.dot_dimension_numbers<[1], [0], [0], [1], [0, 0, 1, 1], [], []>} : vector<32x128xbf16>, vector<128x256xbf16>, vector<32x256xf32> -> vector<32x256xf32>
    %16 = arith.addf %10, %15 : vector<32x256xf32>
    %c0_14 = arith.constant 0 : index
    %c32 = arith.constant 32 : index
    %c0_15 = arith.constant 0 : index
    %17 = vector.load %arg1[%c0_14, %c32, %c0_15] : memref<1x512x128xbf16, #tpu.memory_space<vmem>>, vector<1x32x128xbf16>
    %18 = vector.shape_cast %17 : vector<1x32x128xbf16> to vector<32x128xbf16>
    %c2 = arith.constant 2 : index
    %c0_16 = arith.constant 0 : index
    %c0_17 = arith.constant 0 : index
    %19 = vector.load %arg2[%c2, %c0_16, %c0_17] : memref<5x128x256xbf16, #tpu.memory_space<vmem>>, vector<1x128x256xbf16>
    %20 = vector.shape_cast %19 : vector<1x128x256xbf16> to vector<128x256xbf16>
    %cst_18 = arith.constant dense<0.000000e+00> : vector<32x256xf32>
    %21 = tpu.matmul %18, %20, %cst_18 {dimension_numbers = #tpu.dot_dimension_numbers<[1], [0], [0], [1], [0, 0, 1, 1], [], []>} : vector<32x128xbf16>, vector<128x256xbf16>, vector<32x256xf32> -> vector<32x256xf32>
    %22 = arith.addf %16, %21 : vector<32x256xf32>
    %c0_19 = arith.constant 0 : index
    %c48 = arith.constant 48 : index
    %c0_20 = arith.constant 0 : index
    %23 = vector.load %arg1[%c0_19, %c48, %c0_20] : memref<1x512x128xbf16, #tpu.memory_space<vmem>>, vector<1x32x128xbf16>
    %24 = vector.shape_cast %23 : vector<1x32x128xbf16> to vector<32x128xbf16>
    %c3 = arith.constant 3 : index
    %c0_21 = arith.constant 0 : index
    %c0_22 = arith.constant 0 : index
    %25 = vector.load %arg2[%c3, %c0_21, %c0_22] : memref<5x128x256xbf16, #tpu.memory_space<vmem>>, vector<1x128x256xbf16>
    %26 = vector.shape_cast %25 : vector<1x128x256xbf16> to vector<128x256xbf16>
    %cst_23 = arith.constant dense<0.000000e+00> : vector<32x256xf32>
    %27 = tpu.matmul %24, %26, %cst_23 {dimension_numbers = #tpu.dot_dimension_numbers<[1], [0], [0], [1], [0, 0, 1, 1], [], []>} : vector<32x128xbf16>, vector<128x256xbf16>, vector<32x256xf32> -> vector<32x256xf32>
    %28 = arith.addf %22, %27 : vector<32x256xf32>
    %c0_24 = arith.constant 0 : index
    %c64 = arith.constant 64 : index
    %c0_25 = arith.constant 0 : index
    %29 = vector.load %arg1[%c0_24, %c64, %c0_25] : memref<1x512x128xbf16, #tpu.memory_space<vmem>>, vector<1x32x128xbf16>
    %30 = vector.shape_cast %29 : vector<1x32x128xbf16> to vector<32x128xbf16>
    %c4 = arith.constant 4 : index
    %c0_26 = arith.constant 0 : index
    %c0_27 = arith.constant 0 : index
    %31 = vector.load %arg2[%c4, %c0_26, %c0_27] : memref<5x128x256xbf16, #tpu.memory_space<vmem>>, vector<1x128x256xbf16>
    %32 = vector.shape_cast %31 : vector<1x128x256xbf16> to vector<128x256xbf16>
    %cst_28 = arith.constant dense<0.000000e+00> : vector<32x256xf32>
    %33 = tpu.matmul %30, %32, %cst_28 {dimension_numbers = #tpu.dot_dimension_numbers<[1], [0], [0], [1], [0, 0, 1, 1], [], []>} : vector<32x128xbf16>, vector<128x256xbf16>, vector<32x256xf32> -> vector<32x256xf32>
    %34 = arith.addf %28, %33 : vector<32x256xf32>
    %35 = vector.extract_strided_slice %34 {offsets = [0, 0], sizes = [16, 128], strides = [1, 1]} : vector<32x256xf32> to vector<16x128xf32>
    %36 = vector.extract_strided_slice %34 {offsets = [0, 128], sizes = [16, 128], strides = [1, 1]} : vector<32x256xf32> to vector<16x128xf32>
    %37 = arith.maximumf %35, %36 : vector<16x128xf32>
    %38 = vector.extract_strided_slice %34 {offsets = [16, 0], sizes = [16, 128], strides = [1, 1]} : vector<32x256xf32> to vector<16x128xf32>
    %39 = vector.extract_strided_slice %34 {offsets = [16, 128], sizes = [16, 128], strides = [1, 1]} : vector<32x256xf32> to vector<16x128xf32>
    %40 = arith.maximumf %38, %39 : vector<16x128xf32>
    %41 = arith.maximumf %37, %40 : vector<16x128xf32>
    %42 = arith.addf %41, %2 : vector<16x128xf32>
    %cst_29 = arith.constant 0.000000e+00 : f32
    %43 = vector.broadcast %cst_29 : f32 to vector<16x128xf32>
    %44 = arith.maximumf %42, %43 : vector<16x128xf32>
    %45 = arith.truncf %44 : vector<16x128xf32> to vector<16x128xbf16>
    %c0_30 = arith.constant 0 : index
    %c0_31 = arith.constant 0 : index
    %46 = vector.load %arg13[%c0_30, %c0_31] : memref<224x128xbf16, #tpu.memory_space<vmem>>, vector<16x128xbf16>
    tpu.vector_store %arg13[%c0_30, %c0_31], %45 {strides = array<i32>} : memref<224x128xbf16, #tpu.memory_space<vmem>>, vector<16x128xbf16>,
    %c0_32 = arith.constant 0 : index
    %c32_33 = arith.constant 32 : index
    %c0_34 = arith.constant 0 : index
    %47 = vector.load %arg1[%c0_32, %c32_33, %c0_34] : memref<1x512x128xbf16, #tpu.memory_space<vmem>>, vector<1x32x128xbf16>
    %48 = vector.shape_cast %47 : vector<1x32x128xbf16> to vector<32x128xbf16>
    %c0_35 = arith.constant 0 : index
    %c0_36 = arith.constant 0 : index
    %c0_37 = arith.constant 0 : index
    %49 = vector.load %arg2[%c0_35, %c0_36, %c0_37] : memref<5x128x256xbf16, #tpu.memory_space<vmem>>, vector<1x128x256xbf16>
    %50 = vector.shape_cast %49 : vector<1x128x256xbf16> to vector<128x256xbf16>
    %cst_38 = arith.constant dense<0.000000e+00> : vector<32x256xf32>
    %51 = tpu.matmul %48, %50, %cst_38 {dimension_numbers = #tpu.dot_dimension_numbers<[1], [0], [0], [1], [0, 0, 1, 1], [], []>} : vector<32x128xbf16>, vector<128x256xbf16>, vector<32x256xf32> -> vector<32x256xf32>
    %c0_39 = arith.constant 0 : index
    %c48_40 = arith.constant 48 : index
    %c0_41 = arith.constant 0 : index
    %52 = vector.load %arg1[%c0_39, %c48_40, %c0_41] : memref<1x512x128xbf16, #tpu.memory_space<vmem>>, vector<1x32x128xbf16>
    %53 = vector.shape_cast %52 : vector<1x32x128xbf16> to vector<32x128xbf16>
    %c1_42 = arith.constant 1 : index
    %c0_43 = arith.constant 0 : index
    %c0_44 = arith.constant 0 : index
    %54 = vector.load %arg2[%c1_42, %c0_43, %c0_44] : memref<5x128x256xbf16, #tpu.memory_space<vmem>>, vector<1x128x256xbf16>
    %55 = vector.shape_cast %54 : vector<1x128x256xbf16> to vector<128x256xbf16>
    %cst_45 = arith.constant dense<0.000000e+00> : vector<32x256xf32>
    %56 = tpu.matmul %53, %55, %cst_45 {dimension_numbers = #tpu.dot_dimension_numbers<[1], [0], [0], [1], [0, 0, 1, 1], [], []>} : vector<32x128xbf16>, vector<128x256xbf16>, vector<32x256xf32> -> vector<32x256xf32>
    %57 = arith.addf %51, %56 : vector<32x256xf32>
    %c0_46 = arith.constant 0 : index
    %c64_47 = arith.constant 64 : index
    %c0_48 = arith.constant 0 : index
    %58 = vector.load %arg1[%c0_46, %c64_47, %c0_48] : memref<1x512x128xbf16, #tpu.memory_space<vmem>>, vector<1x32x128xbf16>
    %59 = vector.shape_cast %58 : vector<1x32x128xbf16> to vector<32x128xbf16>
    %c2_49 = arith.constant 2 : index
    %c0_50 = arith.constant 0 : index
    %c0_51 = arith.constant 0 : index
    %60 = vector.load %arg2[%c2_49, %c0_50, %c0_51] : memref<5x128x256xbf16, #tpu.memory_space<vmem>>, vector<1x128x256xbf16>
    %61 = vector.shape_cast %60 : vector<1x128x256xbf16> to vector<128x256xbf16>
    %cst_52 = arith.constant dense<0.000000e+00> : vector<32x256xf32>
    %62 = tpu.matmul %59, %61, %cst_52 {dimension_numbers = #tpu.dot_dimension_numbers<[1], [0], [0], [1], [0, 0, 1, 1], [], []>} : vector<32x128xbf16>, vector<128x256xbf16>, vector<32x256xf32> -> vector<32x256xf32>
    %63 = arith.addf %57, %62 : vector<32x256xf32>
    %c0_53 = arith.constant 0 : index
    %c80 = arith.constant 80 : index
    %c0_54 = arith.constant 0 : index
    %64 = vector.load %arg1[%c0_53, %c80, %c0_54] : memref<1x512x128xbf16, #tpu.memory_space<vmem>>, vector<1x32x128xbf16>
    %65 = vector.shape_cast %64 : vector<1x32x128xbf16> to vector<32x128xbf16>
    %c3_55 = arith.constant 3 : index
    %c0_56 = arith.constant 0 : index
    %c0_57 = arith.constant 0 : index
    %66 = vector.load %arg2[%c3_55, %c0_56, %c0_57] : memref<5x128x256xbf16, #tpu.memory_space<vmem>>, vector<1x128x256xbf16>
    %67 = vector.shape_cast %66 : vector<1x128x256xbf16> to vector<128x256xbf16>
    %cst_58 = arith.constant dense<0.000000e+00> : vector<32x256xf32>
    %68 = tpu.matmul %65, %67, %cst_58 {dimension_numbers = #tpu.dot_dimension_numbers<[1], [0], [0], [1], [0, 0, 1, 1], [], []>} : vector<32x128xbf16>, vector<128x256xbf16>, vector<32x256xf32> -> vector<32x256xf32>
    %69 = arith.addf %63, %68 : vector<32x256xf32>
    %c0_59 = arith.constant 0 : index
    %c96 = arith.constant 96 : index
    %c0_60 = arith.constant 0 : index
    %70 = vector.load %arg1[%c0_59, %c96, %c0_60] : memref<1x512x128xbf16, #tpu.memory_space<vmem>>, vector<1x32x128xbf16>
    %71 = vector.shape_cast %70 : vector<1x32x128xbf16> to vector<32x128xbf16>
    %c4_61 = arith.constant 4 : index
    %c0_62 = arith.constant 0 : index
    %c0_63 = arith.constant 0 : index
    %72 = vector.load %arg2[%c4_61, %c0_62, %c0_63] : memref<5x128x256xbf16, #tpu.memory_space<vmem>>, vector<1x128x256xbf16>
    %73 = vector.shape_cast %72 : vector<1x128x256xbf16> to vector<128x256xbf16>
    %cst_64 = arith.constant dense<0.000000e+00> : vector<32x256xf32>
    %74 = tpu.matmul %71, %73, %cst_64 {dimension_numbers = #tpu.dot_dimension_numbers<[1], [0], [0], [1], [0, 0, 1, 1], [], []>} : vector<32x128xbf16>, vector<128x256xbf16>, vector<32x256xf32> -> vector<32x256xf32>
    %75 = arith.addf %69, %74 : vector<32x256xf32>
    %76 = vector.extract_strided_slice %75 {offsets = [0, 0], sizes = [16, 128], strides = [1, 1]} : vector<32x256xf32> to vector<16x128xf32>
    %77 = vector.extract_strided_slice %75 {offsets = [0, 128], sizes = [16, 128], strides = [1, 1]} : vector<32x256xf32> to vector<16x128xf32>
    %78 = arith.maximumf %76, %77 : vector<16x128xf32>
    %79 = vector.extract_strided_slice %75 {offsets = [16, 0], sizes = [16, 128], strides = [1, 1]} : vector<32x256xf32> to vector<16x128xf32>
    %80 = vector.extract_strided_slice %75 {offsets = [16, 128], sizes = [16, 128], strides = [1, 1]} : vector<32x256xf32> to vector<16x128xf32>
    %81 = arith.maximumf %79, %80 : vector<16x128xf32>
    %82 = arith.maximumf %78, %81 : vector<16x128xf32>
    %83 = arith.addf %82, %2 : vector<16x128xf32>
    %cst_65 = arith.constant 0.000000e+00 : f32
    %84 = vector.broadcast %cst_65 : f32 to vector<16x128xf32>
    %85 = arith.maximumf %83, %84 : vector<16x128xf32>
    %86 = arith.truncf %85 : vector<16x128xf32> to vector<16x128xbf16>
    %c16_66 = arith.constant 16 : index
    %c0_67 = arith.constant 0 : index
    %87 = vector.load %arg13[%c16_66, %c0_67] : memref<224x128xbf16, #tpu.memory_space<vmem>>, vector<16x128xbf16>
    tpu.vector_store %arg13[%c16_66, %c0_67], %86 {strides = array<i32>} : memref<224x128xbf16, #tpu.memory_space<vmem>>, vector<16x128xbf16>,
    %c0_68 = arith.constant 0 : index
    %c64_69 = arith.constant 64 : index
    %c0_70 = arith.constant 0 : index
    %88 = vector.load %arg1[%c0_68, %c64_69, %c0_70] : memref<1x512x128xbf16, #tpu.memory_space<vmem>>, vector<1x32x128xbf16>
    %89 = vector.shape_cast %88 : vector<1x32x128xbf16> to vector<32x128xbf16>
    %c0_71 = arith.constant 0 : index
    %c0_72 = arith.constant 0 : index
    %c0_73 = arith.constant 0 : index
    %90 = vector.load %arg2[%c0_71, %c0_72, %c0_73] : memref<5x128x256xbf16, #tpu.memory_space<vmem>>, vector<1x128x256xbf16>
    %91 = vector.shape_cast %90 : vector<1x128x256xbf16> to vector<128x256xbf16>
    %cst_74 = arith.constant dense<0.000000e+00> : vector<32x256xf32>
    %92 = tpu.matmul %89, %91, %cst_74 {dimension_numbers = #tpu.dot_dimension_numbers<[1], [0], [0], [1], [0, 0, 1, 1], [], []>} : vector<32x128xbf16>, vector<128x256xbf16>, vector<32x256xf32> -> vector<32x256xf32>
    %c0_75 = arith.constant 0 : index
    %c80_76 = arith.constant 80 : index
    %c0_77 = arith.constant 0 : index
    %93 = vector.load %arg1[%c0_75, %c80_76, %c0_77] : memref<1x512x128xbf16, #tpu.memory_space<vmem>>, vector<1x32x128xbf16>
    %94 = vector.shape_cast %93 : vector<1x32x128xbf16> to vector<32x128xbf16>
    %c1_78 = arith.constant 1 : index
    %c0_79 = arith.constant 0 : index
    %c0_80 = arith.constant 0 : index
    %95 = vector.load %arg2[%c1_78, %c0_79, %c0_80] : memref<5x128x256xbf16, #tpu.memory_space<vmem>>, vector<1x128x256xbf16>
    %96 = vector.shape_cast %95 : vector<1x128x256xbf16> to vector<128x256xbf16>
    %cst_81 = arith.constant dense<0.000000e+00> : vector<32x256xf32>
    %97 = tpu.matmul %94, %96, %cst_81 {dimension_numbers = #tpu.dot_dimension_numbers<[1], [0], [0], [1], [0, 0, 1, 1], [], []>} : vector<32x128xbf16>, vector<128x256xbf16>, vector<32x256xf32> -> vector<32x256xf32>
    %98 = arith.addf %92, %97 : vector<32x256xf32>
    %c0_82 = arith.constant 0 : index
    %c96_83 = arith.constant 96 : index
    %c0_84 = arith.constant 0 : index
    %99 = vector.load %arg1[%c0_82, %c96_83, %c0_84] : memref<1x512x128xbf16, #tpu.memory_space<vmem>>, vector<1x32x128xbf16>
    %100 = vector.shape_cast %99 : vector<1x32x128xbf16> to vector<32x128xbf16>
    %c2_85 = arith.constant 2 : index
    %c0_86 = arith.constant 0 : index
    %c0_87 = arith.constant 0 : index
    %101 = vector.load %arg2[%c2_85, %c0_86, %c0_87] : memref<5x128x256xbf16, #tpu.memory_space<vmem>>, vector<1x128x256xbf16>
    %102 = vector.shape_cast %101 : vector<1x128x256xbf16> to vector<128x256xbf16>
    %cst_88 = arith.constant dense<0.000000e+00> : vector<32x256xf32>
    %103 = tpu.matmul %100, %102, %cst_88 {dimension_numbers = #tpu.dot_dimension_numbers<[1], [0], [0], [1], [0, 0, 1, 1], [], []>} : vector<32x128xbf16>, vector<128x256xbf16>, vector<32x256xf32> -> vector<32x256xf32>
    %104 = arith.addf %98, %103 : vector<32x256xf32>
    %c0_89 = arith.constant 0 : index
    %c112 = arith.constant 112 : index
    %c0_90 = arith.constant 0 : index
    %105 = vector.load %arg1[%c0_89, %c112, %c0_90] : memref<1x512x128xbf16, #tpu.memory_space<vmem>>, vector<1x32x128xbf16>
    %106 = vector.shape_cast %105 : vector<1x32x128xbf16> to vector<32x128xbf16>
    %c3_91 = arith.constant 3 : index
    %c0_92 = arith.constant 0 : index
    %c0_93 = arith.constant 0 : index
    %107 = vector.load %arg2[%c3_91, %c0_92, %c0_93] : memref<5x128x256xbf16, #tpu.memory_space<vmem>>, vector<1x128x256xbf16>
    %108 = vector.shape_cast %107 : vector<1x128x256xbf16> to vector<128x256xbf16>
    %cst_94 = arith.constant dense<0.000000e+00> : vector<32x256xf32>
    %109 = tpu.matmul %106, %108, %cst_94 {dimension_numbers = #tpu.dot_dimension_numbers<[1], [0], [0], [1], [0, 0, 1, 1], [], []>} : vector<32x128xbf16>, vector<128x256xbf16>, vector<32x256xf32> -> vector<32x256xf32>
    %110 = arith.addf %104, %109 : vector<32x256xf32>
    %c0_95 = arith.constant 0 : index
    %c128 = arith.constant 128 : index
    %c0_96 = arith.constant 0 : index
    %111 = vector.load %arg1[%c0_95, %c128, %c0_96] : memref<1x512x128xbf16, #tpu.memory_space<vmem>>, vector<1x32x128xbf16>
    %112 = vector.shape_cast %111 : vector<1x32x128xbf16> to vector<32x128xbf16>
    %c4_97 = arith.constant 4 : index
    %c0_98 = arith.constant 0 : index
    %c0_99 = arith.constant 0 : index
    %113 = vector.load %arg2[%c4_97, %c0_98, %c0_99] : memref<5x128x256xbf16, #tpu.memory_space<vmem>>, vector<1x128x256xbf16>
    %114 = vector.shape_cast %113 : vector<1x128x256xbf16> to vector<128x256xbf16>
    %cst_100 = arith.constant dense<0.000000e+00> : vector<32x256xf32>
    %115 = tpu.matmul %112, %114, %cst_100 {dimension_numbers = #tpu.dot_dimension_numbers<[1], [0], [0], [1], [0, 0, 1, 1], [], []>} : vector<32x128xbf16>, vector<128x256xbf16>, vector<32x256xf32> -> vector<32x256xf32>
    %116 = arith.addf %110, %115 : vector<32x256xf32>
    %117 = vector.extract_strided_slice %116 {offsets = [0, 0], sizes = [16, 128], strides = [1, 1]} : vector<32x256xf32> to vector<16x128xf32>
    %118 = vector.extract_strided_slice %116 {offsets = [0, 128], sizes = [16, 128], strides = [1, 1]} : vector<32x256xf32> to vector<16x128xf32>
    %119 = arith.maximumf %117, %118 : vector<16x128xf32>
    %120 = vector.extract_strided_slice %116 {offsets = [16, 0], sizes = [16, 128], strides = [1, 1]} : vector<32x256xf32> to vector<16x128xf32>
    %121 = vector.extract_strided_slice %116 {offsets = [16, 128], sizes = [16, 128], strides = [1, 1]} : vector<32x256xf32> to vector<16x128xf32>
    %122 = arith.maximumf %120, %121 : vector<16x128xf32>
    %123 = arith.maximumf %119, %122 : vector<16x128xf32>
    %124 = arith.addf %123, %2 : vector<16x128xf32>
    %cst_101 = arith.constant 0.000000e+00 : f32
    %125 = vector.broadcast %cst_101 : f32 to vector<16x128xf32>
    %126 = arith.maximumf %124, %125 : vector<16x128xf32>
    %127 = arith.truncf %126 : vector<16x128xf32> to vector<16x128xbf16>
    %c32_102 = arith.constant 32 : index
    %c0_103 = arith.constant 0 : index
    %128 = vector.load %arg13[%c32_102, %c0_103] : memref<224x128xbf16, #tpu.memory_space<vmem>>, vector<16x128xbf16>
    tpu.vector_store %arg13[%c32_102, %c0_103], %127 {strides = array<i32>} : memref<224x128xbf16, #tpu.memory_space<vmem>>, vector<16x128xbf16>,
    %c0_104 = arith.constant 0 : index
    %c96_105 = arith.constant 96 : index
    %c0_106 = arith.constant 0 : index
    %129 = vector.load %arg1[%c0_104, %c96_105, %c0_106] : memref<1x512x128xbf16, #tpu.memory_space<vmem>>, vector<1x32x128xbf16>
    %130 = vector.shape_cast %129 : vector<1x32x128xbf16> to vector<32x128xbf16>
    %c0_107 = arith.constant 0 : index
    %c0_108 = arith.constant 0 : index
    %c0_109 = arith.constant 0 : index
    %131 = vector.load %arg2[%c0_107, %c0_108, %c0_109] : memref<5x128x256xbf16, #tpu.memory_space<vmem>>, vector<1x128x256xbf16>
    %132 = vector.shape_cast %131 : vector<1x128x256xbf16> to vector<128x256xbf16>
    %cst_110 = arith.constant dense<0.000000e+00> : vector<32x256xf32>
    %133 = tpu.matmul %130, %132, %cst_110 {dimension_numbers = #tpu.dot_dimension_numbers<[1], [0], [0], [1], [0, 0, 1, 1], [], []>} : vector<32x128xbf16>, vector<128x256xbf16>, vector<32x256xf32> -> vector<32x256xf32>
    %c0_111 = arith.constant 0 : index
    %c112_112 = arith.constant 112 : index
    %c0_113 = arith.constant 0 : index
    %134 = vector.load %arg1[%c0_111, %c112_112, %c0_113] : memref<1x512x128xbf16, #tpu.memory_space<vmem>>, vector<1x32x128xbf16>
    %135 = vector.shape_cast %134 : vector<1x32x128xbf16> to vector<32x128xbf16>
    %c1_114 = arith.constant 1 : index
    %c0_115 = arith.constant 0 : index
    %c0_116 = arith.constant 0 : index
    %136 = vector.load %arg2[%c1_114, %c0_115, %c0_116] : memref<5x128x256xbf16, #tpu.memory_space<vmem>>, vector<1x128x256xbf16>
    %137 = vector.shape_cast %136 : vector<1x128x256xbf16> to vector<128x256xbf16>
    %cst_117 = arith.constant dense<0.000000e+00> : vector<32x256xf32>
    %138 = tpu.matmul %135, %137, %cst_117 {dimension_numbers = #tpu.dot_dimension_numbers<[1], [0], [0], [1], [0, 0, 1, 1], [], []>} : vector<32x128xbf16>, vector<128x256xbf16>, vector<32x256xf32> -> vector<32x256xf32>
    %139 = arith.addf %133, %138 : vector<32x256xf32>
    %c0_118 = arith.constant 0 : index
    %c128_119 = arith.constant 128 : index
    %c0_120 = arith.constant 0 : index
    %140 = vector.load %arg1[%c0_118, %c128_119, %c0_120] : memref<1x512x128xbf16, #tpu.memory_space<vmem>>, vector<1x32x128xbf16>
    %141 = vector.shape_cast %140 : vector<1x32x128xbf16> to vector<32x128xbf16>
    %c2_121 = arith.constant 2 : index
    %c0_122 = arith.constant 0 : index
    %c0_123 = arith.constant 0 : index
    %142 = vector.load %arg2[%c2_121, %c0_122, %c0_123] : memref<5x128x256xbf16, #tpu.memory_space<vmem>>, vector<1x128x256xbf16>
    %143 = vector.shape_cast %142 : vector<1x128x256xbf16> to vector<128x256xbf16>
    %cst_124 = arith.constant dense<0.000000e+00> : vector<32x256xf32>
    %144 = tpu.matmul %141, %143, %cst_124 {dimension_numbers = #tpu.dot_dimension_numbers<[1], [0], [0], [1], [0, 0, 1, 1], [], []>} : vector<32x128xbf16>, vector<128x256xbf16>, vector<32x256xf32> -> vector<32x256xf32>
    %145 = arith.addf %139, %144 : vector<32x256xf32>
    %c0_125 = arith.constant 0 : index
    %c144 = arith.constant 144 : index
    %c0_126 = arith.constant 0 : index
    %146 = vector.load %arg1[%c0_125, %c144, %c0_126] : memref<1x512x128xbf16, #tpu.memory_space<vmem>>, vector<1x32x128xbf16>
    %147 = vector.shape_cast %146 : vector<1x32x128xbf16> to vector<32x128xbf16>
    %c3_127 = arith.constant 3 : index
    %c0_128 = arith.constant 0 : index
    %c0_129 = arith.constant 0 : index
    %148 = vector.load %arg2[%c3_127, %c0_128, %c0_129] : memref<5x128x256xbf16, #tpu.memory_space<vmem>>, vector<1x128x256xbf16>
    %149 = vector.shape_cast %148 : vector<1x128x256xbf16> to vector<128x256xbf16>
    %cst_130 = arith.constant dense<0.000000e+00> : vector<32x256xf32>
    %150 = tpu.matmul %147, %149, %cst_130 {dimension_numbers = #tpu.dot_dimension_numbers<[1], [0], [0], [1], [0, 0, 1, 1], [], []>} : vector<32x128xbf16>, vector<128x256xbf16>, vector<32x256xf32> -> vector<32x256xf32>
    %151 = arith.addf %145, %150 : vector<32x256xf32>
    %c0_131 = arith.constant 0 : index
    %c160 = arith.constant 160 : index
    %c0_132 = arith.constant 0 : index
    %152 = vector.load %arg1[%c0_131, %c160, %c0_132] : memref<1x512x128xbf16, #tpu.memory_space<vmem>>, vector<1x32x128xbf16>
    %153 = vector.shape_cast %152 : vector<1x32x128xbf16> to vector<32x128xbf16>
    %c4_133 = arith.constant 4 : index
    %c0_134 = arith.constant 0 : index
    %c0_135 = arith.constant 0 : index
    %154 = vector.load %arg2[%c4_133, %c0_134, %c0_135] : memref<5x128x256xbf16, #tpu.memory_space<vmem>>, vector<1x128x256xbf16>
    %155 = vector.shape_cast %154 : vector<1x128x256xbf16> to vector<128x256xbf16>
    %cst_136 = arith.constant dense<0.000000e+00> : vector<32x256xf32>
    %156 = tpu.matmul %153, %155, %cst_136 {dimension_numbers = #tpu.dot_dimension_numbers<[1], [0], [0], [1], [0, 0, 1, 1], [], []>} : vector<32x128xbf16>, vector<128x256xbf16>, vector<32x256xf32> -> vector<32x256xf32>
    %157 = arith.addf %151, %156 : vector<32x256xf32>
    %158 = vector.extract_strided_slice %157 {offsets = [0, 0], sizes = [16, 128], strides = [1, 1]} : vector<32x256xf32> to vector<16x128xf32>
    %159 = vector.extract_strided_slice %157 {offsets = [0, 128], sizes = [16, 128], strides = [1, 1]} : vector<32x256xf32> to vector<16x128xf32>
    %160 = arith.maximumf %158, %159 : vector<16x128xf32>
    %161 = vector.extract_strided_slice %157 {offsets = [16, 0], sizes = [16, 128], strides = [1, 1]} : vector<32x256xf32> to vector<16x128xf32>
    %162 = vector.extract_strided_slice %157 {offsets = [16, 128], sizes = [16, 128], strides = [1, 1]} : vector<32x256xf32> to vector<16x128xf32>
    %163 = arith.maximumf %161, %162 : vector<16x128xf32>
    %164 = arith.maximumf %160, %163 : vector<16x128xf32>
    %165 = arith.addf %164, %2 : vector<16x128xf32>
    %cst_137 = arith.constant 0.000000e+00 : f32
    %166 = vector.broadcast %cst_137 : f32 to vector<16x128xf32>
    %167 = arith.maximumf %165, %166 : vector<16x128xf32>
    %168 = arith.truncf %167 : vector<16x128xf32> to vector<16x128xbf16>
    %c48_138 = arith.constant 48 : index
    %c0_139 = arith.constant 0 : index
    %169 = vector.load %arg13[%c48_138, %c0_139] : memref<224x128xbf16, #tpu.memory_space<vmem>>, vector<16x128xbf16>
    tpu.vector_store %arg13[%c48_138, %c0_139], %168 {strides = array<i32>} : memref<224x128xbf16, #tpu.memory_space<vmem>>, vector<16x128xbf16>,
    %c0_140 = arith.constant 0 : index
    %c128_141 = arith.constant 128 : index
    %c0_142 = arith.constant 0 : index
    %170 = vector.load %arg1[%c0_140, %c128_141, %c0_142] : memref<1x512x128xbf16, #tpu.memory_space<vmem>>, vector<1x32x128xbf16>
    %171 = vector.shape_cast %170 : vector<1x32x128xbf16> to vector<32x128xbf16>
    %c0_143 = arith.constant 0 : index
    %c0_144 = arith.constant 0 : index
    %c0_145 = arith.constant 0 : index
    %172 = vector.load %arg2[%c0_143, %c0_144, %c0_145] : memref<5x128x256xbf16, #tpu.memory_space<vmem>>, vector<1x128x256xbf16>
    %173 = vector.shape_cast %172 : vector<1x128x256xbf16> to vector<128x256xbf16>
    %cst_146 = arith.constant dense<0.000000e+00> : vector<32x256xf32>
    %174 = tpu.matmul %171, %173, %cst_146 {dimension_numbers = #tpu.dot_dimension_numbers<[1], [0], [0], [1], [0, 0, 1, 1], [], []>} : vector<32x128xbf16>, vector<128x256xbf16>, vector<32x256xf32> -> vector<32x256xf32>
    %c0_147 = arith.constant 0 : index
    %c144_148 = arith.constant 144 : index
    %c0_149 = arith.constant 0 : index
    %175 = vector.load %arg1[%c0_147, %c144_148, %c0_149] : memref<1x512x128xbf16, #tpu.memory_space<vmem>>, vector<1x32x128xbf16>
    %176 = vector.shape_cast %175 : vector<1x32x128xbf16> to vector<32x128xbf16>
    %c1_150 = arith.constant 1 : index
    %c0_151 = arith.constant 0 : index
    %c0_152 = arith.constant 0 : index
    %177 = vector.load %arg2[%c1_150, %c0_151, %c0_152] : memref<5x128x256xbf16, #tpu.memory_space<vmem>>, vector<1x128x256xbf16>
    %178 = vector.shape_cast %177 : vector<1x128x256xbf16> to vector<128x256xbf16>
    %cst_153 = arith.constant dense<0.000000e+00> : vector<32x256xf32>
    %179 = tpu.matmul %176, %178, %cst_153 {dimension_numbers = #tpu.dot_dimension_numbers<[1], [0], [0], [1], [0, 0, 1, 1], [], []>} : vector<32x128xbf16>, vector<128x256xbf16>, vector<32x256xf32> -> vector<32x256xf32>
    %180 = arith.addf %174, %179 : vector<32x256xf32>
    %c0_154 = arith.constant 0 : index
    %c160_155 = arith.constant 160 : index
    %c0_156 = arith.constant 0 : index
    %181 = vector.load %arg1[%c0_154, %c160_155, %c0_156] : memref<1x512x128xbf16, #tpu.memory_space<vmem>>, vector<1x32x128xbf16>
    %182 = vector.shape_cast %181 : vector<1x32x128xbf16> to vector<32x128xbf16>
    %c2_157 = arith.constant 2 : index
    %c0_158 = arith.constant 0 : index
    %c0_159 = arith.constant 0 : index
    %183 = vector.load %arg2[%c2_157, %c0_158, %c0_159] : memref<5x128x256xbf16, #tpu.memory_space<vmem>>, vector<1x128x256xbf16>
    %184 = vector.shape_cast %183 : vector<1x128x256xbf16> to vector<128x256xbf16>
    %cst_160 = arith.constant dense<0.000000e+00> : vector<32x256xf32>
    %185 = tpu.matmul %182, %184, %cst_160 {dimension_numbers = #tpu.dot_dimension_numbers<[1], [0], [0], [1], [0, 0, 1, 1], [], []>} : vector<32x128xbf16>, vector<128x256xbf16>, vector<32x256xf32> -> vector<32x256xf32>
    %186 = arith.addf %180, %185 : vector<32x256xf32>
    %c0_161 = arith.constant 0 : index
    %c176 = arith.constant 176 : index
    %c0_162 = arith.constant 0 : index
    %187 = vector.load %arg1[%c0_161, %c176, %c0_162] : memref<1x512x128xbf16, #tpu.memory_space<vmem>>, vector<1x32x128xbf16>
    %188 = vector.shape_cast %187 : vector<1x32x128xbf16> to vector<32x128xbf16>
    %c3_163 = arith.constant 3 : index
    %c0_164 = arith.constant 0 : index
    %c0_165 = arith.constant 0 : index
    %189 = vector.load %arg2[%c3_163, %c0_164, %c0_165] : memref<5x128x256xbf16, #tpu.memory_space<vmem>>, vector<1x128x256xbf16>
    %190 = vector.shape_cast %189 : vector<1x128x256xbf16> to vector<128x256xbf16>
    %cst_166 = arith.constant dense<0.000000e+00> : vector<32x256xf32>
    %191 = tpu.matmul %188, %190, %cst_166 {dimension_numbers = #tpu.dot_dimension_numbers<[1], [0], [0], [1], [0, 0, 1, 1], [], []>} : vector<32x128xbf16>, vector<128x256xbf16>, vector<32x256xf32> -> vector<32x256xf32>
    %192 = arith.addf %186, %191 : vector<32x256xf32>
    %c0_167 = arith.constant 0 : index
    %c192 = arith.constant 192 : index
    %c0_168 = arith.constant 0 : index
    %193 = vector.load %arg1[%c0_167, %c192, %c0_168] : memref<1x512x128xbf16, #tpu.memory_space<vmem>>, vector<1x32x128xbf16>
    %194 = vector.shape_cast %193 : vector<1x32x128xbf16> to vector<32x128xbf16>
    %c4_169 = arith.constant 4 : index
    %c0_170 = arith.constant 0 : index
    %c0_171 = arith.constant 0 : index
    %195 = vector.load %arg2[%c4_169, %c0_170, %c0_171] : memref<5x128x256xbf16, #tpu.memory_space<vmem>>, vector<1x128x256xbf16>
    %196 = vector.shape_cast %195 : vector<1x128x256xbf16> to vector<128x256xbf16>
    %cst_172 = arith.constant dense<0.000000e+00> : vector<32x256xf32>
    %197 = tpu.matmul %194, %196, %cst_172 {dimension_numbers = #tpu.dot_dimension_numbers<[1], [0], [0], [1], [0, 0, 1, 1], [], []>} : vector<32x128xbf16>, vector<128x256xbf16>, vector<32x256xf32> -> vector<32x256xf32>
    %198 = arith.addf %192, %197 : vector<32x256xf32>
    %199 = vector.extract_strided_slice %198 {offsets = [0, 0], sizes = [16, 128], strides = [1, 1]} : vector<32x256xf32> to vector<16x128xf32>
    %200 = vector.extract_strided_slice %198 {offsets = [0, 128], sizes = [16, 128], strides = [1, 1]} : vector<32x256xf32> to vector<16x128xf32>
    %201 = arith.maximumf %199, %200 : vector<16x128xf32>
    %202 = vector.extract_strided_slice %198 {offsets = [16, 0], sizes = [16, 128], strides = [1, 1]} : vector<32x256xf32> to vector<16x128xf32>
    %203 = vector.extract_strided_slice %198 {offsets = [16, 128], sizes = [16, 128], strides = [1, 1]} : vector<32x256xf32> to vector<16x128xf32>
    %204 = arith.maximumf %202, %203 : vector<16x128xf32>
    %205 = arith.maximumf %201, %204 : vector<16x128xf32>
    %206 = arith.addf %205, %2 : vector<16x128xf32>
    %cst_173 = arith.constant 0.000000e+00 : f32
    %207 = vector.broadcast %cst_173 : f32 to vector<16x128xf32>
    %208 = arith.maximumf %206, %207 : vector<16x128xf32>
    %209 = arith.truncf %208 : vector<16x128xf32> to vector<16x128xbf16>
    %c64_174 = arith.constant 64 : index
    %c0_175 = arith.constant 0 : index
    %210 = vector.load %arg13[%c64_174, %c0_175] : memref<224x128xbf16, #tpu.memory_space<vmem>>, vector<16x128xbf16>
    tpu.vector_store %arg13[%c64_174, %c0_175], %209 {strides = array<i32>} : memref<224x128xbf16, #tpu.memory_space<vmem>>, vector<16x128xbf16>,
    %c0_176 = arith.constant 0 : index
    %c160_177 = arith.constant 160 : index
    %c0_178 = arith.constant 0 : index
    %211 = vector.load %arg1[%c0_176, %c160_177, %c0_178] : memref<1x512x128xbf16, #tpu.memory_space<vmem>>, vector<1x32x128xbf16>
    %212 = vector.shape_cast %211 : vector<1x32x128xbf16> to vector<32x128xbf16>
    %c0_179 = arith.constant 0 : index
    %c0_180 = arith.constant 0 : index
    %c0_181 = arith.constant 0 : index
    %213 = vector.load %arg2[%c0_179, %c0_180, %c0_181] : memref<5x128x256xbf16, #tpu.memory_space<vmem>>, vector<1x128x256xbf16>
    %214 = vector.shape_cast %213 : vector<1x128x256xbf16> to vector<128x256xbf16>
    %cst_182 = arith.constant dense<0.000000e+00> : vector<32x256xf32>
    %215 = tpu.matmul %212, %214, %cst_182 {dimension_numbers = #tpu.dot_dimension_numbers<[1], [0], [0], [1], [0, 0, 1, 1], [], []>} : vector<32x128xbf16>, vector<128x256xbf16>, vector<32x256xf32> -> vector<32x256xf32>
    %c0_183 = arith.constant 0 : index
    %c176_184 = arith.constant 176 : index
    %c0_185 = arith.constant 0 : index
    %216 = vector.load %arg1[%c0_183, %c176_184, %c0_185] : memref<1x512x128xbf16, #tpu.memory_space<vmem>>, vector<1x32x128xbf16>
    %217 = vector.shape_cast %216 : vector<1x32x128xbf16> to vector<32x128xbf16>
    %c1_186 = arith.constant 1 : index
    %c0_187 = arith.constant 0 : index
    %c0_188 = arith.constant 0 : index
    %218 = vector.load %arg2[%c1_186, %c0_187, %c0_188] : memref<5x128x256xbf16, #tpu.memory_space<vmem>>, vector<1x128x256xbf16>
    %219 = vector.shape_cast %218 : vector<1x128x256xbf16> to vector<128x256xbf16>
    %cst_189 = arith.constant dense<0.000000e+00> : vector<32x256xf32>
    %220 = tpu.matmul %217, %219, %cst_189 {dimension_numbers = #tpu.dot_dimension_numbers<[1], [0], [0], [1], [0, 0, 1, 1], [], []>} : vector<32x128xbf16>, vector<128x256xbf16>, vector<32x256xf32> -> vector<32x256xf32>
    %221 = arith.addf %215, %220 : vector<32x256xf32>
    %c0_190 = arith.constant 0 : index
    %c192_191 = arith.constant 192 : index
    %c0_192 = arith.constant 0 : index
    %222 = vector.load %arg1[%c0_190, %c192_191, %c0_192] : memref<1x512x128xbf16, #tpu.memory_space<vmem>>, vector<1x32x128xbf16>
    %223 = vector.shape_cast %222 : vector<1x32x128xbf16> to vector<32x128xbf16>
    %c2_193 = arith.constant 2 : index
    %c0_194 = arith.constant 0 : index
    %c0_195 = arith.constant 0 : index
    %224 = vector.load %arg2[%c2_193, %c0_194, %c0_195] : memref<5x128x256xbf16, #tpu.memory_space<vmem>>, vector<1x128x256xbf16>
    %225 = vector.shape_cast %224 : vector<1x128x256xbf16> to vector<128x256xbf16>
    %cst_196 = arith.constant dense<0.000000e+00> : vector<32x256xf32>
    %226 = tpu.matmul %223, %225, %cst_196 {dimension_numbers = #tpu.dot_dimension_numbers<[1], [0], [0], [1], [0, 0, 1, 1], [], []>} : vector<32x128xbf16>, vector<128x256xbf16>, vector<32x256xf32> -> vector<32x256xf32>
    %227 = arith.addf %221, %226 : vector<32x256xf32>
    %c0_197 = arith.constant 0 : index
    %c208 = arith.constant 208 : index
    %c0_198 = arith.constant 0 : index
    %228 = vector.load %arg1[%c0_197, %c208, %c0_198] : memref<1x512x128xbf16, #tpu.memory_space<vmem>>, vector<1x32x128xbf16>
    %229 = vector.shape_cast %228 : vector<1x32x128xbf16> to vector<32x128xbf16>
    %c3_199 = arith.constant 3 : index
    %c0_200 = arith.constant 0 : index
    %c0_201 = arith.constant 0 : index
    %230 = vector.load %arg2[%c3_199, %c0_200, %c0_201] : memref<5x128x256xbf16, #tpu.memory_space<vmem>>, vector<1x128x256xbf16>
    %231 = vector.shape_cast %230 : vector<1x128x256xbf16> to vector<128x256xbf16>
    %cst_202 = arith.constant dense<0.000000e+00> : vector<32x256xf32>
    %232 = tpu.matmul %229, %231, %cst_202 {dimension_numbers = #tpu.dot_dimension_numbers<[1], [0], [0], [1], [0, 0, 1, 1], [], []>} : vector<32x128xbf16>, vector<128x256xbf16>, vector<32x256xf32> -> vector<32x256xf32>
    %233 = arith.addf %227, %232 : vector<32x256xf32>
    %c0_203 = arith.constant 0 : index
    %c224 = arith.constant 224 : index
    %c0_204 = arith.constant 0 : index
    %234 = vector.load %arg1[%c0_203, %c224, %c0_204] : memref<1x512x128xbf16, #tpu.memory_space<vmem>>, vector<1x32x128xbf16>
    %235 = vector.shape_cast %234 : vector<1x32x128xbf16> to vector<32x128xbf16>
    %c4_205 = arith.constant 4 : index
    %c0_206 = arith.constant 0 : index
    %c0_207 = arith.constant 0 : index
    %236 = vector.load %arg2[%c4_205, %c0_206, %c0_207] : memref<5x128x256xbf16, #tpu.memory_space<vmem>>, vector<1x128x256xbf16>
    %237 = vector.shape_cast %236 : vector<1x128x256xbf16> to vector<128x256xbf16>
    %cst_208 = arith.constant dense<0.000000e+00> : vector<32x256xf32>
    %238 = tpu.matmul %235, %237, %cst_208 {dimension_numbers = #tpu.dot_dimension_numbers<[1], [0], [0], [1], [0, 0, 1, 1], [], []>} : vector<32x128xbf16>, vector<128x256xbf16>, vector<32x256xf32> -> vector<32x256xf32>
    %239 = arith.addf %233, %238 : vector<32x256xf32>
    %240 = vector.extract_strided_slice %239 {offsets = [0, 0], sizes = [16, 128], strides = [1, 1]} : vector<32x256xf32> to vector<16x128xf32>
    %241 = vector.extract_strided_slice %239 {offsets = [0, 128], sizes = [16, 128], strides = [1, 1]} : vector<32x256xf32> to vector<16x128xf32>
    %242 = arith.maximumf %240, %241 : vector<16x128xf32>
    %243 = vector.extract_strided_slice %239 {offsets = [16, 0], sizes = [16, 128], strides = [1, 1]} : vector<32x256xf32> to vector<16x128xf32>
    %244 = vector.extract_strided_slice %239 {offsets = [16, 128], sizes = [16, 128], strides = [1, 1]} : vector<32x256xf32> to vector<16x128xf32>
    %245 = arith.maximumf %243, %244 : vector<16x128xf32>
    %246 = arith.maximumf %242, %245 : vector<16x128xf32>
    %247 = arith.addf %246, %2 : vector<16x128xf32>
    %cst_209 = arith.constant 0.000000e+00 : f32
    %248 = vector.broadcast %cst_209 : f32 to vector<16x128xf32>
    %249 = arith.maximumf %247, %248 : vector<16x128xf32>
    %250 = arith.truncf %249 : vector<16x128xf32> to vector<16x128xbf16>
    %c80_210 = arith.constant 80 : index
    %c0_211 = arith.constant 0 : index
    %251 = vector.load %arg13[%c80_210, %c0_211] : memref<224x128xbf16, #tpu.memory_space<vmem>>, vector<16x128xbf16>
    tpu.vector_store %arg13[%c80_210, %c0_211], %250 {strides = array<i32>} : memref<224x128xbf16, #tpu.memory_space<vmem>>, vector<16x128xbf16>,
    %c0_212 = arith.constant 0 : index
    %c192_213 = arith.constant 192 : index
    %c0_214 = arith.constant 0 : index
    %252 = vector.load %arg1[%c0_212, %c192_213, %c0_214] : memref<1x512x128xbf16, #tpu.memory_space<vmem>>, vector<1x32x128xbf16>
    %253 = vector.shape_cast %252 : vector<1x32x128xbf16> to vector<32x128xbf16>
    %c0_215 = arith.constant 0 : index
    %c0_216 = arith.constant 0 : index
    %c0_217 = arith.constant 0 : index
    %254 = vector.load %arg2[%c0_215, %c0_216, %c0_217] : memref<5x128x256xbf16, #tpu.memory_space<vmem>>, vector<1x128x256xbf16>
    %255 = vector.shape_cast %254 : vector<1x128x256xbf16> to vector<128x256xbf16>
    %cst_218 = arith.constant dense<0.000000e+00> : vector<32x256xf32>
    %256 = tpu.matmul %253, %255, %cst_218 {dimension_numbers = #tpu.dot_dimension_numbers<[1], [0], [0], [1], [0, 0, 1, 1], [], []>} : vector<32x128xbf16>, vector<128x256xbf16>, vector<32x256xf32> -> vector<32x256xf32>
    %c0_219 = arith.constant 0 : index
    %c208_220 = arith.constant 208 : index
    %c0_221 = arith.constant 0 : index
    %257 = vector.load %arg1[%c0_219, %c208_220, %c0_221] : memref<1x512x128xbf16, #tpu.memory_space<vmem>>, vector<1x32x128xbf16>
    %258 = vector.shape_cast %257 : vector<1x32x128xbf16> to vector<32x128xbf16>
    %c1_222 = arith.constant 1 : index
    %c0_223 = arith.constant 0 : index
    %c0_224 = arith.constant 0 : index
    %259 = vector.load %arg2[%c1_222, %c0_223, %c0_224] : memref<5x128x256xbf16, #tpu.memory_space<vmem>>, vector<1x128x256xbf16>
    %260 = vector.shape_cast %259 : vector<1x128x256xbf16> to vector<128x256xbf16>
    %cst_225 = arith.constant dense<0.000000e+00> : vector<32x256xf32>
    %261 = tpu.matmul %258, %260, %cst_225 {dimension_numbers = #tpu.dot_dimension_numbers<[1], [0], [0], [1], [0, 0, 1, 1], [], []>} : vector<32x128xbf16>, vector<128x256xbf16>, vector<32x256xf32> -> vector<32x256xf32>
    %262 = arith.addf %256, %261 : vector<32x256xf32>
    %c0_226 = arith.constant 0 : index
    %c224_227 = arith.constant 224 : index
    %c0_228 = arith.constant 0 : index
    %263 = vector.load %arg1[%c0_226, %c224_227, %c0_228] : memref<1x512x128xbf16, #tpu.memory_space<vmem>>, vector<1x32x128xbf16>
    %264 = vector.shape_cast %263 : vector<1x32x128xbf16> to vector<32x128xbf16>
    %c2_229 = arith.constant 2 : index
    %c0_230 = arith.constant 0 : index
    %c0_231 = arith.constant 0 : index
    %265 = vector.load %arg2[%c2_229, %c0_230, %c0_231] : memref<5x128x256xbf16, #tpu.memory_space<vmem>>, vector<1x128x256xbf16>
    %266 = vector.shape_cast %265 : vector<1x128x256xbf16> to vector<128x256xbf16>
    %cst_232 = arith.constant dense<0.000000e+00> : vector<32x256xf32>
    %267 = tpu.matmul %264, %266, %cst_232 {dimension_numbers = #tpu.dot_dimension_numbers<[1], [0], [0], [1], [0, 0, 1, 1], [], []>} : vector<32x128xbf16>, vector<128x256xbf16>, vector<32x256xf32> -> vector<32x256xf32>
    %268 = arith.addf %262, %267 : vector<32x256xf32>
    %c0_233 = arith.constant 0 : index
    %c240 = arith.constant 240 : index
    %c0_234 = arith.constant 0 : index
    %269 = vector.load %arg1[%c0_233, %c240, %c0_234] : memref<1x512x128xbf16, #tpu.memory_space<vmem>>, vector<1x32x128xbf16>
    %270 = vector.shape_cast %269 : vector<1x32x128xbf16> to vector<32x128xbf16>
    %c3_235 = arith.constant 3 : index
    %c0_236 = arith.constant 0 : index
    %c0_237 = arith.constant 0 : index
    %271 = vector.load %arg2[%c3_235, %c0_236, %c0_237] : memref<5x128x256xbf16, #tpu.memory_space<vmem>>, vector<1x128x256xbf16>
    %272 = vector.shape_cast %271 : vector<1x128x256xbf16> to vector<128x256xbf16>
    %cst_238 = arith.constant dense<0.000000e+00> : vector<32x256xf32>
    %273 = tpu.matmul %270, %272, %cst_238 {dimension_numbers = #tpu.dot_dimension_numbers<[1], [0], [0], [1], [0, 0, 1, 1], [], []>} : vector<32x128xbf16>, vector<128x256xbf16>, vector<32x256xf32> -> vector<32x256xf32>
    %274 = arith.addf %268, %273 : vector<32x256xf32>
    %c0_239 = arith.constant 0 : index
    %c256 = arith.constant 256 : index
    %c0_240 = arith.constant 0 : index
    %275 = vector.load %arg1[%c0_239, %c256, %c0_240] : memref<1x512x128xbf16, #tpu.memory_space<vmem>>, vector<1x32x128xbf16>
    %276 = vector.shape_cast %275 : vector<1x32x128xbf16> to vector<32x128xbf16>
    %c4_241 = arith.constant 4 : index
    %c0_242 = arith.constant 0 : index
    %c0_243 = arith.constant 0 : index
    %277 = vector.load %arg2[%c4_241, %c0_242, %c0_243] : memref<5x128x256xbf16, #tpu.memory_space<vmem>>, vector<1x128x256xbf16>
    %278 = vector.shape_cast %277 : vector<1x128x256xbf16> to vector<128x256xbf16>
    %cst_244 = arith.constant dense<0.000000e+00> : vector<32x256xf32>
    %279 = tpu.matmul %276, %278, %cst_244 {dimension_numbers = #tpu.dot_dimension_numbers<[1], [0], [0], [1], [0, 0, 1, 1], [], []>} : vector<32x128xbf16>, vector<128x256xbf16>, vector<32x256xf32> -> vector<32x256xf32>
    %280 = arith.addf %274, %279 : vector<32x256xf32>
    %281 = vector.extract_strided_slice %280 {offsets = [0, 0], sizes = [16, 128], strides = [1, 1]} : vector<32x256xf32> to vector<16x128xf32>
    %282 = vector.extract_strided_slice %280 {offsets = [0, 128], sizes = [16, 128], strides = [1, 1]} : vector<32x256xf32> to vector<16x128xf32>
    %283 = arith.maximumf %281, %282 : vector<16x128xf32>
    %284 = vector.extract_strided_slice %280 {offsets = [16, 0], sizes = [16, 128], strides = [1, 1]} : vector<32x256xf32> to vector<16x128xf32>
    %285 = vector.extract_strided_slice %280 {offsets = [16, 128], sizes = [16, 128], strides = [1, 1]} : vector<32x256xf32> to vector<16x128xf32>
    %286 = arith.maximumf %284, %285 : vector<16x128xf32>
    %287 = arith.maximumf %283, %286 : vector<16x128xf32>
    %288 = arith.addf %287, %2 : vector<16x128xf32>
    %cst_245 = arith.constant 0.000000e+00 : f32
    %289 = vector.broadcast %cst_245 : f32 to vector<16x128xf32>
    %290 = arith.maximumf %288, %289 : vector<16x128xf32>
    %291 = arith.truncf %290 : vector<16x128xf32> to vector<16x128xbf16>
    %c96_246 = arith.constant 96 : index
    %c0_247 = arith.constant 0 : index
    %292 = vector.load %arg13[%c96_246, %c0_247] : memref<224x128xbf16, #tpu.memory_space<vmem>>, vector<16x128xbf16>
    tpu.vector_store %arg13[%c96_246, %c0_247], %291 {strides = array<i32>} : memref<224x128xbf16, #tpu.memory_space<vmem>>, vector<16x128xbf16>,
    %c0_248 = arith.constant 0 : index
    %c224_249 = arith.constant 224 : index
    %c0_250 = arith.constant 0 : index
    %293 = vector.load %arg1[%c0_248, %c224_249, %c0_250] : memref<1x512x128xbf16, #tpu.memory_space<vmem>>, vector<1x32x128xbf16>
    %294 = vector.shape_cast %293 : vector<1x32x128xbf16> to vector<32x128xbf16>
    %c0_251 = arith.constant 0 : index
    %c0_252 = arith.constant 0 : index
    %c0_253 = arith.constant 0 : index
    %295 = vector.load %arg2[%c0_251, %c0_252, %c0_253] : memref<5x128x256xbf16, #tpu.memory_space<vmem>>, vector<1x128x256xbf16>
    %296 = vector.shape_cast %295 : vector<1x128x256xbf16> to vector<128x256xbf16>
    %cst_254 = arith.constant dense<0.000000e+00> : vector<32x256xf32>
    %297 = tpu.matmul %294, %296, %cst_254 {dimension_numbers = #tpu.dot_dimension_numbers<[1], [0], [0], [1], [0, 0, 1, 1], [], []>} : vector<32x128xbf16>, vector<128x256xbf16>, vector<32x256xf32> -> vector<32x256xf32>
    %c0_255 = arith.constant 0 : index
    %c240_256 = arith.constant 240 : index
    %c0_257 = arith.constant 0 : index
    %298 = vector.load %arg1[%c0_255, %c240_256, %c0_257] : memref<1x512x128xbf16, #tpu.memory_space<vmem>>, vector<1x32x128xbf16>
    %299 = vector.shape_cast %298 : vector<1x32x128xbf16> to vector<32x128xbf16>
    %c1_258 = arith.constant 1 : index
    %c0_259 = arith.constant 0 : index
    %c0_260 = arith.constant 0 : index
    %300 = vector.load %arg2[%c1_258, %c0_259, %c0_260] : memref<5x128x256xbf16, #tpu.memory_space<vmem>>, vector<1x128x256xbf16>
    %301 = vector.shape_cast %300 : vector<1x128x256xbf16> to vector<128x256xbf16>
    %cst_261 = arith.constant dense<0.000000e+00> : vector<32x256xf32>
    %302 = tpu.matmul %299, %301, %cst_261 {dimension_numbers = #tpu.dot_dimension_numbers<[1], [0], [0], [1], [0, 0, 1, 1], [], []>} : vector<32x128xbf16>, vector<128x256xbf16>, vector<32x256xf32> -> vector<32x256xf32>
    %303 = arith.addf %297, %302 : vector<32x256xf32>
    %c0_262 = arith.constant 0 : index
    %c256_263 = arith.constant 256 : index
    %c0_264 = arith.constant 0 : index
    %304 = vector.load %arg1[%c0_262, %c256_263, %c0_264] : memref<1x512x128xbf16, #tpu.memory_space<vmem>>, vector<1x32x128xbf16>
    %305 = vector.shape_cast %304 : vector<1x32x128xbf16> to vector<32x128xbf16>
    %c2_265 = arith.constant 2 : index
    %c0_266 = arith.constant 0 : index
    %c0_267 = arith.constant 0 : index
    %306 = vector.load %arg2[%c2_265, %c0_266, %c0_267] : memref<5x128x256xbf16, #tpu.memory_space<vmem>>, vector<1x128x256xbf16>
    %307 = vector.shape_cast %306 : vector<1x128x256xbf16> to vector<128x256xbf16>
    %cst_268 = arith.constant dense<0.000000e+00> : vector<32x256xf32>
    %308 = tpu.matmul %305, %307, %cst_268 {dimension_numbers = #tpu.dot_dimension_numbers<[1], [0], [0], [1], [0, 0, 1, 1], [], []>} : vector<32x128xbf16>, vector<128x256xbf16>, vector<32x256xf32> -> vector<32x256xf32>
    %309 = arith.addf %303, %308 : vector<32x256xf32>
    %c0_269 = arith.constant 0 : index
    %c272 = arith.constant 272 : index
    %c0_270 = arith.constant 0 : index
    %310 = vector.load %arg1[%c0_269, %c272, %c0_270] : memref<1x512x128xbf16, #tpu.memory_space<vmem>>, vector<1x32x128xbf16>
    %311 = vector.shape_cast %310 : vector<1x32x128xbf16> to vector<32x128xbf16>
    %c3_271 = arith.constant 3 : index
    %c0_272 = arith.constant 0 : index
    %c0_273 = arith.constant 0 : index
    %312 = vector.load %arg2[%c3_271, %c0_272, %c0_273] : memref<5x128x256xbf16, #tpu.memory_space<vmem>>, vector<1x128x256xbf16>
    %313 = vector.shape_cast %312 : vector<1x128x256xbf16> to vector<128x256xbf16>
    %cst_274 = arith.constant dense<0.000000e+00> : vector<32x256xf32>
    %314 = tpu.matmul %311, %313, %cst_274 {dimension_numbers = #tpu.dot_dimension_numbers<[1], [0], [0], [1], [0, 0, 1, 1], [], []>} : vector<32x128xbf16>, vector<128x256xbf16>, vector<32x256xf32> -> vector<32x256xf32>
    %315 = arith.addf %309, %314 : vector<32x256xf32>
    %c0_275 = arith.constant 0 : index
    %c288 = arith.constant 288 : index
    %c0_276 = arith.constant 0 : index
    %316 = vector.load %arg1[%c0_275, %c288, %c0_276] : memref<1x512x128xbf16, #tpu.memory_space<vmem>>, vector<1x32x128xbf16>
    %317 = vector.shape_cast %316 : vector<1x32x128xbf16> to vector<32x128xbf16>
    %c4_277 = arith.constant 4 : index
    %c0_278 = arith.constant 0 : index
    %c0_279 = arith.constant 0 : index
    %318 = vector.load %arg2[%c4_277, %c0_278, %c0_279] : memref<5x128x256xbf16, #tpu.memory_space<vmem>>, vector<1x128x256xbf16>
    %319 = vector.shape_cast %318 : vector<1x128x256xbf16> to vector<128x256xbf16>
    %cst_280 = arith.constant dense<0.000000e+00> : vector<32x256xf32>
    %320 = tpu.matmul %317, %319, %cst_280 {dimension_numbers = #tpu.dot_dimension_numbers<[1], [0], [0], [1], [0, 0, 1, 1], [], []>} : vector<32x128xbf16>, vector<128x256xbf16>, vector<32x256xf32> -> vector<32x256xf32>
    %321 = arith.addf %315, %320 : vector<32x256xf32>
    %322 = vector.extract_strided_slice %321 {offsets = [0, 0], sizes = [16, 128], strides = [1, 1]} : vector<32x256xf32> to vector<16x128xf32>
    %323 = vector.extract_strided_slice %321 {offsets = [0, 128], sizes = [16, 128], strides = [1, 1]} : vector<32x256xf32> to vector<16x128xf32>
    %324 = arith.maximumf %322, %323 : vector<16x128xf32>
    %325 = vector.extract_strided_slice %321 {offsets = [16, 0], sizes = [16, 128], strides = [1, 1]} : vector<32x256xf32> to vector<16x128xf32>
    %326 = vector.extract_strided_slice %321 {offsets = [16, 128], sizes = [16, 128], strides = [1, 1]} : vector<32x256xf32> to vector<16x128xf32>
    %327 = arith.maximumf %325, %326 : vector<16x128xf32>
    %328 = arith.maximumf %324, %327 : vector<16x128xf32>
    %329 = arith.addf %328, %2 : vector<16x128xf32>
    %cst_281 = arith.constant 0.000000e+00 : f32
    %330 = vector.broadcast %cst_281 : f32 to vector<16x128xf32>
    %331 = arith.maximumf %329, %330 : vector<16x128xf32>
    %332 = arith.truncf %331 : vector<16x128xf32> to vector<16x128xbf16>
    %c112_282 = arith.constant 112 : index
    %c0_283 = arith.constant 0 : index
    %333 = vector.load %arg13[%c112_282, %c0_283] : memref<224x128xbf16, #tpu.memory_space<vmem>>, vector<16x128xbf16>
    tpu.vector_store %arg13[%c112_282, %c0_283], %332 {strides = array<i32>} : memref<224x128xbf16, #tpu.memory_space<vmem>>, vector<16x128xbf16>,
    %c0_284 = arith.constant 0 : index
    %c256_285 = arith.constant 256 : index
    %c0_286 = arith.constant 0 : index
    %334 = vector.load %arg1[%c0_284, %c256_285, %c0_286] : memref<1x512x128xbf16, #tpu.memory_space<vmem>>, vector<1x32x128xbf16>
    %335 = vector.shape_cast %334 : vector<1x32x128xbf16> to vector<32x128xbf16>
    %c0_287 = arith.constant 0 : index
    %c0_288 = arith.constant 0 : index
    %c0_289 = arith.constant 0 : index
    %336 = vector.load %arg2[%c0_287, %c0_288, %c0_289] : memref<5x128x256xbf16, #tpu.memory_space<vmem>>, vector<1x128x256xbf16>
    %337 = vector.shape_cast %336 : vector<1x128x256xbf16> to vector<128x256xbf16>
    %cst_290 = arith.constant dense<0.000000e+00> : vector<32x256xf32>
    %338 = tpu.matmul %335, %337, %cst_290 {dimension_numbers = #tpu.dot_dimension_numbers<[1], [0], [0], [1], [0, 0, 1, 1], [], []>} : vector<32x128xbf16>, vector<128x256xbf16>, vector<32x256xf32> -> vector<32x256xf32>
    %c0_291 = arith.constant 0 : index
    %c272_292 = arith.constant 272 : index
    %c0_293 = arith.constant 0 : index
    %339 = vector.load %arg1[%c0_291, %c272_292, %c0_293] : memref<1x512x128xbf16, #tpu.memory_space<vmem>>, vector<1x32x128xbf16>
    %340 = vector.shape_cast %339 : vector<1x32x128xbf16> to vector<32x128xbf16>
    %c1_294 = arith.constant 1 : index
    %c0_295 = arith.constant 0 : index
    %c0_296 = arith.constant 0 : index
    %341 = vector.load %arg2[%c1_294, %c0_295, %c0_296] : memref<5x128x256xbf16, #tpu.memory_space<vmem>>, vector<1x128x256xbf16>
    %342 = vector.shape_cast %341 : vector<1x128x256xbf16> to vector<128x256xbf16>
    %cst_297 = arith.constant dense<0.000000e+00> : vector<32x256xf32>
    %343 = tpu.matmul %340, %342, %cst_297 {dimension_numbers = #tpu.dot_dimension_numbers<[1], [0], [0], [1], [0, 0, 1, 1], [], []>} : vector<32x128xbf16>, vector<128x256xbf16>, vector<32x256xf32> -> vector<32x256xf32>
    %344 = arith.addf %338, %343 : vector<32x256xf32>
    %c0_298 = arith.constant 0 : index
    %c288_299 = arith.constant 288 : index
    %c0_300 = arith.constant 0 : index
    %345 = vector.load %arg1[%c0_298, %c288_299, %c0_300] : memref<1x512x128xbf16, #tpu.memory_space<vmem>>, vector<1x32x128xbf16>
    %346 = vector.shape_cast %345 : vector<1x32x128xbf16> to vector<32x128xbf16>
    %c2_301 = arith.constant 2 : index
    %c0_302 = arith.constant 0 : index
    %c0_303 = arith.constant 0 : index
    %347 = vector.load %arg2[%c2_301, %c0_302, %c0_303] : memref<5x128x256xbf16, #tpu.memory_space<vmem>>, vector<1x128x256xbf16>
    %348 = vector.shape_cast %347 : vector<1x128x256xbf16> to vector<128x256xbf16>
    %cst_304 = arith.constant dense<0.000000e+00> : vector<32x256xf32>
    %349 = tpu.matmul %346, %348, %cst_304 {dimension_numbers = #tpu.dot_dimension_numbers<[1], [0], [0], [1], [0, 0, 1, 1], [], []>} : vector<32x128xbf16>, vector<128x256xbf16>, vector<32x256xf32> -> vector<32x256xf32>
    %350 = arith.addf %344, %349 : vector<32x256xf32>
    %c0_305 = arith.constant 0 : index
    %c304 = arith.constant 304 : index
    %c0_306 = arith.constant 0 : index
    %351 = vector.load %arg1[%c0_305, %c304, %c0_306] : memref<1x512x128xbf16, #tpu.memory_space<vmem>>, vector<1x32x128xbf16>
    %352 = vector.shape_cast %351 : vector<1x32x128xbf16> to vector<32x128xbf16>
    %c3_307 = arith.constant 3 : index
    %c0_308 = arith.constant 0 : index
    %c0_309 = arith.constant 0 : index
    %353 = vector.load %arg2[%c3_307, %c0_308, %c0_309] : memref<5x128x256xbf16, #tpu.memory_space<vmem>>, vector<1x128x256xbf16>
    %354 = vector.shape_cast %353 : vector<1x128x256xbf16> to vector<128x256xbf16>
    %cst_310 = arith.constant dense<0.000000e+00> : vector<32x256xf32>
    %355 = tpu.matmul %352, %354, %cst_310 {dimension_numbers = #tpu.dot_dimension_numbers<[1], [0], [0], [1], [0, 0, 1, 1], [], []>} : vector<32x128xbf16>, vector<128x256xbf16>, vector<32x256xf32> -> vector<32x256xf32>
    %356 = arith.addf %350, %355 : vector<32x256xf32>
    %c0_311 = arith.constant 0 : index
    %c320 = arith.constant 320 : index
    %c0_312 = arith.constant 0 : index
    %357 = vector.load %arg1[%c0_311, %c320, %c0_312] : memref<1x512x128xbf16, #tpu.memory_space<vmem>>, vector<1x32x128xbf16>
    %358 = vector.shape_cast %357 : vector<1x32x128xbf16> to vector<32x128xbf16>
    %c4_313 = arith.constant 4 : index
    %c0_314 = arith.constant 0 : index
    %c0_315 = arith.constant 0 : index
    %359 = vector.load %arg2[%c4_313, %c0_314, %c0_315] : memref<5x128x256xbf16, #tpu.memory_space<vmem>>, vector<1x128x256xbf16>
    %360 = vector.shape_cast %359 : vector<1x128x256xbf16> to vector<128x256xbf16>
    %cst_316 = arith.constant dense<0.000000e+00> : vector<32x256xf32>
    %361 = tpu.matmul %358, %360, %cst_316 {dimension_numbers = #tpu.dot_dimension_numbers<[1], [0], [0], [1], [0, 0, 1, 1], [], []>} : vector<32x128xbf16>, vector<128x256xbf16>, vector<32x256xf32> -> vector<32x256xf32>
    %362 = arith.addf %356, %361 : vector<32x256xf32>
    %363 = vector.extract_strided_slice %362 {offsets = [0, 0], sizes = [16, 128], strides = [1, 1]} : vector<32x256xf32> to vector<16x128xf32>
    %364 = vector.extract_strided_slice %362 {offsets = [0, 128], sizes = [16, 128], strides = [1, 1]} : vector<32x256xf32> to vector<16x128xf32>
    %365 = arith.maximumf %363, %364 : vector<16x128xf32>
    %366 = vector.extract_strided_slice %362 {offsets = [16, 0], sizes = [16, 128], strides = [1, 1]} : vector<32x256xf32> to vector<16x128xf32>
    %367 = vector.extract_strided_slice %362 {offsets = [16, 128], sizes = [16, 128], strides = [1, 1]} : vector<32x256xf32> to vector<16x128xf32>
    %368 = arith.maximumf %366, %367 : vector<16x128xf32>
    %369 = arith.maximumf %365, %368 : vector<16x128xf32>
    %370 = arith.addf %369, %2 : vector<16x128xf32>
    %cst_317 = arith.constant 0.000000e+00 : f32
    %371 = vector.broadcast %cst_317 : f32 to vector<16x128xf32>
    %372 = arith.maximumf %370, %371 : vector<16x128xf32>
    %373 = arith.truncf %372 : vector<16x128xf32> to vector<16x128xbf16>
    %c128_318 = arith.constant 128 : index
    %c0_319 = arith.constant 0 : index
    %374 = vector.load %arg13[%c128_318, %c0_319] : memref<224x128xbf16, #tpu.memory_space<vmem>>, vector<16x128xbf16>
    tpu.vector_store %arg13[%c128_318, %c0_319], %373 {strides = array<i32>} : memref<224x128xbf16, #tpu.memory_space<vmem>>, vector<16x128xbf16>,
    %c0_320 = arith.constant 0 : index
    %c288_321 = arith.constant 288 : index
    %c0_322 = arith.constant 0 : index
    %375 = vector.load %arg1[%c0_320, %c288_321, %c0_322] : memref<1x512x128xbf16, #tpu.memory_space<vmem>>, vector<1x32x128xbf16>
    %376 = vector.shape_cast %375 : vector<1x32x128xbf16> to vector<32x128xbf16>
    %c0_323 = arith.constant 0 : index
    %c0_324 = arith.constant 0 : index
    %c0_325 = arith.constant 0 : index
    %377 = vector.load %arg2[%c0_323, %c0_324, %c0_325] : memref<5x128x256xbf16, #tpu.memory_space<vmem>>, vector<1x128x256xbf16>
    %378 = vector.shape_cast %377 : vector<1x128x256xbf16> to vector<128x256xbf16>
    %cst_326 = arith.constant dense<0.000000e+00> : vector<32x256xf32>
    %379 = tpu.matmul %376, %378, %cst_326 {dimension_numbers = #tpu.dot_dimension_numbers<[1], [0], [0], [1], [0, 0, 1, 1], [], []>} : vector<32x128xbf16>, vector<128x256xbf16>, vector<32x256xf32> -> vector<32x256xf32>
    %c0_327 = arith.constant 0 : index
    %c304_328 = arith.constant 304 : index
    %c0_329 = arith.constant 0 : index
    %380 = vector.load %arg1[%c0_327, %c304_328, %c0_329] : memref<1x512x128xbf16, #tpu.memory_space<vmem>>, vector<1x32x128xbf16>
    %381 = vector.shape_cast %380 : vector<1x32x128xbf16> to vector<32x128xbf16>
    %c1_330 = arith.constant 1 : index
    %c0_331 = arith.constant 0 : index
    %c0_332 = arith.constant 0 : index
    %382 = vector.load %arg2[%c1_330, %c0_331, %c0_332] : memref<5x128x256xbf16, #tpu.memory_space<vmem>>, vector<1x128x256xbf16>
    %383 = vector.shape_cast %382 : vector<1x128x256xbf16> to vector<128x256xbf16>
    %cst_333 = arith.constant dense<0.000000e+00> : vector<32x256xf32>
    %384 = tpu.matmul %381, %383, %cst_333 {dimension_numbers = #tpu.dot_dimension_numbers<[1], [0], [0], [1], [0, 0, 1, 1], [], []>} : vector<32x128xbf16>, vector<128x256xbf16>, vector<32x256xf32> -> vector<32x256xf32>
    %385 = arith.addf %379, %384 : vector<32x256xf32>
    %c0_334 = arith.constant 0 : index
    %c320_335 = arith.constant 320 : index
    %c0_336 = arith.constant 0 : index
    %386 = vector.load %arg1[%c0_334, %c320_335, %c0_336] : memref<1x512x128xbf16, #tpu.memory_space<vmem>>, vector<1x32x128xbf16>
    %387 = vector.shape_cast %386 : vector<1x32x128xbf16> to vector<32x128xbf16>
    %c2_337 = arith.constant 2 : index
    %c0_338 = arith.constant 0 : index
    %c0_339 = arith.constant 0 : index
    %388 = vector.load %arg2[%c2_337, %c0_338, %c0_339] : memref<5x128x256xbf16, #tpu.memory_space<vmem>>, vector<1x128x256xbf16>
    %389 = vector.shape_cast %388 : vector<1x128x256xbf16> to vector<128x256xbf16>
    %cst_340 = arith.constant dense<0.000000e+00> : vector<32x256xf32>
    %390 = tpu.matmul %387, %389, %cst_340 {dimension_numbers = #tpu.dot_dimension_numbers<[1], [0], [0], [1], [0, 0, 1, 1], [], []>} : vector<32x128xbf16>, vector<128x256xbf16>, vector<32x256xf32> -> vector<32x256xf32>
    %391 = arith.addf %385, %390 : vector<32x256xf32>
    %c0_341 = arith.constant 0 : index
    %c336 = arith.constant 336 : index
    %c0_342 = arith.constant 0 : index
    %392 = vector.load %arg1[%c0_341, %c336, %c0_342] : memref<1x512x128xbf16, #tpu.memory_space<vmem>>, vector<1x32x128xbf16>
    %393 = vector.shape_cast %392 : vector<1x32x128xbf16> to vector<32x128xbf16>
    %c3_343 = arith.constant 3 : index
    %c0_344 = arith.constant 0 : index
    %c0_345 = arith.constant 0 : index
    %394 = vector.load %arg2[%c3_343, %c0_344, %c0_345] : memref<5x128x256xbf16, #tpu.memory_space<vmem>>, vector<1x128x256xbf16>
    %395 = vector.shape_cast %394 : vector<1x128x256xbf16> to vector<128x256xbf16>
    %cst_346 = arith.constant dense<0.000000e+00> : vector<32x256xf32>
    %396 = tpu.matmul %393, %395, %cst_346 {dimension_numbers = #tpu.dot_dimension_numbers<[1], [0], [0], [1], [0, 0, 1, 1], [], []>} : vector<32x128xbf16>, vector<128x256xbf16>, vector<32x256xf32> -> vector<32x256xf32>
    %397 = arith.addf %391, %396 : vector<32x256xf32>
    %c0_347 = arith.constant 0 : index
    %c352 = arith.constant 352 : index
    %c0_348 = arith.constant 0 : index
    %398 = vector.load %arg1[%c0_347, %c352, %c0_348] : memref<1x512x128xbf16, #tpu.memory_space<vmem>>, vector<1x32x128xbf16>
    %399 = vector.shape_cast %398 : vector<1x32x128xbf16> to vector<32x128xbf16>
    %c4_349 = arith.constant 4 : index
    %c0_350 = arith.constant 0 : index
    %c0_351 = arith.constant 0 : index
    %400 = vector.load %arg2[%c4_349, %c0_350, %c0_351] : memref<5x128x256xbf16, #tpu.memory_space<vmem>>, vector<1x128x256xbf16>
    %401 = vector.shape_cast %400 : vector<1x128x256xbf16> to vector<128x256xbf16>
    %cst_352 = arith.constant dense<0.000000e+00> : vector<32x256xf32>
    %402 = tpu.matmul %399, %401, %cst_352 {dimension_numbers = #tpu.dot_dimension_numbers<[1], [0], [0], [1], [0, 0, 1, 1], [], []>} : vector<32x128xbf16>, vector<128x256xbf16>, vector<32x256xf32> -> vector<32x256xf32>
    %403 = arith.addf %397, %402 : vector<32x256xf32>
    %404 = vector.extract_strided_slice %403 {offsets = [0, 0], sizes = [16, 128], strides = [1, 1]} : vector<32x256xf32> to vector<16x128xf32>
    %405 = vector.extract_strided_slice %403 {offsets = [0, 128], sizes = [16, 128], strides = [1, 1]} : vector<32x256xf32> to vector<16x128xf32>
    %406 = arith.maximumf %404, %405 : vector<16x128xf32>
    %407 = vector.extract_strided_slice %403 {offsets = [16, 0], sizes = [16, 128], strides = [1, 1]} : vector<32x256xf32> to vector<16x128xf32>
    %408 = vector.extract_strided_slice %403 {offsets = [16, 128], sizes = [16, 128], strides = [1, 1]} : vector<32x256xf32> to vector<16x128xf32>
    %409 = arith.maximumf %407, %408 : vector<16x128xf32>
    %410 = arith.maximumf %406, %409 : vector<16x128xf32>
    %411 = arith.addf %410, %2 : vector<16x128xf32>
    %cst_353 = arith.constant 0.000000e+00 : f32
    %412 = vector.broadcast %cst_353 : f32 to vector<16x128xf32>
    %413 = arith.maximumf %411, %412 : vector<16x128xf32>
    %414 = arith.truncf %413 : vector<16x128xf32> to vector<16x128xbf16>
    %c144_354 = arith.constant 144 : index
    %c0_355 = arith.constant 0 : index
    %415 = vector.load %arg13[%c144_354, %c0_355] : memref<224x128xbf16, #tpu.memory_space<vmem>>, vector<16x128xbf16>
    tpu.vector_store %arg13[%c144_354, %c0_355], %414 {strides = array<i32>} : memref<224x128xbf16, #tpu.memory_space<vmem>>, vector<16x128xbf16>,
    %c0_356 = arith.constant 0 : index
    %c320_357 = arith.constant 320 : index
    %c0_358 = arith.constant 0 : index
    %416 = vector.load %arg1[%c0_356, %c320_357, %c0_358] : memref<1x512x128xbf16, #tpu.memory_space<vmem>>, vector<1x32x128xbf16>
    %417 = vector.shape_cast %416 : vector<1x32x128xbf16> to vector<32x128xbf16>
    %c0_359 = arith.constant 0 : index
    %c0_360 = arith.constant 0 : index
    %c0_361 = arith.constant 0 : index
    %418 = vector.load %arg2[%c0_359, %c0_360, %c0_361] : memref<5x128x256xbf16, #tpu.memory_space<vmem>>, vector<1x128x256xbf16>
    %419 = vector.shape_cast %418 : vector<1x128x256xbf16> to vector<128x256xbf16>
    %cst_362 = arith.constant dense<0.000000e+00> : vector<32x256xf32>
    %420 = tpu.matmul %417, %419, %cst_362 {dimension_numbers = #tpu.dot_dimension_numbers<[1], [0], [0], [1], [0, 0, 1, 1], [], []>} : vector<32x128xbf16>, vector<128x256xbf16>, vector<32x256xf32> -> vector<32x256xf32>
    %c0_363 = arith.constant 0 : index
    %c336_364 = arith.constant 336 : index
    %c0_365 = arith.constant 0 : index
    %421 = vector.load %arg1[%c0_363, %c336_364, %c0_365] : memref<1x512x128xbf16, #tpu.memory_space<vmem>>, vector<1x32x128xbf16>
    %422 = vector.shape_cast %421 : vector<1x32x128xbf16> to vector<32x128xbf16>
    %c1_366 = arith.constant 1 : index
    %c0_367 = arith.constant 0 : index
    %c0_368 = arith.constant 0 : index
    %423 = vector.load %arg2[%c1_366, %c0_367, %c0_368] : memref<5x128x256xbf16, #tpu.memory_space<vmem>>, vector<1x128x256xbf16>
    %424 = vector.shape_cast %423 : vector<1x128x256xbf16> to vector<128x256xbf16>
    %cst_369 = arith.constant dense<0.000000e+00> : vector<32x256xf32>
    %425 = tpu.matmul %422, %424, %cst_369 {dimension_numbers = #tpu.dot_dimension_numbers<[1], [0], [0], [1], [0, 0, 1, 1], [], []>} : vector<32x128xbf16>, vector<128x256xbf16>, vector<32x256xf32> -> vector<32x256xf32>
    %426 = arith.addf %420, %425 : vector<32x256xf32>
    %c0_370 = arith.constant 0 : index
    %c352_371 = arith.constant 352 : index
    %c0_372 = arith.constant 0 : index
    %427 = vector.load %arg1[%c0_370, %c352_371, %c0_372] : memref<1x512x128xbf16, #tpu.memory_space<vmem>>, vector<1x32x128xbf16>
    %428 = vector.shape_cast %427 : vector<1x32x128xbf16> to vector<32x128xbf16>
    %c2_373 = arith.constant 2 : index
    %c0_374 = arith.constant 0 : index
    %c0_375 = arith.constant 0 : index
    %429 = vector.load %arg2[%c2_373, %c0_374, %c0_375] : memref<5x128x256xbf16, #tpu.memory_space<vmem>>, vector<1x128x256xbf16>
    %430 = vector.shape_cast %429 : vector<1x128x256xbf16> to vector<128x256xbf16>
    %cst_376 = arith.constant dense<0.000000e+00> : vector<32x256xf32>
    %431 = tpu.matmul %428, %430, %cst_376 {dimension_numbers = #tpu.dot_dimension_numbers<[1], [0], [0], [1], [0, 0, 1, 1], [], []>} : vector<32x128xbf16>, vector<128x256xbf16>, vector<32x256xf32> -> vector<32x256xf32>
    %432 = arith.addf %426, %431 : vector<32x256xf32>
    %c0_377 = arith.constant 0 : index
    %c368 = arith.constant 368 : index
    %c0_378 = arith.constant 0 : index
    %433 = vector.load %arg1[%c0_377, %c368, %c0_378] : memref<1x512x128xbf16, #tpu.memory_space<vmem>>, vector<1x32x128xbf16>
    %434 = vector.shape_cast %433 : vector<1x32x128xbf16> to vector<32x128xbf16>
    %c3_379 = arith.constant 3 : index
    %c0_380 = arith.constant 0 : index
    %c0_381 = arith.constant 0 : index
    %435 = vector.load %arg2[%c3_379, %c0_380, %c0_381] : memref<5x128x256xbf16, #tpu.memory_space<vmem>>, vector<1x128x256xbf16>
    %436 = vector.shape_cast %435 : vector<1x128x256xbf16> to vector<128x256xbf16>
    %cst_382 = arith.constant dense<0.000000e+00> : vector<32x256xf32>
    %437 = tpu.matmul %434, %436, %cst_382 {dimension_numbers = #tpu.dot_dimension_numbers<[1], [0], [0], [1], [0, 0, 1, 1], [], []>} : vector<32x128xbf16>, vector<128x256xbf16>, vector<32x256xf32> -> vector<32x256xf32>
    %438 = arith.addf %432, %437 : vector<32x256xf32>
    %c0_383 = arith.constant 0 : index
    %c384 = arith.constant 384 : index
    %c0_384 = arith.constant 0 : index
    %439 = vector.load %arg1[%c0_383, %c384, %c0_384] : memref<1x512x128xbf16, #tpu.memory_space<vmem>>, vector<1x32x128xbf16>
    %440 = vector.shape_cast %439 : vector<1x32x128xbf16> to vector<32x128xbf16>
    %c4_385 = arith.constant 4 : index
    %c0_386 = arith.constant 0 : index
    %c0_387 = arith.constant 0 : index
    %441 = vector.load %arg2[%c4_385, %c0_386, %c0_387] : memref<5x128x256xbf16, #tpu.memory_space<vmem>>, vector<1x128x256xbf16>
    %442 = vector.shape_cast %441 : vector<1x128x256xbf16> to vector<128x256xbf16>
    %cst_388 = arith.constant dense<0.000000e+00> : vector<32x256xf32>
    %443 = tpu.matmul %440, %442, %cst_388 {dimension_numbers = #tpu.dot_dimension_numbers<[1], [0], [0], [1], [0, 0, 1, 1], [], []>} : vector<32x128xbf16>, vector<128x256xbf16>, vector<32x256xf32> -> vector<32x256xf32>
    %444 = arith.addf %438, %443 : vector<32x256xf32>
    %445 = vector.extract_strided_slice %444 {offsets = [0, 0], sizes = [16, 128], strides = [1, 1]} : vector<32x256xf32> to vector<16x128xf32>
    %446 = vector.extract_strided_slice %444 {offsets = [0, 128], sizes = [16, 128], strides = [1, 1]} : vector<32x256xf32> to vector<16x128xf32>
    %447 = arith.maximumf %445, %446 : vector<16x128xf32>
    %448 = vector.extract_strided_slice %444 {offsets = [16, 0], sizes = [16, 128], strides = [1, 1]} : vector<32x256xf32> to vector<16x128xf32>
    %449 = vector.extract_strided_slice %444 {offsets = [16, 128], sizes = [16, 128], strides = [1, 1]} : vector<32x256xf32> to vector<16x128xf32>
    %450 = arith.maximumf %448, %449 : vector<16x128xf32>
    %451 = arith.maximumf %447, %450 : vector<16x128xf32>
    %452 = arith.addf %451, %2 : vector<16x128xf32>
    %cst_389 = arith.constant 0.000000e+00 : f32
    %453 = vector.broadcast %cst_389 : f32 to vector<16x128xf32>
    %454 = arith.maximumf %452, %453 : vector<16x128xf32>
    %455 = arith.truncf %454 : vector<16x128xf32> to vector<16x128xbf16>
    %c160_390 = arith.constant 160 : index
    %c0_391 = arith.constant 0 : index
    %456 = vector.load %arg13[%c160_390, %c0_391] : memref<224x128xbf16, #tpu.memory_space<vmem>>, vector<16x128xbf16>
    tpu.vector_store %arg13[%c160_390, %c0_391], %455 {strides = array<i32>} : memref<224x128xbf16, #tpu.memory_space<vmem>>, vector<16x128xbf16>,
    %c0_392 = arith.constant 0 : index
    %c352_393 = arith.constant 352 : index
    %c0_394 = arith.constant 0 : index
    %457 = vector.load %arg1[%c0_392, %c352_393, %c0_394] : memref<1x512x128xbf16, #tpu.memory_space<vmem>>, vector<1x32x128xbf16>
    %458 = vector.shape_cast %457 : vector<1x32x128xbf16> to vector<32x128xbf16>
    %c0_395 = arith.constant 0 : index
    %c0_396 = arith.constant 0 : index
    %c0_397 = arith.constant 0 : index
    %459 = vector.load %arg2[%c0_395, %c0_396, %c0_397] : memref<5x128x256xbf16, #tpu.memory_space<vmem>>, vector<1x128x256xbf16>
    %460 = vector.shape_cast %459 : vector<1x128x256xbf16> to vector<128x256xbf16>
    %cst_398 = arith.constant dense<0.000000e+00> : vector<32x256xf32>
    %461 = tpu.matmul %458, %460, %cst_398 {dimension_numbers = #tpu.dot_dimension_numbers<[1], [0], [0], [1], [0, 0, 1, 1], [], []>} : vector<32x128xbf16>, vector<128x256xbf16>, vector<32x256xf32> -> vector<32x256xf32>
    %c0_399 = arith.constant 0 : index
    %c368_400 = arith.constant 368 : index
    %c0_401 = arith.constant 0 : index
    %462 = vector.load %arg1[%c0_399, %c368_400, %c0_401] : memref<1x512x128xbf16, #tpu.memory_space<vmem>>, vector<1x32x128xbf16>
    %463 = vector.shape_cast %462 : vector<1x32x128xbf16> to vector<32x128xbf16>
    %c1_402 = arith.constant 1 : index
    %c0_403 = arith.constant 0 : index
    %c0_404 = arith.constant 0 : index
    %464 = vector.load %arg2[%c1_402, %c0_403, %c0_404] : memref<5x128x256xbf16, #tpu.memory_space<vmem>>, vector<1x128x256xbf16>
    %465 = vector.shape_cast %464 : vector<1x128x256xbf16> to vector<128x256xbf16>
    %cst_405 = arith.constant dense<0.000000e+00> : vector<32x256xf32>
    %466 = tpu.matmul %463, %465, %cst_405 {dimension_numbers = #tpu.dot_dimension_numbers<[1], [0], [0], [1], [0, 0, 1, 1], [], []>} : vector<32x128xbf16>, vector<128x256xbf16>, vector<32x256xf32> -> vector<32x256xf32>
    %467 = arith.addf %461, %466 : vector<32x256xf32>
    %c0_406 = arith.constant 0 : index
    %c384_407 = arith.constant 384 : index
    %c0_408 = arith.constant 0 : index
    %468 = vector.load %arg1[%c0_406, %c384_407, %c0_408] : memref<1x512x128xbf16, #tpu.memory_space<vmem>>, vector<1x32x128xbf16>
    %469 = vector.shape_cast %468 : vector<1x32x128xbf16> to vector<32x128xbf16>
    %c2_409 = arith.constant 2 : index
    %c0_410 = arith.constant 0 : index
    %c0_411 = arith.constant 0 : index
    %470 = vector.load %arg2[%c2_409, %c0_410, %c0_411] : memref<5x128x256xbf16, #tpu.memory_space<vmem>>, vector<1x128x256xbf16>
    %471 = vector.shape_cast %470 : vector<1x128x256xbf16> to vector<128x256xbf16>
    %cst_412 = arith.constant dense<0.000000e+00> : vector<32x256xf32>
    %472 = tpu.matmul %469, %471, %cst_412 {dimension_numbers = #tpu.dot_dimension_numbers<[1], [0], [0], [1], [0, 0, 1, 1], [], []>} : vector<32x128xbf16>, vector<128x256xbf16>, vector<32x256xf32> -> vector<32x256xf32>
    %473 = arith.addf %467, %472 : vector<32x256xf32>
    %c0_413 = arith.constant 0 : index
    %c400 = arith.constant 400 : index
    %c0_414 = arith.constant 0 : index
    %474 = vector.load %arg1[%c0_413, %c400, %c0_414] : memref<1x512x128xbf16, #tpu.memory_space<vmem>>, vector<1x32x128xbf16>
    %475 = vector.shape_cast %474 : vector<1x32x128xbf16> to vector<32x128xbf16>
    %c3_415 = arith.constant 3 : index
    %c0_416 = arith.constant 0 : index
    %c0_417 = arith.constant 0 : index
    %476 = vector.load %arg2[%c3_415, %c0_416, %c0_417] : memref<5x128x256xbf16, #tpu.memory_space<vmem>>, vector<1x128x256xbf16>
    %477 = vector.shape_cast %476 : vector<1x128x256xbf16> to vector<128x256xbf16>
    %cst_418 = arith.constant dense<0.000000e+00> : vector<32x256xf32>
    %478 = tpu.matmul %475, %477, %cst_418 {dimension_numbers = #tpu.dot_dimension_numbers<[1], [0], [0], [1], [0, 0, 1, 1], [], []>} : vector<32x128xbf16>, vector<128x256xbf16>, vector<32x256xf32> -> vector<32x256xf32>
    %479 = arith.addf %473, %478 : vector<32x256xf32>
    %c0_419 = arith.constant 0 : index
    %c416 = arith.constant 416 : index
    %c0_420 = arith.constant 0 : index
    %480 = vector.load %arg1[%c0_419, %c416, %c0_420] : memref<1x512x128xbf16, #tpu.memory_space<vmem>>, vector<1x32x128xbf16>
    %481 = vector.shape_cast %480 : vector<1x32x128xbf16> to vector<32x128xbf16>
    %c4_421 = arith.constant 4 : index
    %c0_422 = arith.constant 0 : index
    %c0_423 = arith.constant 0 : index
    %482 = vector.load %arg2[%c4_421, %c0_422, %c0_423] : memref<5x128x256xbf16, #tpu.memory_space<vmem>>, vector<1x128x256xbf16>
    %483 = vector.shape_cast %482 : vector<1x128x256xbf16> to vector<128x256xbf16>
    %cst_424 = arith.constant dense<0.000000e+00> : vector<32x256xf32>
    %484 = tpu.matmul %481, %483, %cst_424 {dimension_numbers = #tpu.dot_dimension_numbers<[1], [0], [0], [1], [0, 0, 1, 1], [], []>} : vector<32x128xbf16>, vector<128x256xbf16>, vector<32x256xf32> -> vector<32x256xf32>
    %485 = arith.addf %479, %484 : vector<32x256xf32>
    %486 = vector.extract_strided_slice %485 {offsets = [0, 0], sizes = [16, 128], strides = [1, 1]} : vector<32x256xf32> to vector<16x128xf32>
    %487 = vector.extract_strided_slice %485 {offsets = [0, 128], sizes = [16, 128], strides = [1, 1]} : vector<32x256xf32> to vector<16x128xf32>
    %488 = arith.maximumf %486, %487 : vector<16x128xf32>
    %489 = vector.extract_strided_slice %485 {offsets = [16, 0], sizes = [16, 128], strides = [1, 1]} : vector<32x256xf32> to vector<16x128xf32>
    %490 = vector.extract_strided_slice %485 {offsets = [16, 128], sizes = [16, 128], strides = [1, 1]} : vector<32x256xf32> to vector<16x128xf32>
    %491 = arith.maximumf %489, %490 : vector<16x128xf32>
    %492 = arith.maximumf %488, %491 : vector<16x128xf32>
    %493 = arith.addf %492, %2 : vector<16x128xf32>
    %cst_425 = arith.constant 0.000000e+00 : f32
    %494 = vector.broadcast %cst_425 : f32 to vector<16x128xf32>
    %495 = arith.maximumf %493, %494 : vector<16x128xf32>
    %496 = arith.truncf %495 : vector<16x128xf32> to vector<16x128xbf16>
    %c176_426 = arith.constant 176 : index
    %c0_427 = arith.constant 0 : index
    %497 = vector.load %arg13[%c176_426, %c0_427] : memref<224x128xbf16, #tpu.memory_space<vmem>>, vector<16x128xbf16>
    tpu.vector_store %arg13[%c176_426, %c0_427], %496 {strides = array<i32>} : memref<224x128xbf16, #tpu.memory_space<vmem>>, vector<16x128xbf16>,
    %c0_428 = arith.constant 0 : index
    %c384_429 = arith.constant 384 : index
    %c0_430 = arith.constant 0 : index
    %498 = vector.load %arg1[%c0_428, %c384_429, %c0_430] : memref<1x512x128xbf16, #tpu.memory_space<vmem>>, vector<1x32x128xbf16>
    %499 = vector.shape_cast %498 : vector<1x32x128xbf16> to vector<32x128xbf16>
    %c0_431 = arith.constant 0 : index
    %c0_432 = arith.constant 0 : index
    %c0_433 = arith.constant 0 : index
    %500 = vector.load %arg2[%c0_431, %c0_432, %c0_433] : memref<5x128x256xbf16, #tpu.memory_space<vmem>>, vector<1x128x256xbf16>
    %501 = vector.shape_cast %500 : vector<1x128x256xbf16> to vector<128x256xbf16>
    %cst_434 = arith.constant dense<0.000000e+00> : vector<32x256xf32>
    %502 = tpu.matmul %499, %501, %cst_434 {dimension_numbers = #tpu.dot_dimension_numbers<[1], [0], [0], [1], [0, 0, 1, 1], [], []>} : vector<32x128xbf16>, vector<128x256xbf16>, vector<32x256xf32> -> vector<32x256xf32>
    %c0_435 = arith.constant 0 : index
    %c400_436 = arith.constant 400 : index
    %c0_437 = arith.constant 0 : index
    %503 = vector.load %arg1[%c0_435, %c400_436, %c0_437] : memref<1x512x128xbf16, #tpu.memory_space<vmem>>, vector<1x32x128xbf16>
    %504 = vector.shape_cast %503 : vector<1x32x128xbf16> to vector<32x128xbf16>
    %c1_438 = arith.constant 1 : index
    %c0_439 = arith.constant 0 : index
    %c0_440 = arith.constant 0 : index
    %505 = vector.load %arg2[%c1_438, %c0_439, %c0_440] : memref<5x128x256xbf16, #tpu.memory_space<vmem>>, vector<1x128x256xbf16>
    %506 = vector.shape_cast %505 : vector<1x128x256xbf16> to vector<128x256xbf16>
    %cst_441 = arith.constant dense<0.000000e+00> : vector<32x256xf32>
    %507 = tpu.matmul %504, %506, %cst_441 {dimension_numbers = #tpu.dot_dimension_numbers<[1], [0], [0], [1], [0, 0, 1, 1], [], []>} : vector<32x128xbf16>, vector<128x256xbf16>, vector<32x256xf32> -> vector<32x256xf32>
    %508 = arith.addf %502, %507 : vector<32x256xf32>
    %c0_442 = arith.constant 0 : index
    %c416_443 = arith.constant 416 : index
    %c0_444 = arith.constant 0 : index
    %509 = vector.load %arg1[%c0_442, %c416_443, %c0_444] : memref<1x512x128xbf16, #tpu.memory_space<vmem>>, vector<1x32x128xbf16>
    %510 = vector.shape_cast %509 : vector<1x32x128xbf16> to vector<32x128xbf16>
    %c2_445 = arith.constant 2 : index
    %c0_446 = arith.constant 0 : index
    %c0_447 = arith.constant 0 : index
    %511 = vector.load %arg2[%c2_445, %c0_446, %c0_447] : memref<5x128x256xbf16, #tpu.memory_space<vmem>>, vector<1x128x256xbf16>
    %512 = vector.shape_cast %511 : vector<1x128x256xbf16> to vector<128x256xbf16>
    %cst_448 = arith.constant dense<0.000000e+00> : vector<32x256xf32>
    %513 = tpu.matmul %510, %512, %cst_448 {dimension_numbers = #tpu.dot_dimension_numbers<[1], [0], [0], [1], [0, 0, 1, 1], [], []>} : vector<32x128xbf16>, vector<128x256xbf16>, vector<32x256xf32> -> vector<32x256xf32>
    %514 = arith.addf %508, %513 : vector<32x256xf32>
    %c0_449 = arith.constant 0 : index
    %c432 = arith.constant 432 : index
    %c0_450 = arith.constant 0 : index
    %515 = vector.load %arg1[%c0_449, %c432, %c0_450] : memref<1x512x128xbf16, #tpu.memory_space<vmem>>, vector<1x32x128xbf16>
    %516 = vector.shape_cast %515 : vector<1x32x128xbf16> to vector<32x128xbf16>
    %c3_451 = arith.constant 3 : index
    %c0_452 = arith.constant 0 : index
    %c0_453 = arith.constant 0 : index
    %517 = vector.load %arg2[%c3_451, %c0_452, %c0_453] : memref<5x128x256xbf16, #tpu.memory_space<vmem>>, vector<1x128x256xbf16>
    %518 = vector.shape_cast %517 : vector<1x128x256xbf16> to vector<128x256xbf16>
    %cst_454 = arith.constant dense<0.000000e+00> : vector<32x256xf32>
    %519 = tpu.matmul %516, %518, %cst_454 {dimension_numbers = #tpu.dot_dimension_numbers<[1], [0], [0], [1], [0, 0, 1, 1], [], []>} : vector<32x128xbf16>, vector<128x256xbf16>, vector<32x256xf32> -> vector<32x256xf32>
    %520 = arith.addf %514, %519 : vector<32x256xf32>
    %c0_455 = arith.constant 0 : index
    %c448 = arith.constant 448 : index
    %c0_456 = arith.constant 0 : index
    %521 = vector.load %arg1[%c0_455, %c448, %c0_456] : memref<1x512x128xbf16, #tpu.memory_space<vmem>>, vector<1x32x128xbf16>
    %522 = vector.shape_cast %521 : vector<1x32x128xbf16> to vector<32x128xbf16>
    %c4_457 = arith.constant 4 : index
    %c0_458 = arith.constant 0 : index
    %c0_459 = arith.constant 0 : index
    %523 = vector.load %arg2[%c4_457, %c0_458, %c0_459] : memref<5x128x256xbf16, #tpu.memory_space<vmem>>, vector<1x128x256xbf16>
    %524 = vector.shape_cast %523 : vector<1x128x256xbf16> to vector<128x256xbf16>
    %cst_460 = arith.constant dense<0.000000e+00> : vector<32x256xf32>
    %525 = tpu.matmul %522, %524, %cst_460 {dimension_numbers = #tpu.dot_dimension_numbers<[1], [0], [0], [1], [0, 0, 1, 1], [], []>} : vector<32x128xbf16>, vector<128x256xbf16>, vector<32x256xf32> -> vector<32x256xf32>
    %526 = arith.addf %520, %525 : vector<32x256xf32>
    %527 = vector.extract_strided_slice %526 {offsets = [0, 0], sizes = [16, 128], strides = [1, 1]} : vector<32x256xf32> to vector<16x128xf32>
    %528 = vector.extract_strided_slice %526 {offsets = [0, 128], sizes = [16, 128], strides = [1, 1]} : vector<32x256xf32> to vector<16x128xf32>
    %529 = arith.maximumf %527, %528 : vector<16x128xf32>
    %530 = vector.extract_strided_slice %526 {offsets = [16, 0], sizes = [16, 128], strides = [1, 1]} : vector<32x256xf32> to vector<16x128xf32>
    %531 = vector.extract_strided_slice %526 {offsets = [16, 128], sizes = [16, 128], strides = [1, 1]} : vector<32x256xf32> to vector<16x128xf32>
    %532 = arith.maximumf %530, %531 : vector<16x128xf32>
    %533 = arith.maximumf %529, %532 : vector<16x128xf32>
    %534 = arith.addf %533, %2 : vector<16x128xf32>
    %cst_461 = arith.constant 0.000000e+00 : f32
    %535 = vector.broadcast %cst_461 : f32 to vector<16x128xf32>
    %536 = arith.maximumf %534, %535 : vector<16x128xf32>
    %537 = arith.truncf %536 : vector<16x128xf32> to vector<16x128xbf16>
    %c192_462 = arith.constant 192 : index
    %c0_463 = arith.constant 0 : index
    %538 = vector.load %arg13[%c192_462, %c0_463] : memref<224x128xbf16, #tpu.memory_space<vmem>>, vector<16x128xbf16>
    tpu.vector_store %arg13[%c192_462, %c0_463], %537 {strides = array<i32>} : memref<224x128xbf16, #tpu.memory_space<vmem>>, vector<16x128xbf16>,
    %c0_464 = arith.constant 0 : index
    %c416_465 = arith.constant 416 : index
    %c0_466 = arith.constant 0 : index
    %539 = vector.load %arg1[%c0_464, %c416_465, %c0_466] : memref<1x512x128xbf16, #tpu.memory_space<vmem>>, vector<1x32x128xbf16>
    %540 = vector.shape_cast %539 : vector<1x32x128xbf16> to vector<32x128xbf16>
    %c0_467 = arith.constant 0 : index
    %c0_468 = arith.constant 0 : index
    %c0_469 = arith.constant 0 : index
    %541 = vector.load %arg2[%c0_467, %c0_468, %c0_469] : memref<5x128x256xbf16, #tpu.memory_space<vmem>>, vector<1x128x256xbf16>
    %542 = vector.shape_cast %541 : vector<1x128x256xbf16> to vector<128x256xbf16>
    %cst_470 = arith.constant dense<0.000000e+00> : vector<32x256xf32>
    %543 = tpu.matmul %540, %542, %cst_470 {dimension_numbers = #tpu.dot_dimension_numbers<[1], [0], [0], [1], [0, 0, 1, 1], [], []>} : vector<32x128xbf16>, vector<128x256xbf16>, vector<32x256xf32> -> vector<32x256xf32>
    %c0_471 = arith.constant 0 : index
    %c432_472 = arith.constant 432 : index
    %c0_473 = arith.constant 0 : index
    %544 = vector.load %arg1[%c0_471, %c432_472, %c0_473] : memref<1x512x128xbf16, #tpu.memory_space<vmem>>, vector<1x32x128xbf16>
    %545 = vector.shape_cast %544 : vector<1x32x128xbf16> to vector<32x128xbf16>
    %c1_474 = arith.constant 1 : index
    %c0_475 = arith.constant 0 : index
    %c0_476 = arith.constant 0 : index
    %546 = vector.load %arg2[%c1_474, %c0_475, %c0_476] : memref<5x128x256xbf16, #tpu.memory_space<vmem>>, vector<1x128x256xbf16>
    %547 = vector.shape_cast %546 : vector<1x128x256xbf16> to vector<128x256xbf16>
    %cst_477 = arith.constant dense<0.000000e+00> : vector<32x256xf32>
    %548 = tpu.matmul %545, %547, %cst_477 {dimension_numbers = #tpu.dot_dimension_numbers<[1], [0], [0], [1], [0, 0, 1, 1], [], []>} : vector<32x128xbf16>, vector<128x256xbf16>, vector<32x256xf32> -> vector<32x256xf32>
    %549 = arith.addf %543, %548 : vector<32x256xf32>
    %c0_478 = arith.constant 0 : index
    %c448_479 = arith.constant 448 : index
    %c0_480 = arith.constant 0 : index
    %550 = vector.load %arg1[%c0_478, %c448_479, %c0_480] : memref<1x512x128xbf16, #tpu.memory_space<vmem>>, vector<1x32x128xbf16>
    %551 = vector.shape_cast %550 : vector<1x32x128xbf16> to vector<32x128xbf16>
    %c2_481 = arith.constant 2 : index
    %c0_482 = arith.constant 0 : index
    %c0_483 = arith.constant 0 : index
    %552 = vector.load %arg2[%c2_481, %c0_482, %c0_483] : memref<5x128x256xbf16, #tpu.memory_space<vmem>>, vector<1x128x256xbf16>
    %553 = vector.shape_cast %552 : vector<1x128x256xbf16> to vector<128x256xbf16>
    %cst_484 = arith.constant dense<0.000000e+00> : vector<32x256xf32>
    %554 = tpu.matmul %551, %553, %cst_484 {dimension_numbers = #tpu.dot_dimension_numbers<[1], [0], [0], [1], [0, 0, 1, 1], [], []>} : vector<32x128xbf16>, vector<128x256xbf16>, vector<32x256xf32> -> vector<32x256xf32>
    %555 = arith.addf %549, %554 : vector<32x256xf32>
    %c0_485 = arith.constant 0 : index
    %c464 = arith.constant 464 : index
    %c0_486 = arith.constant 0 : index
    %556 = vector.load %arg1[%c0_485, %c464, %c0_486] : memref<1x512x128xbf16, #tpu.memory_space<vmem>>, vector<1x32x128xbf16>
    %557 = vector.shape_cast %556 : vector<1x32x128xbf16> to vector<32x128xbf16>
    %c3_487 = arith.constant 3 : index
    %c0_488 = arith.constant 0 : index
    %c0_489 = arith.constant 0 : index
    %558 = vector.load %arg2[%c3_487, %c0_488, %c0_489] : memref<5x128x256xbf16, #tpu.memory_space<vmem>>, vector<1x128x256xbf16>
    %559 = vector.shape_cast %558 : vector<1x128x256xbf16> to vector<128x256xbf16>
    %cst_490 = arith.constant dense<0.000000e+00> : vector<32x256xf32>
    %560 = tpu.matmul %557, %559, %cst_490 {dimension_numbers = #tpu.dot_dimension_numbers<[1], [0], [0], [1], [0, 0, 1, 1], [], []>} : vector<32x128xbf16>, vector<128x256xbf16>, vector<32x256xf32> -> vector<32x256xf32>
    %561 = arith.addf %555, %560 : vector<32x256xf32>
    %c0_491 = arith.constant 0 : index
    %c480 = arith.constant 480 : index
    %c0_492 = arith.constant 0 : index
    %562 = vector.load %arg1[%c0_491, %c480, %c0_492] : memref<1x512x128xbf16, #tpu.memory_space<vmem>>, vector<1x32x128xbf16>
    %563 = vector.shape_cast %562 : vector<1x32x128xbf16> to vector<32x128xbf16>
    %c4_493 = arith.constant 4 : index
    %c0_494 = arith.constant 0 : index
    %c0_495 = arith.constant 0 : index
    %564 = vector.load %arg2[%c4_493, %c0_494, %c0_495] : memref<5x128x256xbf16, #tpu.memory_space<vmem>>, vector<1x128x256xbf16>
    %565 = vector.shape_cast %564 : vector<1x128x256xbf16> to vector<128x256xbf16>
    %cst_496 = arith.constant dense<0.000000e+00> : vector<32x256xf32>
    %566 = tpu.matmul %563, %565, %cst_496 {dimension_numbers = #tpu.dot_dimension_numbers<[1], [0], [0], [1], [0, 0, 1, 1], [], []>} : vector<32x128xbf16>, vector<128x256xbf16>, vector<32x256xf32> -> vector<32x256xf32>
    %567 = arith.addf %561, %566 : vector<32x256xf32>
    %568 = vector.extract_strided_slice %567 {offsets = [0, 0], sizes = [16, 128], strides = [1, 1]} : vector<32x256xf32> to vector<16x128xf32>
    %569 = vector.extract_strided_slice %567 {offsets = [0, 128], sizes = [16, 128], strides = [1, 1]} : vector<32x256xf32> to vector<16x128xf32>
    %570 = arith.maximumf %568, %569 : vector<16x128xf32>
    %571 = vector.extract_strided_slice %567 {offsets = [16, 0], sizes = [16, 128], strides = [1, 1]} : vector<32x256xf32> to vector<16x128xf32>
    %572 = vector.extract_strided_slice %567 {offsets = [16, 128], sizes = [16, 128], strides = [1, 1]} : vector<32x256xf32> to vector<16x128xf32>
    %573 = arith.maximumf %571, %572 : vector<16x128xf32>
    %574 = arith.maximumf %570, %573 : vector<16x128xf32>
    %575 = arith.addf %574, %2 : vector<16x128xf32>
    %cst_497 = arith.constant 0.000000e+00 : f32
    %576 = vector.broadcast %cst_497 : f32 to vector<16x128xf32>
    %577 = arith.maximumf %575, %576 : vector<16x128xf32>
    %578 = arith.truncf %577 : vector<16x128xf32> to vector<16x128xbf16>
    %c208_498 = arith.constant 208 : index
    %c0_499 = arith.constant 0 : index
    %579 = vector.load %arg13[%c208_498, %c0_499] : memref<224x128xbf16, #tpu.memory_space<vmem>>, vector<16x128xbf16>
    tpu.vector_store %arg13[%c208_498, %c0_499], %578 {strides = array<i32>} : memref<224x128xbf16, #tpu.memory_space<vmem>>, vector<16x128xbf16>,
    %c0_500 = arith.constant 0 : index
    %c0_501 = arith.constant 0 : index
    %580 = vector.load %arg13[%c0_500, %c0_501] : memref<224x128xbf16, #tpu.memory_space<vmem>>, vector<32x128xbf16>
    %c0_502 = arith.constant 0 : index
    %c0_503 = arith.constant 0 : index
    %c0_504 = arith.constant 0 : index
    %581 = vector.load %arg4[%c0_502, %c0_503, %c0_504] : memref<5x128x256xbf16, #tpu.memory_space<vmem>>, vector<1x128x256xbf16>
    %582 = vector.shape_cast %581 : vector<1x128x256xbf16> to vector<128x256xbf16>
    %cst_505 = arith.constant dense<0.000000e+00> : vector<32x256xf32>
    %583 = tpu.matmul %580, %582, %cst_505 {dimension_numbers = #tpu.dot_dimension_numbers<[1], [0], [0], [1], [0, 0, 1, 1], [], []>} : vector<32x128xbf16>, vector<128x256xbf16>, vector<32x256xf32> -> vector<32x256xf32>
    %c16_506 = arith.constant 16 : index
    %c0_507 = arith.constant 0 : index
    %584 = vector.load %arg13[%c16_506, %c0_507] : memref<224x128xbf16, #tpu.memory_space<vmem>>, vector<32x128xbf16>
    %c1_508 = arith.constant 1 : index
    %c0_509 = arith.constant 0 : index
    %c0_510 = arith.constant 0 : index
    %585 = vector.load %arg4[%c1_508, %c0_509, %c0_510] : memref<5x128x256xbf16, #tpu.memory_space<vmem>>, vector<1x128x256xbf16>
    %586 = vector.shape_cast %585 : vector<1x128x256xbf16> to vector<128x256xbf16>
    %cst_511 = arith.constant dense<0.000000e+00> : vector<32x256xf32>
    %587 = tpu.matmul %584, %586, %cst_511 {dimension_numbers = #tpu.dot_dimension_numbers<[1], [0], [0], [1], [0, 0, 1, 1], [], []>} : vector<32x128xbf16>, vector<128x256xbf16>, vector<32x256xf32> -> vector<32x256xf32>
    %588 = arith.addf %583, %587 : vector<32x256xf32>
    %c32_512 = arith.constant 32 : index
    %c0_513 = arith.constant 0 : index
    %589 = vector.load %arg13[%c32_512, %c0_513] : memref<224x128xbf16, #tpu.memory_space<vmem>>, vector<32x128xbf16>
    %c2_514 = arith.constant 2 : index
    %c0_515 = arith.constant 0 : index
    %c0_516 = arith.constant 0 : index
    %590 = vector.load %arg4[%c2_514, %c0_515, %c0_516] : memref<5x128x256xbf16, #tpu.memory_space<vmem>>, vector<1x128x256xbf16>
    %591 = vector.shape_cast %590 : vector<1x128x256xbf16> to vector<128x256xbf16>
    %cst_517 = arith.constant dense<0.000000e+00> : vector<32x256xf32>
    %592 = tpu.matmul %589, %591, %cst_517 {dimension_numbers = #tpu.dot_dimension_numbers<[1], [0], [0], [1], [0, 0, 1, 1], [], []>} : vector<32x128xbf16>, vector<128x256xbf16>, vector<32x256xf32> -> vector<32x256xf32>
    %593 = arith.addf %588, %592 : vector<32x256xf32>
    %c48_518 = arith.constant 48 : index
    %c0_519 = arith.constant 0 : index
    %594 = vector.load %arg13[%c48_518, %c0_519] : memref<224x128xbf16, #tpu.memory_space<vmem>>, vector<32x128xbf16>
    %c3_520 = arith.constant 3 : index
    %c0_521 = arith.constant 0 : index
    %c0_522 = arith.constant 0 : index
    %595 = vector.load %arg4[%c3_520, %c0_521, %c0_522] : memref<5x128x256xbf16, #tpu.memory_space<vmem>>, vector<1x128x256xbf16>
    %596 = vector.shape_cast %595 : vector<1x128x256xbf16> to vector<128x256xbf16>
    %cst_523 = arith.constant dense<0.000000e+00> : vector<32x256xf32>
    %597 = tpu.matmul %594, %596, %cst_523 {dimension_numbers = #tpu.dot_dimension_numbers<[1], [0], [0], [1], [0, 0, 1, 1], [], []>} : vector<32x128xbf16>, vector<128x256xbf16>, vector<32x256xf32> -> vector<32x256xf32>
    %598 = arith.addf %593, %597 : vector<32x256xf32>
    %c64_524 = arith.constant 64 : index
    %c0_525 = arith.constant 0 : index
    %599 = vector.load %arg13[%c64_524, %c0_525] : memref<224x128xbf16, #tpu.memory_space<vmem>>, vector<32x128xbf16>
    %c4_526 = arith.constant 4 : index
    %c0_527 = arith.constant 0 : index
    %c0_528 = arith.constant 0 : index
    %600 = vector.load %arg4[%c4_526, %c0_527, %c0_528] : memref<5x128x256xbf16, #tpu.memory_space<vmem>>, vector<1x128x256xbf16>
    %601 = vector.shape_cast %600 : vector<1x128x256xbf16> to vector<128x256xbf16>
    %cst_529 = arith.constant dense<0.000000e+00> : vector<32x256xf32>
    %602 = tpu.matmul %599, %601, %cst_529 {dimension_numbers = #tpu.dot_dimension_numbers<[1], [0], [0], [1], [0, 0, 1, 1], [], []>} : vector<32x128xbf16>, vector<128x256xbf16>, vector<32x256xf32> -> vector<32x256xf32>
    %603 = arith.addf %598, %602 : vector<32x256xf32>
    %604 = vector.extract_strided_slice %603 {offsets = [0, 0], sizes = [16, 128], strides = [1, 1]} : vector<32x256xf32> to vector<16x128xf32>
    %605 = vector.extract_strided_slice %603 {offsets = [0, 128], sizes = [16, 128], strides = [1, 1]} : vector<32x256xf32> to vector<16x128xf32>
    %606 = arith.maximumf %604, %605 : vector<16x128xf32>
    %607 = vector.extract_strided_slice %603 {offsets = [16, 0], sizes = [16, 128], strides = [1, 1]} : vector<32x256xf32> to vector<16x128xf32>
    %608 = vector.extract_strided_slice %603 {offsets = [16, 128], sizes = [16, 128], strides = [1, 1]} : vector<32x256xf32> to vector<16x128xf32>
    %609 = arith.maximumf %607, %608 : vector<16x128xf32>
    %610 = arith.maximumf %606, %609 : vector<16x128xf32>
    %611 = arith.addf %610, %5 : vector<16x128xf32>
    %cst_530 = arith.constant 0.000000e+00 : f32
    %612 = vector.broadcast %cst_530 : f32 to vector<16x128xf32>
    %613 = arith.maximumf %611, %612 : vector<16x128xf32>
    %614 = arith.truncf %613 : vector<16x128xf32> to vector<16x128xbf16>
    %c0_531 = arith.constant 0 : index
    %c0_532 = arith.constant 0 : index
    %615 = vector.load %arg14[%c0_531, %c0_532] : memref<16x640xbf16, #tpu.memory_space<vmem>>, vector<16x128xbf16>
    tpu.vector_store %arg14[%c0_531, %c0_532], %614 {strides = array<i32>} : memref<16x640xbf16, #tpu.memory_space<vmem>>, vector<16x128xbf16>,
    %c32_533 = arith.constant 32 : index
    %c0_534 = arith.constant 0 : index
    %616 = vector.load %arg13[%c32_533, %c0_534] : memref<224x128xbf16, #tpu.memory_space<vmem>>, vector<32x128xbf16>
    %c0_535 = arith.constant 0 : index
    %c0_536 = arith.constant 0 : index
    %c0_537 = arith.constant 0 : index
    %617 = vector.load %arg4[%c0_535, %c0_536, %c0_537] : memref<5x128x256xbf16, #tpu.memory_space<vmem>>, vector<1x128x256xbf16>
    %618 = vector.shape_cast %617 : vector<1x128x256xbf16> to vector<128x256xbf16>
    %cst_538 = arith.constant dense<0.000000e+00> : vector<32x256xf32>
    %619 = tpu.matmul %616, %618, %cst_538 {dimension_numbers = #tpu.dot_dimension_numbers<[1], [0], [0], [1], [0, 0, 1, 1], [], []>} : vector<32x128xbf16>, vector<128x256xbf16>, vector<32x256xf32> -> vector<32x256xf32>
    %c48_539 = arith.constant 48 : index
    %c0_540 = arith.constant 0 : index
    %620 = vector.load %arg13[%c48_539, %c0_540] : memref<224x128xbf16, #tpu.memory_space<vmem>>, vector<32x128xbf16>
    %c1_541 = arith.constant 1 : index
    %c0_542 = arith.constant 0 : index
    %c0_543 = arith.constant 0 : index
    %621 = vector.load %arg4[%c1_541, %c0_542, %c0_543] : memref<5x128x256xbf16, #tpu.memory_space<vmem>>, vector<1x128x256xbf16>
    %622 = vector.shape_cast %621 : vector<1x128x256xbf16> to vector<128x256xbf16>
    %cst_544 = arith.constant dense<0.000000e+00> : vector<32x256xf32>
    %623 = tpu.matmul %620, %622, %cst_544 {dimension_numbers = #tpu.dot_dimension_numbers<[1], [0], [0], [1], [0, 0, 1, 1], [], []>} : vector<32x128xbf16>, vector<128x256xbf16>, vector<32x256xf32> -> vector<32x256xf32>
    %624 = arith.addf %619, %623 : vector<32x256xf32>
    %c64_545 = arith.constant 64 : index
    %c0_546 = arith.constant 0 : index
    %625 = vector.load %arg13[%c64_545, %c0_546] : memref<224x128xbf16, #tpu.memory_space<vmem>>, vector<32x128xbf16>
    %c2_547 = arith.constant 2 : index
    %c0_548 = arith.constant 0 : index
    %c0_549 = arith.constant 0 : index
    %626 = vector.load %arg4[%c2_547, %c0_548, %c0_549] : memref<5x128x256xbf16, #tpu.memory_space<vmem>>, vector<1x128x256xbf16>
    %627 = vector.shape_cast %626 : vector<1x128x256xbf16> to vector<128x256xbf16>
    %cst_550 = arith.constant dense<0.000000e+00> : vector<32x256xf32>
    %628 = tpu.matmul %625, %627, %cst_550 {dimension_numbers = #tpu.dot_dimension_numbers<[1], [0], [0], [1], [0, 0, 1, 1], [], []>} : vector<32x128xbf16>, vector<128x256xbf16>, vector<32x256xf32> -> vector<32x256xf32>
    %629 = arith.addf %624, %628 : vector<32x256xf32>
    %c80_551 = arith.constant 80 : index
    %c0_552 = arith.constant 0 : index
    %630 = vector.load %arg13[%c80_551, %c0_552] : memref<224x128xbf16, #tpu.memory_space<vmem>>, vector<32x128xbf16>
    %c3_553 = arith.constant 3 : index
    %c0_554 = arith.constant 0 : index
    %c0_555 = arith.constant 0 : index
    %631 = vector.load %arg4[%c3_553, %c0_554, %c0_555] : memref<5x128x256xbf16, #tpu.memory_space<vmem>>, vector<1x128x256xbf16>
    %632 = vector.shape_cast %631 : vector<1x128x256xbf16> to vector<128x256xbf16>
    %cst_556 = arith.constant dense<0.000000e+00> : vector<32x256xf32>
    %633 = tpu.matmul %630, %632, %cst_556 {dimension_numbers = #tpu.dot_dimension_numbers<[1], [0], [0], [1], [0, 0, 1, 1], [], []>} : vector<32x128xbf16>, vector<128x256xbf16>, vector<32x256xf32> -> vector<32x256xf32>
    %634 = arith.addf %629, %633 : vector<32x256xf32>
    %c96_557 = arith.constant 96 : index
    %c0_558 = arith.constant 0 : index
    %635 = vector.load %arg13[%c96_557, %c0_558] : memref<224x128xbf16, #tpu.memory_space<vmem>>, vector<32x128xbf16>
    %c4_559 = arith.constant 4 : index
    %c0_560 = arith.constant 0 : index
    %c0_561 = arith.constant 0 : index
    %636 = vector.load %arg4[%c4_559, %c0_560, %c0_561] : memref<5x128x256xbf16, #tpu.memory_space<vmem>>, vector<1x128x256xbf16>
    %637 = vector.shape_cast %636 : vector<1x128x256xbf16> to vector<128x256xbf16>
    %cst_562 = arith.constant dense<0.000000e+00> : vector<32x256xf32>
    %638 = tpu.matmul %635, %637, %cst_562 {dimension_numbers = #tpu.dot_dimension_numbers<[1], [0], [0], [1], [0, 0, 1, 1], [], []>} : vector<32x128xbf16>, vector<128x256xbf16>, vector<32x256xf32> -> vector<32x256xf32>
    %639 = arith.addf %634, %638 : vector<32x256xf32>
    %640 = vector.extract_strided_slice %639 {offsets = [0, 0], sizes = [16, 128], strides = [1, 1]} : vector<32x256xf32> to vector<16x128xf32>
    %641 = vector.extract_strided_slice %639 {offsets = [0, 128], sizes = [16, 128], strides = [1, 1]} : vector<32x256xf32> to vector<16x128xf32>
    %642 = arith.maximumf %640, %641 : vector<16x128xf32>
    %643 = vector.extract_strided_slice %639 {offsets = [16, 0], sizes = [16, 128], strides = [1, 1]} : vector<32x256xf32> to vector<16x128xf32>
    %644 = vector.extract_strided_slice %639 {offsets = [16, 128], sizes = [16, 128], strides = [1, 1]} : vector<32x256xf32> to vector<16x128xf32>
    %645 = arith.maximumf %643, %644 : vector<16x128xf32>
    %646 = arith.maximumf %642, %645 : vector<16x128xf32>
    %647 = arith.addf %646, %5 : vector<16x128xf32>
    %cst_563 = arith.constant 0.000000e+00 : f32
    %648 = vector.broadcast %cst_563 : f32 to vector<16x128xf32>
    %649 = arith.maximumf %647, %648 : vector<16x128xf32>
    %650 = arith.truncf %649 : vector<16x128xf32> to vector<16x128xbf16>
    %c0_564 = arith.constant 0 : index
    %c128_565 = arith.constant 128 : index
    %651 = vector.load %arg14[%c0_564, %c128_565] : memref<16x640xbf16, #tpu.memory_space<vmem>>, vector<16x128xbf16>
    tpu.vector_store %arg14[%c0_564, %c128_565], %650 {strides = array<i32>} : memref<16x640xbf16, #tpu.memory_space<vmem>>, vector<16x128xbf16>,
    %c64_566 = arith.constant 64 : index
    %c0_567 = arith.constant 0 : index
    %652 = vector.load %arg13[%c64_566, %c0_567] : memref<224x128xbf16, #tpu.memory_space<vmem>>, vector<32x128xbf16>
    %c0_568 = arith.constant 0 : index
    %c0_569 = arith.constant 0 : index
    %c0_570 = arith.constant 0 : index
    %653 = vector.load %arg4[%c0_568, %c0_569, %c0_570] : memref<5x128x256xbf16, #tpu.memory_space<vmem>>, vector<1x128x256xbf16>
    %654 = vector.shape_cast %653 : vector<1x128x256xbf16> to vector<128x256xbf16>
    %cst_571 = arith.constant dense<0.000000e+00> : vector<32x256xf32>
    %655 = tpu.matmul %652, %654, %cst_571 {dimension_numbers = #tpu.dot_dimension_numbers<[1], [0], [0], [1], [0, 0, 1, 1], [], []>} : vector<32x128xbf16>, vector<128x256xbf16>, vector<32x256xf32> -> vector<32x256xf32>
    %c80_572 = arith.constant 80 : index
    %c0_573 = arith.constant 0 : index
    %656 = vector.load %arg13[%c80_572, %c0_573] : memref<224x128xbf16, #tpu.memory_space<vmem>>, vector<32x128xbf16>
    %c1_574 = arith.constant 1 : index
    %c0_575 = arith.constant 0 : index
    %c0_576 = arith.constant 0 : index
    %657 = vector.load %arg4[%c1_574, %c0_575, %c0_576] : memref<5x128x256xbf16, #tpu.memory_space<vmem>>, vector<1x128x256xbf16>
    %658 = vector.shape_cast %657 : vector<1x128x256xbf16> to vector<128x256xbf16>
    %cst_577 = arith.constant dense<0.000000e+00> : vector<32x256xf32>
    %659 = tpu.matmul %656, %658, %cst_577 {dimension_numbers = #tpu.dot_dimension_numbers<[1], [0], [0], [1], [0, 0, 1, 1], [], []>} : vector<32x128xbf16>, vector<128x256xbf16>, vector<32x256xf32> -> vector<32x256xf32>
    %660 = arith.addf %655, %659 : vector<32x256xf32>
    %c96_578 = arith.constant 96 : index
    %c0_579 = arith.constant 0 : index
    %661 = vector.load %arg13[%c96_578, %c0_579] : memref<224x128xbf16, #tpu.memory_space<vmem>>, vector<32x128xbf16>
    %c2_580 = arith.constant 2 : index
    %c0_581 = arith.constant 0 : index
    %c0_582 = arith.constant 0 : index
    %662 = vector.load %arg4[%c2_580, %c0_581, %c0_582] : memref<5x128x256xbf16, #tpu.memory_space<vmem>>, vector<1x128x256xbf16>
    %663 = vector.shape_cast %662 : vector<1x128x256xbf16> to vector<128x256xbf16>
    %cst_583 = arith.constant dense<0.000000e+00> : vector<32x256xf32>
    %664 = tpu.matmul %661, %663, %cst_583 {dimension_numbers = #tpu.dot_dimension_numbers<[1], [0], [0], [1], [0, 0, 1, 1], [], []>} : vector<32x128xbf16>, vector<128x256xbf16>, vector<32x256xf32> -> vector<32x256xf32>
    %665 = arith.addf %660, %664 : vector<32x256xf32>
    %c112_584 = arith.constant 112 : index
    %c0_585 = arith.constant 0 : index
    %666 = vector.load %arg13[%c112_584, %c0_585] : memref<224x128xbf16, #tpu.memory_space<vmem>>, vector<32x128xbf16>
    %c3_586 = arith.constant 3 : index
    %c0_587 = arith.constant 0 : index
    %c0_588 = arith.constant 0 : index
    %667 = vector.load %arg4[%c3_586, %c0_587, %c0_588] : memref<5x128x256xbf16, #tpu.memory_space<vmem>>, vector<1x128x256xbf16>
    %668 = vector.shape_cast %667 : vector<1x128x256xbf16> to vector<128x256xbf16>
    %cst_589 = arith.constant dense<0.000000e+00> : vector<32x256xf32>
    %669 = tpu.matmul %666, %668, %cst_589 {dimension_numbers = #tpu.dot_dimension_numbers<[1], [0], [0], [1], [0, 0, 1, 1], [], []>} : vector<32x128xbf16>, vector<128x256xbf16>, vector<32x256xf32> -> vector<32x256xf32>
    %670 = arith.addf %665, %669 : vector<32x256xf32>
    %c128_590 = arith.constant 128 : index
    %c0_591 = arith.constant 0 : index
    %671 = vector.load %arg13[%c128_590, %c0_591] : memref<224x128xbf16, #tpu.memory_space<vmem>>, vector<32x128xbf16>
    %c4_592 = arith.constant 4 : index
    %c0_593 = arith.constant 0 : index
    %c0_594 = arith.constant 0 : index
    %672 = vector.load %arg4[%c4_592, %c0_593, %c0_594] : memref<5x128x256xbf16, #tpu.memory_space<vmem>>, vector<1x128x256xbf16>
    %673 = vector.shape_cast %672 : vector<1x128x256xbf16> to vector<128x256xbf16>
    %cst_595 = arith.constant dense<0.000000e+00> : vector<32x256xf32>
    %674 = tpu.matmul %671, %673, %cst_595 {dimension_numbers = #tpu.dot_dimension_numbers<[1], [0], [0], [1], [0, 0, 1, 1], [], []>} : vector<32x128xbf16>, vector<128x256xbf16>, vector<32x256xf32> -> vector<32x256xf32>
    %675 = arith.addf %670, %674 : vector<32x256xf32>
    %676 = vector.extract_strided_slice %675 {offsets = [0, 0], sizes = [16, 128], strides = [1, 1]} : vector<32x256xf32> to vector<16x128xf32>
    %677 = vector.extract_strided_slice %675 {offsets = [0, 128], sizes = [16, 128], strides = [1, 1]} : vector<32x256xf32> to vector<16x128xf32>
    %678 = arith.maximumf %676, %677 : vector<16x128xf32>
    %679 = vector.extract_strided_slice %675 {offsets = [16, 0], sizes = [16, 128], strides = [1, 1]} : vector<32x256xf32> to vector<16x128xf32>
    %680 = vector.extract_strided_slice %675 {offsets = [16, 128], sizes = [16, 128], strides = [1, 1]} : vector<32x256xf32> to vector<16x128xf32>
    %681 = arith.maximumf %679, %680 : vector<16x128xf32>
    %682 = arith.maximumf %678, %681 : vector<16x128xf32>
    %683 = arith.addf %682, %5 : vector<16x128xf32>
    %cst_596 = arith.constant 0.000000e+00 : f32
    %684 = vector.broadcast %cst_596 : f32 to vector<16x128xf32>
    %685 = arith.maximumf %683, %684 : vector<16x128xf32>
    %686 = arith.truncf %685 : vector<16x128xf32> to vector<16x128xbf16>
    %c0_597 = arith.constant 0 : index
    %c256_598 = arith.constant 256 : index
    %687 = vector.load %arg14[%c0_597, %c256_598] : memref<16x640xbf16, #tpu.memory_space<vmem>>, vector<16x128xbf16>
    tpu.vector_store %arg14[%c0_597, %c256_598], %686 {strides = array<i32>} : memref<16x640xbf16, #tpu.memory_space<vmem>>, vector<16x128xbf16>,
    %c96_599 = arith.constant 96 : index
    %c0_600 = arith.constant 0 : index
    %688 = vector.load %arg13[%c96_599, %c0_600] : memref<224x128xbf16, #tpu.memory_space<vmem>>, vector<32x128xbf16>
    %c0_601 = arith.constant 0 : index
    %c0_602 = arith.constant 0 : index
    %c0_603 = arith.constant 0 : index
    %689 = vector.load %arg4[%c0_601, %c0_602, %c0_603] : memref<5x128x256xbf16, #tpu.memory_space<vmem>>, vector<1x128x256xbf16>
    %690 = vector.shape_cast %689 : vector<1x128x256xbf16> to vector<128x256xbf16>
    %cst_604 = arith.constant dense<0.000000e+00> : vector<32x256xf32>
    %691 = tpu.matmul %688, %690, %cst_604 {dimension_numbers = #tpu.dot_dimension_numbers<[1], [0], [0], [1], [0, 0, 1, 1], [], []>} : vector<32x128xbf16>, vector<128x256xbf16>, vector<32x256xf32> -> vector<32x256xf32>
    %c112_605 = arith.constant 112 : index
    %c0_606 = arith.constant 0 : index
    %692 = vector.load %arg13[%c112_605, %c0_606] : memref<224x128xbf16, #tpu.memory_space<vmem>>, vector<32x128xbf16>
    %c1_607 = arith.constant 1 : index
    %c0_608 = arith.constant 0 : index
    %c0_609 = arith.constant 0 : index
    %693 = vector.load %arg4[%c1_607, %c0_608, %c0_609] : memref<5x128x256xbf16, #tpu.memory_space<vmem>>, vector<1x128x256xbf16>
    %694 = vector.shape_cast %693 : vector<1x128x256xbf16> to vector<128x256xbf16>
    %cst_610 = arith.constant dense<0.000000e+00> : vector<32x256xf32>
    %695 = tpu.matmul %692, %694, %cst_610 {dimension_numbers = #tpu.dot_dimension_numbers<[1], [0], [0], [1], [0, 0, 1, 1], [], []>} : vector<32x128xbf16>, vector<128x256xbf16>, vector<32x256xf32> -> vector<32x256xf32>
    %696 = arith.addf %691, %695 : vector<32x256xf32>
    %c128_611 = arith.constant 128 : index
    %c0_612 = arith.constant 0 : index
    %697 = vector.load %arg13[%c128_611, %c0_612] : memref<224x128xbf16, #tpu.memory_space<vmem>>, vector<32x128xbf16>
    %c2_613 = arith.constant 2 : index
    %c0_614 = arith.constant 0 : index
    %c0_615 = arith.constant 0 : index
    %698 = vector.load %arg4[%c2_613, %c0_614, %c0_615] : memref<5x128x256xbf16, #tpu.memory_space<vmem>>, vector<1x128x256xbf16>
    %699 = vector.shape_cast %698 : vector<1x128x256xbf16> to vector<128x256xbf16>
    %cst_616 = arith.constant dense<0.000000e+00> : vector<32x256xf32>
    %700 = tpu.matmul %697, %699, %cst_616 {dimension_numbers = #tpu.dot_dimension_numbers<[1], [0], [0], [1], [0, 0, 1, 1], [], []>} : vector<32x128xbf16>, vector<128x256xbf16>, vector<32x256xf32> -> vector<32x256xf32>
    %701 = arith.addf %696, %700 : vector<32x256xf32>
    %c144_617 = arith.constant 144 : index
    %c0_618 = arith.constant 0 : index
    %702 = vector.load %arg13[%c144_617, %c0_618] : memref<224x128xbf16, #tpu.memory_space<vmem>>, vector<32x128xbf16>
    %c3_619 = arith.constant 3 : index
    %c0_620 = arith.constant 0 : index
    %c0_621 = arith.constant 0 : index
    %703 = vector.load %arg4[%c3_619, %c0_620, %c0_621] : memref<5x128x256xbf16, #tpu.memory_space<vmem>>, vector<1x128x256xbf16>
    %704 = vector.shape_cast %703 : vector<1x128x256xbf16> to vector<128x256xbf16>
    %cst_622 = arith.constant dense<0.000000e+00> : vector<32x256xf32>
    %705 = tpu.matmul %702, %704, %cst_622 {dimension_numbers = #tpu.dot_dimension_numbers<[1], [0], [0], [1], [0, 0, 1, 1], [], []>} : vector<32x128xbf16>, vector<128x256xbf16>, vector<32x256xf32> -> vector<32x256xf32>
    %706 = arith.addf %701, %705 : vector<32x256xf32>
    %c160_623 = arith.constant 160 : index
    %c0_624 = arith.constant 0 : index
    %707 = vector.load %arg13[%c160_623, %c0_624] : memref<224x128xbf16, #tpu.memory_space<vmem>>, vector<32x128xbf16>
    %c4_625 = arith.constant 4 : index
    %c0_626 = arith.constant 0 : index
    %c0_627 = arith.constant 0 : index
    %708 = vector.load %arg4[%c4_625, %c0_626, %c0_627] : memref<5x128x256xbf16, #tpu.memory_space<vmem>>, vector<1x128x256xbf16>
    %709 = vector.shape_cast %708 : vector<1x128x256xbf16> to vector<128x256xbf16>
    %cst_628 = arith.constant dense<0.000000e+00> : vector<32x256xf32>
    %710 = tpu.matmul %707, %709, %cst_628 {dimension_numbers = #tpu.dot_dimension_numbers<[1], [0], [0], [1], [0, 0, 1, 1], [], []>} : vector<32x128xbf16>, vector<128x256xbf16>, vector<32x256xf32> -> vector<32x256xf32>
    %711 = arith.addf %706, %710 : vector<32x256xf32>
    %712 = vector.extract_strided_slice %711 {offsets = [0, 0], sizes = [16, 128], strides = [1, 1]} : vector<32x256xf32> to vector<16x128xf32>
    %713 = vector.extract_strided_slice %711 {offsets = [0, 128], sizes = [16, 128], strides = [1, 1]} : vector<32x256xf32> to vector<16x128xf32>
    %714 = arith.maximumf %712, %713 : vector<16x128xf32>
    %715 = vector.extract_strided_slice %711 {offsets = [16, 0], sizes = [16, 128], strides = [1, 1]} : vector<32x256xf32> to vector<16x128xf32>
    %716 = vector.extract_strided_slice %711 {offsets = [16, 128], sizes = [16, 128], strides = [1, 1]} : vector<32x256xf32> to vector<16x128xf32>
    %717 = arith.maximumf %715, %716 : vector<16x128xf32>
    %718 = arith.maximumf %714, %717 : vector<16x128xf32>
    %719 = arith.addf %718, %5 : vector<16x128xf32>
    %cst_629 = arith.constant 0.000000e+00 : f32
    %720 = vector.broadcast %cst_629 : f32 to vector<16x128xf32>
    %721 = arith.maximumf %719, %720 : vector<16x128xf32>
    %722 = arith.truncf %721 : vector<16x128xf32> to vector<16x128xbf16>
    %c0_630 = arith.constant 0 : index
    %c384_631 = arith.constant 384 : index
    %723 = vector.load %arg14[%c0_630, %c384_631] : memref<16x640xbf16, #tpu.memory_space<vmem>>, vector<16x128xbf16>
    tpu.vector_store %arg14[%c0_630, %c384_631], %722 {strides = array<i32>} : memref<16x640xbf16, #tpu.memory_space<vmem>>, vector<16x128xbf16>,
    %c128_632 = arith.constant 128 : index
    %c0_633 = arith.constant 0 : index
    %724 = vector.load %arg13[%c128_632, %c0_633] : memref<224x128xbf16, #tpu.memory_space<vmem>>, vector<32x128xbf16>
    %c0_634 = arith.constant 0 : index
    %c0_635 = arith.constant 0 : index
    %c0_636 = arith.constant 0 : index
    %725 = vector.load %arg4[%c0_634, %c0_635, %c0_636] : memref<5x128x256xbf16, #tpu.memory_space<vmem>>, vector<1x128x256xbf16>
    %726 = vector.shape_cast %725 : vector<1x128x256xbf16> to vector<128x256xbf16>
    %cst_637 = arith.constant dense<0.000000e+00> : vector<32x256xf32>
    %727 = tpu.matmul %724, %726, %cst_637 {dimension_numbers = #tpu.dot_dimension_numbers<[1], [0], [0], [1], [0, 0, 1, 1], [], []>} : vector<32x128xbf16>, vector<128x256xbf16>, vector<32x256xf32> -> vector<32x256xf32>
    %c144_638 = arith.constant 144 : index
    %c0_639 = arith.constant 0 : index
    %728 = vector.load %arg13[%c144_638, %c0_639] : memref<224x128xbf16, #tpu.memory_space<vmem>>, vector<32x128xbf16>
    %c1_640 = arith.constant 1 : index
    %c0_641 = arith.constant 0 : index
    %c0_642 = arith.constant 0 : index
    %729 = vector.load %arg4[%c1_640, %c0_641, %c0_642] : memref<5x128x256xbf16, #tpu.memory_space<vmem>>, vector<1x128x256xbf16>
    %730 = vector.shape_cast %729 : vector<1x128x256xbf16> to vector<128x256xbf16>
    %cst_643 = arith.constant dense<0.000000e+00> : vector<32x256xf32>
    %731 = tpu.matmul %728, %730, %cst_643 {dimension_numbers = #tpu.dot_dimension_numbers<[1], [0], [0], [1], [0, 0, 1, 1], [], []>} : vector<32x128xbf16>, vector<128x256xbf16>, vector<32x256xf32> -> vector<32x256xf32>
    %732 = arith.addf %727, %731 : vector<32x256xf32>
    %c160_644 = arith.constant 160 : index
    %c0_645 = arith.constant 0 : index
    %733 = vector.load %arg13[%c160_644, %c0_645] : memref<224x128xbf16, #tpu.memory_space<vmem>>, vector<32x128xbf16>
    %c2_646 = arith.constant 2 : index
    %c0_647 = arith.constant 0 : index
    %c0_648 = arith.constant 0 : index
    %734 = vector.load %arg4[%c2_646, %c0_647, %c0_648] : memref<5x128x256xbf16, #tpu.memory_space<vmem>>, vector<1x128x256xbf16>
    %735 = vector.shape_cast %734 : vector<1x128x256xbf16> to vector<128x256xbf16>
    %cst_649 = arith.constant dense<0.000000e+00> : vector<32x256xf32>
    %736 = tpu.matmul %733, %735, %cst_649 {dimension_numbers = #tpu.dot_dimension_numbers<[1], [0], [0], [1], [0, 0, 1, 1], [], []>} : vector<32x128xbf16>, vector<128x256xbf16>, vector<32x256xf32> -> vector<32x256xf32>
    %737 = arith.addf %732, %736 : vector<32x256xf32>
    %c176_650 = arith.constant 176 : index
    %c0_651 = arith.constant 0 : index
    %738 = vector.load %arg13[%c176_650, %c0_651] : memref<224x128xbf16, #tpu.memory_space<vmem>>, vector<32x128xbf16>
    %c3_652 = arith.constant 3 : index
    %c0_653 = arith.constant 0 : index
    %c0_654 = arith.constant 0 : index
    %739 = vector.load %arg4[%c3_652, %c0_653, %c0_654] : memref<5x128x256xbf16, #tpu.memory_space<vmem>>, vector<1x128x256xbf16>
    %740 = vector.shape_cast %739 : vector<1x128x256xbf16> to vector<128x256xbf16>
    %cst_655 = arith.constant dense<0.000000e+00> : vector<32x256xf32>
    %741 = tpu.matmul %738, %740, %cst_655 {dimension_numbers = #tpu.dot_dimension_numbers<[1], [0], [0], [1], [0, 0, 1, 1], [], []>} : vector<32x128xbf16>, vector<128x256xbf16>, vector<32x256xf32> -> vector<32x256xf32>
    %742 = arith.addf %737, %741 : vector<32x256xf32>
    %c192_656 = arith.constant 192 : index
    %c0_657 = arith.constant 0 : index
    %743 = vector.load %arg13[%c192_656, %c0_657] : memref<224x128xbf16, #tpu.memory_space<vmem>>, vector<32x128xbf16>
    %c4_658 = arith.constant 4 : index
    %c0_659 = arith.constant 0 : index
    %c0_660 = arith.constant 0 : index
    %744 = vector.load %arg4[%c4_658, %c0_659, %c0_660] : memref<5x128x256xbf16, #tpu.memory_space<vmem>>, vector<1x128x256xbf16>
    %745 = vector.shape_cast %744 : vector<1x128x256xbf16> to vector<128x256xbf16>
    %cst_661 = arith.constant dense<0.000000e+00> : vector<32x256xf32>
    %746 = tpu.matmul %743, %745, %cst_661 {dimension_numbers = #tpu.dot_dimension_numbers<[1], [0], [0], [1], [0, 0, 1, 1], [], []>} : vector<32x128xbf16>, vector<128x256xbf16>, vector<32x256xf32> -> vector<32x256xf32>
    %747 = arith.addf %742, %746 : vector<32x256xf32>
    %748 = vector.extract_strided_slice %747 {offsets = [0, 0], sizes = [16, 128], strides = [1, 1]} : vector<32x256xf32> to vector<16x128xf32>
    %749 = vector.extract_strided_slice %747 {offsets = [0, 128], sizes = [16, 128], strides = [1, 1]} : vector<32x256xf32> to vector<16x128xf32>
    %750 = arith.maximumf %748, %749 : vector<16x128xf32>
    %751 = vector.extract_strided_slice %747 {offsets = [16, 0], sizes = [16, 128], strides = [1, 1]} : vector<32x256xf32> to vector<16x128xf32>
    %752 = vector.extract_strided_slice %747 {offsets = [16, 128], sizes = [16, 128], strides = [1, 1]} : vector<32x256xf32> to vector<16x128xf32>
    %753 = arith.maximumf %751, %752 : vector<16x128xf32>
    %754 = arith.maximumf %750, %753 : vector<16x128xf32>
    %755 = arith.addf %754, %5 : vector<16x128xf32>
    %cst_662 = arith.constant 0.000000e+00 : f32
    %756 = vector.broadcast %cst_662 : f32 to vector<16x128xf32>
    %757 = arith.maximumf %755, %756 : vector<16x128xf32>
    %758 = arith.truncf %757 : vector<16x128xf32> to vector<16x128xbf16>
    %c0_663 = arith.constant 0 : index
    %c512 = arith.constant 512 : index
    %759 = vector.load %arg14[%c0_663, %c512] : memref<16x640xbf16, #tpu.memory_space<vmem>>, vector<16x128xbf16>
    tpu.vector_store %arg14[%c0_663, %c512], %758 {strides = array<i32>} : memref<16x640xbf16, #tpu.memory_space<vmem>>, vector<16x128xbf16>,
    %c0_664 = arith.constant 0 : index
    %c0_665 = arith.constant 0 : index
    %760 = vector.load %arg14[%c0_664, %c0_665] : memref<16x640xbf16, #tpu.memory_space<vmem>>, vector<16x640xbf16>
    %c0_666 = arith.constant 0 : index
    %c0_667 = arith.constant 0 : index
    %761 = vector.load %arg6[%c0_666, %c0_667] : memref<640x128xbf16, #tpu.memory_space<vmem>>, vector<640x128xbf16>
    %cst_668 = arith.constant dense<0.000000e+00> : vector<16x128xf32>
    %762 = tpu.matmul %760, %761, %cst_668 {dimension_numbers = #tpu.dot_dimension_numbers<[1], [0], [0], [1], [0, 0, 1, 1], [], []>} : vector<16x640xbf16>, vector<640x128xbf16>, vector<16x128xf32> -> vector<16x128xf32>
    %c0_669 = arith.constant 0 : index
    %c0_670 = arith.constant 0 : index
    %763 = vector.load %arg7[%c0_669, %c0_670] : memref<1x128xf32, #tpu.memory_space<vmem>>, vector<1x128xf32>
    %764 = vector.broadcast %763 : vector<1x128xf32> to vector<16x128xf32>
    %765 = arith.addf %762, %764 : vector<16x128xf32>
    %cst_671 = arith.constant 0.000000e+00 : f32
    %766 = vector.broadcast %cst_671 : f32 to vector<16x128xf32>
    %767 = arith.maximumf %765, %766 : vector<16x128xf32>
    %768 = arith.truncf %767 : vector<16x128xf32> to vector<16x128xbf16>
    %c0_672 = arith.constant 0 : index
    %c0_673 = arith.constant 0 : index
    %769 = vector.load %arg8[%c0_672, %c0_673] : memref<128x128xbf16, #tpu.memory_space<vmem>>, vector<128x128xbf16>
    %cst_674 = arith.constant dense<0.000000e+00> : vector<16x128xf32>
    %770 = tpu.matmul %768, %769, %cst_674 {dimension_numbers = #tpu.dot_dimension_numbers<[1], [0], [0], [1], [0, 0, 1, 1], [], []>} : vector<16x128xbf16>, vector<128x128xbf16>, vector<16x128xf32> -> vector<16x128xf32>
    %c0_675 = arith.constant 0 : index
    %c0_676 = arith.constant 0 : index
    %771 = vector.load %arg9[%c0_675, %c0_676] : memref<1x128xf32, #tpu.memory_space<vmem>>, vector<1x128xf32>
    %772 = vector.broadcast %771 : vector<1x128xf32> to vector<16x128xf32>
    %773 = arith.addf %770, %772 : vector<16x128xf32>
    %cst_677 = arith.constant 0.000000e+00 : f32
    %774 = vector.broadcast %cst_677 : f32 to vector<16x128xf32>
    %775 = arith.maximumf %773, %774 : vector<16x128xf32>
    %776 = arith.truncf %775 : vector<16x128xf32> to vector<16x128xbf16>
    %c0_678 = arith.constant 0 : index
    %c0_679 = arith.constant 0 : index
    %777 = vector.load %arg10[%c0_678, %c0_679] : memref<128x128xbf16, #tpu.memory_space<vmem>>, vector<128x128xbf16>
    %cst_680 = arith.constant dense<0.000000e+00> : vector<16x128xf32>
    %778 = tpu.matmul %776, %777, %cst_680 {dimension_numbers = #tpu.dot_dimension_numbers<[1], [0], [0], [1], [0, 0, 1, 1], [], []>} : vector<16x128xbf16>, vector<128x128xbf16>, vector<16x128xf32> -> vector<16x128xf32>
    %c0_681 = arith.constant 0 : index
    %c0_682 = arith.constant 0 : index
    %779 = vector.load %arg11[%c0_681, %c0_682] : memref<1x128xf32, #tpu.memory_space<vmem>>, vector<1x128xf32>
    %780 = vector.broadcast %779 : vector<1x128xf32> to vector<16x128xf32>
    %781 = arith.addf %778, %780 : vector<16x128xf32>
    %c0_683 = arith.constant 0 : index
    %c0_684 = arith.constant 0 : index
    %c0_685 = arith.constant 0 : index
    %782 = vector.load %arg12[%c0_683, %c0_684, %c0_685] : memref<1x16x128xf32, #tpu.memory_space<vmem>>, vector<1x16x128xf32>
    %783 = vector.shape_cast %782 : vector<1x16x128xf32> to vector<16x128xf32>
    %784 = vector.shape_cast %781 : vector<16x128xf32> to vector<1x16x128xf32>
    tpu.vector_store %arg12[%c0_683, %c0_684, %c0_685], %784 {strides = array<i32>} : memref<1x16x128xf32, #tpu.memory_space<vmem>>, vector<1x16x128xf32>,
    return
  }
  func.func @transform_0(%arg0: i32) -> (i32, i32, i32) {
    %c0_i32 = arith.constant 0 : i32
    %c0_i32_0 = arith.constant 0 : i32
    %c0_i32_1 = arith.constant 0 : i32
    return %arg0, %c0_i32, %c0_i32_0 : i32, i32, i32
  }
  func.func @transform_1(%arg0: i32) -> (i32, i32, i32) {
    %c0_i32 = arith.constant 0 : i32
    %c0_i32_0 = arith.constant 0 : i32
    %c0_i32_1 = arith.constant 0 : i32
    %c0_i32_2 = arith.constant 0 : i32
    return %c0_i32, %c0_i32_0, %c0_i32_1 : i32, i32, i32
  }
  func.func @transform_2(%arg0: i32) -> (i32, i32) {
    %c0_i32 = arith.constant 0 : i32
    %c0_i32_0 = arith.constant 0 : i32
    %c0_i32_1 = arith.constant 0 : i32
    return %c0_i32, %c0_i32_0 : i32, i32
  }
  func.func @transform_3(%arg0: i32) -> (i32, i32, i32) {
    %c0_i32 = arith.constant 0 : i32
    %c0_i32_0 = arith.constant 0 : i32
    %c0_i32_1 = arith.constant 0 : i32
    %c0_i32_2 = arith.constant 0 : i32
    return %c0_i32, %c0_i32_0, %c0_i32_1 : i32, i32, i32
  }
  func.func @transform_4(%arg0: i32) -> (i32, i32) {
    %c0_i32 = arith.constant 0 : i32
    %c0_i32_0 = arith.constant 0 : i32
    %c0_i32_1 = arith.constant 0 : i32
    return %c0_i32, %c0_i32_0 : i32, i32
  }
  func.func @transform_5(%arg0: i32) -> (i32, i32) {
    %c0_i32 = arith.constant 0 : i32
    %c0_i32_0 = arith.constant 0 : i32
    %c0_i32_1 = arith.constant 0 : i32
    return %c0_i32, %c0_i32_0 : i32, i32
  }
  func.func @transform_6(%arg0: i32) -> (i32, i32) {
    %c0_i32 = arith.constant 0 : i32
    %c0_i32_0 = arith.constant 0 : i32
    %c0_i32_1 = arith.constant 0 : i32
    return %c0_i32, %c0_i32_0 : i32, i32
  }
  func.func @transform_7(%arg0: i32) -> (i32, i32) {
    %c0_i32 = arith.constant 0 : i32
    %c0_i32_0 = arith.constant 0 : i32
    %c0_i32_1 = arith.constant 0 : i32
    return %c0_i32, %c0_i32_0 : i32, i32
  }
  func.func @transform_8(%arg0: i32) -> (i32, i32) {
    %c0_i32 = arith.constant 0 : i32
    %c0_i32_0 = arith.constant 0 : i32
    %c0_i32_1 = arith.constant 0 : i32
    return %c0_i32, %c0_i32_0 : i32, i32
  }
  func.func @transform_9(%arg0: i32) -> (i32, i32) {
    %c0_i32 = arith.constant 0 : i32
    %c0_i32_0 = arith.constant 0 : i32
    %c0_i32_1 = arith.constant 0 : i32
    return %c0_i32, %c0_i32_0 : i32, i32
  }
  func.func @transform_10(%arg0: i32) -> (i32, i32) {
    %c0_i32 = arith.constant 0 : i32
    %c0_i32_0 = arith.constant 0 : i32
    %c0_i32_1 = arith.constant 0 : i32
    return %c0_i32, %c0_i32_0 : i32, i32
  }
  func.func @transform_11(%arg0: i32) -> (i32, i32, i32) {
    %c0_i32 = arith.constant 0 : i32
    %c0_i32_0 = arith.constant 0 : i32
    %c0_i32_1 = arith.constant 0 : i32
    return %arg0, %c0_i32, %c0_i32_0 : i32, i32, i32
  }
}

</mosaic_0001>

<bundles_post_ra>
// kernel: cnn_cifar_forward.1
= control target key start
LH: loop header
LB: loop body
LE: loop exit
PB: predicated region body
PF: predicated region fallthrough
CT: control target
= control target key end

     0   :  { %v25174_v1 = vmov 0   ;;  %vm21600_vm0 = vmmov 0   ;;  %s25161_s1 = inlined_call_operand.vmem [shape: bf16[5,128,256], index: 1, kind: input, shape index: {}]   ;;  %s25162_s0 = inlined_call_operand.vmem [shape: bf16[1,512,128], index: 0, kind: input, shape index: {}]   ;;  %s25163_s2 = inlined_call_operand.vmem [shape: f32[1,128], index: 2, kind: input, shape index: {}]   ;;  %s25164_s3 = inlined_call_operand.vmem [shape: bf16[5,128,256], index: 3, kind: input, shape index: {}]   ;;  %s25165_s5 = inlined_call_operand.vmem [shape: bf16[640,128], index: 5, kind: input, shape index: {}]   ;;  %s25166_s4 = inlined_call_operand.vmem [shape: f32[1,128], index: 4, kind: input, shape index: {}]   ;;  %s25167_s7 = inlined_call_operand.vmem [shape: bf16[128,128], index: 7, kind: input, shape index: {}]   ;;  %s25168_s6 = inlined_call_operand.vmem [shape: f32[1,128], index: 6, kind: input, shape index: {}]   ;;  %s25169_s9 = inlined_call_operand.vmem [shape: bf16[128,128], index: 9, kind: input, shape index: {}]   ;;  %s25170_s8 = inlined_call_operand.vmem [shape: f32[1,128], index: 8, kind: input, shape index: {}]   ;;  %s25171_s10 = inlined_call_operand.vmem [shape: f32[1,128], index: 10, kind: input, shape index: {}]   ;;  %s25172_s11 = inlined_call_operand.vmem [shape: f32[1,16,128], index: 11, kind: output, shape index: {}]  }
   0x1   :  { %v20309_v0 = vld [vmem:[%s25161_s1 + $0x84] ss:$8 sps:$4 sm:$0xff]   ;;  %216 = vmatprep.mubr.bf16.mxu0 %v25174_v1  ;;  %1072 = vmatprep.mubr.bf16.mxu1 %v25174_v1  ;;  %v20311_v2 = vld [vmem:[%s25161_s1 + $0x80] ss:$8 sps:$4 sm:$0xff]   ;;  %v20312_v3 = vld [vmem:[%s25161_s1 + $0x94] ss:$8 sps:$4 sm:$0xff]  }
   0x2   :  { %184 = vmatprep.subr.bf16.mxu0 %v20309_v0  ;;  %1040 = vmatprep.subr.bf16.mxu1 %v20309_v0  ;;  %v20314_v4 = vld [vmem:[%s25161_s1 + $0x90] ss:$8 sps:$4 sm:$0xff]   ;;  %v20315_v5 = vld [vmem:[%s25161_s1 + $0xa4] ss:$8 sps:$4 sm:$0xff]   ;;  %v20317_v6 = vld [vmem:[%s25161_s1 + $0xa0] ss:$8 sps:$4 sm:$0xff]  }
   0x3   :  { %185 = vmatpush1.bf16.msra.mxu0 %v20311_v2  ;;  %1041 = vmatpush1.bf16.msra.mxu1 %v20311_v2  ;;  %v20318_v7 = vld [vmem:[%s25161_s1 + $0xb4] ss:$8 sps:$4 sm:$0xff]   ;;  %v20320_v8 = vld [vmem:[%s25161_s1 + $0xb0] ss:$8 sps:$4 sm:$0xff]   ;;  %v20321_v9 = vld [vmem:[%s25161_s1 + $0xc4] ss:$8 sps:$4 sm:$0xff]  }
   0x4   :  { %186 = vmatprep.subr.bf16.mxu0 %v20312_v3  ;;  %1042 = vmatprep.subr.bf16.mxu1 %v20312_v3  ;;  %v20323_v10 = vld [vmem:[%s25161_s1 + $0xc0] ss:$8 sps:$4 sm:$0xff]   ;;  %v20324_v11 = vld [vmem:[%s25161_s1 + $0xd4] ss:$8 sps:$4 sm:$0xff]   ;;  %v20326_v12 = vld [vmem:[%s25161_s1 + $0xd0] ss:$8 sps:$4 sm:$0xff]  }
   0x5   :  { %v20327_v13 = vld [vmem:[%s25161_s1 + $0xe4] ss:$8 sps:$4 sm:$0xff]   ;;  %v20329_v14 = vld [vmem:[%s25161_s1 + $0xe0] ss:$8 sps:$4 sm:$0xff]   ;;  %v20330_v15 = vld [vmem:[%s25161_s1 + $0xf4] ss:$8 sps:$4 sm:$0xff]  }
   0x6   :  { %v20332_v16 = vld [vmem:[%s25161_s1 + $0xf0] ss:$8 sps:$4 sm:$0xff]   ;;  %v20335_v17 = vld [vmem:[%s25161_s1 + $0x4] ss:$8 sps:$4 sm:$0xff]   ;;  %v20333_v20 = vld [vmem:[%s25161_s1] ss:$8 sps:$4 sm:$0xff]  }
   0x7   :  { %187 = vmatpush1.bf16.msra.mxu0 %v20314_v4  ;;  %1043 = vmatpush1.bf16.msra.mxu1 %v20314_v4  ;;  %v21717_v18 = vld [vmem:[%s25162_s0 + $0x8] sm:$0xff]   ;;  %v21722_v19 = vld [vmem:[%s25162_s0 + $0x18] sm:$0xff]   ;;  %v20356_v24 = vld [vmem:[%s25162_s0 + $0x10] sm:$0xff]  }
   0x8   :  { %188 = vmatprep.subr.bf16.mxu0 %v20315_v5  ;;  %1044 = vmatprep.subr.bf16.mxu1 %v20315_v5  ;;  %v20340_v21 = vld [vmem:[%s25161_s1 + $0x14] ss:$8 sps:$4 sm:$0xff]   ;;  %v20338_v22 = vld [vmem:[%s25161_s1 + $0x10] ss:$8 sps:$4 sm:$0xff]   ;;  %v20343_v23 = vld [vmem:[%s25161_s1 + $0x24] ss:$8 sps:$4 sm:$0xff]  }
   0x9   :  { %v20357_v25 = vld [vmem:[%s25162_s0 + $0x20] sm:$0xff]   ;;  %v20346_v27 = vld [vmem:[%s25161_s1 + $0x34] ss:$8 sps:$4 sm:$0xff]   ;;  %v20344_v28 = vld [vmem:[%s25161_s1 + $0x30] ss:$8 sps:$4 sm:$0xff]  }
   0xa   :  { %v20341_v26 = vld [vmem:[%s25161_s1 + $0x20] ss:$8 sps:$4 sm:$0xff]   ;;  %v20349_v29 = vld [vmem:[%s25161_s1 + $0x44] ss:$8 sps:$4 sm:$0xff]   ;;  %v20352_v31 = vld [vmem:[%s25161_s1 + $0x54] ss:$8 sps:$4 sm:$0xff]  }
   0xb   :  { %189 = vmatpush1.bf16.msra.mxu0 %v20317_v6  ;;  %1045 = vmatpush1.bf16.msra.mxu1 %v20317_v6  ;;  %v20347_v30 = vld [vmem:[%s25161_s1 + $0x40] ss:$8 sps:$4 sm:$0xff]   ;;  %v20350_v32 = vld [vmem:[%s25161_s1 + $0x50] ss:$8 sps:$4 sm:$0xff]   ;;  %v20355_v33 = vld [vmem:[%s25161_s1 + $0x64] ss:$8 sps:$4 sm:$0xff]  }
   0xc   :  { %190 = vmatprep.subr.bf16.mxu0 %v20318_v7  ;;  %1046 = vmatprep.subr.bf16.mxu1 %v20318_v7  ;;  %v20353_v34 = vld [vmem:[%s25161_s1 + $0x60] ss:$8 sps:$4 sm:$0xff]   ;;  %v20360_v35 = vld [vmem:[%s25161_s1 + $0x74] ss:$8 sps:$4 sm:$0xff]   ;;  %v20358_v36 = vld [vmem:[%s25161_s1 + $0x70] ss:$8 sps:$4 sm:$0xff]  }
   0xd   :  { %v20363_v37 = vld [vmem:[%s25161_s1 + $0x104] ss:$8 sps:$4 sm:$0xff]   ;;  %v20365_v39 = vld [vmem:[%s25162_s0 + $0x10] sm:$0xff]   ;;  %v20361_v40 = vld [vmem:[%s25161_s1 + $0x100] ss:$8 sps:$4 sm:$0xff]  }
   0xe   :  { %v20364_v38 = vld [vmem:[%s25162_s0] sm:$0xff]   ;;  %v20368_v41 = vld [vmem:[%s25161_s1 + $0x114] ss:$8 sps:$4 sm:$0xff]   ;;  %v20366_v42 = vld [vmem:[%s25161_s1 + $0x110] ss:$8 sps:$4 sm:$0xff]  }
   0xf   :  { %191 = vmatpush1.bf16.msra.mxu0 %v20320_v8  ;;  %1047 = vmatpush1.bf16.msra.mxu1 %v20320_v8  ;;  %v20371_v43 = vld [vmem:[%s25161_s1 + $0x124] ss:$8 sps:$4 sm:$0xff]   ;;  %v20369_v44 = vld [vmem:[%s25161_s1 + $0x120] ss:$8 sps:$4 sm:$0xff]   ;;  %v20374_v45 = vld [vmem:[%s25161_s1 + $0x134] ss:$8 sps:$4 sm:$0xff]  }
  0x10   :  { %192 = vmatprep.subr.bf16.mxu0 %v20321_v9  ;;  %1048 = vmatprep.subr.bf16.mxu1 %v20321_v9  ;;  %v20372_v46 = vld [vmem:[%s25161_s1 + $0x130] ss:$8 sps:$4 sm:$0xff]   ;;  %v20377_v47 = vld [vmem:[%s25161_s1 + $0x144] ss:$8 sps:$4 sm:$0xff]   ;;  %v20375_v48 = vld [vmem:[%s25161_s1 + $0x140] ss:$8 sps:$4 sm:$0xff]  }
  0x11   :  { %v20380_v49 = vld [vmem:[%s25161_s1 + $0x154] ss:$8 sps:$4 sm:$0xff]   ;;  %v20378_v50 = vld [vmem:[%s25161_s1 + $0x150] ss:$8 sps:$4 sm:$0xff]   ;;  %v20383_v51 = vld [vmem:[%s25161_s1 + $0x164] ss:$8 sps:$4 sm:$0xff]  }
  0x12   :  { %v20381_v52 = vld [vmem:[%s25161_s1 + $0x160] ss:$8 sps:$4 sm:$0xff]   ;;  %v20386_v53 = vld [vmem:[%s25161_s1 + $0x174] ss:$8 sps:$4 sm:$0xff]   ;;  %v20384_v54 = vld [vmem:[%s25161_s1 + $0x170] ss:$8 sps:$4 sm:$0xff]  }
  0x13   :  { %193 = vmatpush1.bf16.msra.mxu0 %v20323_v10  ;;  %1049 = vmatpush1.bf16.msra.mxu1 %v20323_v10  ;;  %v20389_v55 = vld [vmem:[%s25161_s1 + $0x184] ss:$8 sps:$4 sm:$0xff]   ;;  %v20390_v56 = vld [vmem:[%s25162_s0 + $0x10] sm:$0xff]   ;;  %v20387_v58 = vld [vmem:[%s25161_s1 + $0x180] ss:$8 sps:$4 sm:$0xff]  }
  0x14   :  { %194 = vmatprep.subr.bf16.mxu0 %v20324_v11  ;;  %1050 = vmatprep.subr.bf16.mxu1 %v20324_v11  ;;  %v20391_v57 = vld [vmem:[%s25162_s0 + $0x20] sm:$0xff]   ;;  %v20394_v59 = vld [vmem:[%s25161_s1 + $0x194] ss:$8 sps:$4 sm:$0xff]   ;;  %v20392_v60 = vld [vmem:[%s25161_s1 + $0x190] ss:$8 sps:$4 sm:$0xff]  }
  0x15   :  { %v20397_v61 = vld [vmem:[%s25161_s1 + $0x1a4] ss:$8 sps:$4 sm:$0xff]   ;;  %v20410_v62 = vld [vmem:[%s25162_s0 + $0x18] sm:$0xff]   ;;  %v20395_v0 = vld [vmem:[%s25161_s1 + $0x1a0] ss:$8 sps:$4 sm:$0xff]  }
  0x16   :  { %v20411_v63 = vld [vmem:[%s25162_s0 + $0x28] sm:$0xff]   ;;  %v20400_v2 = vld [vmem:[%s25161_s1 + $0x1b4] ss:$8 sps:$4 sm:$0xff]   ;;  %v20398_v3 = vld [vmem:[%s25161_s1 + $0x1b0] ss:$8 sps:$4 sm:$0xff]  }
  0x17   :  { %195 = vmatpush1.bf16.msra.mxu0 %v20326_v12  ;;  %1051 = vmatpush1.bf16.msra.mxu1 %v20326_v12  ;;  %v20403_v4 = vld [vmem:[%s25161_s1 + $0x1c4] ss:$8 sps:$4 sm:$0xff]   ;;  %v20401_v5 = vld [vmem:[%s25161_s1 + $0x1c0] ss:$8 sps:$4 sm:$0xff]   ;;  %v20406_v6 = vld [vmem:[%s25161_s1 + $0x1d4] ss:$8 sps:$4 sm:$0xff]  }
  0x18   :  { %196 = vmatprep.subr.bf16.mxu0 %v20327_v13  ;;  %1052 = vmatprep.subr.bf16.mxu1 %v20327_v13  ;;  %v20404_v7 = vld [vmem:[%s25161_s1 + $0x1d0] ss:$8 sps:$4 sm:$0xff]   ;;  %v20409_v8 = vld [vmem:[%s25161_s1 + $0x1e4] ss:$8 sps:$4 sm:$0xff]   ;;  %v20407_v9 = vld [vmem:[%s25161_s1 + $0x1e0] ss:$8 sps:$4 sm:$0xff]  }
  0x19   :  { %v20414_v10 = vld [vmem:[%s25161_s1 + $0x1f4] ss:$8 sps:$4 sm:$0xff]   ;;  %v20412_v11 = vld [vmem:[%s25161_s1 + $0x1f0] ss:$8 sps:$4 sm:$0xff]   ;;  %v20417_v12 = vld [vmem:[%s25161_s1 + $0x204] ss:$8 sps:$4 sm:$0xff]  }
  0x1a   :  { %v20418_v13 = vld [vmem:[%s25162_s0 + $0x18] sm:$0xff]  }
  0x1b   :  { %197 = vmatpush1.bf16.msra.mxu0 %v20329_v14  ;;  %1053 = vmatpush1.bf16.msra.mxu1 %v20329_v14  ;;  %v20419_v14 = vld [vmem:[%s25162_s0 + $0x28] sm:$0xff]  }
  0x1c   :  { %198 = vmatprep.subr.bf16.mxu0 %v20330_v15  ;;  %1054 = vmatprep.subr.bf16.mxu1 %v20330_v15  ;;  %v20415_v15 = vld [vmem:[%s25161_s1 + $0x200] ss:$8 sps:$4 sm:$0xff]  }
  0x1f   :  { %199 = vmatpush1.bf16.msra.mxu0 %v20332_v16  ;;  %1055 = vmatpush1.bf16.msra.mxu1 %v20332_v16  ;;  %v20422_v16 = vld [vmem:[%s25161_s1 + $0x214] ss:$8 sps:$4 sm:$0xff]  }
  0x20   :  { %323 = vmatprep.subr.bf16.mxu0 %v20335_v17  ;;  %1179 = vmatprep.subr.bf16.mxu1 %v20335_v17  ;;  %v20420_v17 = vld [vmem:[%s25161_s1 + $0x210] ss:$8 sps:$4 sm:$0xff]  }
  0x22   :  { %217 = vmatmul.mubr.bf16.vlgmr.msra.gmra.mrb[0].mxu0 %v21717_v18  ;;  %1073 = vmatmul.mubr.bf16.vlgmr.msra.gmra.mrb[0].mxu1 %v21722_v19 }
  0x23   :  { %324 = vmatpush1.bf16.msra.mxu0 %v20333_v20  ;;  %1180 = vmatpush1.bf16.msra.mxu1 %v20333_v20  ;;  %v20439_v20 = vld [vmem:[%s25162_s0 + $0x30] sm:$0xff]  }
  0x24   :  { %325 = vmatprep.subr.bf16.mxu0 %v20340_v21  ;;  %1181 = vmatprep.subr.bf16.mxu1 %v20340_v21  ;;  %v20423_v21 = vld [vmem:[%s25161_s1 + $0x220] ss:$8 sps:$4 sm:$0xff]  }
  0x25   :  { %226 = vmatprep.mubr.bf16.mxu0 %v25174_v1  ;;  %1082 = vmatprep.mubr.bf16.mxu1 %v25174_v1 }
  0x27   :  { %326 = vmatpush1.bf16.msra.mxu0 %v20338_v22  ;;  %1182 = vmatpush1.bf16.msra.mxu1 %v20338_v22  ;;  %v20428_v22 = vld [vmem:[%s25161_s1 + $0x234] ss:$8 sps:$4 sm:$0xff]  }
  0x28   :  { %327 = vmatprep.subr.bf16.mxu0 %v20343_v23  ;;  %1183 = vmatprep.subr.bf16.mxu1 %v20343_v23  ;;  %v20426_v23 = vld [vmem:[%s25161_s1 + $0x230] ss:$8 sps:$4 sm:$0xff]  }
  0x2a   :  { %227 = vmatmul.mubr.bf16.gmra.mrb[4].mxu0 %v20356_v24  ;;  %1083 = vmatmul.mubr.bf16.gmra.mrb[4].mxu1 %v20357_v25  ;;  %v20431_v24 = vld [vmem:[%s25161_s1 + $0x244] ss:$8 sps:$4 sm:$0xff]   ;;  %v20429_v25 = vld [vmem:[%s25161_s1 + $0x240] ss:$8 sps:$4 sm:$0xff]  }
  0x2b   :  { %328 = vmatpush1.bf16.msra.mxu0 %v20341_v26  ;;  %1184 = vmatpush1.bf16.msra.mxu1 %v20341_v26  ;;  %v20434_v26 = vld [vmem:[%s25161_s1 + $0x254] ss:$8 sps:$4 sm:$0xff]  }
  0x2c   :  { %329 = vmatprep.subr.bf16.mxu0 %v20346_v27  ;;  %1185 = vmatprep.subr.bf16.mxu1 %v20346_v27  ;;  %v20432_v27 = vld [vmem:[%s25161_s1 + $0x250] ss:$8 sps:$4 sm:$0xff]  }
  0x2d   :  { %355 = vmatprep.mubr.bf16.mxu0 %v25174_v1  ;;  %1211 = vmatprep.mubr.bf16.mxu1 %v25174_v1 }
  0x2f   :  { %330 = vmatpush1.bf16.msra.mxu0 %v20344_v28  ;;  %1186 = vmatpush1.bf16.msra.mxu1 %v20344_v28  ;;  %v20438_v28 = vld [vmem:[%s25161_s1 + $0x264] ss:$8 sps:$4 sm:$0xff]  }
  0x30   :  { %331 = vmatprep.subr.bf16.mxu0 %v20349_v29  ;;  %1187 = vmatprep.subr.bf16.mxu1 %v20349_v29  ;;  %v20436_v29 = vld [vmem:[%s25161_s1 + $0x260] ss:$8 sps:$4 sm:$0xff]  }
  0x33   :  { %332 = vmatpush1.bf16.msra.mxu0 %v20347_v30  ;;  %1188 = vmatpush1.bf16.msra.mxu1 %v20347_v30  ;;  %v20442_v30 = vld [vmem:[%s25161_s1 + $0x274] ss:$8 sps:$4 sm:$0xff]  }
  0x34   :  { %333 = vmatprep.subr.bf16.mxu0 %v20352_v31  ;;  %1189 = vmatprep.subr.bf16.mxu1 %v20352_v31  ;;  %v20440_v31 = vld [vmem:[%s25161_s1 + $0x270] ss:$8 sps:$4 sm:$0xff]  }
  0x37   :  { %334 = vmatpush1.bf16.msra.mxu0 %v20350_v32  ;;  %1190 = vmatpush1.bf16.msra.mxu1 %v20350_v32  ;;  %v20447_v32 = vld [vmem:[%s25161_s1 + $0x84] ss:$8 sps:$4 sm:$0xff]  }
  0x38   :  { %335 = vmatprep.subr.bf16.mxu0 %v20355_v33  ;;  %1191 = vmatprep.subr.bf16.mxu1 %v20355_v33  ;;  %v20443_v33 = vld [vmem:[%s25162_s0 + $0x20] sm:$0xff]  }
  0x3b   :  { %336 = vmatpush1.bf16.msra.mxu0 %v20353_v34  ;;  %1192 = vmatpush1.bf16.msra.mxu1 %v20353_v34  ;;  %v20444_v34 = vld [vmem:[%s25162_s0 + $0x30] sm:$0xff]  }
  0x3c   :  { %337 = vmatprep.subr.bf16.mxu0 %v20360_v35  ;;  %1193 = vmatprep.subr.bf16.mxu1 %v20360_v35  ;;  %v20445_v35 = vld [vmem:[%s25161_s1 + $0x80] ss:$8 sps:$4 sm:$0xff]  }
  0x3f   :  { %338 = vmatpush1.bf16.msra.mxu0 %v20358_v36  ;;  %1194 = vmatpush1.bf16.msra.mxu1 %v20358_v36  ;;  %v20450_v36 = vld [vmem:[%s25161_s1 + $0x94] ss:$8 sps:$4 sm:$0xff]  }
  0x40   :  { %489 = vmatprep.subr.bf16.mxu0 %v20363_v37  ;;  %1344 = vmatprep.subr.bf16.mxu1 %v20363_v37  ;;  %v20448_v37 = vld [vmem:[%s25161_s1 + $0x90] ss:$8 sps:$4 sm:$0xff]  }
  0x42   :  { %356 = vmatmul.mubr.bf16.vlgmr.msra.gmra.mrb[0].mxu0 %v20364_v38  ;;  %1212 = vmatmul.mubr.bf16.vlgmr.msra.gmra.mrb[0].mxu1 %v20365_v39  ;;  %v20455_v38 = vld [vmem:[%s25161_s1 + $0xa4] ss:$8 sps:$4 sm:$0xff]  }
  0x43   :  { %490 = vmatpush1.bf16.msra.mxu0 %v20361_v40  ;;  %1345 = vmatpush1.bf16.msra.mxu1 %v20361_v40  ;;  %v20451_v39 = vld [vmem:[%s25162_s0 + $0x28] sm:$0xff]   ;;  %v20452_v40 = vld [vmem:[%s25162_s0 + $0x38] sm:$0xff]  }
  0x44   :  { %491 = vmatprep.subr.bf16.mxu0 %v20368_v41  ;;  %1346 = vmatprep.subr.bf16.mxu1 %v20368_v41  ;;  %v20453_v41 = vld [vmem:[%s25161_s1 + $0xa0] ss:$8 sps:$4 sm:$0xff]  }
  0x45   :  { %365 = vmatprep.mubr.bf16.mxu0 %v25174_v1  ;;  %1221 = vmatprep.mubr.bf16.mxu1 %v25174_v1 }
  0x47   :  { %492 = vmatpush1.bf16.msra.mxu0 %v20366_v42  ;;  %1347 = vmatpush1.bf16.msra.mxu1 %v20366_v42  ;;  %v20458_v42 = vld [vmem:[%s25161_s1 + $0xb4] ss:$8 sps:$4 sm:$0xff]  }
  0x48   :  { %493 = vmatprep.subr.bf16.mxu0 %v20371_v43  ;;  %1348 = vmatprep.subr.bf16.mxu1 %v20371_v43  ;;  %v20456_v43 = vld [vmem:[%s25161_s1 + $0xb0] ss:$8 sps:$4 sm:$0xff]  }
  0x4a   :  { %366 = vmatmul.mubr.bf16.gmra.mrb[4].mxu0 %v21717_v18  ;;  %1222 = vmatmul.mubr.bf16.gmra.mrb[4].mxu1 %v21722_v19  ;;  %v20425_v18 = vld [vmem:[%s25161_s1 + $0x224] ss:$8 sps:$4 sm:$0xff]  }
  0x4b   :  { %494 = vmatpush1.bf16.msra.mxu0 %v20369_v44  ;;  %1349 = vmatpush1.bf16.msra.mxu1 %v20369_v44  ;;  %v20435_v19 = vld [vmem:[%s25162_s0 + $0x20] sm:$0xff]  }
  0x4c   :  { %495 = vmatprep.subr.bf16.mxu0 %v20374_v45  ;;  %1350 = vmatprep.subr.bf16.mxu1 %v20374_v45  ;;  %v20461_v44 = vld [vmem:[%s25161_s1 + $0xc4] ss:$8 sps:$4 sm:$0xff]   ;;  %v20459_v45 = vld [vmem:[%s25161_s1 + $0xc0] ss:$8 sps:$4 sm:$0xff]  }
  0x4d   :  { %521 = vmatprep.mubr.bf16.mxu0 %v25174_v1  ;;  %1376 = vmatprep.mubr.bf16.mxu1 %v25174_v1 }
  0x4f   :  { %496 = vmatpush1.bf16.msra.mxu0 %v20372_v46  ;;  %1351 = vmatpush1.bf16.msra.mxu1 %v20372_v46  ;;  %v20464_v46 = vld [vmem:[%s25161_s1 + $0xd4] ss:$8 sps:$4 sm:$0xff]  }
  0x50   :  { %497 = vmatprep.subr.bf16.mxu0 %v20377_v47  ;;  %1352 = vmatprep.subr.bf16.mxu1 %v20377_v47  ;;  %v20462_v47 = vld [vmem:[%s25161_s1 + $0xd0] ss:$8 sps:$4 sm:$0xff]  }
  0x53   :  { %498 = vmatpush1.bf16.msra.mxu0 %v20375_v48  ;;  %1353 = vmatpush1.bf16.msra.mxu1 %v20375_v48  ;;  %v20467_v48 = vld [vmem:[%s25161_s1 + $0xe4] ss:$8 sps:$4 sm:$0xff]  }
  0x54   :  { %499 = vmatprep.subr.bf16.mxu0 %v20380_v49  ;;  %1354 = vmatprep.subr.bf16.mxu1 %v20380_v49  ;;  %v20465_v49 = vld [vmem:[%s25161_s1 + $0xe0] ss:$8 sps:$4 sm:$0xff]  }
  0x57   :  { %500 = vmatpush1.bf16.msra.mxu0 %v20378_v50  ;;  %1355 = vmatpush1.bf16.msra.mxu1 %v20378_v50  ;;  %v20470_v50 = vld [vmem:[%s25161_s1 + $0xf4] ss:$8 sps:$4 sm:$0xff]  }
  0x58   :  { %501 = vmatprep.subr.bf16.mxu0 %v20383_v51  ;;  %1356 = vmatprep.subr.bf16.mxu1 %v20383_v51  ;;  %v20468_v51 = vld [vmem:[%s25161_s1 + $0xf0] ss:$8 sps:$4 sm:$0xff]  }
  0x5b   :  { %502 = vmatpush1.bf16.msra.mxu0 %v20381_v52  ;;  %1357 = vmatpush1.bf16.msra.mxu1 %v20381_v52  ;;  %v20473_v52 = vld [vmem:[%s25161_s1 + $0x4] ss:$8 sps:$4 sm:$0xff]  }
  0x5c   :  { %503 = vmatprep.subr.bf16.mxu0 %v20386_v53  ;;  %1358 = vmatprep.subr.bf16.mxu1 %v20386_v53  ;;  %v22039_v53 = vld [vmem:[%s25162_s0 + $0x28] sm:$0xff]  }
  0x5f   :  { %504 = vmatpush1.bf16.msra.mxu0 %v20384_v54  ;;  %1359 = vmatpush1.bf16.msra.mxu1 %v20384_v54  ;;  %v22044_v54 = vld [vmem:[%s25162_s0 + $0x38] sm:$0xff]  }
  0x60   :  { %663 = vmatprep.subr.bf16.mxu0 %v20389_v55  ;;  %1517 = vmatprep.subr.bf16.mxu1 %v20389_v55  ;;  %v20471_v55 = vld [vmem:[%s25161_s1] ss:$8 sps:$4 sm:$0xff]  }
  0x62   :  { %522 = vmatmul.mubr.bf16.vlgmr.msra.gmra.mrb[0].mxu0 %v20390_v56  ;;  %1377 = vmatmul.mubr.bf16.vlgmr.msra.gmra.mrb[0].mxu1 %v20391_v57  ;;  %v20478_v56 = vld [vmem:[%s25161_s1 + $0x14] ss:$8 sps:$4 sm:$0xff]   ;;  %v20476_v57 = vld [vmem:[%s25161_s1 + $0x10] ss:$8 sps:$4 sm:$0xff]  }
  0x63   :  { %664 = vmatpush1.bf16.msra.mxu0 %v20387_v58  ;;  %1518 = vmatpush1.bf16.msra.mxu1 %v20387_v58  ;;  %v20481_v58 = vld [vmem:[%s25161_s1 + $0x24] ss:$8 sps:$4 sm:$0xff]  }
  0x64   :  { %665 = vmatprep.subr.bf16.mxu0 %v20394_v59  ;;  %1519 = vmatprep.subr.bf16.mxu1 %v20394_v59  ;;  %v20494_v59 = vld [vmem:[%s25162_s0 + $0x30] sm:$0xff]  }
  0x65   :  { %531 = vmatprep.mubr.bf16.mxu0 %v25174_v1  ;;  %1386 = vmatprep.mubr.bf16.mxu1 %v25174_v1 }
  0x67   :  { %666 = vmatpush1.bf16.msra.mxu0 %v20392_v60  ;;  %1520 = vmatpush1.bf16.msra.mxu1 %v20392_v60  ;;  %v20495_v60 = vld [vmem:[%s25162_s0 + $0x40] sm:$0xff]  }
  0x68   :  { %667 = vmatprep.subr.bf16.mxu0 %v20397_v61  ;;  %1521 = vmatprep.subr.bf16.mxu1 %v20397_v61  ;;  %v20479_v61 = vld [vmem:[%s25161_s1 + $0x20] ss:$8 sps:$4 sm:$0xff]  }
  0x6a   :  { %532 = vmatmul.mubr.bf16.gmra.mrb[4].mxu0 %v20410_v62  ;;  %1387 = vmatmul.mubr.bf16.gmra.mrb[4].mxu1 %v20411_v63  ;;  %v20484_v62 = vld [vmem:[%s25161_s1 + $0x34] ss:$8 sps:$4 sm:$0xff]   ;;  %v20482_v63 = vld [vmem:[%s25161_s1 + $0x30] ss:$8 sps:$4 sm:$0xff]  }
  0x6b   :  { %668 = vmatpush1.bf16.msra.mxu0 %v20395_v0  ;;  %1522 = vmatpush1.bf16.msra.mxu1 %v20395_v0  ;;  %v20487_v0 = vld [vmem:[%s25161_s1 + $0x44] ss:$8 sps:$4 sm:$0xff]  }
  0x6c   :  { %669 = vmatprep.subr.bf16.mxu0 %v20400_v2  ;;  %1523 = vmatprep.subr.bf16.mxu1 %v20400_v2  ;;  %v20485_v2 = vld [vmem:[%s25161_s1 + $0x40] ss:$8 sps:$4 sm:$0xff]  }
  0x6d   :  { %695 = vmatprep.mubr.bf16.mxu0 %v25174_v1  ;;  %1549 = vmatprep.mubr.bf16.mxu1 %v25174_v1 }
  0x6f   :  { %670 = vmatpush1.bf16.msra.mxu0 %v20398_v3  ;;  %1524 = vmatpush1.bf16.msra.mxu1 %v20398_v3  ;;  %v20490_v3 = vld [vmem:[%s25161_s1 + $0x54] ss:$8 sps:$4 sm:$0xff]  }
  0x70   :  { %671 = vmatprep.subr.bf16.mxu0 %v20403_v4  ;;  %1525 = vmatprep.subr.bf16.mxu1 %v20403_v4  ;;  %v20488_v4 = vld [vmem:[%s25161_s1 + $0x50] ss:$8 sps:$4 sm:$0xff]  }
  0x73   :  { %672 = vmatpush1.bf16.msra.mxu0 %v20401_v5  ;;  %1526 = vmatpush1.bf16.msra.mxu1 %v20401_v5  ;;  %v20493_v5 = vld [vmem:[%s25161_s1 + $0x64] ss:$8 sps:$4 sm:$0xff]  }
  0x74   :  { %673 = vmatprep.subr.bf16.mxu0 %v20406_v6  ;;  %1527 = vmatprep.subr.bf16.mxu1 %v20406_v6  ;;  %v20491_v6 = vld [vmem:[%s25161_s1 + $0x60] ss:$8 sps:$4 sm:$0xff]  }
  0x77   :  { %674 = vmatpush1.bf16.msra.mxu0 %v20404_v7  ;;  %1528 = vmatpush1.bf16.msra.mxu1 %v20404_v7  ;;  %v20498_v7 = vld [vmem:[%s25161_s1 + $0x74] ss:$8 sps:$4 sm:$0xff]  }
  0x78   :  { %675 = vmatprep.subr.bf16.mxu0 %v20409_v8  ;;  %1529 = vmatprep.subr.bf16.mxu1 %v20409_v8  ;;  %v20496_v8 = vld [vmem:[%s25161_s1 + $0x70] ss:$8 sps:$4 sm:$0xff]  }
  0x7b   :  { %676 = vmatpush1.bf16.msra.mxu0 %v20407_v9  ;;  %1530 = vmatpush1.bf16.msra.mxu1 %v20407_v9  ;;  %v20501_v9 = vld [vmem:[%s25161_s1 + $0x104] ss:$8 sps:$4 sm:$0xff]  }
  0x7c   :  { %677 = vmatprep.subr.bf16.mxu0 %v20414_v10  ;;  %1531 = vmatprep.subr.bf16.mxu1 %v20414_v10  ;;  %v20502_v10 = vld [vmem:[%s25162_s0 + $0x20] sm:$0xff]  }
  0x7f   :  { %678 = vmatpush1.bf16.msra.mxu0 %v20412_v11  ;;  %1532 = vmatpush1.bf16.msra.mxu1 %v20412_v11  ;;  %v20503_v11 = vld [vmem:[%s25162_s0 + $0x30] sm:$0xff]  }
  0x80   :  { %837 = vmatprep.subr.bf16.mxu0 %v20417_v12  ;;  %1690 = vmatprep.subr.bf16.mxu1 %v20417_v12  ;;  %v20499_v12 = vld [vmem:[%s25161_s1 + $0x100] ss:$8 sps:$4 sm:$0xff]  }
  0x82   :  { %696 = vmatmul.mubr.bf16.vlgmr.msra.gmra.mrb[0].mxu0 %v20418_v13  ;;  %1550 = vmatmul.mubr.bf16.vlgmr.msra.gmra.mrb[0].mxu1 %v20419_v14  ;;  %v20506_v13 = vld [vmem:[%s25161_s1 + $0x114] ss:$8 sps:$4 sm:$0xff]   ;;  %v20504_v14 = vld [vmem:[%s25161_s1 + $0x110] ss:$8 sps:$4 sm:$0xff]  }
  0x83   :  { %838 = vmatpush1.bf16.msra.mxu0 %v20415_v15  ;;  %1691 = vmatpush1.bf16.msra.mxu1 %v20415_v15  ;;  %v20509_v15 = vld [vmem:[%s25161_s1 + $0x124] ss:$8 sps:$4 sm:$0xff]  }
  0x84   :  { %839 = vmatprep.subr.bf16.mxu0 %v20422_v16  ;;  %1692 = vmatprep.subr.bf16.mxu1 %v20422_v16  ;;  %v20507_v16 = vld [vmem:[%s25161_s1 + $0x120] ss:$8 sps:$4 sm:$0xff]  }
  0x85   :  { %705 = vmatprep.mubr.bf16.mxu0 %v25174_v1  ;;  %1559 = vmatprep.mubr.bf16.mxu1 %v25174_v1 }
  0x87   :  { %840 = vmatpush1.bf16.msra.mxu0 %v20420_v17  ;;  %1693 = vmatpush1.bf16.msra.mxu1 %v20420_v17  ;;  %v20512_v17 = vld [vmem:[%s25161_s1 + $0x134] ss:$8 sps:$4 sm:$0xff]  }
  0x88   :  { %841 = vmatprep.subr.bf16.mxu0 %v20425_v18  ;;  %1694 = vmatprep.subr.bf16.mxu1 %v20425_v18  ;;  %v20510_v18 = vld [vmem:[%s25161_s1 + $0x130] ss:$8 sps:$4 sm:$0xff]  }
  0x8a   :  { %706 = vmatmul.mubr.bf16.gmra.mrb[4].mxu0 %v20435_v19  ;;  %1560 = vmatmul.mubr.bf16.gmra.mrb[4].mxu1 %v20439_v20  ;;  %v20515_v19 = vld [vmem:[%s25161_s1 + $0x144] ss:$8 sps:$4 sm:$0xff]   ;;  %v20513_v20 = vld [vmem:[%s25161_s1 + $0x140] ss:$8 sps:$4 sm:$0xff]  }
  0x8b   :  { %842 = vmatpush1.bf16.msra.mxu0 %v20423_v21  ;;  %1695 = vmatpush1.bf16.msra.mxu1 %v20423_v21  ;;  %v20518_v21 = vld [vmem:[%s25161_s1 + $0x154] ss:$8 sps:$4 sm:$0xff]  }
  0x8c   :  { %843 = vmatprep.subr.bf16.mxu0 %v20428_v22  ;;  %1696 = vmatprep.subr.bf16.mxu1 %v20428_v22  ;;  %v20516_v22 = vld [vmem:[%s25161_s1 + $0x150] ss:$8 sps:$4 sm:$0xff]  }
  0x8d   :  { %869 = vmatprep.mubr.bf16.mxu0 %v25174_v1  ;;  %1722 = vmatprep.mubr.bf16.mxu1 %v25174_v1 }
  0x8f   :  { %844 = vmatpush1.bf16.msra.mxu0 %v20426_v23  ;;  %1697 = vmatpush1.bf16.msra.mxu1 %v20426_v23  ;;  %v20521_v23 = vld [vmem:[%s25161_s1 + $0x164] ss:$8 sps:$4 sm:$0xff]  }
  0x90   :  { %845 = vmatprep.subr.bf16.mxu0 %v20431_v24  ;;  %1698 = vmatprep.subr.bf16.mxu1 %v20431_v24  ;;  %v20519_v24 = vld [vmem:[%s25161_s1 + $0x160] ss:$8 sps:$4 sm:$0xff]  }
  0x93   :  { %846 = vmatpush1.bf16.msra.mxu0 %v20429_v25  ;;  %1699 = vmatpush1.bf16.msra.mxu1 %v20429_v25  ;;  %v20524_v25 = vld [vmem:[%s25161_s1 + $0x174] ss:$8 sps:$4 sm:$0xff]  }
  0x94   :  { %847 = vmatprep.subr.bf16.mxu0 %v20434_v26  ;;  %1700 = vmatprep.subr.bf16.mxu1 %v20434_v26  ;;  %v20522_v26 = vld [vmem:[%s25161_s1 + $0x170] ss:$8 sps:$4 sm:$0xff]  }
  0x97   :  { %848 = vmatpush1.bf16.msra.mxu0 %v20432_v27  ;;  %1701 = vmatpush1.bf16.msra.mxu1 %v20432_v27  ;;  %v20527_v27 = vld [vmem:[%s25161_s1 + $0x184] ss:$8 sps:$4 sm:$0xff]  }
  0x98   :  { %849 = vmatprep.subr.bf16.mxu0 %v20438_v28  ;;  %1702 = vmatprep.subr.bf16.mxu1 %v20438_v28  ;;  %v20525_v28 = vld [vmem:[%s25161_s1 + $0x180] ss:$8 sps:$4 sm:$0xff]  }
  0x9b   :  { %850 = vmatpush1.bf16.msra.mxu0 %v20436_v29  ;;  %1703 = vmatpush1.bf16.msra.mxu1 %v20436_v29  ;;  %v20528_v29 = vld [vmem:[%s25162_s0 + $0x30] sm:$0xff]  }
  0x9c   :  { %851 = vmatprep.subr.bf16.mxu0 %v20442_v30  ;;  %1704 = vmatprep.subr.bf16.mxu1 %v20442_v30  ;;  %v20529_v30 = vld [vmem:[%s25162_s0 + $0x40] sm:$0xff]  }
  0x9f   :  { %852 = vmatpush1.bf16.msra.mxu0 %v20440_v31  ;;  %1705 = vmatpush1.bf16.msra.mxu1 %v20440_v31  ;;  %v20532_v31 = vld [vmem:[%s25161_s1 + $0x194] ss:$8 sps:$4 sm:$0xff]  }
  0xa0   :  { %1893 = vmatprep.subr.bf16.mxu0 %v20447_v32  ;;  %2746 = vmatprep.subr.bf16.mxu1 %v20447_v32  ;;  %v20530_v32 = vld [vmem:[%s25161_s1 + $0x190] ss:$8 sps:$4 sm:$0xff]  }
  0xa2   :  { %870 = vmatmul.mubr.bf16.vlgmr.msra.gmra.mrb[0].mxu0 %v20443_v33  ;;  %1723 = vmatmul.mubr.bf16.vlgmr.msra.gmra.mrb[0].mxu1 %v20444_v34  ;;  %v20535_v33 = vld [vmem:[%s25161_s1 + $0x1a4] ss:$8 sps:$4 sm:$0xff]   ;;  %v20533_v34 = vld [vmem:[%s25161_s1 + $0x1a0] ss:$8 sps:$4 sm:$0xff]  }
  0xa3   :  { %1894 = vmatpush1.bf16.msra.mxu0 %v20445_v35  ;;  %2747 = vmatpush1.bf16.msra.mxu1 %v20445_v35  ;;  %v20548_v35 = vld [vmem:[%s25162_s0 + $0x38] sm:$0xff]  }
  0xa4   :  { %1895 = vmatprep.subr.bf16.mxu0 %v20450_v36  ;;  %2748 = vmatprep.subr.bf16.mxu1 %v20450_v36  ;;  %v20538_v36 = vld [vmem:[%s25161_s1 + $0x1b4] ss:$8 sps:$4 sm:$0xff]  }
  0xa5   :  { %879 = vmatprep.mubr.bf16.mxu0 %v25174_v1  ;;  %1732 = vmatprep.mubr.bf16.mxu1 %v25174_v1 }
  0xa7   :  { %1896 = vmatpush1.bf16.msra.mxu0 %v20448_v37  ;;  %2749 = vmatpush1.bf16.msra.mxu1 %v20448_v37  ;;  %v20549_v37 = vld [vmem:[%s25162_s0 + $0x48] sm:$0xff]  }
  0xa8   :  { %1897 = vmatprep.subr.bf16.mxu0 %v20455_v38  ;;  %2750 = vmatprep.subr.bf16.mxu1 %v20455_v38  ;;  %v20536_v38 = vld [vmem:[%s25161_s1 + $0x1b0] ss:$8 sps:$4 sm:$0xff]  }
  0xaa   :  { %880 = vmatmul.mubr.bf16.gmra.mrb[4].mxu0 %v20451_v39  ;;  %1733 = vmatmul.mubr.bf16.gmra.mrb[4].mxu1 %v20452_v40  ;;  %v20541_v39 = vld [vmem:[%s25161_s1 + $0x1c4] ss:$8 sps:$4 sm:$0xff]   ;;  %v20539_v40 = vld [vmem:[%s25161_s1 + $0x1c0] ss:$8 sps:$4 sm:$0xff]  }
  0xab   :  { %1898 = vmatpush1.bf16.msra.mxu0 %v20453_v41  ;;  %2751 = vmatpush1.bf16.msra.mxu1 %v20453_v41  ;;  %v20544_v41 = vld [vmem:[%s25161_s1 + $0x1d4] ss:$8 sps:$4 sm:$0xff]  }
  0xac   :  { %1899 = vmatprep.subr.bf16.mxu0 %v20458_v42  ;;  %2752 = vmatprep.subr.bf16.mxu1 %v20458_v42  ;;  %v20542_v42 = vld [vmem:[%s25161_s1 + $0x1d0] ss:$8 sps:$4 sm:$0xff]  }
  0xad   :  { %1925 = vmatprep.mubr.bf16.mxu0 %v25174_v1  ;;  %2778 = vmatprep.mubr.bf16.mxu1 %v25174_v1 }
  0xaf   :  { %1900 = vmatpush1.bf16.msra.mxu0 %v20456_v43  ;;  %2753 = vmatpush1.bf16.msra.mxu1 %v20456_v43  ;;  %v20547_v43 = vld [vmem:[%s25161_s1 + $0x1e4] ss:$8 sps:$4 sm:$0xff]  }
  0xb0   :  { %1901 = vmatprep.subr.bf16.mxu0 %v20461_v44  ;;  %2754 = vmatprep.subr.bf16.mxu1 %v20461_v44  ;;  %v20545_v44 = vld [vmem:[%s25161_s1 + $0x1e0] ss:$8 sps:$4 sm:$0xff]  }
  0xb3   :  { %1902 = vmatpush1.bf16.msra.mxu0 %v20459_v45  ;;  %2755 = vmatpush1.bf16.msra.mxu1 %v20459_v45  ;;  %v20552_v45 = vld [vmem:[%s25161_s1 + $0x1f4] ss:$8 sps:$4 sm:$0xff]  }
  0xb4   :  { %1903 = vmatprep.subr.bf16.mxu0 %v20464_v46  ;;  %2756 = vmatprep.subr.bf16.mxu1 %v20464_v46  ;;  %v20550_v46 = vld [vmem:[%s25161_s1 + $0x1f0] ss:$8 sps:$4 sm:$0xff]  }
  0xb7   :  { %1904 = vmatpush1.bf16.msra.mxu0 %v20462_v47  ;;  %2757 = vmatpush1.bf16.msra.mxu1 %v20462_v47  ;;  %v20555_v47 = vld [vmem:[%s25161_s1 + $0x204] ss:$8 sps:$4 sm:$0xff]  }
  0xb8   :  { %1905 = vmatprep.subr.bf16.mxu0 %v20467_v48  ;;  %2758 = vmatprep.subr.bf16.mxu1 %v20467_v48  ;;  %v20556_v48 = vld [vmem:[%s25162_s0 + $0x38] sm:$0xff]  }
  0xbb   :  { %1906 = vmatpush1.bf16.msra.mxu0 %v20465_v49  ;;  %2759 = vmatpush1.bf16.msra.mxu1 %v20465_v49  ;;  %v20557_v49 = vld [vmem:[%s25162_s0 + $0x48] sm:$0xff]  }
  0xbc   :  { %1907 = vmatprep.subr.bf16.mxu0 %v20470_v50  ;;  %2760 = vmatprep.subr.bf16.mxu1 %v20470_v50  ;;  %v20553_v50 = vld [vmem:[%s25161_s1 + $0x200] ss:$8 sps:$4 sm:$0xff]  }
  0xbf   :  { %1908 = vmatpush1.bf16.msra.mxu0 %v20468_v51  ;;  %2761 = vmatpush1.bf16.msra.mxu1 %v20468_v51  ;;  %v20560_v51 = vld [vmem:[%s25161_s1 + $0x214] ss:$8 sps:$4 sm:$0xff]  }
  0xc0   :  { %2032 = vmatprep.subr.bf16.mxu0 %v20473_v52  ;;  %2885 = vmatprep.subr.bf16.mxu1 %v20473_v52  ;;  %v20558_v52 = vld [vmem:[%s25161_s1 + $0x210] ss:$8 sps:$4 sm:$0xff]  }
  0xc2   :  { %1926 = vmatmul.mubr.bf16.vlgmr.msra.gmra.mrb[8].mxu0 %v22039_v53  ;;  %2779 = vmatmul.mubr.bf16.vlgmr.msra.gmra.mrb[8].mxu1 %v22044_v54 }
  0xc3   :  { %2033 = vmatpush1.bf16.msra.mxu0 %v20471_v55  ;;  %2886 = vmatpush1.bf16.msra.mxu1 %v20471_v55  ;;  %v20577_v55 = vld [vmem:[%s25162_s0 + $0x50] sm:$0xff]  }
  0xc4   :  { %2034 = vmatprep.subr.bf16.mxu0 %v20478_v56  ;;  %2887 = vmatprep.subr.bf16.mxu1 %v20478_v56  ;;  %v20561_v56 = vld [vmem:[%s25161_s1 + $0x220] ss:$8 sps:$4 sm:$0xff]  }
  0xc5   :  { %1935 = vmatprep.mubr.bf16.mxu0 %v25174_v1  ;;  %2788 = vmatprep.mubr.bf16.mxu1 %v25174_v1 }
  0xc7   :  { %2035 = vmatpush1.bf16.msra.mxu0 %v20476_v57  ;;  %2888 = vmatpush1.bf16.msra.mxu1 %v20476_v57  ;;  %v20566_v57 = vld [vmem:[%s25161_s1 + $0x234] ss:$8 sps:$4 sm:$0xff]  }
  0xc8   :  { %2036 = vmatprep.subr.bf16.mxu0 %v20481_v58  ;;  %2889 = vmatprep.subr.bf16.mxu1 %v20481_v58  ;;  %v20564_v58 = vld [vmem:[%s25161_s1 + $0x230] ss:$8 sps:$4 sm:$0xff]  }
  0xca   :  { %1936 = vmatmul.mubr.bf16.gmra.mrb[12].mxu0 %v20494_v59  ;;  %2789 = vmatmul.mubr.bf16.gmra.mrb[12].mxu1 %v20495_v60  ;;  %v20569_v59 = vld [vmem:[%s25161_s1 + $0x244] ss:$8 sps:$4 sm:$0xff]   ;;  %v20567_v60 = vld [vmem:[%s25161_s1 + $0x240] ss:$8 sps:$4 sm:$0xff]  }
  0xcb   :  { %2037 = vmatpush1.bf16.msra.mxu0 %v20479_v61  ;;  %2890 = vmatpush1.bf16.msra.mxu1 %v20479_v61  ;;  %v20572_v61 = vld [vmem:[%s25161_s1 + $0x254] ss:$8 sps:$4 sm:$0xff]  }
  0xcc   :  { %2038 = vmatprep.subr.bf16.mxu0 %v20484_v62  ;;  %2891 = vmatprep.subr.bf16.mxu1 %v20484_v62  ;;  %v20570_v62 = vld [vmem:[%s25161_s1 + $0x250] ss:$8 sps:$4 sm:$0xff]  }
  0xcd   :  { %2064 = vmatprep.mubr.bf16.mxu0 %v25174_v1  ;;  %2917 = vmatprep.mubr.bf16.mxu1 %v25174_v1 }
  0xcf   :  { %2039 = vmatpush1.bf16.msra.mxu0 %v20482_v63  ;;  %2892 = vmatpush1.bf16.msra.mxu1 %v20482_v63  ;;  %v20576_v63 = vld [vmem:[%s25161_s1 + $0x264] ss:$8 sps:$4 sm:$0xff]  }
  0xd0   :  { %2040 = vmatprep.subr.bf16.mxu0 %v20487_v0  ;;  %2893 = vmatprep.subr.bf16.mxu1 %v20487_v0  ;;  %v20574_v0 = vld [vmem:[%s25161_s1 + $0x260] ss:$8 sps:$4 sm:$0xff]  }
  0xd3   :  { %2041 = vmatpush1.bf16.msra.mxu0 %v20485_v2  ;;  %2894 = vmatpush1.bf16.msra.mxu1 %v20485_v2  ;;  %v20580_v2 = vld [vmem:[%s25161_s1 + $0x274] ss:$8 sps:$4 sm:$0xff]  }
  0xd4   :  { %2042 = vmatprep.subr.bf16.mxu0 %v20490_v3  ;;  %2895 = vmatprep.subr.bf16.mxu1 %v20490_v3  ;;  %v20578_v3 = vld [vmem:[%s25161_s1 + $0x270] ss:$8 sps:$4 sm:$0xff]  }
  0xd7   :  { %2043 = vmatpush1.bf16.msra.mxu0 %v20488_v4  ;;  %2896 = vmatpush1.bf16.msra.mxu1 %v20488_v4  ;;  %v20581_v4 = vld [vmem:[%s25162_s0 + $0x40] sm:$0xff]  }
  0xd8   :  { %2044 = vmatprep.subr.bf16.mxu0 %v20493_v5  ;;  %2897 = vmatprep.subr.bf16.mxu1 %v20493_v5  ;;  %v20582_v5 = vld [vmem:[%s25162_s0 + $0x50] sm:$0xff]  }
  0xdb   :  { %2045 = vmatpush1.bf16.msra.mxu0 %v20491_v6  ;;  %2898 = vmatpush1.bf16.msra.mxu1 %v20491_v6  ;;  %v20585_v6 = vld [vmem:[%s25161_s1 + $0x84] ss:$8 sps:$4 sm:$0xff]  }
  0xdc   :  { %2046 = vmatprep.subr.bf16.mxu0 %v20498_v7  ;;  %2899 = vmatprep.subr.bf16.mxu1 %v20498_v7  ;;  %v20583_v7 = vld [vmem:[%s25161_s1 + $0x80] ss:$8 sps:$4 sm:$0xff]  }
  0xdf   :  { %2047 = vmatpush1.bf16.msra.mxu0 %v20496_v8  ;;  %2900 = vmatpush1.bf16.msra.mxu1 %v20496_v8  ;;  %v20588_v8 = vld [vmem:[%s25161_s1 + $0x94] ss:$8 sps:$4 sm:$0xff]  }
  0xe0   :  { %2197 = vmatprep.subr.bf16.mxu0 %v20501_v9  ;;  %3050 = vmatprep.subr.bf16.mxu1 %v20501_v9  ;;  %v20586_v9 = vld [vmem:[%s25161_s1 + $0x90] ss:$8 sps:$4 sm:$0xff]  }
  0xe2   :  { %2065 = vmatmul.mubr.bf16.vlgmr.msra.gmra.mrb[8].mxu0 %v20502_v10  ;;  %2918 = vmatmul.mubr.bf16.vlgmr.msra.gmra.mrb[8].mxu1 %v20503_v11  ;;  %v20589_v10 = vld [vmem:[%s25162_s0 + $0x48] sm:$0xff]   ;;  %v20590_v11 = vld [vmem:[%s25162_s0 + $0x58] sm:$0xff]  }
  0xe3   :  { %2198 = vmatpush1.bf16.msra.mxu0 %v20499_v12  ;;  %3051 = vmatpush1.bf16.msra.mxu1 %v20499_v12  ;;  %v20593_v12 = vld [vmem:[%s25161_s1 + $0xa4] ss:$8 sps:$4 sm:$0xff]  }
  0xe4   :  { %2199 = vmatprep.subr.bf16.mxu0 %v20506_v13  ;;  %3052 = vmatprep.subr.bf16.mxu1 %v20506_v13  ;;  %v20591_v13 = vld [vmem:[%s25161_s1 + $0xa0] ss:$8 sps:$4 sm:$0xff]  }
  0xe5   :  { %2074 = vmatprep.mubr.bf16.mxu0 %v25174_v1  ;;  %2927 = vmatprep.mubr.bf16.mxu1 %v25174_v1 }
  0xe7   :  { %2200 = vmatpush1.bf16.msra.mxu0 %v20504_v14  ;;  %3053 = vmatpush1.bf16.msra.mxu1 %v20504_v14  ;;  %v20596_v14 = vld [vmem:[%s25161_s1 + $0xb4] ss:$8 sps:$4 sm:$0xff]  }
  0xe8   :  { %2201 = vmatprep.subr.bf16.mxu0 %v20509_v15  ;;  %3054 = vmatprep.subr.bf16.mxu1 %v20509_v15  ;;  %v20594_v15 = vld [vmem:[%s25161_s1 + $0xb0] ss:$8 sps:$4 sm:$0xff]  }
  0xea   :  { %2075 = vmatmul.mubr.bf16.gmra.mrb[12].mxu0 %v22039_v53  ;;  %2928 = vmatmul.mubr.bf16.gmra.mrb[12].mxu1 %v22044_v54  ;;  %v20563_v53 = vld [vmem:[%s25161_s1 + $0x224] ss:$8 sps:$4 sm:$0xff]  }
  0xeb   :  { %2202 = vmatpush1.bf16.msra.mxu0 %v20507_v16  ;;  %3055 = vmatpush1.bf16.msra.mxu1 %v20507_v16  ;;  %v20573_v54 = vld [vmem:[%s25162_s0 + $0x40] sm:$0xff]  }
  0xec   :  { %2203 = vmatprep.subr.bf16.mxu0 %v20512_v17  ;;  %3056 = vmatprep.subr.bf16.mxu1 %v20512_v17  ;;  %v20599_v16 = vld [vmem:[%s25161_s1 + $0xc4] ss:$8 sps:$4 sm:$0xff]   ;;  %v20597_v17 = vld [vmem:[%s25161_s1 + $0xc0] ss:$8 sps:$4 sm:$0xff]  }
  0xed   :  { %2229 = vmatprep.mubr.bf16.mxu0 %v25174_v1  ;;  %3082 = vmatprep.mubr.bf16.mxu1 %v25174_v1 }
  0xef   :  { %2204 = vmatpush1.bf16.msra.mxu0 %v20510_v18  ;;  %3057 = vmatpush1.bf16.msra.mxu1 %v20510_v18  ;;  %v20602_v18 = vld [vmem:[%s25161_s1 + $0xd4] ss:$8 sps:$4 sm:$0xff]  }
  0xf0   :  { %2205 = vmatprep.subr.bf16.mxu0 %v20515_v19  ;;  %3058 = vmatprep.subr.bf16.mxu1 %v20515_v19  ;;  %v20600_v19 = vld [vmem:[%s25161_s1 + $0xd0] ss:$8 sps:$4 sm:$0xff]  }
  0xf3   :  { %2206 = vmatpush1.bf16.msra.mxu0 %v20513_v20  ;;  %3059 = vmatpush1.bf16.msra.mxu1 %v20513_v20  ;;  %v20605_v20 = vld [vmem:[%s25161_s1 + $0xe4] ss:$8 sps:$4 sm:$0xff]  }
  0xf4   :  { %2207 = vmatprep.subr.bf16.mxu0 %v20518_v21  ;;  %3060 = vmatprep.subr.bf16.mxu1 %v20518_v21  ;;  %v20603_v21 = vld [vmem:[%s25161_s1 + $0xe0] ss:$8 sps:$4 sm:$0xff]  }
  0xf7   :  { %2208 = vmatpush1.bf16.msra.mxu0 %v20516_v22  ;;  %3061 = vmatpush1.bf16.msra.mxu1 %v20516_v22  ;;  %v20608_v22 = vld [vmem:[%s25161_s1 + $0xf4] ss:$8 sps:$4 sm:$0xff]  }
  0xf8   :  { %2209 = vmatprep.subr.bf16.mxu0 %v20521_v23  ;;  %3062 = vmatprep.subr.bf16.mxu1 %v20521_v23  ;;  %v20606_v23 = vld [vmem:[%s25161_s1 + $0xf0] ss:$8 sps:$4 sm:$0xff]  }
  0xfb   :  { %2210 = vmatpush1.bf16.msra.mxu0 %v20519_v24  ;;  %3063 = vmatpush1.bf16.msra.mxu1 %v20519_v24  ;;  %v20611_v24 = vld [vmem:[%s25161_s1 + $0x4] ss:$8 sps:$4 sm:$0xff]  }
  0xfc   :  { %2211 = vmatprep.subr.bf16.mxu0 %v20524_v25  ;;  %3064 = vmatprep.subr.bf16.mxu1 %v20524_v25  ;;  %v22361_v25 = vld [vmem:[%s25162_s0 + $0x48] sm:$0xff]  }
  0xff   :  { %2212 = vmatpush1.bf16.msra.mxu0 %v20522_v26  ;;  %3065 = vmatpush1.bf16.msra.mxu1 %v20522_v26  ;;  %v22366_v26 = vld [vmem:[%s25162_s0 + $0x58] sm:$0xff]  }
 0x100   :  { %2370 = vmatprep.subr.bf16.mxu0 %v20527_v27  ;;  %3223 = vmatprep.subr.bf16.mxu1 %v20527_v27  ;;  %v20609_v27 = vld [vmem:[%s25161_s1] ss:$8 sps:$4 sm:$0xff]  }
 0x102   :  { %2230 = vmatmul.mubr.bf16.vlgmr.msra.gmra.mrb[8].mxu0 %v20528_v29  ;;  %3083 = vmatmul.mubr.bf16.vlgmr.msra.gmra.mrb[8].mxu1 %v20529_v30  ;;  %v20614_v29 = vld [vmem:[%s25161_s1 + $0x10] ss:$8 sps:$4 sm:$0xff]   ;;  %v20619_v30 = vld [vmem:[%s25161_s1 + $0x24] ss:$8 sps:$4 sm:$0xff]  }
 0x103   :  { %2371 = vmatpush1.bf16.msra.mxu0 %v20525_v28  ;;  %3224 = vmatpush1.bf16.msra.mxu1 %v20525_v28  ;;  %v20616_v28 = vld [vmem:[%s25161_s1 + $0x14] ss:$8 sps:$4 sm:$0xff]  }
 0x104   :  { %2372 = vmatprep.subr.bf16.mxu0 %v20532_v31  ;;  %3225 = vmatprep.subr.bf16.mxu1 %v20532_v31  ;;  %v20632_v31 = vld [vmem:[%s25162_s0 + $0x50] sm:$0xff]  }
 0x105   :  { %2239 = vmatprep.mubr.bf16.mxu0 %v25174_v1  ;;  %3092 = vmatprep.mubr.bf16.mxu1 %v25174_v1 }
 0x107   :  { %2373 = vmatpush1.bf16.msra.mxu0 %v20530_v32  ;;  %3226 = vmatpush1.bf16.msra.mxu1 %v20530_v32  ;;  %v20633_v32 = vld [vmem:[%s25162_s0 + $0x60] sm:$0xff]  }
 0x108   :  { %2374 = vmatprep.subr.bf16.mxu0 %v20535_v33  ;;  %3227 = vmatprep.subr.bf16.mxu1 %v20535_v33  ;;  %v20617_v33 = vld [vmem:[%s25161_s1 + $0x20] ss:$8 sps:$4 sm:$0xff]  }
 0x10a   :  { %2240 = vmatmul.mubr.bf16.gmra.mrb[12].mxu0 %v20548_v35  ;;  %3093 = vmatmul.mubr.bf16.gmra.mrb[12].mxu1 %v20549_v37  ;;  %v20620_v35 = vld [vmem:[%s25161_s1 + $0x30] ss:$8 sps:$4 sm:$0xff]   ;;  %v20623_v37 = vld [vmem:[%s25161_s1 + $0x40] ss:$8 sps:$4 sm:$0xff]  }
 0x10b   :  { %2375 = vmatpush1.bf16.msra.mxu0 %v20533_v34  ;;  %3228 = vmatpush1.bf16.msra.mxu1 %v20533_v34  ;;  %v20622_v34 = vld [vmem:[%s25161_s1 + $0x34] ss:$8 sps:$4 sm:$0xff]  }
 0x10c   :  { %2376 = vmatprep.subr.bf16.mxu0 %v20538_v36  ;;  %3229 = vmatprep.subr.bf16.mxu1 %v20538_v36  ;;  %v20625_v36 = vld [vmem:[%s25161_s1 + $0x44] ss:$8 sps:$4 sm:$0xff]  }
 0x10d   :  { %2402 = vmatprep.mubr.bf16.mxu0 %v25174_v1  ;;  %3255 = vmatprep.mubr.bf16.mxu1 %v25174_v1 }
 0x10f   :  { %2377 = vmatpush1.bf16.msra.mxu0 %v20536_v38  ;;  %3230 = vmatpush1.bf16.msra.mxu1 %v20536_v38  ;;  %v20628_v38 = vld [vmem:[%s25161_s1 + $0x54] ss:$8 sps:$4 sm:$0xff]  }
 0x110   :  { %2378 = vmatprep.subr.bf16.mxu0 %v20541_v39  ;;  %3231 = vmatprep.subr.bf16.mxu1 %v20541_v39  ;;  %v20626_v39 = vld [vmem:[%s25161_s1 + $0x50] ss:$8 sps:$4 sm:$0xff]  }
 0x113   :  { %2379 = vmatpush1.bf16.msra.mxu0 %v20539_v40  ;;  %3232 = vmatpush1.bf16.msra.mxu1 %v20539_v40  ;;  %v20631_v40 = vld [vmem:[%s25161_s1 + $0x64] ss:$8 sps:$4 sm:$0xff]  }
 0x114   :  { %2380 = vmatprep.subr.bf16.mxu0 %v20544_v41  ;;  %3233 = vmatprep.subr.bf16.mxu1 %v20544_v41 }
 0x117   :  { %2381 = vmatpush1.bf16.msra.mxu0 %v20542_v42  ;;  %3234 = vmatpush1.bf16.msra.mxu1 %v20542_v42 }
 0x118   :  { %2382 = vmatprep.subr.bf16.mxu0 %v20547_v43  ;;  %3235 = vmatprep.subr.bf16.mxu1 %v20547_v43 }
 0x11b   :  { %2383 = vmatpush1.bf16.msra.mxu0 %v20545_v44  ;;  %3236 = vmatpush1.bf16.msra.mxu1 %v20545_v44 }
 0x11c   :  { %2384 = vmatprep.subr.bf16.mxu0 %v20552_v45  ;;  %3237 = vmatprep.subr.bf16.mxu1 %v20552_v45 }
 0x11f   :  { %2385 = vmatpush1.bf16.msra.mxu0 %v20550_v46  ;;  %3238 = vmatpush1.bf16.msra.mxu1 %v20550_v46 }
 0x120   :  { %2543 = vmatprep.subr.bf16.mxu0 %v20555_v47  ;;  %3396 = vmatprep.subr.bf16.mxu1 %v20555_v47 }
 0x122   :  { %2403 = vmatmul.mubr.bf16.vlgmr.msra.gmra.mrb[8].mxu0 %v20556_v48  ;;  %3256 = vmatmul.mubr.bf16.vlgmr.msra.gmra.mrb[8].mxu1 %v20557_v49  ;;  %v20629_v49 = vld [vmem:[%s25161_s1 + $0x60] ss:$8 sps:$4 sm:$0xff]  }
 0x123   :  { %2544 = vmatpush1.bf16.msra.mxu0 %v20553_v50  ;;  %3397 = vmatpush1.bf16.msra.mxu1 %v20553_v50 }
 0x124   :  { %2545 = vmatprep.subr.bf16.mxu0 %v20560_v51  ;;  %3398 = vmatprep.subr.bf16.mxu1 %v20560_v51 }
 0x125   :  { %2412 = vmatprep.mubr.bf16.mxu0 %v25174_v1  ;;  %3265 = vmatprep.mubr.bf16.mxu1 %v25174_v1 }
 0x127   :  { %2546 = vmatpush1.bf16.msra.mxu0 %v20558_v52  ;;  %3399 = vmatpush1.bf16.msra.mxu1 %v20558_v52  ;;  %v20636_v52 = vld [vmem:[%s25161_s1 + $0x74] ss:$8 sps:$4 sm:$0xff]  }
 0x128   :  { %2547 = vmatprep.subr.bf16.mxu0 %v20563_v53  ;;  %3400 = vmatprep.subr.bf16.mxu1 %v20563_v53 }
 0x12a   :  { %2413 = vmatmul.mubr.bf16.gmra.mrb[12].mxu0 %v20573_v54  ;;  %3266 = vmatmul.mubr.bf16.gmra.mrb[12].mxu1 %v20577_v55  ;;  %v20634_v55 = vld [vmem:[%s25161_s1 + $0x70] ss:$8 sps:$4 sm:$0xff]  }
 0x12b   :  { %2548 = vmatpush1.bf16.msra.mxu0 %v20561_v56  ;;  %3401 = vmatpush1.bf16.msra.mxu1 %v20561_v56  ;;  %v20639_v56 = vld [vmem:[%s25161_s1 + $0x104] ss:$8 sps:$4 sm:$0xff]  }
 0x12c   :  { %2549 = vmatprep.subr.bf16.mxu0 %v20566_v57  ;;  %3402 = vmatprep.subr.bf16.mxu1 %v20566_v57 }
 0x12d   :  { %2575 = vmatprep.mubr.bf16.mxu0 %v25174_v1  ;;  %3428 = vmatprep.mubr.bf16.mxu1 %v25174_v1 }
 0x12f   :  { %2550 = vmatpush1.bf16.msra.mxu0 %v20564_v58  ;;  %3403 = vmatpush1.bf16.msra.mxu1 %v20564_v58 }
 0x130   :  { %2551 = vmatprep.subr.bf16.mxu0 %v20569_v59  ;;  %3404 = vmatprep.subr.bf16.mxu1 %v20569_v59 }
 0x133   :  { %2552 = vmatpush1.bf16.msra.mxu0 %v20567_v60  ;;  %3405 = vmatpush1.bf16.msra.mxu1 %v20567_v60 }
 0x134   :  { %2553 = vmatprep.subr.bf16.mxu0 %v20572_v61  ;;  %3406 = vmatprep.subr.bf16.mxu1 %v20572_v61  ;;  %v20640_v61 = vld [vmem:[%s25162_s0 + $0x40] sm:$0xff]  }
 0x137   :  { %2554 = vmatpush1.bf16.msra.mxu0 %v20570_v62  ;;  %3407 = vmatpush1.bf16.msra.mxu1 %v20570_v62  ;;  %v20641_v62 = vld [vmem:[%s25162_s0 + $0x50] sm:$0xff]  }
 0x138   :  { %2555 = vmatprep.subr.bf16.mxu0 %v20576_v63  ;;  %3408 = vmatprep.subr.bf16.mxu1 %v20576_v63 }
 0x13b   :  { %2556 = vmatpush1.bf16.msra.mxu0 %v20574_v0  ;;  %3409 = vmatpush1.bf16.msra.mxu1 %v20574_v0 }
 0x13c   :  { %2557 = vmatprep.subr.bf16.mxu0 %v20580_v2  ;;  %3410 = vmatprep.subr.bf16.mxu1 %v20580_v2 }
 0x13f   :  { %2558 = vmatpush1.bf16.msra.mxu0 %v20578_v3  ;;  %3411 = vmatpush1.bf16.msra.mxu1 %v20578_v3 }
 0x140   :  { %3599 = vmatprep.subr.bf16.mxu0 %v20585_v6  ;;  %4452 = vmatprep.subr.bf16.mxu1 %v20585_v6 }
 0x142   :  { %2576 = vmatmul.mubr.bf16.vlgmr.msra.gmra.mrb[8].mxu0 %v20581_v4  ;;  %3429 = vmatmul.mubr.bf16.vlgmr.msra.gmra.mrb[8].mxu1 %v20582_v5  ;;  %v20637_v4 = vld [vmem:[%s25161_s1 + $0x100] ss:$8 sps:$4 sm:$0xff]  }
 0x143   :  { %3600 = vmatpush1.bf16.msra.mxu0 %v20583_v7  ;;  %4453 = vmatpush1.bf16.msra.mxu1 %v20583_v7  ;;  %v22440_v5 = vld [vmem:[%s25163_s2] ss:$0 sm:$0xff] }
 0x144   :  { %3601 = vmatprep.subr.bf16.mxu0 %v20588_v8  ;;  %4454 = vmatprep.subr.bf16.mxu1 %v20588_v8  ;;  %v20644_v8 = vld [vmem:[%s25161_s1 + $0x114] ss:$8 sps:$4 sm:$0xff]  }
 0x145   :  { %2585 = vmatprep.mubr.bf16.mxu0 %v25174_v1  ;;  %3438 = vmatprep.mubr.bf16.mxu1 %v25174_v1 }
 0x147   :  { %3602 = vmatpush1.bf16.msra.mxu0 %v20586_v9  ;;  %4455 = vmatpush1.bf16.msra.mxu1 %v20586_v9 }
 0x148   :  { %3603 = vmatprep.subr.bf16.mxu0 %v20593_v12  ;;  %4456 = vmatprep.subr.bf16.mxu1 %v20593_v12 }
 0x14a   :  { %2586 = vmatmul.mubr.bf16.gmra.mrb[12].mxu0 %v20589_v10  ;;  %3439 = vmatmul.mubr.bf16.gmra.mrb[12].mxu1 %v20590_v11 }
 0x14b   :  { %3604 = vmatpush1.bf16.msra.mxu0 %v20591_v13  ;;  %4457 = vmatpush1.bf16.msra.mxu1 %v20591_v13 }
 0x14c   :  { %3605 = vmatprep.subr.bf16.mxu0 %v20596_v14  ;;  %4458 = vmatprep.subr.bf16.mxu1 %v20596_v14 }
 0x14d   :  { %3631 = vmatprep.mubr.bf16.mxu0 %v25174_v1  ;;  %4484 = vmatprep.mubr.bf16.mxu1 %v25174_v1 }
 0x14f   :  { %3606 = vmatpush1.bf16.msra.mxu0 %v20594_v15  ;;  %4459 = vmatpush1.bf16.msra.mxu1 %v20594_v15 }
 0x150   :  { %3607 = vmatprep.subr.bf16.mxu0 %v20599_v16  ;;  %4460 = vmatprep.subr.bf16.mxu1 %v20599_v16 }
 0x153   :  { %3608 = vmatpush1.bf16.msra.mxu0 %v20597_v17  ;;  %4461 = vmatpush1.bf16.msra.mxu1 %v20597_v17  ;;  %v20642_v17 = vld [vmem:[%s25161_s1 + $0x110] ss:$8 sps:$4 sm:$0xff]  }
 0x154   :  { %3609 = vmatprep.subr.bf16.mxu0 %v20602_v18  ;;  %4462 = vmatprep.subr.bf16.mxu1 %v20602_v18  ;;  %v20647_v18 = vld [vmem:[%s25161_s1 + $0x124] ss:$8 sps:$4 sm:$0xff]  }
 0x157   :  { %3610 = vmatpush1.bf16.msra.mxu0 %v20600_v19  ;;  %4463 = vmatpush1.bf16.msra.mxu1 %v20600_v19 }
 0x158   :  { %3611 = vmatprep.subr.bf16.mxu0 %v20605_v20  ;;  %4464 = vmatprep.subr.bf16.mxu1 %v20605_v20 }
 0x15b   :  { %3612 = vmatpush1.bf16.msra.mxu0 %v20603_v21  ;;  %4465 = vmatpush1.bf16.msra.mxu1 %v20603_v21 }
 0x15c   :  { %3613 = vmatprep.subr.bf16.mxu0 %v20608_v22  ;;  %4466 = vmatprep.subr.bf16.mxu1 %v20608_v22 }
 0x15f   :  { %3614 = vmatpush1.bf16.msra.mxu0 %v20606_v23  ;;  %4467 = vmatpush1.bf16.msra.mxu1 %v20606_v23 }
 0x160   :  { %3738 = vmatprep.subr.bf16.mxu0 %v20611_v24  ;;  %4591 = vmatprep.subr.bf16.mxu1 %v20611_v24 }
 0x162   :  { %3632 = vmatmul.mubr.bf16.vlgmr.msra.gmra.mrb[16].mxu0 %v22361_v25  ;;  %4485 = vmatmul.mubr.bf16.vlgmr.msra.gmra.mrb[16].mxu1 %v22366_v26 }
 0x163   :  { %3739 = vmatpush1.bf16.msra.mxu0 %v20609_v27  ;;  %4592 = vmatpush1.bf16.msra.mxu1 %v20609_v27  ;;  %v20645_v27 = vld [vmem:[%s25161_s1 + $0x120] ss:$8 sps:$4 sm:$0xff]  }
 0x164   :  { %3740 = vmatprep.subr.bf16.mxu0 %v20616_v28  ;;  %4593 = vmatprep.subr.bf16.mxu1 %v20616_v28  ;;  %v20650_v28 = vld [vmem:[%s25161_s1 + $0x134] ss:$8 sps:$4 sm:$0xff]  }
 0x165   :  { %3641 = vmatprep.mubr.bf16.mxu0 %v25174_v1  ;;  %4494 = vmatprep.mubr.bf16.mxu1 %v25174_v1 }
 0x167   :  { %3741 = vmatpush1.bf16.msra.mxu0 %v20614_v29  ;;  %4594 = vmatpush1.bf16.msra.mxu1 %v20614_v29 }
 0x168   :  { %3742 = vmatprep.subr.bf16.mxu0 %v20619_v30  ;;  %4595 = vmatprep.subr.bf16.mxu1 %v20619_v30 }
 0x16a   :  { %3642 = vmatmul.mubr.bf16.gmra.mrb[20].mxu0 %v20632_v31  ;;  %4495 = vmatmul.mubr.bf16.gmra.mrb[20].mxu1 %v20633_v32  ;;  %v20648_v31 = vld [vmem:[%s25161_s1 + $0x130] ss:$8 sps:$4 sm:$0xff]   ;;  %v20653_v32 = vld [vmem:[%s25161_s1 + $0x144] ss:$8 sps:$4 sm:$0xff]  }
 0x16b   :  { %3743 = vmatpush1.bf16.msra.mxu0 %v20617_v33  ;;  %4596 = vmatpush1.bf16.msra.mxu1 %v20617_v33  ;;  %v20654_v33 = vld [vmem:[%s25161_s1 + $0x150] ss:$8 sps:$4 sm:$0xff]  }
 0x16c   :  { %3744 = vmatprep.subr.bf16.mxu0 %v20622_v34  ;;  %4597 = vmatprep.subr.bf16.mxu1 %v20622_v34  ;;  %v20659_v34 = vld [vmem:[%s25161_s1 + $0x164] ss:$8 sps:$4 sm:$0xff]  }
 0x16d   :  { %3770 = vmatprep.mubr.bf16.mxu0 %v25174_v1  ;;  %4623 = vmatprep.mubr.bf16.mxu1 %v25174_v1 }
 0x16f   :  { %3745 = vmatpush1.bf16.msra.mxu0 %v20620_v35  ;;  %4598 = vmatpush1.bf16.msra.mxu1 %v20620_v35  ;;  %v20657_v35 = vld [vmem:[%s25161_s1 + $0x160] ss:$8 sps:$4 sm:$0xff]  }
 0x170   :  { %3746 = vmatprep.subr.bf16.mxu0 %v20625_v36  ;;  %4599 = vmatprep.subr.bf16.mxu1 %v20625_v36  ;;  %v20662_v36 = vld [vmem:[%s25161_s1 + $0x174] ss:$8 sps:$4 sm:$0xff]  }
 0x173   :  { %3747 = vmatpush1.bf16.msra.mxu0 %v20623_v37  ;;  %4600 = vmatpush1.bf16.msra.mxu1 %v20623_v37  ;;  %v20660_v37 = vld [vmem:[%s25161_s1 + $0x170] ss:$8 sps:$4 sm:$0xff]  }
 0x174   :  { %3748 = vmatprep.subr.bf16.mxu0 %v20628_v38  ;;  %4601 = vmatprep.subr.bf16.mxu1 %v20628_v38  ;;  %v20665_v38 = vld [vmem:[%s25161_s1 + $0x184] ss:$8 sps:$4 sm:$0xff]  }
 0x175   :  { %v871_v41 = vpop.f32.mrb[0].mxu0  ;;  %v1724_v42 = vpop.f32.mrb[0].mxu1 }
 0x176   :  { %v873_v43 = vpop.f32.mrb[1].mxu0  ;;  %v1726_v44 = vpop.f32.mrb[1].mxu1 }
 0x177   :  { %v898_v45 = vmax.f32 %v871_v41, %v873_v43  ;;  %v1751_v46 = vmax.f32 %v1724_v42, %v1726_v44  ;;  %v875_v47 = vpop.f32.mrb[2].mxu0  ;;  %v1728_v48 = vpop.f32.mrb[2].mxu1  ;;  %3749 = vmatpush1.bf16.msra.mxu0 %v20626_v39  ;;  %4602 = vmatpush1.bf16.msra.mxu1 %v20626_v39  ;;  %v20666_v39 = vld [vmem:[%s25162_s0 + $0x50] sm:$0xff]   ;;  %v20667_v41 = vld [vmem:[%s25162_s0 + $0x60] sm:$0xff]  }
 0x178   :  { %v877_v50 = vpop.f32.mrb[3].mxu0  ;;  %v1730_v51 = vpop.f32.mrb[3].mxu1  ;;  %3750 = vmatprep.subr.bf16.mxu0 %v20631_v40  ;;  %4603 = vmatprep.subr.bf16.mxu1 %v20631_v40  ;;  %v20663_v40 = vld [vmem:[%s25161_s1 + $0x180] ss:$8 sps:$4 sm:$0xff]   ;;  %v20670_v42 = vld [vmem:[%s25161_s1 + $0x194] ss:$8 sps:$4 sm:$0xff]  }
 0x179   :  { %v899_v53 = vmax.f32 %v875_v47, %v877_v50  ;;  %v1752_v54 = vmax.f32 %v1728_v48, %v1730_v51  ;;  %v20668_v43 = vld [vmem:[%s25161_s1 + $0x190] ss:$8 sps:$4 sm:$0xff]   ;;  %v20673_v44 = vld [vmem:[%s25161_s1 + $0x1a4] ss:$8 sps:$4 sm:$0xff]   ;;  %v20676_v48 = vld [vmem:[%s25161_s1 + $0x1b4] ss:$8 sps:$4 sm:$0xff]  }
 0x17a   :  { %v20687_v47 = vld [vmem:[%s25162_s0 + $0x68] sm:$0xff]  }
 0x17b   :  { %3751 = vmatpush1.bf16.msra.mxu0 %v20629_v49  ;;  %4604 = vmatpush1.bf16.msra.mxu1 %v20629_v49  ;;  %v20674_v49 = vld [vmem:[%s25161_s1 + $0x1b0] ss:$8 sps:$4 sm:$0xff]   ;;  %v20679_v50 = vld [vmem:[%s25161_s1 + $0x1c4] ss:$8 sps:$4 sm:$0xff]   ;;  %v20677_v51 = vld [vmem:[%s25161_s1 + $0x1c0] ss:$8 sps:$4 sm:$0xff]  }
 0x17c   :  { %3752 = vmatprep.subr.bf16.mxu0 %v20636_v52  ;;  %4605 = vmatprep.subr.bf16.mxu1 %v20636_v52  ;;  %v20682_v52 = vld [vmem:[%s25161_s1 + $0x1d4] ss:$8 sps:$4 sm:$0xff]  }
 0x17d   :  { %v881_v57 = vpop.f32.mrb[4].mxu0  ;;  %v1734_v58 = vpop.f32.mrb[4].mxu1 }
 0x17e   :  { %v883_v59 = vpop.f32.mrb[5].mxu0  ;;  %v1736_v60 = vpop.f32.mrb[5].mxu1 }
 0x17f   :  { %v900_v63 = vmax.f32 %v881_v57, %v883_v59  ;;  %v1753_v0 = vmax.f32 %v1734_v58, %v1736_v60  ;;  %v885_v2 = vpop.f32.mrb[6].mxu0  ;;  %v1738_v3 = vpop.f32.mrb[6].mxu1  ;;  %3753 = vmatpush1.bf16.msra.mxu0 %v20634_v55  ;;  %4606 = vmatpush1.bf16.msra.mxu1 %v20634_v55  ;;  %v20683_v55 = vld [vmem:[%s25161_s1 + $0x1e0] ss:$8 sps:$4 sm:$0xff]   ;;  %v20688_v57 = vld [vmem:[%s25161_s1 + $0x1f0] ss:$8 sps:$4 sm:$0xff]  }
 0x180   :  { %v887_v6 = vpop.f32.mrb[7].mxu0  ;;  %v1740_v7 = vpop.f32.mrb[7].mxu1  ;;  %3903 = vmatprep.subr.bf16.mxu0 %v20639_v56  ;;  %4756 = vmatprep.subr.bf16.mxu1 %v20639_v56  ;;  %v20690_v56 = vld [vmem:[%s25161_s1 + $0x1f4] ss:$8 sps:$4 sm:$0xff]   ;;  %v20693_v58 = vld [vmem:[%s25161_s1 + $0x204] ss:$8 sps:$4 sm:$0xff]  }
 0x181   :  { %v902_v9 = vmax.f32 %v898_v45, %v900_v63  ;;  %v1755_v10 = vmax.f32 %v1751_v46, %v1753_v0  ;;  %v901_v11 = vmax.f32 %v885_v2, %v887_v6  ;;  %v1754_v12 = vmax.f32 %v1738_v3, %v1740_v7  ;;  %v20686_v45 = vld [vmem:[%s25162_s0 + $0x58] sm:$0xff]   ;;  %v20671_v46 = vld [vmem:[%s25161_s1 + $0x1a0] ss:$8 sps:$4 sm:$0xff]   ;;  %v20701_v0 = vld [vmem:[%s25161_s1 + $0x224] ss:$8 sps:$4 sm:$0xff]  }
 0x182   :  { %3771 = vmatmul.mubr.bf16.vlgmr.msra.gmra.mrb[16].mxu0 %v20640_v61  ;;  %4624 = vmatmul.mubr.bf16.vlgmr.msra.gmra.mrb[16].mxu1 %v20641_v62  ;;  %v20694_v59 = vld [vmem:[%s25162_s0 + $0x58] sm:$0xff]   ;;  %v20691_v60 = vld [vmem:[%s25161_s1 + $0x200] ss:$8 sps:$4 sm:$0xff]  }
 0x183   :  { %v904_v13 = vadd.f32 %v22440_v5, %v902_v9  ;;  %v1757_v14 = vadd.f32 %v22440_v5, %v1755_v10  ;;  %v903_v15 = vmax.f32 %v899_v53, %v901_v11  ;;  %v1756_v16 = vmax.f32 %v1752_v54, %v1754_v12  ;;  %3904 = vmatpush1.bf16.msra.mxu0 %v20637_v4  ;;  %v20680_v53 = vld [vmem:[%s25161_s1 + $0x1d0] ss:$8 sps:$4 sm:$0xff]   ;;  %v20685_v54 = vld [vmem:[%s25161_s1 + $0x1e4] ss:$8 sps:$4 sm:$0xff]   ;;  %v20698_v62 = vld [vmem:[%s25161_s1 + $0x214] ss:$8 sps:$4 sm:$0xff]  }
 0x184   :  { %4757 = vmatpush1.bf16.msra.mxu1 %v20637_v4  ;;  %3905 = vmatprep.subr.bf16.mxu0 %v20644_v8  ;;  %v20695_v61 = vld [vmem:[%s25162_s0 + $0x68] sm:$0xff]   ;;  %v20696_v63 = vld [vmem:[%s25161_s1 + $0x210] ss:$8 sps:$4 sm:$0xff]   ;;  %v20711_v2 = vld [vmem:[%s25162_s0 + $0x60] sm:$0xff]  }
 0x185   :  { %v905_v19 = vadd.f32 %v22440_v5, %v903_v15  ;;  %v1758_v20 = vadd.f32 %v22440_v5, %v1756_v16  ;;  %4758 = vmatprep.subr.bf16.mxu1 %v20644_v8  ;;  %3780 = vmatprep.mubr.bf16.mxu0 %v25174_v1  ;;  %v906_v21 = vmax.f32 %v904_v13, 0.0  ;;  %v1759_v22 = vmax.f32 %v1757_v14, 0.0  ;;  %v20699_v3 = vld [vmem:[%s25161_s1 + $0x220] ss:$8 sps:$4 sm:$0xff]   ;;  %v20715_v4 = vld [vmem:[%s25162_s0 + $0x70] sm:$0xff]  }
 0x186   :  { %4633 = vmatprep.mubr.bf16.mxu1 %v25174_v1  ;;  %v20704_v6 = vld [vmem:[%s25161_s1 + $0x234] ss:$8 sps:$4 sm:$0xff]   ;;  %v20702_v7 = vld [vmem:[%s25161_s1 + $0x230] ss:$8 sps:$4 sm:$0xff]   ;;  %v20707_v8 = vld [vmem:[%s25161_s1 + $0x244] ss:$8 sps:$4 sm:$0xff]  }
 0x187   :  { %v907_v23 = vmax.f32 %v905_v19, 0.0  ;;  %v1760_v24 = vmax.f32 %v1758_v20, 0.0  ;;  %3906 = vmatpush1.bf16.msra.mxu0 %v20642_v17  ;;  %v20705_v9 = vld [vmem:[%s25161_s1 + $0x240] ss:$8 sps:$4 sm:$0xff]   ;;  %v20710_v10 = vld [vmem:[%s25161_s1 + $0x254] ss:$8 sps:$4 sm:$0xff]  }
 0x188   :  { %4759 = vmatpush1.bf16.msra.mxu1 %v20642_v17  ;;  %3907 = vmatprep.subr.bf16.mxu0 %v20647_v18  ;;  %v20708_v11 = vld [vmem:[%s25161_s1 + $0x250] ss:$8 sps:$4 sm:$0xff]   ;;  %v20714_v12 = vld [vmem:[%s25161_s1 + $0x264] ss:$8 sps:$4 sm:$0xff]   ;;  %v20712_v13 = vld [vmem:[%s25161_s1 + $0x260] ss:$8 sps:$4 sm:$0xff]  }
 0x189   :  { %v22463_v29 = vpack.c.bf16 %v907_v23, %v906_v21  ;;  %v22465_v30 = vpack.c.bf16 %v1760_v24, %v1759_v22  ;;  %4760 = vmatprep.subr.bf16.mxu1 %v20647_v18  ;;  %v20718_v14 = vld [vmem:[%s25161_s1 + $0x274] ss:$8 sps:$4 sm:$0xff]   ;;  %v20716_v15 = vld [vmem:[%s25161_s1 + $0x270] ss:$8 sps:$4 sm:$0xff]   ;;  %v20723_v16 = vld [vmem:[%s25161_s1 + $0x84] ss:$8 sps:$4 sm:$0xff]  }
 0x18a   :  { %3781 = vmatmul.mubr.bf16.gmra.mrb[20].mxu0 %v22361_v25  ;;  %4634 = vmatmul.mubr.bf16.gmra.mrb[20].mxu1 %v22366_v26  ;;  %v20651_v25 = vld [vmem:[%s25161_s1 + $0x140] ss:$8 sps:$4 sm:$0xff]   ;;  %v20656_v26 = vld [vmem:[%s25161_s1 + $0x154] ss:$8 sps:$4 sm:$0xff]   ;;  %v20724_v21 = vld [vmem:[%s25161_s1 + $0x90] ss:$8 sps:$4 sm:$0xff]  }
 0x18b   :  { %3908 = vmatpush1.bf16.msra.mxu0 %v20645_v27  ;;  %3935 = vmatprep.mubr.bf16.mxu0 %v25174_v1  ;;  %v20719_v17 = vld [vmem:[%s25162_s0 + $0x60] sm:$0xff]   ;;  %v20720_v18 = vld [vmem:[%s25162_s0 + $0x70] sm:$0xff]   ;;  %v20727_v23 = vld [vmem:[%s25162_s0 + $0x68] sm:$0xff]  }
 0x18c   :  { %4761 = vmatpush1.bf16.msra.mxu1 %v20645_v27  ;;  %3909 = vmatprep.subr.bf16.mxu0 %v20650_v28  ;;  %v20721_v19 = vld [vmem:[%s25161_s1 + $0x80] ss:$8 sps:$4 sm:$0xff]   ;;  %v20726_v20 = vld [vmem:[%s25161_s1 + $0x94] ss:$8 sps:$4 sm:$0xff]   ;;  %v20731_v22 = vld [vmem:[%s25161_s1 + $0xa4] ss:$8 sps:$4 sm:$0xff]  }
 0x18d   :  { %4762 = vmatprep.subr.bf16.mxu1 %v20650_v28  ;;  %4788 = vmatprep.mubr.bf16.mxu1 %v25174_v1  ;;  %v20728_v24 = vld [vmem:[%s25162_s0 + $0x78] sm:$0xff]   ;;  %v20729_v27 = vld [vmem:[%s25161_s1 + $0xa0] ss:$8 sps:$4 sm:$0xff]  }
 0x18e   :  { %v20734_v28 = vld [vmem:[%s25161_s1 + $0xb4] ss:$8 sps:$4 sm:$0xff]  }
 0x18f   :  { %3910 = vmatpush1.bf16.msra.mxu0 %v20648_v31 }
 0x190   :  { %4763 = vmatpush1.bf16.msra.mxu1 %v20648_v31  ;;  %3911 = vmatprep.subr.bf16.mxu0 %v20653_v32  ;;  %v20732_v31 = vld [vmem:[%s25161_s1 + $0xb0] ss:$8 sps:$4 sm:$0xff]  }
 0x191   :  { %4764 = vmatprep.subr.bf16.mxu1 %v20653_v32  ;;  %v20737_v32 = vld [vmem:[%s25161_s1 + $0xc4] ss:$8 sps:$4 sm:$0xff]  }
 0x193   :  { %3912 = vmatpush1.bf16.msra.mxu0 %v20651_v25 }
 0x194   :  { %4765 = vmatpush1.bf16.msra.mxu1 %v20651_v25  ;;  %3913 = vmatprep.subr.bf16.mxu0 %v20656_v26  ;;  %v20735_v25 = vld [vmem:[%s25161_s1 + $0xc0] ss:$8 sps:$4 sm:$0xff]  }
 0x195   :  { %4766 = vmatprep.subr.bf16.mxu1 %v20656_v26  ;;  %v20740_v26 = vld [vmem:[%s25161_s1 + $0xd4] ss:$8 sps:$4 sm:$0xff]  }
 0x197   :  { %3914 = vmatpush1.bf16.msra.mxu0 %v20654_v33 }
 0x198   :  { %4767 = vmatpush1.bf16.msra.mxu1 %v20654_v33  ;;  %3915 = vmatprep.subr.bf16.mxu0 %v20659_v34  ;;  %v20738_v33 = vld [vmem:[%s25161_s1 + $0xd0] ss:$8 sps:$4 sm:$0xff]  }
 0x199   :  { %4768 = vmatprep.subr.bf16.mxu1 %v20659_v34  ;;  %v20743_v34 = vld [vmem:[%s25161_s1 + $0xe4] ss:$8 sps:$4 sm:$0xff]  }
 0x19b   :  { %3916 = vmatpush1.bf16.msra.mxu0 %v20657_v35 }
 0x19c   :  { %4769 = vmatpush1.bf16.msra.mxu1 %v20657_v35  ;;  %3917 = vmatprep.subr.bf16.mxu0 %v20662_v36  ;;  %v20741_v35 = vld [vmem:[%s25161_s1 + $0xe0] ss:$8 sps:$4 sm:$0xff]  }
 0x19d   :  { %4770 = vmatprep.subr.bf16.mxu1 %v20662_v36  ;;  %v20746_v36 = vld [vmem:[%s25161_s1 + $0xf4] ss:$8 sps:$4 sm:$0xff]  }
 0x19f   :  { %3918 = vmatpush1.bf16.msra.mxu0 %v20660_v37 }
 0x1a0   :  { %4771 = vmatpush1.bf16.msra.mxu1 %v20660_v37  ;;  %4076 = vmatprep.subr.bf16.mxu0 %v20665_v38  ;;  %v20744_v37 = vld [vmem:[%s25161_s1 + $0xf0] ss:$8 sps:$4 sm:$0xff]  }
 0x1a1   :  { %4929 = vmatprep.subr.bf16.mxu1 %v20665_v38  ;;  %v20749_v38 = vld [vmem:[%s25161_s1 + $0x4] ss:$8 sps:$4 sm:$0xff]  }
 0x1a2   :  { %3936 = vmatmul.mubr.bf16.vlgmr.msra.gmra.mrb[16].mxu0 %v20666_v39  ;;  %v22696_v39 = vld [vmem:[%s25162_s0 + $0x68] sm:$0xff]  }
 0x1a3   :  { %4077 = vmatpush1.bf16.msra.mxu0 %v20663_v40  ;;  %4789 = vmatmul.mubr.bf16.vlgmr.msra.gmra.mrb[16].mxu1 %v20667_v41  ;;  %v22704_v41 = vld [vmem:[%s25162_s0 + $0x78] sm:$0xff]  }
 0x1a4   :  { %4930 = vmatpush1.bf16.msra.mxu1 %v20663_v40  ;;  %4078 = vmatprep.subr.bf16.mxu0 %v20670_v42  ;;  %v20747_v40 = vld [vmem:[%s25161_s1] ss:$8 sps:$4 sm:$0xff]  }
 0x1a5   :  { %4931 = vmatprep.subr.bf16.mxu1 %v20670_v42  ;;  %3945 = vmatprep.mubr.bf16.mxu0 %v25174_v1  ;;  %v20754_v42 = vld [vmem:[%s25161_s1 + $0x14] ss:$8 sps:$4 sm:$0xff]  }
 0x1a6   :  { %4798 = vmatprep.mubr.bf16.mxu1 %v25174_v1 }
 0x1a7   :  { %4079 = vmatpush1.bf16.msra.mxu0 %v20668_v43 }
 0x1a8   :  { %4932 = vmatpush1.bf16.msra.mxu1 %v20668_v43  ;;  %4080 = vmatprep.subr.bf16.mxu0 %v20673_v44  ;;  %v20752_v43 = vld [vmem:[%s25161_s1 + $0x10] ss:$8 sps:$4 sm:$0xff]  }
 0x1a9   :  { %4933 = vmatprep.subr.bf16.mxu1 %v20673_v44  ;;  %v20757_v44 = vld [vmem:[%s25161_s1 + $0x24] ss:$8 sps:$4 sm:$0xff]  }
 0x1aa   :  { %3946 = vmatmul.mubr.bf16.gmra.mrb[20].mxu0 %v20686_v45  ;;  %v20770_v45 = vld [vmem:[%s25162_s0 + $0x70] sm:$0xff]  }
 0x1ab   :  { %4081 = vmatpush1.bf16.msra.mxu0 %v20671_v46  ;;  %4799 = vmatmul.mubr.bf16.gmra.mrb[20].mxu1 %v20687_v47  ;;  %v20771_v47 = vld [vmem:[%s25162_s0 + $0x80] sm:$0xff]  }
 0x1ac   :  { %4934 = vmatpush1.bf16.msra.mxu1 %v20671_v46  ;;  %4082 = vmatprep.subr.bf16.mxu0 %v20676_v48  ;;  %v20755_v46 = vld [vmem:[%s25161_s1 + $0x20] ss:$8 sps:$4 sm:$0xff]  }
 0x1ad   :  { %4935 = vmatprep.subr.bf16.mxu1 %v20676_v48  ;;  %4108 = vmatprep.mubr.bf16.mxu0 %v25174_v1  ;;  %v20760_v48 = vld [vmem:[%s25161_s1 + $0x34] ss:$8 sps:$4 sm:$0xff]  }
 0x1ae   :  { %4961 = vmatprep.mubr.bf16.mxu1 %v25174_v1 }
 0x1af   :  { %4083 = vmatpush1.bf16.msra.mxu0 %v20674_v49 }
 0x1b0   :  { %4936 = vmatpush1.bf16.msra.mxu1 %v20674_v49  ;;  %4084 = vmatprep.subr.bf16.mxu0 %v20679_v50  ;;  %v20758_v49 = vld [vmem:[%s25161_s1 + $0x30] ss:$8 sps:$4 sm:$0xff]  }
 0x1b1   :  { %4937 = vmatprep.subr.bf16.mxu1 %v20679_v50  ;;  %v20763_v50 = vld [vmem:[%s25161_s1 + $0x44] ss:$8 sps:$4 sm:$0xff]  }
 0x1b3   :  { %4085 = vmatpush1.bf16.msra.mxu0 %v20677_v51 }
 0x1b4   :  { %4938 = vmatpush1.bf16.msra.mxu1 %v20677_v51  ;;  %4086 = vmatprep.subr.bf16.mxu0 %v20682_v52  ;;  %v20761_v51 = vld [vmem:[%s25161_s1 + $0x40] ss:$8 sps:$4 sm:$0xff]  }
 0x1b5   :  { %4939 = vmatprep.subr.bf16.mxu1 %v20682_v52  ;;  %v20766_v52 = vld [vmem:[%s25161_s1 + $0x54] ss:$8 sps:$4 sm:$0xff]  }
 0x1b7   :  { %4087 = vmatpush1.bf16.msra.mxu0 %v20680_v53 }
 0x1b8   :  { %4940 = vmatpush1.bf16.msra.mxu1 %v20680_v53  ;;  %4088 = vmatprep.subr.bf16.mxu0 %v20685_v54  ;;  %v20764_v53 = vld [vmem:[%s25161_s1 + $0x50] ss:$8 sps:$4 sm:$0xff]  }
 0x1b9   :  { %4941 = vmatprep.subr.bf16.mxu1 %v20685_v54  ;;  %v20769_v54 = vld [vmem:[%s25161_s1 + $0x64] ss:$8 sps:$4 sm:$0xff]  }
 0x1bb   :  { %4089 = vmatpush1.bf16.msra.mxu0 %v20683_v55 }
 0x1bc   :  { %4942 = vmatpush1.bf16.msra.mxu1 %v20683_v55  ;;  %4090 = vmatprep.subr.bf16.mxu0 %v20690_v56 }
 0x1bd   :  { %4943 = vmatprep.subr.bf16.mxu1 %v20690_v56 }
 0x1bf   :  { %4091 = vmatpush1.bf16.msra.mxu0 %v20688_v57 }
 0x1c0   :  { %4944 = vmatpush1.bf16.msra.mxu1 %v20688_v57  ;;  %4249 = vmatprep.subr.bf16.mxu0 %v20693_v58 }
 0x1c1   :  { %5102 = vmatprep.subr.bf16.mxu1 %v20693_v58 }
 0x1c2   :  { %4109 = vmatmul.mubr.bf16.vlgmr.msra.gmra.mrb[16].mxu0 %v20694_v59 }
 0x1c3   :  { %4250 = vmatpush1.bf16.msra.mxu0 %v20691_v60  ;;  %4962 = vmatmul.mubr.bf16.vlgmr.msra.gmra.mrb[16].mxu1 %v20695_v61 }
 0x1c4   :  { %5103 = vmatpush1.bf16.msra.mxu1 %v20691_v60  ;;  %4251 = vmatprep.subr.bf16.mxu0 %v20698_v62 }
 0x1c5   :  { %5104 = vmatprep.subr.bf16.mxu1 %v20698_v62  ;;  %4118 = vmatprep.mubr.bf16.mxu0 %v25174_v1 }
 0x1c6   :  { %4971 = vmatprep.mubr.bf16.mxu1 %v25174_v1 }
 0x1c7   :  { %4252 = vmatpush1.bf16.msra.mxu0 %v20696_v63 }
 0x1c8   :  { %5105 = vmatpush1.bf16.msra.mxu1 %v20696_v63  ;;  %4253 = vmatprep.subr.bf16.mxu0 %v20701_v0  ;;  %v20767_v63 = vld [vmem:[%s25161_s1 + $0x60] ss:$8 sps:$4 sm:$0xff]  }
 0x1c9   :  { %5106 = vmatprep.subr.bf16.mxu1 %v20701_v0 }
 0x1ca   :  { %4119 = vmatmul.mubr.bf16.gmra.mrb[20].mxu0 %v20711_v2 }
 0x1cb   :  { %4254 = vmatpush1.bf16.msra.mxu0 %v20699_v3  ;;  %4972 = vmatmul.mubr.bf16.gmra.mrb[20].mxu1 %v20715_v4 }
 0x1cc   :  { %5107 = vmatpush1.bf16.msra.mxu1 %v20699_v3  ;;  %4255 = vmatprep.subr.bf16.mxu0 %v20704_v6  ;;  %v20774_v3 = vld [vmem:[%s25161_s1 + $0x74] ss:$8 sps:$4 sm:$0xff]  }
 0x1cd   :  { %5108 = vmatprep.subr.bf16.mxu1 %v20704_v6  ;;  %4281 = vmatprep.mubr.bf16.mxu0 %v25174_v1 }
 0x1ce   :  { %5134 = vmatprep.mubr.bf16.mxu1 %v25174_v1 }
 0x1cf   :  { %4256 = vmatpush1.bf16.msra.mxu0 %v20702_v7 }
 0x1d0   :  { %5109 = vmatpush1.bf16.msra.mxu1 %v20702_v7  ;;  %4257 = vmatprep.subr.bf16.mxu0 %v20707_v8  ;;  %v20772_v7 = vld [vmem:[%s25161_s1 + $0x70] ss:$8 sps:$4 sm:$0xff]  }
 0x1d1   :  { %5110 = vmatprep.subr.bf16.mxu1 %v20707_v8  ;;  %v20777_v8 = vld [vmem:[%s25161_s1 + $0x104] ss:$8 sps:$4 sm:$0xff]  }
 0x1d3   :  { %4258 = vmatpush1.bf16.msra.mxu0 %v20705_v9 }
 0x1d4   :  { %5111 = vmatpush1.bf16.msra.mxu1 %v20705_v9  ;;  %4259 = vmatprep.subr.bf16.mxu0 %v20710_v10 }
 0x1d5   :  { %5112 = vmatprep.subr.bf16.mxu1 %v20710_v10 }
 0x1d7   :  { %4260 = vmatpush1.bf16.msra.mxu0 %v20708_v11 }
 0x1d8   :  { %5113 = vmatpush1.bf16.msra.mxu1 %v20708_v11  ;;  %4261 = vmatprep.subr.bf16.mxu0 %v20714_v12 }
 0x1d9   :  { %5114 = vmatprep.subr.bf16.mxu1 %v20714_v12 }
 0x1db   :  { %4262 = vmatpush1.bf16.msra.mxu0 %v20712_v13 }
 0x1dc   :  { %5115 = vmatpush1.bf16.msra.mxu1 %v20712_v13  ;;  %4263 = vmatprep.subr.bf16.mxu0 %v20718_v14  ;;  %v20778_v13 = vld [vmem:[%s25162_s0 + $0x60] sm:$0xff]  }
 0x1dd   :  { %5116 = vmatprep.subr.bf16.mxu1 %v20718_v14 }
 0x1df   :  { %4264 = vmatpush1.bf16.msra.mxu0 %v20716_v15 }
 0x1e0   :  { %5117 = vmatpush1.bf16.msra.mxu1 %v20716_v15  ;;  %5305 = vmatprep.subr.bf16.mxu0 %v20723_v16 }
 0x1e1   :  { %6158 = vmatprep.subr.bf16.mxu1 %v20723_v16 }
 0x1e2   :  { %4282 = vmatmul.mubr.bf16.vlgmr.msra.gmra.mrb[16].mxu0 %v20719_v17 }
 0x1e3   :  { %5135 = vmatmul.mubr.bf16.vlgmr.msra.gmra.mrb[16].mxu1 %v20720_v18  ;;  %5306 = vmatpush1.bf16.msra.mxu0 %v20721_v19  ;;  %v20775_v18 = vld [vmem:[%s25161_s1 + $0x100] ss:$8 sps:$4 sm:$0xff]  }
 0x1e4   :  { %6159 = vmatpush1.bf16.msra.mxu1 %v20721_v19  ;;  %5307 = vmatprep.subr.bf16.mxu0 %v20726_v20 }
 0x1e5   :  { %6160 = vmatprep.subr.bf16.mxu1 %v20726_v20  ;;  %4291 = vmatprep.mubr.bf16.mxu0 %v25174_v1 }
 0x1e6   :  { %5144 = vmatprep.mubr.bf16.mxu1 %v25174_v1 }
 0x1e7   :  { %5308 = vmatpush1.bf16.msra.mxu0 %v20724_v21 }
 0x1e8   :  { %6161 = vmatpush1.bf16.msra.mxu1 %v20724_v21  ;;  %5309 = vmatprep.subr.bf16.mxu0 %v20731_v22  ;;  %v20779_v21 = vld [vmem:[%s25162_s0 + $0x70] sm:$0xff]  }
 0x1e9   :  { %6162 = vmatprep.subr.bf16.mxu1 %v20731_v22  ;;  %v20782_v22 = vld [vmem:[%s25161_s1 + $0x114] ss:$8 sps:$4 sm:$0xff]  }
 0x1ea   :  { %4292 = vmatmul.mubr.bf16.gmra.mrb[20].mxu0 %v20727_v23 }
 0x1eb   :  { %5145 = vmatmul.mubr.bf16.gmra.mrb[20].mxu1 %v20728_v24  ;;  %5310 = vmatpush1.bf16.msra.mxu0 %v20729_v27 }
 0x1ec   :  { %6163 = vmatpush1.bf16.msra.mxu1 %v20729_v27  ;;  %5311 = vmatprep.subr.bf16.mxu0 %v20734_v28 }
 0x1ed   :  { %6164 = vmatprep.subr.bf16.mxu1 %v20734_v28  ;;  %5337 = vmatprep.mubr.bf16.mxu0 %v25174_v1 }
 0x1ee   :  { %6190 = vmatprep.mubr.bf16.mxu1 %v25174_v1 }
 0x1ef   :  { %5312 = vmatpush1.bf16.msra.mxu0 %v20732_v31 }
 0x1f0   :  { %6165 = vmatpush1.bf16.msra.mxu1 %v20732_v31  ;;  %5313 = vmatprep.subr.bf16.mxu0 %v20737_v32 }
 0x1f1   :  { %6166 = vmatprep.subr.bf16.mxu1 %v20737_v32 }
 0x1f3   :  { %5314 = vmatpush1.bf16.msra.mxu0 %v20735_v25 }
 0x1f4   :  { %6167 = vmatpush1.bf16.msra.mxu1 %v20735_v25  ;;  %5315 = vmatprep.subr.bf16.mxu0 %v20740_v26 }
 0x1f5   :  { %6168 = vmatprep.subr.bf16.mxu1 %v20740_v26 }
 0x1f7   :  { %5316 = vmatpush1.bf16.msra.mxu0 %v20738_v33 }
 0x1f8   :  { %6169 = vmatpush1.bf16.msra.mxu1 %v20738_v33  ;;  %5317 = vmatprep.subr.bf16.mxu0 %v20743_v34  ;;  %v20780_v33 = vld [vmem:[%s25161_s1 + $0x110] ss:$8 sps:$4 sm:$0xff]  }
 0x1f9   :  { %6170 = vmatprep.subr.bf16.mxu1 %v20743_v34  ;;  %v20785_v34 = vld [vmem:[%s25161_s1 + $0x124] ss:$8 sps:$4 sm:$0xff]  }
 0x1fb   :  { %5318 = vmatpush1.bf16.msra.mxu0 %v20741_v35 }
 0x1fc   :  { %6171 = vmatpush1.bf16.msra.mxu1 %v20741_v35  ;;  %5319 = vmatprep.subr.bf16.mxu0 %v20746_v36 }
 0x1fd   :  { %6172 = vmatprep.subr.bf16.mxu1 %v20746_v36 }
 0x1ff   :  { %5320 = vmatpush1.bf16.msra.mxu0 %v20744_v37 }
 0x200   :  { %6173 = vmatpush1.bf16.msra.mxu1 %v20744_v37  ;;  %5444 = vmatprep.subr.bf16.mxu0 %v20749_v38 }
 0x201   :  { %6297 = vmatprep.subr.bf16.mxu1 %v20749_v38 }
 0x202   :  { %5338 = vmatmul.mubr.bf16.vlgmr.msra.gmra.mrb[24].mxu0 %v22696_v39 }
 0x203   :  { %5445 = vmatpush1.bf16.msra.mxu0 %v20747_v40  ;;  %6191 = vmatmul.mubr.bf16.vlgmr.msra.gmra.mrb[24].mxu1 %v22704_v41 }
 0x204   :  { %6298 = vmatpush1.bf16.msra.mxu1 %v20747_v40  ;;  %5446 = vmatprep.subr.bf16.mxu0 %v20754_v42 }
 0x205   :  { %6299 = vmatprep.subr.bf16.mxu1 %v20754_v42  ;;  %5347 = vmatprep.mubr.bf16.mxu0 %v25174_v1 }
 0x206   :  { %6200 = vmatprep.mubr.bf16.mxu1 %v25174_v1 }
 0x207   :  { %5447 = vmatpush1.bf16.msra.mxu0 %v20752_v43 }
 0x208   :  { %6300 = vmatpush1.bf16.msra.mxu1 %v20752_v43  ;;  %5448 = vmatprep.subr.bf16.mxu0 %v20757_v44  ;;  %v20783_v43 = vld [vmem:[%s25161_s1 + $0x120] ss:$8 sps:$4 sm:$0xff]  }
 0x209   :  { %6301 = vmatprep.subr.bf16.mxu1 %v20757_v44 }
 0x20a   :  { %5348 = vmatmul.mubr.bf16.gmra.mrb[28].mxu0 %v20770_v45 }
 0x20b   :  { %5449 = vmatpush1.bf16.msra.mxu0 %v20755_v46  ;;  %6201 = vmatmul.mubr.bf16.gmra.mrb[28].mxu1 %v20771_v47  ;;  %v20791_v47 = vld [vmem:[%s25161_s1 + $0x144] ss:$8 sps:$4 sm:$0xff]  }
 0x20c   :  { %6302 = vmatpush1.bf16.msra.mxu1 %v20755_v46  ;;  %5450 = vmatprep.subr.bf16.mxu0 %v20760_v48  ;;  %v20786_v46 = vld [vmem:[%s25161_s1 + $0x130] ss:$8 sps:$4 sm:$0xff]  }
 0x20d   :  { %6303 = vmatprep.subr.bf16.mxu1 %v20760_v48  ;;  %5476 = vmatprep.mubr.bf16.mxu0 %v25174_v1  ;;  %v20794_v48 = vld [vmem:[%s25161_s1 + $0x154] ss:$8 sps:$4 sm:$0xff]  }
 0x20e   :  { %6329 = vmatprep.mubr.bf16.mxu1 %v25174_v1 }
 0x20f   :  { %5451 = vmatpush1.bf16.msra.mxu0 %v20758_v49 }
 0x210   :  { %6304 = vmatpush1.bf16.msra.mxu1 %v20758_v49  ;;  %5452 = vmatprep.subr.bf16.mxu0 %v20763_v50  ;;  %v20797_v49 = vld [vmem:[%s25161_s1 + $0x164] ss:$8 sps:$4 sm:$0xff]  }
 0x211   :  { %6305 = vmatprep.subr.bf16.mxu1 %v20763_v50  ;;  %v20795_v50 = vld [vmem:[%s25161_s1 + $0x160] ss:$8 sps:$4 sm:$0xff]  }
 0x213   :  { %5453 = vmatpush1.bf16.msra.mxu0 %v20761_v51 }
 0x214   :  { %6306 = vmatpush1.bf16.msra.mxu1 %v20761_v51  ;;  %5454 = vmatprep.subr.bf16.mxu0 %v20766_v52  ;;  %v20800_v51 = vld [vmem:[%s25161_s1 + $0x174] ss:$8 sps:$4 sm:$0xff]  }
 0x215   :  { %v2577_v55 = vpop.f32.mrb[8].mxu0  ;;  %v3430_v56 = vpop.f32.mrb[8].mxu1  ;;  %6307 = vmatprep.subr.bf16.mxu1 %v20766_v52  ;;  %v20798_v52 = vld [vmem:[%s25161_s1 + $0x170] ss:$8 sps:$4 sm:$0xff]  }
 0x216   :  { %v2579_v57 = vpop.f32.mrb[9].mxu0  ;;  %v3432_v58 = vpop.f32.mrb[9].mxu1 }
 0x217   :  { %v2604_v59 = vmax.f32 %v2577_v55, %v2579_v57  ;;  %v3457_v60 = vmax.f32 %v3430_v56, %v3432_v58  ;;  %v2581_v61 = vpop.f32.mrb[10].mxu0  ;;  %v3434_v62 = vpop.f32.mrb[10].mxu1  ;;  %5455 = vmatpush1.bf16.msra.mxu0 %v20764_v53  ;;  %v20801_v55 = vld [vmem:[%s25161_s1 + $0x180] ss:$8 sps:$4 sm:$0xff]   ;;  %v20808_v57 = vld [vmem:[%s25161_s1 + $0x194] ss:$8 sps:$4 sm:$0xff]  }
 0x218   :  { %6308 = vmatpush1.bf16.msra.mxu1 %v20764_v53  ;;  %v2583_v0 = vpop.f32.mrb[11].mxu0  ;;  %v3436_v2 = vpop.f32.mrb[11].mxu1  ;;  %5456 = vmatprep.subr.bf16.mxu0 %v20769_v54  ;;  %v20803_v53 = vld [vmem:[%s25161_s1 + $0x184] ss:$8 sps:$4 sm:$0xff]   ;;  %v20806_v58 = vld [vmem:[%s25161_s1 + $0x190] ss:$8 sps:$4 sm:$0xff]  }
 0x219   :  { %v2605_v4 = vmax.f32 %v2581_v61, %v2583_v0  ;;  %v3458_v6 = vmax.f32 %v3434_v62, %v3436_v2  ;;  %6309 = vmatprep.subr.bf16.mxu1 %v20769_v54  ;;  %v20804_v54 = vld [vmem:[%s25162_s0 + $0x70] sm:$0xff]   ;;  %v20805_v56 = vld [vmem:[%s25162_s0 + $0x80] sm:$0xff]  }
 0x21a   :  { %v20809_v61 = vld [vmem:[%s25161_s1 + $0x1a0] ss:$8 sps:$4 sm:$0xff]   ;;  %v20814_v62 = vld [vmem:[%s25161_s1 + $0x1b4] ss:$8 sps:$4 sm:$0xff]   ;;  %v20812_v0 = vld [vmem:[%s25161_s1 + $0x1b0] ss:$8 sps:$4 sm:$0xff]  }
 0x21b   :  { %5457 = vmatpush1.bf16.msra.mxu0 %v20767_v63  ;;  %v20817_v2 = vld [vmem:[%s25161_s1 + $0x1c4] ss:$8 sps:$4 sm:$0xff]  }
 0x21c   :  { %6310 = vmatpush1.bf16.msra.mxu1 %v20767_v63  ;;  %5458 = vmatprep.subr.bf16.mxu0 %v20774_v3  ;;  %v20825_v63 = vld [vmem:[%s25162_s0 + $0x88] sm:$0xff]  }
 0x21d   :  { %v2587_v9 = vpop.f32.mrb[12].mxu0  ;;  %v3440_v10 = vpop.f32.mrb[12].mxu1  ;;  %6311 = vmatprep.subr.bf16.mxu1 %v20774_v3  ;;  %v20815_v3 = vld [vmem:[%s25161_s1 + $0x1c0] ss:$8 sps:$4 sm:$0xff]  }
 0x21e   :  { %v2589_v11 = vpop.f32.mrb[13].mxu0  ;;  %v3442_v12 = vpop.f32.mrb[13].mxu1 }
 0x21f   :  { %v2606_v14 = vmax.f32 %v2587_v9, %v2589_v11  ;;  %v3459_v15 = vmax.f32 %v3440_v10, %v3442_v12  ;;  %v2591_v16 = vpop.f32.mrb[14].mxu0  ;;  %v3444_v17 = vpop.f32.mrb[14].mxu1  ;;  %5459 = vmatpush1.bf16.msra.mxu0 %v20772_v7  ;;  %v20828_v9 = vld [vmem:[%s25161_s1 + $0x1f4] ss:$8 sps:$4 sm:$0xff]   ;;  %v20826_v10 = vld [vmem:[%s25161_s1 + $0x1f0] ss:$8 sps:$4 sm:$0xff]  }
 0x220   :  { %6312 = vmatpush1.bf16.msra.mxu1 %v20772_v7  ;;  %v2593_v19 = vpop.f32.mrb[15].mxu0  ;;  %v3446_v20 = vpop.f32.mrb[15].mxu1  ;;  %5609 = vmatprep.subr.bf16.mxu0 %v20777_v8  ;;  %v20823_v7 = vld [vmem:[%s25161_s1 + $0x1e4] ss:$8 sps:$4 sm:$0xff]   ;;  %v20832_v12 = vld [vmem:[%s25162_s0 + $0x78] sm:$0xff]  }
 0x221   :  { %v2608_v23 = vmax.f32 %v2604_v59, %v2606_v14  ;;  %v3461_v24 = vmax.f32 %v3457_v60, %v3459_v15  ;;  %v2607_v27 = vmax.f32 %v2591_v16, %v2593_v19  ;;  %v3460_v28 = vmax.f32 %v3444_v17, %v3446_v20  ;;  %6462 = vmatprep.subr.bf16.mxu1 %v20777_v8  ;;  %v20811_v59 = vld [vmem:[%s25161_s1 + $0x1a4] ss:$8 sps:$4 sm:$0xff]   ;;  %v20824_v60 = vld [vmem:[%s25162_s0 + $0x78] sm:$0xff]   ;;  %v20821_v8 = vld [vmem:[%s25161_s1 + $0x1e0] ss:$8 sps:$4 sm:$0xff]  }
 0x222   :  { %5477 = vmatmul.mubr.bf16.vlgmr.msra.gmra.mrb[24].mxu0 %v20778_v13  ;;  %v20831_v11 = vld [vmem:[%s25161_s1 + $0x204] ss:$8 sps:$4 sm:$0xff]   ;;  %v20829_v13 = vld [vmem:[%s25161_s1 + $0x200] ss:$8 sps:$4 sm:$0xff]   ;;  %v20836_v15 = vld [vmem:[%s25161_s1 + $0x214] ss:$8 sps:$4 sm:$0xff]  }
 0x223   :  { %v2610_v31 = vadd.f32 %v22440_v5, %v2608_v23  ;;  %v3463_v32 = vadd.f32 %v22440_v5, %v3461_v24  ;;  %v2609_v25 = vmax.f32 %v2605_v4, %v2607_v27  ;;  %v3462_v26 = vmax.f32 %v3458_v6, %v3460_v28  ;;  %5610 = vmatpush1.bf16.msra.mxu0 %v20775_v18  ;;  %v20820_v4 = vld [vmem:[%s25161_s1 + $0x1d4] ss:$8 sps:$4 sm:$0xff]   ;;  %v20818_v6 = vld [vmem:[%s25161_s1 + $0x1d0] ss:$8 sps:$4 sm:$0xff]   ;;  %v20833_v14 = vld [vmem:[%s25162_s0 + $0x88] sm:$0xff]  }
 0x224   :  { %6330 = vmatmul.mubr.bf16.vlgmr.msra.gmra.mrb[24].mxu1 %v20779_v21  ;;  %5611 = vmatprep.subr.bf16.mxu0 %v20782_v22  ;;  %v20834_v16 = vld [vmem:[%s25161_s1 + $0x210] ss:$8 sps:$4 sm:$0xff]   ;;  %v20839_v17 = vld [vmem:[%s25161_s1 + $0x224] ss:$8 sps:$4 sm:$0xff]   ;;  %v20837_v19 = vld [vmem:[%s25161_s1 + $0x220] ss:$8 sps:$4 sm:$0xff]  }
 0x225   :  { %v2611_v35 = vadd.f32 %v22440_v5, %v2609_v25  ;;  %v3464_v36 = vadd.f32 %v22440_v5, %v3462_v26  ;;  %6463 = vmatpush1.bf16.msra.mxu1 %v20775_v18  ;;  %5486 = vmatprep.mubr.bf16.mxu0 %v25174_v1  ;;  %v2612_v37 = vmax.f32 %v2610_v31, 0.0  ;;  %v3465_v38 = vmax.f32 %v3463_v32, 0.0  ;;  %v20788_v5 = vld [vmem:[%s25161_s1 + $0x134] ss:$8 sps:$4 sm:$0xff]   ;;  %v20849_v18 = vld [vmem:[%s25162_s0 + $0x80] sm:$0xff]  }
 0x226   :  { %6464 = vmatprep.subr.bf16.mxu1 %v20782_v22  ;;  %6339 = vmatprep.mubr.bf16.mxu1 %v25174_v1  ;;  %v20842_v20 = vld [vmem:[%s25161_s1 + $0x234] ss:$8 sps:$4 sm:$0xff]   ;;  %v20840_v22 = vld [vmem:[%s25161_s1 + $0x230] ss:$8 sps:$4 sm:$0xff]   ;;  %v20845_v23 = vld [vmem:[%s25161_s1 + $0x244] ss:$8 sps:$4 sm:$0xff]  }
 0x227   :  { %v2613_v40 = vmax.f32 %v2611_v35, 0.0  ;;  %v3466_v42 = vmax.f32 %v3464_v36, 0.0  ;;  %5612 = vmatpush1.bf16.msra.mxu0 %v20780_v33  ;;  %v20853_v21 = vld [vmem:[%s25162_s0 + $0x90] sm:$0xff]   ;;  %v20843_v24 = vld [vmem:[%s25161_s1 + $0x240] ss:$8 sps:$4 sm:$0xff]  }
 0x228   :  { %5613 = vmatprep.subr.bf16.mxu0 %v20785_v34  ;;  %v20848_v27 = vld [vmem:[%s25161_s1 + $0x254] ss:$8 sps:$4 sm:$0xff]   ;;  %v20846_v28 = vld [vmem:[%s25161_s1 + $0x250] ss:$8 sps:$4 sm:$0xff]   ;;  %v20852_v31 = vld [vmem:[%s25161_s1 + $0x264] ss:$8 sps:$4 sm:$0xff]  }
 0x229   :  { %v22793_v44 = vpack.c.bf16 %v3466_v42, %v3465_v38  ;;  %6465 = vmatpush1.bf16.msra.mxu1 %v20780_v33  ;;  %v22795_v45 = vpack.c.bf16 %v2613_v40, %v2612_v37  ;;  %v20850_v32 = vld [vmem:[%s25161_s1 + $0x260] ss:$8 sps:$4 sm:$0xff]   ;;  %v20856_v25 = vld [vmem:[%s25161_s1 + $0x274] ss:$8 sps:$4 sm:$0xff]   ;;  %v20854_v26 = vld [vmem:[%s25161_s1 + $0x270] ss:$8 sps:$4 sm:$0xff]  }
 0x22a   :  { %6466 = vmatprep.subr.bf16.mxu1 %v20785_v34  ;;  %5487 = vmatmul.mubr.bf16.gmra.mrb[28].mxu0 %v22696_v39  ;;  %v20789_v39 = vld [vmem:[%s25161_s1 + $0x140] ss:$8 sps:$4 sm:$0xff]   ;;  %v20861_v33 = vld [vmem:[%s25161_s1 + $0x84] ss:$8 sps:$4 sm:$0xff]   ;;  %v20858_v36 = vld [vmem:[%s25162_s0 + $0x90] sm:$0xff]  }
 0x22b   :  { %5614 = vmatpush1.bf16.msra.mxu0 %v20783_v43  ;;  %5641 = vmatprep.mubr.bf16.mxu0 %v25174_v1  ;;  %v20857_v34 = vld [vmem:[%s25162_s0 + $0x80] sm:$0xff]   ;;  %v20864_v37 = vld [vmem:[%s25161_s1 + $0x94] ss:$8 sps:$4 sm:$0xff]   ;;  %v20862_v38 = vld [vmem:[%s25161_s1 + $0x90] ss:$8 sps:$4 sm:$0xff]  }
 0x22c   :  { %5615 = vmatprep.subr.bf16.mxu0 %v20788_v5  ;;  %6340 = vmatmul.mubr.bf16.gmra.mrb[28].mxu1 %v22704_v41  ;;  %v20792_v41 = vld [vmem:[%s25161_s1 + $0x150] ss:$8 sps:$4 sm:$0xff]   ;;  %v20859_v35 = vld [vmem:[%s25161_s1 + $0x80] ss:$8 sps:$4 sm:$0xff]   ;;  %v20869_v40 = vld [vmem:[%s25161_s1 + $0xa4] ss:$8 sps:$4 sm:$0xff]  }
 0x22d   :  { %6467 = vmatpush1.bf16.msra.mxu1 %v20783_v43  ;;  %6494 = vmatprep.mubr.bf16.mxu1 %v25174_v1  ;;  %v20865_v42 = vld [vmem:[%s25162_s0 + $0x88] sm:$0xff]  }
 0x22e   :  { %6468 = vmatprep.subr.bf16.mxu1 %v20788_v5  ;;  %v20867_v43 = vld [vmem:[%s25161_s1 + $0xa0] ss:$8 sps:$4 sm:$0xff]   ;;  %v20866_v5 = vld [vmem:[%s25162_s0 + $0x98] sm:$0xff]  }
 0x22f   :  { %5616 = vmatpush1.bf16.msra.mxu0 %v20786_v46 }
 0x230   :  { %5617 = vmatprep.subr.bf16.mxu0 %v20791_v47 }
 0x231   :  { %6469 = vmatpush1.bf16.msra.mxu1 %v20786_v46  ;;  %v20872_v46 = vld [vmem:[%s25161_s1 + $0xb4] ss:$8 sps:$4 sm:$0xff]  }
 0x232   :  { %6470 = vmatprep.subr.bf16.mxu1 %v20791_v47  ;;  %v20870_v47 = vld [vmem:[%s25161_s1 + $0xb0] ss:$8 sps:$4 sm:$0xff]  }
 0x233   :  { %5618 = vmatpush1.bf16.msra.mxu0 %v20789_v39 }
 0x234   :  { %5619 = vmatprep.subr.bf16.mxu0 %v20794_v48 }
 0x235   :  { %6471 = vmatpush1.bf16.msra.mxu1 %v20789_v39  ;;  %v20875_v39 = vld [vmem:[%s25161_s1 + $0xc4] ss:$8 sps:$4 sm:$0xff]  }
 0x236   :  { %6472 = vmatprep.subr.bf16.mxu1 %v20794_v48  ;;  %v20873_v48 = vld [vmem:[%s25161_s1 + $0xc0] ss:$8 sps:$4 sm:$0xff]  }
 0x237   :  { %5620 = vmatpush1.bf16.msra.mxu0 %v20792_v41 }
 0x238   :  { %5621 = vmatprep.subr.bf16.mxu0 %v20797_v49 }
 0x239   :  { %6473 = vmatpush1.bf16.msra.mxu1 %v20792_v41  ;;  %v20878_v41 = vld [vmem:[%s25161_s1 + $0xd4] ss:$8 sps:$4 sm:$0xff]  }
 0x23a   :  { %6474 = vmatprep.subr.bf16.mxu1 %v20797_v49  ;;  %v20876_v49 = vld [vmem:[%s25161_s1 + $0xd0] ss:$8 sps:$4 sm:$0xff]  }
 0x23b   :  { %5622 = vmatpush1.bf16.msra.mxu0 %v20795_v50 }
 0x23c   :  { %5623 = vmatprep.subr.bf16.mxu0 %v20800_v51 }
 0x23d   :  { %6475 = vmatpush1.bf16.msra.mxu1 %v20795_v50  ;;  %v20881_v50 = vld [vmem:[%s25161_s1 + $0xe4] ss:$8 sps:$4 sm:$0xff]  }
 0x23e   :  { %6476 = vmatprep.subr.bf16.mxu1 %v20800_v51  ;;  %v20879_v51 = vld [vmem:[%s25161_s1 + $0xe0] ss:$8 sps:$4 sm:$0xff]  }
 0x23f   :  { %5624 = vmatpush1.bf16.msra.mxu0 %v20798_v52 }
 0x240   :  { %5782 = vmatprep.subr.bf16.mxu0 %v20803_v53 }
 0x241   :  { %6477 = vmatpush1.bf16.msra.mxu1 %v20798_v52  ;;  %v20884_v52 = vld [vmem:[%s25161_s1 + $0xf4] ss:$8 sps:$4 sm:$0xff]  }
 0x242   :  { %6635 = vmatprep.subr.bf16.mxu1 %v20803_v53  ;;  %5642 = vmatmul.mubr.bf16.vlgmr.msra.gmra.mrb[24].mxu0 %v20804_v54  ;;  %v20882_v53 = vld [vmem:[%s25161_s1 + $0xf0] ss:$8 sps:$4 sm:$0xff]   ;;  %v20887_v54 = vld [vmem:[%s25161_s1 + $0x4] ss:$8 sps:$4 sm:$0xff]  }
 0x243   :  { %5783 = vmatpush1.bf16.msra.mxu0 %v20801_v55  ;;  %5651 = vmatprep.mubr.bf16.mxu0 %v25174_v1 }
 0x244   :  { %6495 = vmatmul.mubr.bf16.vlgmr.msra.gmra.mrb[24].mxu1 %v20805_v56  ;;  %5784 = vmatprep.subr.bf16.mxu0 %v20808_v57  ;;  %v20885_v56 = vld [vmem:[%s25161_s1] ss:$8 sps:$4 sm:$0xff]  }
 0x245   :  { %6636 = vmatpush1.bf16.msra.mxu1 %v20801_v55  ;;  %6504 = vmatprep.mubr.bf16.mxu1 %v25174_v1  ;;  %v23026_v55 = vld [vmem:[%s25162_s0 + $0x88] sm:$0xff]  }
 0x246   :  { %6637 = vmatprep.subr.bf16.mxu1 %v20808_v57  ;;  %v23034_v57 = vld [vmem:[%s25162_s0 + $0x98] sm:$0xff]  }
 0x247   :  { %5785 = vmatpush1.bf16.msra.mxu0 %v20806_v58 }
 0x248   :  { %5786 = vmatprep.subr.bf16.mxu0 %v20811_v59 }
 0x249   :  { %6638 = vmatpush1.bf16.msra.mxu1 %v20806_v58  ;;  %v20892_v58 = vld [vmem:[%s25161_s1 + $0x14] ss:$8 sps:$4 sm:$0xff]  }
 0x24a   :  { %6639 = vmatprep.subr.bf16.mxu1 %v20811_v59  ;;  %5652 = vmatmul.mubr.bf16.gmra.mrb[28].mxu0 %v20824_v60  ;;  %v20890_v59 = vld [vmem:[%s25161_s1 + $0x10] ss:$8 sps:$4 sm:$0xff]   ;;  %v20895_v60 = vld [vmem:[%s25161_s1 + $0x24] ss:$8 sps:$4 sm:$0xff]  }
 0x24b   :  { %5787 = vmatpush1.bf16.msra.mxu0 %v20809_v61  ;;  %5814 = vmatprep.mubr.bf16.mxu0 %v25174_v1 }
 0x24c   :  { %5788 = vmatprep.subr.bf16.mxu0 %v20814_v62  ;;  %6505 = vmatmul.mubr.bf16.gmra.mrb[28].mxu1 %v20825_v63  ;;  %v20898_v63 = vld [vmem:[%s25161_s1 + $0x34] ss:$8 sps:$4 sm:$0xff]  }
 0x24d   :  { %6640 = vmatpush1.bf16.msra.mxu1 %v20809_v61  ;;  %6667 = vmatprep.mubr.bf16.mxu1 %v25174_v1  ;;  %v20908_v61 = vld [vmem:[%s25162_s0 + $0x90] sm:$0xff]  }
 0x24e   :  { %6641 = vmatprep.subr.bf16.mxu1 %v20814_v62  ;;  %v20893_v62 = vld [vmem:[%s25161_s1 + $0x20] ss:$8 sps:$4 sm:$0xff]  }
 0x24f   :  { %5789 = vmatpush1.bf16.msra.mxu0 %v20812_v0 }
 0x250   :  { %5790 = vmatprep.subr.bf16.mxu0 %v20817_v2 }
 0x251   :  { %6642 = vmatpush1.bf16.msra.mxu1 %v20812_v0  ;;  %v20909_v0 = vld [vmem:[%s25162_s0 + $0xa0] sm:$0xff]  }
 0x252   :  { %6643 = vmatprep.subr.bf16.mxu1 %v20817_v2  ;;  %v20896_v2 = vld [vmem:[%s25161_s1 + $0x30] ss:$8 sps:$4 sm:$0xff]  }
 0x253   :  { %5791 = vmatpush1.bf16.msra.mxu0 %v20815_v3 }
 0x254   :  { %5792 = vmatprep.subr.bf16.mxu0 %v20820_v4 }
 0x255   :  { %6644 = vmatpush1.bf16.msra.mxu1 %v20815_v3  ;;  %v20901_v3 = vld [vmem:[%s25161_s1 + $0x44] ss:$8 sps:$4 sm:$0xff]  }
 0x256   :  { %6645 = vmatprep.subr.bf16.mxu1 %v20820_v4  ;;  %v20899_v4 = vld [vmem:[%s25161_s1 + $0x40] ss:$8 sps:$4 sm:$0xff]  }
 0x257   :  { %5793 = vmatpush1.bf16.msra.mxu0 %v20818_v6 }
 0x258   :  { %5794 = vmatprep.subr.bf16.mxu0 %v20823_v7 }
 0x259   :  { %6646 = vmatpush1.bf16.msra.mxu1 %v20818_v6  ;;  %v20904_v6 = vld [vmem:[%s25161_s1 + $0x54] ss:$8 sps:$4 sm:$0xff]  }
 0x25a   :  { %6647 = vmatprep.subr.bf16.mxu1 %v20823_v7  ;;  %v20902_v7 = vld [vmem:[%s25161_s1 + $0x50] ss:$8 sps:$4 sm:$0xff]  }
 0x25b   :  { %5795 = vmatpush1.bf16.msra.mxu0 %v20821_v8 }
 0x25c   :  { %5796 = vmatprep.subr.bf16.mxu0 %v20828_v9 }
 0x25d   :  { %6648 = vmatpush1.bf16.msra.mxu1 %v20821_v8  ;;  %v20907_v8 = vld [vmem:[%s25161_s1 + $0x64] ss:$8 sps:$4 sm:$0xff]  }
 0x25e   :  { %6649 = vmatprep.subr.bf16.mxu1 %v20828_v9 }
 0x25f   :  { %5797 = vmatpush1.bf16.msra.mxu0 %v20826_v10 }
 0x260   :  { %5955 = vmatprep.subr.bf16.mxu0 %v20831_v11 }
 0x261   :  { %6650 = vmatpush1.bf16.msra.mxu1 %v20826_v10 }
 0x262   :  { %6808 = vmatprep.subr.bf16.mxu1 %v20831_v11  ;;  %5815 = vmatmul.mubr.bf16.vlgmr.msra.gmra.mrb[24].mxu0 %v20832_v12 }
 0x263   :  { %5956 = vmatpush1.bf16.msra.mxu0 %v20829_v13  ;;  %5824 = vmatprep.mubr.bf16.mxu0 %v25174_v1 }
 0x264   :  { %6668 = vmatmul.mubr.bf16.vlgmr.msra.gmra.mrb[24].mxu1 %v20833_v14  ;;  %5957 = vmatprep.subr.bf16.mxu0 %v20836_v15 }
 0x265   :  { %6809 = vmatpush1.bf16.msra.mxu1 %v20829_v13  ;;  %6677 = vmatprep.mubr.bf16.mxu1 %v25174_v1 }
 0x266   :  { %6810 = vmatprep.subr.bf16.mxu1 %v20836_v15  ;;  %v20905_v15 = vld [vmem:[%s25161_s1 + $0x60] ss:$8 sps:$4 sm:$0xff]  }
 0x267   :  { %5958 = vmatpush1.bf16.msra.mxu0 %v20834_v16 }
 0x268   :  { %5959 = vmatprep.subr.bf16.mxu0 %v20839_v17 }
 0x269   :  { %6811 = vmatpush1.bf16.msra.mxu1 %v20834_v16 }
 0x26a   :  { %6812 = vmatprep.subr.bf16.mxu1 %v20839_v17  ;;  %5825 = vmatmul.mubr.bf16.gmra.mrb[28].mxu0 %v20849_v18 }
 0x26b   :  { %5960 = vmatpush1.bf16.msra.mxu0 %v20837_v19  ;;  %5987 = vmatprep.mubr.bf16.mxu0 %v25174_v1 }
 0x26c   :  { %5961 = vmatprep.subr.bf16.mxu0 %v20842_v20  ;;  %6678 = vmatmul.mubr.bf16.gmra.mrb[28].mxu1 %v20853_v21 }
 0x26d   :  { %6813 = vmatpush1.bf16.msra.mxu1 %v20837_v19  ;;  %6840 = vmatprep.mubr.bf16.mxu1 %v25174_v1  ;;  %v20912_v19 = vld [vmem:[%s25161_s1 + $0x74] ss:$8 sps:$4 sm:$0xff]  }
 0x26e   :  { %6814 = vmatprep.subr.bf16.mxu1 %v20842_v20 }
 0x26f   :  { %5962 = vmatpush1.bf16.msra.mxu0 %v20840_v22 }
 0x270   :  { %5963 = vmatprep.subr.bf16.mxu0 %v20845_v23 }
 0x271   :  { %6815 = vmatpush1.bf16.msra.mxu1 %v20840_v22 }
 0x272   :  { %6816 = vmatprep.subr.bf16.mxu1 %v20845_v23  ;;  %v20910_v23 = vld [vmem:[%s25161_s1 + $0x70] ss:$8 sps:$4 sm:$0xff]  }
 0x273   :  { %5964 = vmatpush1.bf16.msra.mxu0 %v20843_v24 }
 0x274   :  { %5965 = vmatprep.subr.bf16.mxu0 %v20848_v27 }
 0x275   :  { %6817 = vmatpush1.bf16.msra.mxu1 %v20843_v24  ;;  %v20915_v24 = vld [vmem:[%s25161_s1 + $0x104] ss:$8 sps:$4 sm:$0xff]  }
 0x276   :  { %6818 = vmatprep.subr.bf16.mxu1 %v20848_v27 }
 0x277   :  { %5966 = vmatpush1.bf16.msra.mxu0 %v20846_v28 }
 0x278   :  { %5967 = vmatprep.subr.bf16.mxu0 %v20852_v31 }
 0x279   :  { %6819 = vmatpush1.bf16.msra.mxu1 %v20846_v28 }
 0x27a   :  { %6820 = vmatprep.subr.bf16.mxu1 %v20852_v31 }
 0x27b   :  { %5968 = vmatpush1.bf16.msra.mxu0 %v20850_v32 }
 0x27c   :  { %5969 = vmatprep.subr.bf16.mxu0 %v20856_v25 }
 0x27d   :  { %6821 = vmatpush1.bf16.msra.mxu1 %v20850_v32  ;;  %v20916_v32 = vld [vmem:[%s25162_s0 + $0x80] sm:$0xff]  }
 0x27e   :  { %6822 = vmatprep.subr.bf16.mxu1 %v20856_v25 }
 0x27f   :  { %5970 = vmatpush1.bf16.msra.mxu0 %v20854_v26 }
 0x280   :  { %7011 = vmatprep.subr.bf16.mxu0 %v20861_v33 }
 0x281   :  { %6823 = vmatpush1.bf16.msra.mxu1 %v20854_v26 }
 0x282   :  { %5988 = vmatmul.mubr.bf16.vlgmr.msra.gmra.mrb[24].mxu0 %v20857_v34  ;;  %7864 = vmatprep.subr.bf16.mxu1 %v20861_v33  ;;  %v20913_v34 = vld [vmem:[%s25161_s1 + $0x100] ss:$8 sps:$4 sm:$0xff]  }
 0x283   :  { %7012 = vmatpush1.bf16.msra.mxu0 %v20859_v35  ;;  %5997 = vmatprep.mubr.bf16.mxu0 %v25174_v1 }
 0x284   :  { %6841 = vmatmul.mubr.bf16.vlgmr.msra.gmra.mrb[24].mxu1 %v20858_v36  ;;  %7013 = vmatprep.subr.bf16.mxu0 %v20864_v37 }
 0x285   :  { %7865 = vmatpush1.bf16.msra.mxu1 %v20859_v35  ;;  %6850 = vmatprep.mubr.bf16.mxu1 %v25174_v1 }
 0x286   :  { %7866 = vmatprep.subr.bf16.mxu1 %v20864_v37 }
 0x287   :  { %7014 = vmatpush1.bf16.msra.mxu0 %v20862_v38 }
 0x288   :  { %7015 = vmatprep.subr.bf16.mxu0 %v20869_v40 }
 0x289   :  { %7867 = vmatpush1.bf16.msra.mxu1 %v20862_v38  ;;  %v20917_v38 = vld [vmem:[%s25162_s0 + $0x90] sm:$0xff]  }
 0x28a   :  { %5998 = vmatmul.mubr.bf16.gmra.mrb[28].mxu0 %v20865_v42  ;;  %7868 = vmatprep.subr.bf16.mxu1 %v20869_v40  ;;  %v20920_v40 = vld [vmem:[%s25161_s1 + $0x114] ss:$8 sps:$4 sm:$0xff]  }
 0x28b   :  { %7016 = vmatpush1.bf16.msra.mxu0 %v20867_v43  ;;  %7043 = vmatprep.mubr.bf16.mxu0 %v25174_v1 }
 0x28c   :  { %6851 = vmatmul.mubr.bf16.gmra.mrb[28].mxu1 %v20866_v5  ;;  %7017 = vmatprep.subr.bf16.mxu0 %v20872_v46 }
 0x28d   :  { %7869 = vmatpush1.bf16.msra.mxu1 %v20867_v43  ;;  %7896 = vmatprep.mubr.bf16.mxu1 %v25174_v1 }
 0x28e   :  { %7870 = vmatprep.subr.bf16.mxu1 %v20872_v46 }
 0x28f   :  { %7018 = vmatpush1.bf16.msra.mxu0 %v20870_v47 }
 0x290   :  { %7019 = vmatprep.subr.bf16.mxu0 %v20875_v39 }
 0x291   :  { %7871 = vmatpush1.bf16.msra.mxu1 %v20870_v47 }
 0x292   :  { %7872 = vmatprep.subr.bf16.mxu1 %v20875_v39  ;;  %v23108_v39 = vld [vmem:[%s25163_s2] ss:$0 sm:$0xff] }
 0x293   :  { %7020 = vmatpush1.bf16.msra.mxu0 %v20873_v48 }
 0x294   :  { %7021 = vmatprep.subr.bf16.mxu0 %v20878_v41 }
 0x295   :  { %7873 = vmatpush1.bf16.msra.mxu1 %v20873_v48 }
 0x296   :  { %7874 = vmatprep.subr.bf16.mxu1 %v20878_v41 }
 0x297   :  { %7022 = vmatpush1.bf16.msra.mxu0 %v20876_v49 }
 0x298   :  { %7023 = vmatprep.subr.bf16.mxu0 %v20881_v50 }
 0x299   :  { %7875 = vmatpush1.bf16.msra.mxu1 %v20876_v49  ;;  %v20918_v49 = vld [vmem:[%s25161_s1 + $0x110] ss:$8 sps:$4 sm:$0xff]  }
 0x29a   :  { %7876 = vmatprep.subr.bf16.mxu1 %v20881_v50 }
 0x29b   :  { %7024 = vmatpush1.bf16.msra.mxu0 %v20879_v51 }
 0x29c   :  { %7025 = vmatprep.subr.bf16.mxu0 %v20884_v52 }
 0x29d   :  { %7877 = vmatpush1.bf16.msra.mxu1 %v20879_v51 }
 0x29e   :  { %7878 = vmatprep.subr.bf16.mxu1 %v20884_v52  ;;  %v20923_v52 = vld [vmem:[%s25161_s1 + $0x124] ss:$8 sps:$4 sm:$0xff]  }
 0x29f   :  { %7026 = vmatpush1.bf16.msra.mxu0 %v20882_v53 }
 0x2a0   :  { %7150 = vmatprep.subr.bf16.mxu0 %v20887_v54 }
 0x2a1   :  { %7879 = vmatpush1.bf16.msra.mxu1 %v20882_v53 }
 0x2a2   :  { %8003 = vmatprep.subr.bf16.mxu1 %v20887_v54  ;;  %7044 = vmatmul.mubr.bf16.vlgmr.msra.gmra.mrb[32].mxu0 %v23026_v55 }
 0x2a3   :  { %7151 = vmatpush1.bf16.msra.mxu0 %v20885_v56  ;;  %7053 = vmatprep.mubr.bf16.mxu0 %v25174_v1 }
 0x2a4   :  { %7897 = vmatmul.mubr.bf16.vlgmr.msra.gmra.mrb[32].mxu1 %v23034_v57  ;;  %7152 = vmatprep.subr.bf16.mxu0 %v20892_v58 }
 0x2a5   :  { %8004 = vmatpush1.bf16.msra.mxu1 %v20885_v56  ;;  %7906 = vmatprep.mubr.bf16.mxu1 %v25174_v1 }
 0x2a6   :  { %8005 = vmatprep.subr.bf16.mxu1 %v20892_v58 }
 0x2a7   :  { %7153 = vmatpush1.bf16.msra.mxu0 %v20890_v59 }
 0x2a8   :  { %7154 = vmatprep.subr.bf16.mxu0 %v20895_v60 }
 0x2a9   :  { %8006 = vmatpush1.bf16.msra.mxu1 %v20890_v59  ;;  %v20921_v59 = vld [vmem:[%s25161_s1 + $0x120] ss:$8 sps:$4 sm:$0xff]  }
 0x2aa   :  { %8007 = vmatprep.subr.bf16.mxu1 %v20895_v60  ;;  %7054 = vmatmul.mubr.bf16.gmra.mrb[36].mxu0 %v20908_v61 }
 0x2ab   :  { %7155 = vmatpush1.bf16.msra.mxu0 %v20893_v62  ;;  %7182 = vmatprep.mubr.bf16.mxu0 %v25174_v1 }
 0x2ac   :  { %7156 = vmatprep.subr.bf16.mxu0 %v20898_v63  ;;  %7907 = vmatmul.mubr.bf16.gmra.mrb[36].mxu1 %v20909_v0 }
 0x2ad   :  { %8008 = vmatpush1.bf16.msra.mxu1 %v20893_v62  ;;  %8035 = vmatprep.mubr.bf16.mxu1 %v25174_v1  ;;  %v20926_v62 = vld [vmem:[%s25161_s1 + $0x134] ss:$8 sps:$4 sm:$0xff]  }
 0x2ae   :  { %8009 = vmatprep.subr.bf16.mxu1 %v20898_v63 }
 0x2af   :  { %7157 = vmatpush1.bf16.msra.mxu0 %v20896_v2 }
 0x2b0   :  { %7158 = vmatprep.subr.bf16.mxu0 %v20901_v3 }
 0x2b1   :  { %8010 = vmatpush1.bf16.msra.mxu1 %v20896_v2  ;;  %v20924_v2 = vld [vmem:[%s25161_s1 + $0x130] ss:$8 sps:$4 sm:$0xff]  }
 0x2b2   :  { %8011 = vmatprep.subr.bf16.mxu1 %v20901_v3  ;;  %v20929_v3 = vld [vmem:[%s25161_s1 + $0x144] ss:$8 sps:$4 sm:$0xff]  }
 0x2b3   :  { %7159 = vmatpush1.bf16.msra.mxu0 %v20899_v4 }
 0x2b4   :  { %7160 = vmatprep.subr.bf16.mxu0 %v20904_v6 }
 0x2b5   :  { %8012 = vmatpush1.bf16.msra.mxu1 %v20899_v4  ;;  %v4283_v9 = vpop.f32.mrb[16].mxu0  ;;  %v20932_v4 = vld [vmem:[%s25161_s1 + $0x154] ss:$8 sps:$4 sm:$0xff]  }
 0x2b6   :  { %v5136_v10 = vpop.f32.mrb[16].mxu1  ;;  %v4285_v11 = vpop.f32.mrb[17].mxu0  ;;  %8013 = vmatprep.subr.bf16.mxu1 %v20904_v6  ;;  %v20935_v6 = vld [vmem:[%s25161_s1 + $0x164] ss:$8 sps:$4 sm:$0xff]  }
 0x2b7   :  { %v4310_v12 = vmax.f32 %v4283_v9, %v4285_v11  ;;  %v5138_v13 = vpop.f32.mrb[17].mxu1  ;;  %v4287_v14 = vpop.f32.mrb[18].mxu0  ;;  %7161 = vmatpush1.bf16.msra.mxu0 %v20902_v7  ;;  %v20936_v9 = vld [vmem:[%s25161_s1 + $0x170] ss:$8 sps:$4 sm:$0xff]  }
 0x2b8   :  { %v5163_v16 = vmax.f32 %v5136_v10, %v5138_v13  ;;  %v5140_v17 = vpop.f32.mrb[18].mxu1  ;;  %v4289_v18 = vpop.f32.mrb[19].mxu0  ;;  %7162 = vmatprep.subr.bf16.mxu0 %v20907_v8  ;;  %v20941_v10 = vld [vmem:[%s25161_s1 + $0x184] ss:$8 sps:$4 sm:$0xff]   ;;  %v20942_v11 = vld [vmem:[%s25162_s0 + $0x90] sm:$0xff]  }
 0x2b9   :  { %8014 = vmatpush1.bf16.msra.mxu1 %v20902_v7  ;;  %v4311_v20 = vmax.f32 %v4287_v14, %v4289_v18  ;;  %v5142_v21 = vpop.f32.mrb[19].mxu1  ;;  %v20933_v7 = vld [vmem:[%s25161_s1 + $0x160] ss:$8 sps:$4 sm:$0xff]   ;;  %v20946_v14 = vld [vmem:[%s25161_s1 + $0x194] ss:$8 sps:$4 sm:$0xff]  }
 0x2ba   :  { %v5164_v22 = vmax.f32 %v5140_v17, %v5142_v21  ;;  %8015 = vmatprep.subr.bf16.mxu1 %v20907_v8  ;;  %v20938_v8 = vld [vmem:[%s25161_s1 + $0x174] ss:$8 sps:$4 sm:$0xff]   ;;  %v20943_v13 = vld [vmem:[%s25162_s0 + $0xa0] sm:$0xff]   ;;  %v20950_v21 = vld [vmem:[%s25161_s1 + $0x1b0] ss:$8 sps:$4 sm:$0xff]  }
 0x2bb   :  { %7163 = vmatpush1.bf16.msra.mxu0 %v20905_v15  ;;  %v20962_v17 = vld [vmem:[%s25162_s0 + $0x98] sm:$0xff]   ;;  %v20947_v18 = vld [vmem:[%s25161_s1 + $0x1a0] ss:$8 sps:$4 sm:$0xff]  }
 0x2bc   :  { %7164 = vmatprep.subr.bf16.mxu0 %v20912_v19 }
 0x2bd   :  { %8016 = vmatpush1.bf16.msra.mxu1 %v20905_v15  ;;  %v4293_v27 = vpop.f32.mrb[20].mxu0  ;;  %v20944_v15 = vld [vmem:[%s25161_s1 + $0x190] ss:$8 sps:$4 sm:$0xff]  }
 0x2be   :  { %v5146_v28 = vpop.f32.mrb[20].mxu1  ;;  %v4295_v31 = vpop.f32.mrb[21].mxu0  ;;  %8017 = vmatprep.subr.bf16.mxu1 %v20912_v19  ;;  %v20952_v19 = vld [vmem:[%s25161_s1 + $0x1b4] ss:$8 sps:$4 sm:$0xff]  }
 0x2bf   :  { %v4312_v25 = vmax.f32 %v4293_v27, %v4295_v31  ;;  %v5148_v26 = vpop.f32.mrb[21].mxu1  ;;  %v4297_v33 = vpop.f32.mrb[22].mxu0  ;;  %7165 = vmatpush1.bf16.msra.mxu0 %v20910_v23  ;;  %v20956_v27 = vld [vmem:[%s25161_s1 + $0x1d0] ss:$8 sps:$4 sm:$0xff]   ;;  %v20959_v31 = vld [vmem:[%s25161_s1 + $0x1e0] ss:$8 sps:$4 sm:$0xff]  }
 0x2c0   :  { %v5165_v35 = vmax.f32 %v5146_v28, %v5148_v26  ;;  %v5150_v36 = vpop.f32.mrb[22].mxu1  ;;  %v4299_v37 = vpop.f32.mrb[23].mxu0  ;;  %7315 = vmatprep.subr.bf16.mxu0 %v20915_v24  ;;  %v20961_v28 = vld [vmem:[%s25161_s1 + $0x1e4] ss:$8 sps:$4 sm:$0xff]  }
 0x2c1   :  { %v4314_v42 = vmax.f32 %v4310_v12, %v4312_v25  ;;  %8018 = vmatpush1.bf16.msra.mxu1 %v20910_v23  ;;  %v4313_v43 = vmax.f32 %v4297_v33, %v4299_v37  ;;  %v5152_v5 = vpop.f32.mrb[23].mxu1  ;;  %v20939_v12 = vld [vmem:[%s25161_s1 + $0x180] ss:$8 sps:$4 sm:$0xff]   ;;  %v20964_v25 = vld [vmem:[%s25161_s1 + $0x1f0] ss:$8 sps:$4 sm:$0xff]  }
 0x2c2   :  { %v5167_v46 = vmax.f32 %v5163_v16, %v5165_v35  ;;  %v5166_v47 = vmax.f32 %v5150_v36, %v5152_v5  ;;  %8168 = vmatprep.subr.bf16.mxu1 %v20915_v24  ;;  %7183 = vmatmul.mubr.bf16.vlgmr.msra.gmra.mrb[32].mxu0 %v20916_v32  ;;  %v20949_v16 = vld [vmem:[%s25161_s1 + $0x1a4] ss:$8 sps:$4 sm:$0xff]   ;;  %v20953_v23 = vld [vmem:[%s25161_s1 + $0x1c0] ss:$8 sps:$4 sm:$0xff]   ;;  %v20958_v24 = vld [vmem:[%s25161_s1 + $0x1d4] ss:$8 sps:$4 sm:$0xff]  }
 0x2c3   :  { %v4316_v48 = vadd.f32 %v23108_v39, %v4314_v42  ;;  %v4315_v41 = vmax.f32 %v4311_v20, %v4313_v43  ;;  %7316 = vmatpush1.bf16.msra.mxu0 %v20913_v34  ;;  %7192 = vmatprep.mubr.bf16.mxu0 %v25174_v1  ;;  %v20963_v20 = vld [vmem:[%s25162_s0 + $0xa8] sm:$0xff]   ;;  %v20966_v32 = vld [vmem:[%s25161_s1 + $0x1f4] ss:$8 sps:$4 sm:$0xff]   ;;  %v20972_v37 = vld [vmem:[%s25161_s1 + $0x210] ss:$8 sps:$4 sm:$0xff]  }
 0x2c4   :  { %v5169_v50 = vadd.f32 %v23108_v39, %v5167_v46  ;;  %v5168_v51 = vmax.f32 %v5164_v22, %v5166_v47  ;;  %8036 = vmatmul.mubr.bf16.vlgmr.msra.gmra.mrb[32].mxu1 %v20917_v38  ;;  %7317 = vmatprep.subr.bf16.mxu0 %v20920_v40  ;;  %v20955_v22 = vld [vmem:[%s25161_s1 + $0x1c4] ss:$8 sps:$4 sm:$0xff]   ;;  %v20970_v33 = vld [vmem:[%s25162_s0 + $0x98] sm:$0xff]   ;;  %v20975_v42 = vld [vmem:[%s25161_s1 + $0x220] ss:$8 sps:$4 sm:$0xff]  }
 0x2c5   :  { %v4317_v53 = vadd.f32 %v23108_v39, %v4315_v41  ;;  %8169 = vmatpush1.bf16.msra.mxu1 %v20913_v34  ;;  %8045 = vmatprep.mubr.bf16.mxu1 %v25174_v1  ;;  %v4318_v56 = vmax.f32 %v4316_v48, 0.0  ;;  %v20969_v26 = vld [vmem:[%s25161_s1 + $0x204] ss:$8 sps:$4 sm:$0xff]   ;;  %v20967_v34 = vld [vmem:[%s25161_s1 + $0x200] ss:$8 sps:$4 sm:$0xff]   ;;  %v20991_v5 = vld [vmem:[%s25162_s0 + $0xb0] sm:$0xff]  }
 0x2c6   :  { %v5170_v54 = vadd.f32 %v23108_v39, %v5168_v51  ;;  %8170 = vmatprep.subr.bf16.mxu1 %v20920_v40  ;;  %v5171_v60 = vmax.f32 %v5169_v50, 0.0  ;;  %v20971_v35 = vld [vmem:[%s25162_s0 + $0xa8] sm:$0xff]   ;;  %v20974_v36 = vld [vmem:[%s25161_s1 + $0x214] ss:$8 sps:$4 sm:$0xff]   ;;  %v20987_v40 = vld [vmem:[%s25162_s0 + $0xa0] sm:$0xff]  }
 0x2c7   :  { %v4319_v58 = vmax.f32 %v4317_v53, 0.0  ;;  %7318 = vmatpush1.bf16.msra.mxu0 %v20918_v49  ;;  %v20977_v38 = vld [vmem:[%s25161_s1 + $0x224] ss:$8 sps:$4 sm:$0xff]   ;;  %v20980_v43 = vld [vmem:[%s25161_s1 + $0x234] ss:$8 sps:$4 sm:$0xff]  }
 0x2c8   :  { %v5172_v61 = vmax.f32 %v5170_v54, 0.0  ;;  %7319 = vmatprep.subr.bf16.mxu0 %v20923_v52  ;;  %v20978_v46 = vld [vmem:[%s25161_s1 + $0x230] ss:$8 sps:$4 sm:$0xff]   ;;  %v20983_v47 = vld [vmem:[%s25161_s1 + $0x244] ss:$8 sps:$4 sm:$0xff]  }
 0x2c9   :  { %v23128_v63 = vpack.c.bf16 %v4319_v58, %v4318_v56  ;;  %8171 = vmatpush1.bf16.msra.mxu1 %v20918_v49  ;;  %v20981_v48 = vld [vmem:[%s25161_s1 + $0x240] ss:$8 sps:$4 sm:$0xff]   ;;  %v20986_v41 = vld [vmem:[%s25161_s1 + $0x254] ss:$8 sps:$4 sm:$0xff]   ;;  %v20984_v49 = vld [vmem:[%s25161_s1 + $0x250] ss:$8 sps:$4 sm:$0xff]  }
 0x2ca   :  { %v23130_v0 = vpack.c.bf16 %v5172_v61, %v5171_v60  ;;  %8172 = vmatprep.subr.bf16.mxu1 %v20923_v52  ;;  %7193 = vmatmul.mubr.bf16.gmra.mrb[36].mxu0 %v23026_v55  ;;  %v20927_v55 = vld [vmem:[%s25161_s1 + $0x140] ss:$8 sps:$4 sm:$0xff]   ;;  %v20990_v50 = vld [vmem:[%s25161_s1 + $0x264] ss:$8 sps:$4 sm:$0xff]   ;;  %v20994_v52 = vld [vmem:[%s25161_s1 + $0x274] ss:$8 sps:$4 sm:$0xff]  }
 0x2cb   :  { %7320 = vmatpush1.bf16.msra.mxu0 %v20921_v59  ;;  %7347 = vmatprep.mubr.bf16.mxu0 %v25174_v1  ;;  %v20988_v51 = vld [vmem:[%s25161_s1 + $0x260] ss:$8 sps:$4 sm:$0xff]   ;;  %v20992_v53 = vld [vmem:[%s25161_s1 + $0x270] ss:$8 sps:$4 sm:$0xff]   ;;  %v20999_v54 = vld [vmem:[%s25161_s1 + $0x84] ss:$8 sps:$4 sm:$0xff]  }
 0x2cc   :  { %7321 = vmatprep.subr.bf16.mxu0 %v20926_v62  ;;  %8046 = vmatmul.mubr.bf16.gmra.mrb[36].mxu1 %v23034_v57  ;;  %v20930_v57 = vld [vmem:[%s25161_s1 + $0x150] ss:$8 sps:$4 sm:$0xff]   ;;  %v20995_v56 = vld [vmem:[%s25162_s0 + $0xa0] sm:$0xff]   ;;  %v21002_v60 = vld [vmem:[%s25161_s1 + $0x94] ss:$8 sps:$4 sm:$0xff]  }
 0x2cd   :  { %8173 = vmatpush1.bf16.msra.mxu1 %v20921_v59  ;;  %8200 = vmatprep.mubr.bf16.mxu1 %v25174_v1  ;;  %v20997_v58 = vld [vmem:[%s25161_s1 + $0x80] ss:$8 sps:$4 sm:$0xff]   ;;  %v20996_v59 = vld [vmem:[%s25162_s0 + $0xb0] sm:$0xff]  }
 0x2ce   :  { %8174 = vmatprep.subr.bf16.mxu1 %v20926_v62  ;;  %v21000_v61 = vld [vmem:[%s25161_s1 + $0x90] ss:$8 sps:$4 sm:$0xff]   ;;  %v21007_v62 = vld [vmem:[%s25161_s1 + $0xa4] ss:$8 sps:$4 sm:$0xff]  }
 0x2cf   :  { %7322 = vmatpush1.bf16.msra.mxu0 %v20924_v2 }
 0x2d0   :  { %7323 = vmatprep.subr.bf16.mxu0 %v20929_v3 }
 0x2d1   :  { %8175 = vmatpush1.bf16.msra.mxu1 %v20924_v2  ;;  %v21003_v2 = vld [vmem:[%s25162_s0 + $0xa8] sm:$0xff]  }
 0x2d2   :  { %8176 = vmatprep.subr.bf16.mxu1 %v20929_v3  ;;  %v21005_v3 = vld [vmem:[%s25161_s1 + $0xa0] ss:$8 sps:$4 sm:$0xff]  }
 0x2d3   :  { %7324 = vmatpush1.bf16.msra.mxu0 %v20927_v55 }
 0x2d4   :  { %7325 = vmatprep.subr.bf16.mxu0 %v20932_v4 }
 0x2d5   :  { %8177 = vmatpush1.bf16.msra.mxu1 %v20927_v55  ;;  %v21004_v55 = vld [vmem:[%s25162_s0 + $0xb8] sm:$0xff]  }
 0x2d6   :  { %8178 = vmatprep.subr.bf16.mxu1 %v20932_v4  ;;  %v21010_v4 = vld [vmem:[%s25161_s1 + $0xb4] ss:$8 sps:$4 sm:$0xff]  }
 0x2d7   :  { %7326 = vmatpush1.bf16.msra.mxu0 %v20930_v57 }
 0x2d8   :  { %7327 = vmatprep.subr.bf16.mxu0 %v20935_v6 }
 0x2d9   :  { %8179 = vmatpush1.bf16.msra.mxu1 %v20930_v57  ;;  %v21008_v57 = vld [vmem:[%s25161_s1 + $0xb0] ss:$8 sps:$4 sm:$0xff]  }
 0x2da   :  { %8180 = vmatprep.subr.bf16.mxu1 %v20935_v6  ;;  %v21013_v6 = vld [vmem:[%s25161_s1 + $0xc4] ss:$8 sps:$4 sm:$0xff]  }
 0x2db   :  { %7328 = vmatpush1.bf16.msra.mxu0 %v20933_v7 }
 0x2dc   :  { %7329 = vmatprep.subr.bf16.mxu0 %v20938_v8 }
 0x2dd   :  { %8181 = vmatpush1.bf16.msra.mxu1 %v20933_v7  ;;  %v21011_v7 = vld [vmem:[%s25161_s1 + $0xc0] ss:$8 sps:$4 sm:$0xff]  }
 0x2de   :  { %8182 = vmatprep.subr.bf16.mxu1 %v20938_v8  ;;  %v21016_v8 = vld [vmem:[%s25161_s1 + $0xd4] ss:$8 sps:$4 sm:$0xff]  }
 0x2df   :  { %7330 = vmatpush1.bf16.msra.mxu0 %v20936_v9 }
 0x2e0   :  { %7488 = vmatprep.subr.bf16.mxu0 %v20941_v10 }
 0x2e1   :  { %8183 = vmatpush1.bf16.msra.mxu1 %v20936_v9  ;;  %v21014_v9 = vld [vmem:[%s25161_s1 + $0xd0] ss:$8 sps:$4 sm:$0xff]  }
 0x2e2   :  { %8341 = vmatprep.subr.bf16.mxu1 %v20941_v10  ;;  %7348 = vmatmul.mubr.bf16.vlgmr.msra.gmra.mrb[32].mxu0 %v20942_v11  ;;  %v21019_v10 = vld [vmem:[%s25161_s1 + $0xe4] ss:$8 sps:$4 sm:$0xff]   ;;  %v21017_v11 = vld [vmem:[%s25161_s1 + $0xe0] ss:$8 sps:$4 sm:$0xff]  }
 0x2e3   :  { %7489 = vmatpush1.bf16.msra.mxu0 %v20939_v12  ;;  %7357 = vmatprep.mubr.bf16.mxu0 %v25174_v1 }
 0x2e4   :  { %8201 = vmatmul.mubr.bf16.vlgmr.msra.gmra.mrb[32].mxu1 %v20943_v13  ;;  %7490 = vmatprep.subr.bf16.mxu0 %v20946_v14  ;;  %v21020_v13 = vld [vmem:[%s25161_s1 + $0xf0] ss:$8 sps:$4 sm:$0xff]  }
 0x2e5   :  { %8342 = vmatpush1.bf16.msra.mxu1 %v20939_v12  ;;  %8210 = vmatprep.mubr.bf16.mxu1 %v25174_v1  ;;  %v21022_v12 = vld [vmem:[%s25161_s1 + $0xf4] ss:$8 sps:$4 sm:$0xff]  }
 0x2e6   :  { %8343 = vmatprep.subr.bf16.mxu1 %v20946_v14  ;;  %v21025_v14 = vld [vmem:[%s25161_s1 + $0x4] ss:$8 sps:$4 sm:$0xff]  }
 0x2e7   :  { %7491 = vmatpush1.bf16.msra.mxu0 %v20944_v15 }
 0x2e8   :  { %7492 = vmatprep.subr.bf16.mxu0 %v20949_v16 }
 0x2e9   :  { %8344 = vmatpush1.bf16.msra.mxu1 %v20944_v15  ;;  %v23361_v15 = vld [vmem:[%s25162_s0 + $0xa8] sm:$0xff]  }
 0x2ea   :  { %8345 = vmatprep.subr.bf16.mxu1 %v20949_v16  ;;  %7358 = vmatmul.mubr.bf16.gmra.mrb[36].mxu0 %v20962_v17  ;;  %v21023_v16 = vld [vmem:[%s25161_s1] ss:$8 sps:$4 sm:$0xff]   ;;  %v23369_v17 = vld [vmem:[%s25162_s0 + $0xb8] sm:$0xff]  }
 0x2eb   :  { %7493 = vmatpush1.bf16.msra.mxu0 %v20947_v18  ;;  %7520 = vmatprep.mubr.bf16.mxu0 %v25174_v1 }
 0x2ec   :  { %7494 = vmatprep.subr.bf16.mxu0 %v20952_v19  ;;  %8211 = vmatmul.mubr.bf16.gmra.mrb[36].mxu1 %v20963_v20  ;;  %v21033_v20 = vld [vmem:[%s25161_s1 + $0x24] ss:$8 sps:$4 sm:$0xff]  }
 0x2ed   :  { %8346 = vmatpush1.bf16.msra.mxu1 %v20947_v18  ;;  %8373 = vmatprep.mubr.bf16.mxu1 %v25174_v1  ;;  %v21030_v18 = vld [vmem:[%s25161_s1 + $0x14] ss:$8 sps:$4 sm:$0xff]  }
 0x2ee   :  { %8347 = vmatprep.subr.bf16.mxu1 %v20952_v19  ;;  %v21028_v19 = vld [vmem:[%s25161_s1 + $0x10] ss:$8 sps:$4 sm:$0xff]  }
 0x2ef   :  { %7495 = vmatpush1.bf16.msra.mxu0 %v20950_v21 }
 0x2f0   :  { %7496 = vmatprep.subr.bf16.mxu0 %v20955_v22 }
 0x2f1   :  { %8348 = vmatpush1.bf16.msra.mxu1 %v20950_v21  ;;  %v21046_v21 = vld [vmem:[%s25162_s0 + $0xb0] sm:$0xff]  }
 0x2f2   :  { %8349 = vmatprep.subr.bf16.mxu1 %v20955_v22  ;;  %v21031_v22 = vld [vmem:[%s25161_s1 + $0x20] ss:$8 sps:$4 sm:$0xff]  }
 0x2f3   :  { %7497 = vmatpush1.bf16.msra.mxu0 %v20953_v23 }
 0x2f4   :  { %7498 = vmatprep.subr.bf16.mxu0 %v20958_v24 }
 0x2f5   :  { %8350 = vmatpush1.bf16.msra.mxu1 %v20953_v23  ;;  %v21036_v23 = vld [vmem:[%s25161_s1 + $0x34] ss:$8 sps:$4 sm:$0xff]  }
 0x2f6   :  { %8351 = vmatprep.subr.bf16.mxu1 %v20958_v24  ;;  %v21047_v24 = vld [vmem:[%s25162_s0 + $0xc0] sm:$0xff]  }
 0x2f7   :  { %7499 = vmatpush1.bf16.msra.mxu0 %v20956_v27 }
 0x2f8   :  { %7500 = vmatprep.subr.bf16.mxu0 %v20961_v28 }
 0x2f9   :  { %8352 = vmatpush1.bf16.msra.mxu1 %v20956_v27  ;;  %v21034_v27 = vld [vmem:[%s25161_s1 + $0x30] ss:$8 sps:$4 sm:$0xff]  }
 0x2fa   :  { %8353 = vmatprep.subr.bf16.mxu1 %v20961_v28  ;;  %v21039_v28 = vld [vmem:[%s25161_s1 + $0x44] ss:$8 sps:$4 sm:$0xff]  }
 0x2fb   :  { %7501 = vmatpush1.bf16.msra.mxu0 %v20959_v31 }
 0x2fc   :  { %7502 = vmatprep.subr.bf16.mxu0 %v20966_v32 }
 0x2fd   :  { %8354 = vmatpush1.bf16.msra.mxu1 %v20959_v31  ;;  %v21037_v31 = vld [vmem:[%s25161_s1 + $0x40] ss:$8 sps:$4 sm:$0xff]  }
 0x2fe   :  { %8355 = vmatprep.subr.bf16.mxu1 %v20966_v32  ;;  %v21042_v32 = vld [vmem:[%s25161_s1 + $0x54] ss:$8 sps:$4 sm:$0xff]  }
 0x2ff   :  { %7503 = vmatpush1.bf16.msra.mxu0 %v20964_v25 }
 0x300   :  { %7661 = vmatprep.subr.bf16.mxu0 %v20969_v26 }
 0x301   :  { %8356 = vmatpush1.bf16.msra.mxu1 %v20964_v25  ;;  %v21040_v25 = vld [vmem:[%s25161_s1 + $0x50] ss:$8 sps:$4 sm:$0xff]  }
 0x302   :  { %8514 = vmatprep.subr.bf16.mxu1 %v20969_v26  ;;  %7521 = vmatmul.mubr.bf16.vlgmr.msra.gmra.mrb[32].mxu0 %v20970_v33  ;;  %v21045_v26 = vld [vmem:[%s25161_s1 + $0x64] ss:$8 sps:$4 sm:$0xff]  }
 0x303   :  { %7662 = vmatpush1.bf16.msra.mxu0 %v20967_v34  ;;  %7530 = vmatprep.mubr.bf16.mxu0 %v25174_v1 }
 0x304   :  { %8374 = vmatmul.mubr.bf16.vlgmr.msra.gmra.mrb[32].mxu1 %v20971_v35  ;;  %7663 = vmatprep.subr.bf16.mxu0 %v20974_v36 }
 0x305   :  { %8515 = vmatpush1.bf16.msra.mxu1 %v20967_v34  ;;  %8383 = vmatprep.mubr.bf16.mxu1 %v25174_v1 }
 0x306   :  { %8516 = vmatprep.subr.bf16.mxu1 %v20974_v36 }
 0x307   :  { %7664 = vmatpush1.bf16.msra.mxu0 %v20972_v37 }
 0x308   :  { %7665 = vmatprep.subr.bf16.mxu0 %v20977_v38 }
 0x309   :  { %8517 = vmatpush1.bf16.msra.mxu1 %v20972_v37 }
 0x30a   :  { %8518 = vmatprep.subr.bf16.mxu1 %v20977_v38  ;;  %7531 = vmatmul.mubr.bf16.gmra.mrb[36].mxu0 %v20987_v40  ;;  %v21043_v38 = vld [vmem:[%s25161_s1 + $0x60] ss:$8 sps:$4 sm:$0xff]  }
 0x30b   :  { %7666 = vmatpush1.bf16.msra.mxu0 %v20975_v42  ;;  %7693 = vmatprep.mubr.bf16.mxu0 %v25174_v1 }
 0x30c   :  { %7667 = vmatprep.subr.bf16.mxu0 %v20980_v43  ;;  %8384 = vmatmul.mubr.bf16.gmra.mrb[36].mxu1 %v20991_v5 }
 0x30d   :  { %8519 = vmatpush1.bf16.msra.mxu1 %v20975_v42  ;;  %8546 = vmatprep.mubr.bf16.mxu1 %v25174_v1 }
 0x30e   :  { %8520 = vmatprep.subr.bf16.mxu1 %v20980_v43  ;;  %v21050_v43 = vld [vmem:[%s25161_s1 + $0x74] ss:$8 sps:$4 sm:$0xff]  }
 0x30f   :  { %7668 = vmatpush1.bf16.msra.mxu0 %v20978_v46 }
 0x310   :  { %7669 = vmatprep.subr.bf16.mxu0 %v20983_v47 }
 0x311   :  { %8521 = vmatpush1.bf16.msra.mxu1 %v20978_v46 }
 0x312   :  { %8522 = vmatprep.subr.bf16.mxu1 %v20983_v47 }
 0x313   :  { %7670 = vmatpush1.bf16.msra.mxu0 %v20981_v48 }
 0x314   :  { %7671 = vmatprep.subr.bf16.mxu0 %v20986_v41 }
 0x315   :  { %8523 = vmatpush1.bf16.msra.mxu1 %v20981_v48 }
 0x316   :  { %8524 = vmatprep.subr.bf16.mxu1 %v20986_v41 }
 0x317   :  { %7672 = vmatpush1.bf16.msra.mxu0 %v20984_v49 }
 0x318   :  { %7673 = vmatprep.subr.bf16.mxu0 %v20990_v50 }
 0x319   :  { %8525 = vmatpush1.bf16.msra.mxu1 %v20984_v49  ;;  %v21048_v49 = vld [vmem:[%s25161_s1 + $0x70] ss:$8 sps:$4 sm:$0xff]  }
 0x31a   :  { %8526 = vmatprep.subr.bf16.mxu1 %v20990_v50  ;;  %v21053_v50 = vld [vmem:[%s25161_s1 + $0x104] ss:$8 sps:$4 sm:$0xff]  }
 0x31b   :  { %7674 = vmatpush1.bf16.msra.mxu0 %v20988_v51 }
 0x31c   :  { %7675 = vmatprep.subr.bf16.mxu0 %v20994_v52 }
 0x31d   :  { %8527 = vmatpush1.bf16.msra.mxu1 %v20988_v51 }
 0x31e   :  { %8528 = vmatprep.subr.bf16.mxu1 %v20994_v52 }
 0x31f   :  { %7676 = vmatpush1.bf16.msra.mxu0 %v20992_v53 }
 0x320   :  { %8717 = vmatprep.subr.bf16.mxu0 %v20999_v54 }
 0x321   :  { %8529 = vmatpush1.bf16.msra.mxu1 %v20992_v53  ;;  %v21054_v53 = vld [vmem:[%s25162_s0 + $0xa0] sm:$0xff]  }
 0x322   :  { %7694 = vmatmul.mubr.bf16.vlgmr.msra.gmra.mrb[32].mxu0 %v20995_v56  ;;  %9570 = vmatprep.subr.bf16.mxu1 %v20999_v54 }
 0x323   :  { %8718 = vmatpush1.bf16.msra.mxu0 %v20997_v58  ;;  %7703 = vmatprep.mubr.bf16.mxu0 %v25174_v1 }
 0x324   :  { %8547 = vmatmul.mubr.bf16.vlgmr.msra.gmra.mrb[32].mxu1 %v20996_v59  ;;  %8719 = vmatprep.subr.bf16.mxu0 %v21002_v60  ;;  %v21051_v59 = vld [vmem:[%s25161_s1 + $0x100] ss:$8 sps:$4 sm:$0xff]  }
 0x325   :  { %9571 = vmatpush1.bf16.msra.mxu1 %v20997_v58  ;;  %8556 = vmatprep.mubr.bf16.mxu1 %v25174_v1 }
 0x326   :  { %9572 = vmatprep.subr.bf16.mxu1 %v21002_v60 }
 0x327   :  { %8720 = vmatpush1.bf16.msra.mxu0 %v21000_v61 }
 0x328   :  { %8721 = vmatprep.subr.bf16.mxu0 %v21007_v62 }
 0x329   :  { %9573 = vmatpush1.bf16.msra.mxu1 %v21000_v61 }
 0x32a   :  { %7704 = vmatmul.mubr.bf16.gmra.mrb[36].mxu0 %v21003_v2  ;;  %9574 = vmatprep.subr.bf16.mxu1 %v21007_v62  ;;  %v21055_v62 = vld [vmem:[%s25162_s0 + $0xb0] sm:$0xff]  }
 0x32b   :  { %8722 = vmatpush1.bf16.msra.mxu0 %v21005_v3  ;;  %8749 = vmatprep.mubr.bf16.mxu0 %v25174_v1  ;;  %v21058_v2 = vld [vmem:[%s25161_s1 + $0x114] ss:$8 sps:$4 sm:$0xff]  }
 0x32c   :  { %8557 = vmatmul.mubr.bf16.gmra.mrb[36].mxu1 %v21004_v55  ;;  %8723 = vmatprep.subr.bf16.mxu0 %v21010_v4 }
 0x32d   :  { %9575 = vmatpush1.bf16.msra.mxu1 %v21005_v3  ;;  %9602 = vmatprep.mubr.bf16.mxu1 %v25174_v1 }
 0x32e   :  { %9576 = vmatprep.subr.bf16.mxu1 %v21010_v4 }
 0x32f   :  { %8724 = vmatpush1.bf16.msra.mxu0 %v21008_v57 }
 0x330   :  { %8725 = vmatprep.subr.bf16.mxu0 %v21013_v6 }
 0x331   :  { %9577 = vmatpush1.bf16.msra.mxu1 %v21008_v57 }
 0x332   :  { %9578 = vmatprep.subr.bf16.mxu1 %v21013_v6 }
 0x333   :  { %8726 = vmatpush1.bf16.msra.mxu0 %v21011_v7 }
 0x334   :  { %8727 = vmatprep.subr.bf16.mxu0 %v21016_v8 }
 0x335   :  { %9579 = vmatpush1.bf16.msra.mxu1 %v21011_v7 }
 0x336   :  { %9580 = vmatprep.subr.bf16.mxu1 %v21016_v8 }
 0x337   :  { %8728 = vmatpush1.bf16.msra.mxu0 %v21014_v9 }
 0x338   :  { %8729 = vmatprep.subr.bf16.mxu0 %v21019_v10 }
 0x339   :  { %9581 = vmatpush1.bf16.msra.mxu1 %v21014_v9 }
 0x33a   :  { %9582 = vmatprep.subr.bf16.mxu1 %v21019_v10 }
 0x33b   :  { %8730 = vmatpush1.bf16.msra.mxu0 %v21017_v11 }
 0x33c   :  { %8731 = vmatprep.subr.bf16.mxu0 %v21022_v12 }
 0x33d   :  { %9583 = vmatpush1.bf16.msra.mxu1 %v21017_v11  ;;  %v21056_v11 = vld [vmem:[%s25161_s1 + $0x110] ss:$8 sps:$4 sm:$0xff]  }
 0x33e   :  { %9584 = vmatprep.subr.bf16.mxu1 %v21022_v12  ;;  %v21061_v12 = vld [vmem:[%s25161_s1 + $0x124] ss:$8 sps:$4 sm:$0xff]  }
 0x33f   :  { %8732 = vmatpush1.bf16.msra.mxu0 %v21020_v13 }
 0x340   :  { %8856 = vmatprep.subr.bf16.mxu0 %v21025_v14 }
 0x341   :  { %9585 = vmatpush1.bf16.msra.mxu1 %v21020_v13 }
 0x342   :  { %9709 = vmatprep.subr.bf16.mxu1 %v21025_v14  ;;  %8750 = vmatmul.mubr.bf16.vlgmr.msra.gmra.mrb[40].mxu0 %v23361_v15 }
 0x343   :  { %8857 = vmatpush1.bf16.msra.mxu0 %v21023_v16  ;;  %8759 = vmatprep.mubr.bf16.mxu0 %v25174_v1 }
 0x344   :  { %9603 = vmatmul.mubr.bf16.vlgmr.msra.gmra.mrb[40].mxu1 %v23369_v17  ;;  %8858 = vmatprep.subr.bf16.mxu0 %v21030_v18 }
 0x345   :  { %9710 = vmatpush1.bf16.msra.mxu1 %v21023_v16  ;;  %9612 = vmatprep.mubr.bf16.mxu1 %v25174_v1 }
 0x346   :  { %9711 = vmatprep.subr.bf16.mxu1 %v21030_v18 }
 0x347   :  { %8859 = vmatpush1.bf16.msra.mxu0 %v21028_v19 }
 0x348   :  { %8860 = vmatprep.subr.bf16.mxu0 %v21033_v20 }
 0x349   :  { %9712 = vmatpush1.bf16.msra.mxu1 %v21028_v19 }
 0x34a   :  { %9713 = vmatprep.subr.bf16.mxu1 %v21033_v20  ;;  %8760 = vmatmul.mubr.bf16.gmra.mrb[44].mxu0 %v21046_v21  ;;  %v21059_v21 = vld [vmem:[%s25161_s1 + $0x120] ss:$8 sps:$4 sm:$0xff]  }
 0x34b   :  { %8861 = vmatpush1.bf16.msra.mxu0 %v21031_v22  ;;  %8888 = vmatprep.mubr.bf16.mxu0 %v25174_v1 }
 0x34c   :  { %8862 = vmatprep.subr.bf16.mxu0 %v21036_v23  ;;  %9613 = vmatmul.mubr.bf16.gmra.mrb[44].mxu1 %v21047_v24 }
 0x34d   :  { %9714 = vmatpush1.bf16.msra.mxu1 %v21031_v22  ;;  %9741 = vmatprep.mubr.bf16.mxu1 %v25174_v1  ;;  %v21064_v22 = vld [vmem:[%s25161_s1 + $0x134] ss:$8 sps:$4 sm:$0xff]  }
 0x34e   :  { %9715 = vmatprep.subr.bf16.mxu1 %v21036_v23 }
 0x34f   :  { %8863 = vmatpush1.bf16.msra.mxu0 %v21034_v27 }
 0x350   :  { %8864 = vmatprep.subr.bf16.mxu0 %v21039_v28 }
 0x351   :  { %9716 = vmatpush1.bf16.msra.mxu1 %v21034_v27 }
 0x352   :  { %9717 = vmatprep.subr.bf16.mxu1 %v21039_v28 }
 0x353   :  { %8865 = vmatpush1.bf16.msra.mxu0 %v21037_v31 }
 0x354   :  { %8866 = vmatprep.subr.bf16.mxu0 %v21042_v32 }
 0x355   :  { %9718 = vmatpush1.bf16.msra.mxu1 %v21037_v31  ;;  %v5989_v33 = vpop.f32.mrb[24].mxu0  ;;  %v21067_v31 = vld [vmem:[%s25161_s1 + $0x144] ss:$8 sps:$4 sm:$0xff]  }
 0x356   :  { %v5991_v34 = vpop.f32.mrb[25].mxu0  ;;  %9719 = vmatprep.subr.bf16.mxu1 %v21042_v32  ;;  %v21070_v32 = vld [vmem:[%s25161_s1 + $0x154] ss:$8 sps:$4 sm:$0xff]  }
 0x357   :  { %v6842_v35 = vpop.f32.mrb[24].mxu1  ;;  %v6016_v36 = vmax.f32 %v5989_v33, %v5991_v34  ;;  %v5993_v37 = vpop.f32.mrb[26].mxu0  ;;  %8867 = vmatpush1.bf16.msra.mxu0 %v21040_v25  ;;  %v21076_v33 = vld [vmem:[%s25161_s1 + $0x174] ss:$8 sps:$4 sm:$0xff]   ;;  %v21074_v34 = vld [vmem:[%s25161_s1 + $0x170] ss:$8 sps:$4 sm:$0xff]  }
 0x358   :  { %v6844_v40 = vpop.f32.mrb[25].mxu1  ;;  %v5995_v42 = vpop.f32.mrb[27].mxu0  ;;  %8868 = vmatprep.subr.bf16.mxu0 %v21045_v26 }
 0x359   :  { %v6869_v5 = vmax.f32 %v6842_v35, %v6844_v40  ;;  %v6846_v46 = vpop.f32.mrb[26].mxu1  ;;  %9720 = vmatpush1.bf16.msra.mxu1 %v21040_v25  ;;  %v6017_v47 = vmax.f32 %v5993_v37, %v5995_v42  ;;  %v21073_v25 = vld [vmem:[%s25161_s1 + $0x164] ss:$8 sps:$4 sm:$0xff]   ;;  %v21077_v37 = vld [vmem:[%s25161_s1 + $0x180] ss:$8 sps:$4 sm:$0xff]  }
 0x35a   :  { %v6848_v48 = vpop.f32.mrb[27].mxu1  ;;  %9721 = vmatprep.subr.bf16.mxu1 %v21045_v26  ;;  %v21071_v26 = vld [vmem:[%s25161_s1 + $0x160] ss:$8 sps:$4 sm:$0xff]   ;;  %v21079_v35 = vld [vmem:[%s25161_s1 + $0x184] ss:$8 sps:$4 sm:$0xff]  }
 0x35b   :  { %v6870_v41 = vmax.f32 %v6846_v46, %v6848_v48  ;;  %8869 = vmatpush1.bf16.msra.mxu0 %v21043_v38  ;;  %v21084_v40 = vld [vmem:[%s25161_s1 + $0x194] ss:$8 sps:$4 sm:$0xff]   ;;  %v21082_v42 = vld [vmem:[%s25161_s1 + $0x190] ss:$8 sps:$4 sm:$0xff]   ;;  %v21085_v46 = vld [vmem:[%s25161_s1 + $0x1a0] ss:$8 sps:$4 sm:$0xff]  }
 0x35c   :  { %8870 = vmatprep.subr.bf16.mxu0 %v21050_v43  ;;  %v21101_v48 = vld [vmem:[%s25162_s0 + $0xc8] sm:$0xff]  }
 0x35d   :  { %9722 = vmatpush1.bf16.msra.mxu1 %v21043_v38  ;;  %v5999_v51 = vpop.f32.mrb[28].mxu0  ;;  %v21081_v38 = vld [vmem:[%s25162_s0 + $0xc0] sm:$0xff]  }
 0x35e   :  { %v6001_v52 = vpop.f32.mrb[29].mxu0  ;;  %9723 = vmatprep.subr.bf16.mxu1 %v21050_v43  ;;  %v21087_v43 = vld [vmem:[%s25161_s1 + $0x1a4] ss:$8 sps:$4 sm:$0xff]  }
 0x35f   :  { %v6852_v54 = vpop.f32.mrb[28].mxu1  ;;  %v6018_v56 = vmax.f32 %v5999_v51, %v6001_v52  ;;  %v6003_v58 = vpop.f32.mrb[30].mxu0  ;;  %8871 = vmatpush1.bf16.msra.mxu0 %v21048_v49  ;;  %v21096_v51 = vld [vmem:[%s25161_s1 + $0x1d4] ss:$8 sps:$4 sm:$0xff]   ;;  %v21094_v52 = vld [vmem:[%s25161_s1 + $0x1d0] ss:$8 sps:$4 sm:$0xff]  }
 0x360   :  { %v6854_v60 = vpop.f32.mrb[29].mxu1  ;;  %v6005_v61 = vpop.f32.mrb[31].mxu0  ;;  %9021 = vmatprep.subr.bf16.mxu0 %v21053_v50 }
 0x361   :  { %v6020_v3 = vmax.f32 %v6016_v36, %v6018_v56  ;;  %v6871_v55 = vmax.f32 %v6852_v54, %v6854_v60  ;;  %v6856_v4 = vpop.f32.mrb[30].mxu1  ;;  %9724 = vmatpush1.bf16.msra.mxu1 %v21048_v49  ;;  %v6019_v57 = vmax.f32 %v6003_v58, %v6005_v61  ;;  %v21080_v36 = vld [vmem:[%s25162_s0 + $0xb0] sm:$0xff]   ;;  %v21093_v49 = vld [vmem:[%s25161_s1 + $0x1c4] ss:$8 sps:$4 sm:$0xff]   ;;  %v21097_v54 = vld [vmem:[%s25161_s1 + $0x1e0] ss:$8 sps:$4 sm:$0xff]  }
 0x362   :  { %v6858_v6 = vpop.f32.mrb[31].mxu1  ;;  %9874 = vmatprep.subr.bf16.mxu1 %v21053_v50  ;;  %8889 = vmatmul.mubr.bf16.vlgmr.msra.gmra.mrb[40].mxu0 %v21054_v53  ;;  %v21091_v50 = vld [vmem:[%s25161_s1 + $0x1c0] ss:$8 sps:$4 sm:$0xff]   ;;  %v21099_v53 = vld [vmem:[%s25161_s1 + $0x1e4] ss:$8 sps:$4 sm:$0xff]   ;;  %v21108_v60 = vld [vmem:[%s25162_s0 + $0xb8] sm:$0xff]  }
 0x363   :  { %v6022_v7 = vadd.f32 %v23108_v39, %v6020_v3  ;;  %v6873_v8 = vmax.f32 %v6869_v5, %v6871_v55  ;;  %v6021_v9 = vmax.f32 %v6017_v47, %v6019_v57  ;;  %v6872_v10 = vmax.f32 %v6856_v4, %v6858_v6  ;;  %9022 = vmatpush1.bf16.msra.mxu0 %v21051_v59  ;;  %v21100_v5 = vld [vmem:[%s25162_s0 + $0xb8] sm:$0xff]   ;;  %v21105_v61 = vld [vmem:[%s25161_s1 + $0x200] ss:$8 sps:$4 sm:$0xff]   ;;  %v21115_v55 = vld [vmem:[%s25161_s1 + $0x224] ss:$8 sps:$4 sm:$0xff]  }
 0x364   :  { %9742 = vmatmul.mubr.bf16.vlgmr.msra.gmra.mrb[40].mxu1 %v21055_v62  ;;  %9023 = vmatprep.subr.bf16.mxu0 %v21058_v2  ;;  %v21090_v47 = vld [vmem:[%s25161_s1 + $0x1b4] ss:$8 sps:$4 sm:$0xff]   ;;  %v21102_v58 = vld [vmem:[%s25161_s1 + $0x1f0] ss:$8 sps:$4 sm:$0xff]   ;;  %v21109_v62 = vld [vmem:[%s25162_s0 + $0xc8] sm:$0xff]  }
 0x365   :  { %v6875_v13 = vadd.f32 %v23108_v39, %v6873_v8  ;;  %v6023_v14 = vadd.f32 %v23108_v39, %v6021_v9  ;;  %v6874_v16 = vmax.f32 %v6870_v41, %v6872_v10  ;;  %9875 = vmatpush1.bf16.msra.mxu1 %v21051_v59  ;;  %8898 = vmatprep.mubr.bf16.mxu0 %v25174_v1  ;;  %v6024_v18 = vmax.f32 %v6022_v7, 0.0  ;;  %v21088_v41 = vld [vmem:[%s25161_s1 + $0x1b0] ss:$8 sps:$4 sm:$0xff]   ;;  %v21104_v56 = vld [vmem:[%s25161_s1 + $0x1f4] ss:$8 sps:$4 sm:$0xff]   ;;  %v21125_v4 = vld [vmem:[%s25162_s0 + $0xc0] sm:$0xff]  }
 0x366   :  { %9876 = vmatprep.subr.bf16.mxu1 %v21058_v2  ;;  %9751 = vmatprep.mubr.bf16.mxu1 %v25174_v1  ;;  %v21107_v59 = vld [vmem:[%s25161_s1 + $0x204] ss:$8 sps:$4 sm:$0xff]   ;;  %v21112_v2 = vld [vmem:[%s25161_s1 + $0x214] ss:$8 sps:$4 sm:$0xff]   ;;  %v21110_v3 = vld [vmem:[%s25161_s1 + $0x210] ss:$8 sps:$4 sm:$0xff]  }
 0x367   :  { %v6025_v19 = vmax.f32 %v6023_v14, 0.0  ;;  %v6876_v20 = vadd.f32 %v23108_v39, %v6874_v16  ;;  %9024 = vmatpush1.bf16.msra.mxu0 %v21056_v11  ;;  %v6877_v23 = vmax.f32 %v6875_v13, 0.0  ;;  %v21062_v39 = vld [vmem:[%s25161_s1 + $0x130] ss:$8 sps:$4 sm:$0xff]   ;;  %v21113_v57 = vld [vmem:[%s25161_s1 + $0x220] ss:$8 sps:$4 sm:$0xff]  }
 0x368   :  { %9025 = vmatprep.subr.bf16.mxu0 %v21061_v12  ;;  %v21118_v6 = vld [vmem:[%s25161_s1 + $0x234] ss:$8 sps:$4 sm:$0xff]   ;;  %v21116_v8 = vld [vmem:[%s25161_s1 + $0x230] ss:$8 sps:$4 sm:$0xff]   ;;  %v21121_v9 = vld [vmem:[%s25161_s1 + $0x244] ss:$8 sps:$4 sm:$0xff]  }
 0x369   :  { %v23458_v24 = vpack.c.bf16 %v6025_v19, %v6024_v18  ;;  %v6878_v27 = vmax.f32 %v6876_v20, 0.0  ;;  %9877 = vmatpush1.bf16.msra.mxu1 %v21056_v11  ;;  %v21129_v7 = vld [vmem:[%s25162_s0 + $0xd0] sm:$0xff]   ;;  %v21119_v10 = vld [vmem:[%s25161_s1 + $0x240] ss:$8 sps:$4 sm:$0xff]   ;;  %v21128_v13 = vld [vmem:[%s25161_s1 + $0x264] ss:$8 sps:$4 sm:$0xff]  }
 0x36a   :  { %9878 = vmatprep.subr.bf16.mxu1 %v21061_v12  ;;  %8899 = vmatmul.mubr.bf16.gmra.mrb[44].mxu0 %v23361_v15  ;;  %v21065_v15 = vld [vmem:[%s25161_s1 + $0x140] ss:$8 sps:$4 sm:$0xff]   ;;  %v21124_v11 = vld [vmem:[%s25161_s1 + $0x254] ss:$8 sps:$4 sm:$0xff]   ;;  %v21122_v12 = vld [vmem:[%s25161_s1 + $0x250] ss:$8 sps:$4 sm:$0xff]  }
 0x36b   :  { %v23461_v28 = vpack.c.bf16 %v6878_v27, %v6877_v23  ;;  %9026 = vmatpush1.bf16.msra.mxu0 %v21059_v21  ;;  %9053 = vmatprep.mubr.bf16.mxu0 %v25174_v1  ;;  %v21126_v14 = vld [vmem:[%s25161_s1 + $0x260] ss:$8 sps:$4 sm:$0xff]   ;;  %v21132_v16 = vld [vmem:[%s25161_s1 + $0x274] ss:$8 sps:$4 sm:$0xff]   ;;  %v21130_v18 = vld [vmem:[%s25161_s1 + $0x270] ss:$8 sps:$4 sm:$0xff]  }
 0x36c   :  { %9027 = vmatprep.subr.bf16.mxu0 %v21064_v22  ;;  %9752 = vmatmul.mubr.bf16.gmra.mrb[44].mxu1 %v23369_v17  ;;  %v21068_v17 = vld [vmem:[%s25161_s1 + $0x150] ss:$8 sps:$4 sm:$0xff]   ;;  %v21137_v19 = vld [vmem:[%s25161_s1 + $0x84] ss:$8 sps:$4 sm:$0xff]   ;;  %v21140_v23 = vld [vmem:[%s25161_s1 + $0x94] ss:$8 sps:$4 sm:$0xff]  }
 0x36d   :  { %9879 = vmatpush1.bf16.msra.mxu1 %v21059_v21  ;;  %9906 = vmatprep.mubr.bf16.mxu1 %v25174_v1  ;;  %v21133_v20 = vld [vmem:[%s25162_s0 + $0xc0] sm:$0xff]   ;;  %v21138_v27 = vld [vmem:[%s25161_s1 + $0x90] ss:$8 sps:$4 sm:$0xff]  }
 0x36e   :  { %9880 = vmatprep.subr.bf16.mxu1 %v21064_v22  ;;  %v21135_v21 = vld [vmem:[%s25161_s1 + $0x80] ss:$8 sps:$4 sm:$0xff]   ;;  %v21134_v22 = vld [vmem:[%s25162_s0 + $0xd0] sm:$0xff]  }
 0x36f   :  { %9028 = vmatpush1.bf16.msra.mxu0 %v21062_v39 }
 0x370   :  { %9029 = vmatprep.subr.bf16.mxu0 %v21067_v31 }
 0x371   :  { %9881 = vmatpush1.bf16.msra.mxu1 %v21062_v39  ;;  %v21145_v39 = vld [vmem:[%s25161_s1 + $0xa4] ss:$8 sps:$4 sm:$0xff]  }
 0x372   :  { %9882 = vmatprep.subr.bf16.mxu1 %v21067_v31  ;;  %v21141_v31 = vld [vmem:[%s25162_s0 + $0xc8] sm:$0xff]  }
 0x373   :  { %9030 = vmatpush1.bf16.msra.mxu0 %v21065_v15 }
 0x374   :  { %9031 = vmatprep.subr.bf16.mxu0 %v21070_v32 }
 0x375   :  { %9883 = vmatpush1.bf16.msra.mxu1 %v21065_v15  ;;  %v21143_v15 = vld [vmem:[%s25161_s1 + $0xa0] ss:$8 sps:$4 sm:$0xff]  }
 0x376   :  { %9884 = vmatprep.subr.bf16.mxu1 %v21070_v32  ;;  %v21142_v32 = vld [vmem:[%s25162_s0 + $0xd8] sm:$0xff]  }
 0x377   :  { %9032 = vmatpush1.bf16.msra.mxu0 %v21068_v17 }
 0x378   :  { %9033 = vmatprep.subr.bf16.mxu0 %v21073_v25 }
 0x379   :  { %9885 = vmatpush1.bf16.msra.mxu1 %v21068_v17  ;;  %v21148_v17 = vld [vmem:[%s25161_s1 + $0xb4] ss:$8 sps:$4 sm:$0xff]  }
 0x37a   :  { %9886 = vmatprep.subr.bf16.mxu1 %v21073_v25  ;;  %v21146_v25 = vld [vmem:[%s25161_s1 + $0xb0] ss:$8 sps:$4 sm:$0xff]  }
 0x37b   :  { %9034 = vmatpush1.bf16.msra.mxu0 %v21071_v26 }
 0x37c   :  { %9035 = vmatprep.subr.bf16.mxu0 %v21076_v33 }
 0x37d   :  { %9887 = vmatpush1.bf16.msra.mxu1 %v21071_v26  ;;  %v21151_v26 = vld [vmem:[%s25161_s1 + $0xc4] ss:$8 sps:$4 sm:$0xff]  }
 0x37e   :  { %9888 = vmatprep.subr.bf16.mxu1 %v21076_v33  ;;  %v21149_v33 = vld [vmem:[%s25161_s1 + $0xc0] ss:$8 sps:$4 sm:$0xff]  }
 0x37f   :  { %9036 = vmatpush1.bf16.msra.mxu0 %v21074_v34 }
 0x380   :  { %9194 = vmatprep.subr.bf16.mxu0 %v21079_v35 }
 0x381   :  { %9889 = vmatpush1.bf16.msra.mxu1 %v21074_v34  ;;  %v21154_v34 = vld [vmem:[%s25161_s1 + $0xd4] ss:$8 sps:$4 sm:$0xff]  }
 0x382   :  { %10047 = vmatprep.subr.bf16.mxu1 %v21079_v35  ;;  %9054 = vmatmul.mubr.bf16.vlgmr.msra.gmra.mrb[40].mxu0 %v21080_v36  ;;  %v21152_v35 = vld [vmem:[%s25161_s1 + $0xd0] ss:$8 sps:$4 sm:$0xff]   ;;  %v21157_v36 = vld [vmem:[%s25161_s1 + $0xe4] ss:$8 sps:$4 sm:$0xff]  }
 0x383   :  { %9195 = vmatpush1.bf16.msra.mxu0 %v21077_v37  ;;  %9063 = vmatprep.mubr.bf16.mxu0 %v25174_v1 }
 0x384   :  { %9907 = vmatmul.mubr.bf16.vlgmr.msra.gmra.mrb[40].mxu1 %v21081_v38  ;;  %9196 = vmatprep.subr.bf16.mxu0 %v21084_v40  ;;  %v21160_v38 = vld [vmem:[%s25161_s1 + $0xf4] ss:$8 sps:$4 sm:$0xff]  }
 0x385   :  { %10048 = vmatpush1.bf16.msra.mxu1 %v21077_v37  ;;  %9916 = vmatprep.mubr.bf16.mxu1 %v25174_v1  ;;  %v21155_v37 = vld [vmem:[%s25161_s1 + $0xe0] ss:$8 sps:$4 sm:$0xff]  }
 0x386   :  { %10049 = vmatprep.subr.bf16.mxu1 %v21084_v40  ;;  %v21158_v40 = vld [vmem:[%s25161_s1 + $0xf0] ss:$8 sps:$4 sm:$0xff]  }
 0x387   :  { %9197 = vmatpush1.bf16.msra.mxu0 %v21082_v42 }
 0x388   :  { %9198 = vmatprep.subr.bf16.mxu0 %v21087_v43 }
 0x389   :  { %10050 = vmatpush1.bf16.msra.mxu1 %v21082_v42  ;;  %v21163_v42 = vld [vmem:[%s25161_s1 + $0x4] ss:$8 sps:$4 sm:$0xff]  }
 0x38a   :  { %10051 = vmatprep.subr.bf16.mxu1 %v21087_v43  ;;  %9064 = vmatmul.mubr.bf16.gmra.mrb[44].mxu0 %v21100_v5  ;;  %v23691_v43 = vld [vmem:[%s25162_s0 + $0xc8] sm:$0xff]  }
 0x38b   :  { %9199 = vmatpush1.bf16.msra.mxu0 %v21085_v46  ;;  %9226 = vmatprep.mubr.bf16.mxu0 %v25174_v1  ;;  %v21161_v5 = vld [vmem:[%s25161_s1] ss:$8 sps:$4 sm:$0xff]  }
 0x38c   :  { %9200 = vmatprep.subr.bf16.mxu0 %v21090_v47  ;;  %9917 = vmatmul.mubr.bf16.gmra.mrb[44].mxu1 %v21101_v48  ;;  %v21166_v48 = vld [vmem:[%s25161_s1 + $0x10] ss:$8 sps:$4 sm:$0xff]  }
 0x38d   :  { %10052 = vmatpush1.bf16.msra.mxu1 %v21085_v46  ;;  %10079 = vmatprep.mubr.bf16.mxu1 %v25174_v1  ;;  %v23699_v46 = vld [vmem:[%s25162_s0 + $0xd8] sm:$0xff]  }
 0x38e   :  { %10053 = vmatprep.subr.bf16.mxu1 %v21090_v47  ;;  %v21168_v47 = vld [vmem:[%s25161_s1 + $0x14] ss:$8 sps:$4 sm:$0xff]  }
 0x38f   :  { %9201 = vmatpush1.bf16.msra.mxu0 %v21088_v41 }
 0x390   :  { %9202 = vmatprep.subr.bf16.mxu0 %v21093_v49 }
 0x391   :  { %10054 = vmatpush1.bf16.msra.mxu1 %v21088_v41  ;;  %v21171_v41 = vld [vmem:[%s25161_s1 + $0x24] ss:$8 sps:$4 sm:$0xff]  }
 0x392   :  { %10055 = vmatprep.subr.bf16.mxu1 %v21093_v49  ;;  %v21169_v49 = vld [vmem:[%s25161_s1 + $0x20] ss:$8 sps:$4 sm:$0xff]  }
 0x393   :  { %9203 = vmatpush1.bf16.msra.mxu0 %v21091_v50 }
 0x394   :  { %9204 = vmatprep.subr.bf16.mxu0 %v21096_v51 }
 0x395   :  { %10056 = vmatpush1.bf16.msra.mxu1 %v21091_v50  ;;  %v21184_v50 = vld [vmem:[%s25162_s0 + $0xd0] sm:$0xff]  }
 0x396   :  { %10057 = vmatprep.subr.bf16.mxu1 %v21096_v51  ;;  %v21174_v51 = vld [vmem:[%s25161_s1 + $0x34] ss:$8 sps:$4 sm:$0xff]  }
 0x397   :  { %9205 = vmatpush1.bf16.msra.mxu0 %v21094_v52 }
 0x398   :  { %9206 = vmatprep.subr.bf16.mxu0 %v21099_v53 }
 0x399   :  { %10058 = vmatpush1.bf16.msra.mxu1 %v21094_v52  ;;  %v21185_v52 = vld [vmem:[%s25162_s0 + $0xe0] sm:$0xff]  }
 0x39a   :  { %10059 = vmatprep.subr.bf16.mxu1 %v21099_v53  ;;  %v21172_v53 = vld [vmem:[%s25161_s1 + $0x30] ss:$8 sps:$4 sm:$0xff]  }
 0x39b   :  { %9207 = vmatpush1.bf16.msra.mxu0 %v21097_v54 }
 0x39c   :  { %9208 = vmatprep.subr.bf16.mxu0 %v21104_v56 }
 0x39d   :  { %10060 = vmatpush1.bf16.msra.mxu1 %v21097_v54  ;;  %v21177_v54 = vld [vmem:[%s25161_s1 + $0x44] ss:$8 sps:$4 sm:$0xff]  }
 0x39e   :  { %10061 = vmatprep.subr.bf16.mxu1 %v21104_v56  ;;  %v21175_v56 = vld [vmem:[%s25161_s1 + $0x40] ss:$8 sps:$4 sm:$0xff]  }
 0x39f   :  { %9209 = vmatpush1.bf16.msra.mxu0 %v21102_v58 }
 0x3a0   :  { %9367 = vmatprep.subr.bf16.mxu0 %v21107_v59 }
 0x3a1   :  { %10062 = vmatpush1.bf16.msra.mxu1 %v21102_v58  ;;  %v21180_v58 = vld [vmem:[%s25161_s1 + $0x54] ss:$8 sps:$4 sm:$0xff]  }
 0x3a2   :  { %10220 = vmatprep.subr.bf16.mxu1 %v21107_v59  ;;  %9227 = vmatmul.mubr.bf16.vlgmr.msra.gmra.mrb[40].mxu0 %v21108_v60  ;;  %v21178_v59 = vld [vmem:[%s25161_s1 + $0x50] ss:$8 sps:$4 sm:$0xff]   ;;  %v21183_v60 = vld [vmem:[%s25161_s1 + $0x64] ss:$8 sps:$4 sm:$0xff]  }
 0x3a3   :  { %9368 = vmatpush1.bf16.msra.mxu0 %v21105_v61  ;;  %9236 = vmatprep.mubr.bf16.mxu0 %v25174_v1 }
 0x3a4   :  { %10080 = vmatmul.mubr.bf16.vlgmr.msra.gmra.mrb[40].mxu1 %v21109_v62  ;;  %9369 = vmatprep.subr.bf16.mxu0 %v21112_v2  ;;  %v21181_v62 = vld [vmem:[%s25161_s1 + $0x60] ss:$8 sps:$4 sm:$0xff]  }
 0x3a5   :  { %10221 = vmatpush1.bf16.msra.mxu1 %v21105_v61  ;;  %10089 = vmatprep.mubr.bf16.mxu1 %v25174_v1 }
 0x3a6   :  { %10222 = vmatprep.subr.bf16.mxu1 %v21112_v2 }
 0x3a7   :  { %9370 = vmatpush1.bf16.msra.mxu0 %v21110_v3 }
 0x3a8   :  { %9371 = vmatprep.subr.bf16.mxu0 %v21115_v55 }
 0x3a9   :  { %10223 = vmatpush1.bf16.msra.mxu1 %v21110_v3  ;;  %v21188_v3 = vld [vmem:[%s25161_s1 + $0x74] ss:$8 sps:$4 sm:$0xff]  }
 0x3aa   :  { %10224 = vmatprep.subr.bf16.mxu1 %v21115_v55  ;;  %9237 = vmatmul.mubr.bf16.gmra.mrb[44].mxu0 %v21125_v4 }
 0x3ab   :  { %9372 = vmatpush1.bf16.msra.mxu0 %v21113_v57  ;;  %9399 = vmatprep.mubr.bf16.mxu0 %v25174_v1 }
 0x3ac   :  { %9373 = vmatprep.subr.bf16.mxu0 %v21118_v6  ;;  %10090 = vmatmul.mubr.bf16.gmra.mrb[44].mxu1 %v21129_v7 }
 0x3ad   :  { %10225 = vmatpush1.bf16.msra.mxu1 %v21113_v57  ;;  %10252 = vmatprep.mubr.bf16.mxu1 %v25174_v1 }
 0x3ae   :  { %10226 = vmatprep.subr.bf16.mxu1 %v21118_v6 }
 0x3af   :  { %9374 = vmatpush1.bf16.msra.mxu0 %v21116_v8 }
 0x3b0   :  { %9375 = vmatprep.subr.bf16.mxu0 %v21121_v9 }
 0x3b1   :  { %10227 = vmatpush1.bf16.msra.mxu1 %v21116_v8 }
 0x3b2   :  { %10228 = vmatprep.subr.bf16.mxu1 %v21121_v9 }
 0x3b3   :  { %9376 = vmatpush1.bf16.msra.mxu0 %v21119_v10 }
 0x3b4   :  { %9377 = vmatprep.subr.bf16.mxu0 %v21124_v11 }
 0x3b5   :  { %10229 = vmatpush1.bf16.msra.mxu1 %v21119_v10 }
 0x3b6   :  { %10230 = vmatprep.subr.bf16.mxu1 %v21124_v11  ;;  %v21186_v11 = vld [vmem:[%s25161_s1 + $0x70] ss:$8 sps:$4 sm:$0xff]  }
 0x3b7   :  { %9378 = vmatpush1.bf16.msra.mxu0 %v21122_v12 }
 0x3b8   :  { %9379 = vmatprep.subr.bf16.mxu0 %v21128_v13 }
 0x3b9   :  { %10231 = vmatpush1.bf16.msra.mxu1 %v21122_v12 }
 0x3ba   :  { %10232 = vmatprep.subr.bf16.mxu1 %v21128_v13  ;;  %v21191_v13 = vld [vmem:[%s25161_s1 + $0x104] ss:$8 sps:$4 sm:$0xff]  }
 0x3bb   :  { %9380 = vmatpush1.bf16.msra.mxu0 %v21126_v14 }
 0x3bc   :  { %9381 = vmatprep.subr.bf16.mxu0 %v21132_v16 }
 0x3bd   :  { %10233 = vmatpush1.bf16.msra.mxu1 %v21126_v14 }
 0x3be   :  { %10234 = vmatprep.subr.bf16.mxu1 %v21132_v16 }
 0x3bf   :  { %9382 = vmatpush1.bf16.msra.mxu0 %v21130_v18 }
 0x3c0   :  { %10423 = vmatprep.subr.bf16.mxu0 %v21137_v19 }
 0x3c1   :  { %10235 = vmatpush1.bf16.msra.mxu1 %v21130_v18  ;;  %v21189_v18 = vld [vmem:[%s25161_s1 + $0x100] ss:$8 sps:$4 sm:$0xff]  }
 0x3c2   :  { %9400 = vmatmul.mubr.bf16.vlgmr.msra.gmra.mrb[40].mxu0 %v21133_v20  ;;  %11276 = vmatprep.subr.bf16.mxu1 %v21137_v19  ;;  %v21192_v19 = vld [vmem:[%s25162_s0 + $0xc0] sm:$0xff]  }
 0x3c3   :  { %10424 = vmatpush1.bf16.msra.mxu0 %v21135_v21  ;;  %9409 = vmatprep.mubr.bf16.mxu0 %v25174_v1 }
 0x3c4   :  { %10253 = vmatmul.mubr.bf16.vlgmr.msra.gmra.mrb[40].mxu1 %v21134_v22  ;;  %10425 = vmatprep.subr.bf16.mxu0 %v21140_v23  ;;  %v21196_v22 = vld [vmem:[%s25161_s1 + $0x114] ss:$8 sps:$4 sm:$0xff]  }
 0x3c5   :  { %11277 = vmatpush1.bf16.msra.mxu1 %v21135_v21  ;;  %10262 = vmatprep.mubr.bf16.mxu1 %v25174_v1  ;;  %v21193_v21 = vld [vmem:[%s25162_s0 + $0xd0] sm:$0xff]  }
 0x3c6   :  { %11278 = vmatprep.subr.bf16.mxu1 %v21140_v23 }
 0x3c7   :  { %10426 = vmatpush1.bf16.msra.mxu0 %v21138_v27 }
 0x3c8   :  { %10427 = vmatprep.subr.bf16.mxu0 %v21145_v39 }
 0x3c9   :  { %11279 = vmatpush1.bf16.msra.mxu1 %v21138_v27 }
 0x3ca   :  { %9410 = vmatmul.mubr.bf16.gmra.mrb[44].mxu0 %v21141_v31  ;;  %11280 = vmatprep.subr.bf16.mxu1 %v21145_v39 }
 0x3cb   :  { %10428 = vmatpush1.bf16.msra.mxu0 %v21143_v15  ;;  %10455 = vmatprep.mubr.bf16.mxu0 %v25174_v1 }
 0x3cc   :  { %10263 = vmatmul.mubr.bf16.gmra.mrb[44].mxu1 %v21142_v32  ;;  %10429 = vmatprep.subr.bf16.mxu0 %v21148_v17 }
 0x3cd   :  { %11281 = vmatpush1.bf16.msra.mxu1 %v21143_v15  ;;  %11308 = vmatprep.mubr.bf16.mxu1 %v25174_v1 }
 0x3ce   :  { %11282 = vmatprep.subr.bf16.mxu1 %v21148_v17 }
 0x3cf   :  { %10430 = vmatpush1.bf16.msra.mxu0 %v21146_v25 }
 0x3d0   :  { %10431 = vmatprep.subr.bf16.mxu0 %v21151_v26 }
 0x3d1   :  { %11283 = vmatpush1.bf16.msra.mxu1 %v21146_v25 }
 0x3d2   :  { %11284 = vmatprep.subr.bf16.mxu1 %v21151_v26 }
 0x3d3   :  { %10432 = vmatpush1.bf16.msra.mxu0 %v21149_v33 }
 0x3d4   :  { %10433 = vmatprep.subr.bf16.mxu0 %v21154_v34 }
 0x3d5   :  { %11285 = vmatpush1.bf16.msra.mxu1 %v21149_v33 }
 0x3d6   :  { %11286 = vmatprep.subr.bf16.mxu1 %v21154_v34  ;;  %v21194_v34 = vld [vmem:[%s25161_s1 + $0x110] ss:$8 sps:$4 sm:$0xff]  }
 0x3d7   :  { %10434 = vmatpush1.bf16.msra.mxu0 %v21152_v35 }
 0x3d8   :  { %10435 = vmatprep.subr.bf16.mxu0 %v21157_v36 }
 0x3d9   :  { %11287 = vmatpush1.bf16.msra.mxu1 %v21152_v35  ;;  %v21199_v35 = vld [vmem:[%s25161_s1 + $0x124] ss:$8 sps:$4 sm:$0xff]  }
 0x3da   :  { %11288 = vmatprep.subr.bf16.mxu1 %v21157_v36  ;;  %v23779_v36 = vld [vmem:[%s25163_s2] ss:$0 sm:$0xff] }
 0x3db   :  { %10436 = vmatpush1.bf16.msra.mxu0 %v21155_v37 }
 0x3dc   :  { %10437 = vmatprep.subr.bf16.mxu0 %v21160_v38 }
 0x3dd   :  { %11289 = vmatpush1.bf16.msra.mxu1 %v21155_v37 }
 0x3de   :  { %11290 = vmatprep.subr.bf16.mxu1 %v21160_v38 }
 0x3df   :  { %10438 = vmatpush1.bf16.msra.mxu0 %v21158_v40 }
 0x3e0   :  { %10562 = vmatprep.subr.bf16.mxu0 %v21163_v42 }
 0x3e1   :  { %11291 = vmatpush1.bf16.msra.mxu1 %v21158_v40 }
 0x3e2   :  { %11415 = vmatprep.subr.bf16.mxu1 %v21163_v42  ;;  %10456 = vmatmul.mubr.bf16.vlgmr.msra.gmra.mrb[48].mxu0 %v23691_v43 }
 0x3e3   :  { %10563 = vmatpush1.bf16.msra.mxu0 %v21161_v5  ;;  %10465 = vmatprep.mubr.bf16.mxu0 %v25174_v1 }
 0x3e4   :  { %11309 = vmatmul.mubr.bf16.vlgmr.msra.gmra.mrb[48].mxu1 %v23699_v46  ;;  %10564 = vmatprep.subr.bf16.mxu0 %v21168_v47 }
 0x3e5   :  { %11416 = vmatpush1.bf16.msra.mxu1 %v21161_v5  ;;  %11318 = vmatprep.mubr.bf16.mxu1 %v25174_v1 }
 0x3e6   :  { %11417 = vmatprep.subr.bf16.mxu1 %v21168_v47 }
 0x3e7   :  { %10565 = vmatpush1.bf16.msra.mxu0 %v21166_v48 }
 0x3e8   :  { %10566 = vmatprep.subr.bf16.mxu0 %v21171_v41 }
 0x3e9   :  { %11418 = vmatpush1.bf16.msra.mxu1 %v21166_v48 }
 0x3ea   :  { %11419 = vmatprep.subr.bf16.mxu1 %v21171_v41  ;;  %10466 = vmatmul.mubr.bf16.gmra.mrb[52].mxu0 %v21184_v50  ;;  %v21197_v41 = vld [vmem:[%s25161_s1 + $0x120] ss:$8 sps:$4 sm:$0xff]  }
 0x3eb   :  { %10567 = vmatpush1.bf16.msra.mxu0 %v21169_v49  ;;  %10594 = vmatprep.mubr.bf16.mxu0 %v25174_v1 }
 0x3ec   :  { %10568 = vmatprep.subr.bf16.mxu0 %v21174_v51  ;;  %11319 = vmatmul.mubr.bf16.gmra.mrb[52].mxu1 %v21185_v52 }
 0x3ed   :  { %11420 = vmatpush1.bf16.msra.mxu1 %v21169_v49  ;;  %11447 = vmatprep.mubr.bf16.mxu1 %v25174_v1  ;;  %v21202_v49 = vld [vmem:[%s25161_s1 + $0x134] ss:$8 sps:$4 sm:$0xff]  }
 0x3ee   :  { %11421 = vmatprep.subr.bf16.mxu1 %v21174_v51 }
 0x3ef   :  { %10569 = vmatpush1.bf16.msra.mxu0 %v21172_v53 }
 0x3f0   :  { %10570 = vmatprep.subr.bf16.mxu0 %v21177_v54 }
 0x3f1   :  { %11422 = vmatpush1.bf16.msra.mxu1 %v21172_v53 }
 0x3f2   :  { %11423 = vmatprep.subr.bf16.mxu1 %v21177_v54 }
 0x3f3   :  { %10571 = vmatpush1.bf16.msra.mxu0 %v21175_v56 }
 0x3f4   :  { %10572 = vmatprep.subr.bf16.mxu0 %v21180_v58 }
 0x3f5   :  { %11424 = vmatpush1.bf16.msra.mxu1 %v21175_v56  ;;  %v7695_v61 = vpop.f32.mrb[32].mxu0 }
 0x3f6   :  { %v7697_v2 = vpop.f32.mrb[33].mxu0  ;;  %11425 = vmatprep.subr.bf16.mxu1 %v21180_v58  ;;  %v21200_v58 = vld [vmem:[%s25161_s1 + $0x130] ss:$8 sps:$4 sm:$0xff]  }
 0x3f7   :  { %v8548_v55 = vpop.f32.mrb[32].mxu1  ;;  %v7722_v4 = vmax.f32 %v7695_v61, %v7697_v2  ;;  %v7699_v57 = vpop.f32.mrb[34].mxu0  ;;  %10573 = vmatpush1.bf16.msra.mxu0 %v21178_v59  ;;  %v21203_v61 = vld [vmem:[%s25161_s1 + $0x140] ss:$8 sps:$4 sm:$0xff]  }
 0x3f8   :  { %v8550_v6 = vpop.f32.mrb[33].mxu1  ;;  %v7701_v7 = vpop.f32.mrb[35].mxu0  ;;  %10574 = vmatprep.subr.bf16.mxu0 %v21183_v60  ;;  %v21209_v2 = vld [vmem:[%s25161_s1 + $0x160] ss:$8 sps:$4 sm:$0xff]  }
 0x3f9   :  { %v8575_v8 = vmax.f32 %v8548_v55, %v8550_v6  ;;  %v8552_v9 = vpop.f32.mrb[34].mxu1  ;;  %11426 = vmatpush1.bf16.msra.mxu1 %v21178_v59  ;;  %v7723_v10 = vmax.f32 %v7699_v57, %v7701_v7  ;;  %v21205_v59 = vld [vmem:[%s25161_s1 + $0x144] ss:$8 sps:$4 sm:$0xff]   ;;  %v21212_v55 = vld [vmem:[%s25161_s1 + $0x170] ss:$8 sps:$4 sm:$0xff]  }
 0x3fa   :  { %v8554_v12 = vpop.f32.mrb[35].mxu1  ;;  %11427 = vmatprep.subr.bf16.mxu1 %v21183_v60  ;;  %v21218_v57 = vld [vmem:[%s25162_s0 + $0xd0] sm:$0xff]   ;;  %v21215_v6 = vld [vmem:[%s25161_s1 + $0x180] ss:$8 sps:$4 sm:$0xff]  }
 0x3fb   :  { %v8576_v14 = vmax.f32 %v8552_v9, %v8554_v12  ;;  %10575 = vmatpush1.bf16.msra.mxu0 %v21181_v62  ;;  %v21219_v7 = vld [vmem:[%s25162_s0 + $0xe0] sm:$0xff]   ;;  %v21220_v9 = vld [vmem:[%s25161_s1 + $0x190] ss:$8 sps:$4 sm:$0xff]   ;;  %v21228_v12 = vld [vmem:[%s25161_s1 + $0x1b4] ss:$8 sps:$4 sm:$0xff]  }
 0x3fc   :  { %10576 = vmatprep.subr.bf16.mxu0 %v21188_v3 }
 0x3fd   :  { %11428 = vmatpush1.bf16.msra.mxu1 %v21181_v62  ;;  %v7705_v16 = vpop.f32.mrb[36].mxu0  ;;  %v21206_v62 = vld [vmem:[%s25161_s1 + $0x150] ss:$8 sps:$4 sm:$0xff]  }
 0x3fe   :  { %v7707_v20 = vpop.f32.mrb[37].mxu0  ;;  %11429 = vmatprep.subr.bf16.mxu1 %v21188_v3  ;;  %v21214_v3 = vld [vmem:[%s25161_s1 + $0x174] ss:$8 sps:$4 sm:$0xff]  }
 0x3ff   :  { %v8558_v23 = vpop.f32.mrb[36].mxu1  ;;  %v7724_v27 = vmax.f32 %v7705_v16, %v7707_v20  ;;  %v7709_v39 = vpop.f32.mrb[38].mxu0  ;;  %10577 = vmatpush1.bf16.msra.mxu0 %v21186_v11  ;;  %v21226_v16 = vld [vmem:[%s25161_s1 + $0x1b0] ss:$8 sps:$4 sm:$0xff]   ;;  %v21234_v20 = vld [vmem:[%s25161_s1 + $0x1d4] ss:$8 sps:$4 sm:$0xff]  }
 0x400   :  { %v8560_v31 = vpop.f32.mrb[37].mxu1  ;;  %v7711_v15 = vpop.f32.mrb[39].mxu0  ;;  %10727 = vmatprep.subr.bf16.mxu0 %v21191_v13 }
 0x401   :  { %v7726_v32 = vmax.f32 %v7722_v4, %v7724_v27  ;;  %v8577_v17 = vmax.f32 %v8558_v23, %v8560_v31  ;;  %v8562_v25 = vpop.f32.mrb[38].mxu1  ;;  %11430 = vmatpush1.bf16.msra.mxu1 %v21186_v11  ;;  %v7725_v26 = vmax.f32 %v7709_v39, %v7711_v15  ;;  %v21217_v4 = vld [vmem:[%s25161_s1 + $0x184] ss:$8 sps:$4 sm:$0xff]   ;;  %v21223_v11 = vld [vmem:[%s25161_s1 + $0x1a0] ss:$8 sps:$4 sm:$0xff]   ;;  %v21246_v15 = vld [vmem:[%s25162_s0 + $0xd8] sm:$0xff]  }
 0x402   :  { %v8564_v33 = vpop.f32.mrb[39].mxu1  ;;  %11580 = vmatprep.subr.bf16.mxu1 %v21191_v13  ;;  %10595 = vmatmul.mubr.bf16.vlgmr.msra.gmra.mrb[48].mxu0 %v21192_v19  ;;  %v21238_v13 = vld [vmem:[%s25162_s0 + $0xd8] sm:$0xff]   ;;  %v21229_v19 = vld [vmem:[%s25161_s1 + $0x1c0] ss:$8 sps:$4 sm:$0xff]   ;;  %v21245_v31 = vld [vmem:[%s25161_s1 + $0x204] ss:$8 sps:$4 sm:$0xff]  }
 0x403   :  { %v7728_v37 = vadd.f32 %v23779_v36, %v7726_v32  ;;  %v8579_v38 = vmax.f32 %v8575_v8, %v8577_v17  ;;  %v7727_v40 = vmax.f32 %v7723_v10, %v7725_v26  ;;  %v8578_v42 = vmax.f32 %v8562_v25, %v8564_v33  ;;  %10728 = vmatpush1.bf16.msra.mxu0 %v21189_v18  ;;  %v21222_v8 = vld [vmem:[%s25161_s1 + $0x194] ss:$8 sps:$4 sm:$0xff]   ;;  %v21225_v10 = vld [vmem:[%s25161_s1 + $0x1a4] ss:$8 sps:$4 sm:$0xff]   ;;  %v21235_v23 = vld [vmem:[%s25161_s1 + $0x1e0] ss:$8 sps:$4 sm:$0xff]  }
 0x404   :  { %11448 = vmatmul.mubr.bf16.vlgmr.msra.gmra.mrb[48].mxu1 %v21193_v21  ;;  %10729 = vmatprep.subr.bf16.mxu0 %v21196_v22  ;;  %v21232_v21 = vld [vmem:[%s25161_s1 + $0x1d0] ss:$8 sps:$4 sm:$0xff]   ;;  %v21242_v27 = vld [vmem:[%s25161_s1 + $0x1f4] ss:$8 sps:$4 sm:$0xff]   ;;  %v21243_v32 = vld [vmem:[%s25161_s1 + $0x200] ss:$8 sps:$4 sm:$0xff]  }
 0x405   :  { %v8581_v5 = vadd.f32 %v23779_v36, %v8579_v38  ;;  %v7729_v47 = vadd.f32 %v23779_v36, %v7727_v40  ;;  %v8580_v48 = vmax.f32 %v8576_v14, %v8578_v42  ;;  %11581 = vmatpush1.bf16.msra.mxu1 %v21189_v18  ;;  %10604 = vmatprep.mubr.bf16.mxu0 %v25174_v1  ;;  %v7730_v50 = vmax.f32 %v7728_v37, 0.0  ;;  %v21239_v14 = vld [vmem:[%s25162_s0 + $0xe8] sm:$0xff]   ;;  %v21240_v39 = vld [vmem:[%s25161_s1 + $0x1f0] ss:$8 sps:$4 sm:$0xff]   ;;  %v21250_v25 = vld [vmem:[%s25161_s1 + $0x214] ss:$8 sps:$4 sm:$0xff]  }
 0x406   :  { %11582 = vmatprep.subr.bf16.mxu1 %v21196_v22  ;;  %11457 = vmatprep.mubr.bf16.mxu1 %v25174_v1  ;;  %v21231_v18 = vld [vmem:[%s25161_s1 + $0x1c4] ss:$8 sps:$4 sm:$0xff]   ;;  %v21248_v26 = vld [vmem:[%s25161_s1 + $0x210] ss:$8 sps:$4 sm:$0xff]   ;;  %v21256_v37 = vld [vmem:[%s25161_s1 + $0x234] ss:$8 sps:$4 sm:$0xff]  }
 0x407   :  { %v7731_v51 = vmax.f32 %v7729_v47, 0.0  ;;  %v8582_v52 = vadd.f32 %v23779_v36, %v8580_v48  ;;  %10730 = vmatpush1.bf16.msra.mxu0 %v21194_v34  ;;  %v8583_v53 = vmax.f32 %v8581_v5, 0.0  ;;  %v21237_v22 = vld [vmem:[%s25161_s1 + $0x1e4] ss:$8 sps:$4 sm:$0xff]   ;;  %v21267_v38 = vld [vmem:[%s25162_s0 + $0xf0] sm:$0xff]  }
 0x408   :  { %10731 = vmatprep.subr.bf16.mxu0 %v21199_v35  ;;  %v21247_v17 = vld [vmem:[%s25162_s0 + $0xe8] sm:$0xff]   ;;  %v21254_v40 = vld [vmem:[%s25161_s1 + $0x230] ss:$8 sps:$4 sm:$0xff]   ;;  %v21262_v47 = vld [vmem:[%s25161_s1 + $0x254] ss:$8 sps:$4 sm:$0xff]  }
 0x409   :  { %v23793_v54 = vpack.c.bf16 %v7731_v51, %v7730_v50  ;;  %v8584_v56 = vmax.f32 %v8582_v52, 0.0  ;;  %11583 = vmatpush1.bf16.msra.mxu1 %v21194_v34  ;;  %v21253_v33 = vld [vmem:[%s25161_s1 + $0x224] ss:$8 sps:$4 sm:$0xff]   ;;  %v21257_v5 = vld [vmem:[%s25161_s1 + $0x240] ss:$8 sps:$4 sm:$0xff]  }
 0x40a   :  { %11584 = vmatprep.subr.bf16.mxu1 %v21199_v35  ;;  %10605 = vmatmul.mubr.bf16.gmra.mrb[52].mxu0 %v23691_v43  ;;  %v21208_v43 = vld [vmem:[%s25161_s1 + $0x154] ss:$8 sps:$4 sm:$0xff]   ;;  %v21263_v34 = vld [vmem:[%s25162_s0 + $0xe0] sm:$0xff]   ;;  %v21260_v48 = vld [vmem:[%s25161_s1 + $0x250] ss:$8 sps:$4 sm:$0xff]  }
 0x40b   :  { %v23802_v60 = vpack.c.bf16 %v8584_v56, %v8583_v53  ;;  %10732 = vmatpush1.bf16.msra.mxu0 %v21197_v41  ;;  %10759 = vmatprep.mubr.bf16.mxu0 %v25174_v1  ;;  %v21251_v35 = vld [vmem:[%s25161_s1 + $0x220] ss:$8 sps:$4 sm:$0xff]   ;;  %v21259_v42 = vld [vmem:[%s25161_s1 + $0x244] ss:$8 sps:$4 sm:$0xff]   ;;  %v21270_v50 = vld [vmem:[%s25161_s1 + $0x274] ss:$8 sps:$4 sm:$0xff]  }
 0x40c   :  { %10733 = vmatprep.subr.bf16.mxu0 %v21202_v49  ;;  %11458 = vmatmul.mubr.bf16.gmra.mrb[52].mxu1 %v23699_v46  ;;  %v21211_v46 = vld [vmem:[%s25161_s1 + $0x164] ss:$8 sps:$4 sm:$0xff]   ;;  %v21268_v51 = vld [vmem:[%s25161_s1 + $0x270] ss:$8 sps:$4 sm:$0xff]   ;;  %v21273_v56 = vld [vmem:[%s25164_s3 + $0x80] ss:$8 sps:$4 sm:$0xff]  }
 0x40d   :  { %11585 = vmatpush1.bf16.msra.mxu1 %v21197_v41  ;;  %11612 = vmatprep.mubr.bf16.mxu1 %v25174_v1  ;;  %v21266_v41 = vld [vmem:[%s25161_s1 + $0x264] ss:$8 sps:$4 sm:$0xff]  }
 0x40e   :  { %11586 = vmatprep.subr.bf16.mxu1 %v21202_v49  ;;  %v21264_v49 = vld [vmem:[%s25161_s1 + $0x260] ss:$8 sps:$4 sm:$0xff]   ;;  %v21275_v52 = vld [vmem:[%s25164_s3 + $0x84] ss:$8 sps:$4 sm:$0xff]  }
 0x40f   :  { %10734 = vmatpush1.bf16.msra.mxu0 %v21200_v58  ;;  %v21271_v53 = vld [vmem:[%s25162_s0 + $0xe0] sm:$0xff]  }
 0x410   :  { %10735 = vmatprep.subr.bf16.mxu0 %v21205_v59 }
 0x411   :  { %11587 = vmatpush1.bf16.msra.mxu1 %v21200_v58  ;;  %v21272_v58 = vld [vmem:[%s25162_s0 + $0xf0] sm:$0xff]  }
 0x412   :  { %11588 = vmatprep.subr.bf16.mxu1 %v21205_v59  ;;  %v21278_v59 = vld [vmem:[%s25164_s3 + $0x94] ss:$8 sps:$4 sm:$0xff]  }
 0x413   :  { %10736 = vmatpush1.bf16.msra.mxu0 %v21203_v61 }
 0x414   :  { %10737 = vmatprep.subr.bf16.mxu0 %v21208_v43 }
 0x415   :  { %11589 = vmatpush1.bf16.msra.mxu1 %v21203_v61  ;;  %v21276_v61 = vld [vmem:[%s25164_s3 + $0x90] ss:$8 sps:$4 sm:$0xff]  }
 0x416   :  { %11590 = vmatprep.subr.bf16.mxu1 %v21208_v43  ;;  %v21283_v43 = vld [vmem:[%s25164_s3 + $0xa4] ss:$8 sps:$4 sm:$0xff]  }
 0x417   :  { %10738 = vmatpush1.bf16.msra.mxu0 %v21206_v62 }
 0x418   :  { %10739 = vmatprep.subr.bf16.mxu0 %v21211_v46 }
 0x419   :  { %11591 = vmatpush1.bf16.msra.mxu1 %v21206_v62  ;;  %v21279_v62 = vld [vmem:[%s25162_s0 + $0xe8] sm:$0xff]  }
 0x41a   :  { %11592 = vmatprep.subr.bf16.mxu1 %v21211_v46  ;;  %v21281_v46 = vld [vmem:[%s25164_s3 + $0xa0] ss:$8 sps:$4 sm:$0xff]  }
 0x41b   :  { %10740 = vmatpush1.bf16.msra.mxu0 %v21209_v2 }
 0x41c   :  { %10741 = vmatprep.subr.bf16.mxu0 %v21214_v3 }
 0x41d   :  { %11593 = vmatpush1.bf16.msra.mxu1 %v21209_v2  ;;  %v21280_v2 = vld [vmem:[%s25162_s0 + $0xf8] sm:$0xff]  }
 0x41e   :  { %11594 = vmatprep.subr.bf16.mxu1 %v21214_v3  ;;  %v21286_v3 = vld [vmem:[%s25164_s3 + $0xb4] ss:$8 sps:$4 sm:$0xff]  }
 0x41f   :  { %10742 = vmatpush1.bf16.msra.mxu0 %v21212_v55 }
 0x420   :  { %10900 = vmatprep.subr.bf16.mxu0 %v21217_v4 }
 0x421   :  { %11595 = vmatpush1.bf16.msra.mxu1 %v21212_v55  ;;  %v21284_v55 = vld [vmem:[%s25164_s3 + $0xb0] ss:$8 sps:$4 sm:$0xff]  }
 0x422   :  { %11753 = vmatprep.subr.bf16.mxu1 %v21217_v4  ;;  %10760 = vmatmul.mubr.bf16.vlgmr.msra.gmra.mrb[48].mxu0 %v21218_v57  ;;  %v21289_v4 = vld [vmem:[%s25164_s3 + $0xc4] ss:$8 sps:$4 sm:$0xff]   ;;  %v21287_v57 = vld [vmem:[%s25164_s3 + $0xc0] ss:$8 sps:$4 sm:$0xff]  }
 0x423   :  { %10901 = vmatpush1.bf16.msra.mxu0 %v21215_v6  ;;  %10769 = vmatprep.mubr.bf16.mxu0 %v25174_v1 }
 0x424   :  { %11613 = vmatmul.mubr.bf16.vlgmr.msra.gmra.mrb[48].mxu1 %v21219_v7  ;;  %10902 = vmatprep.subr.bf16.mxu0 %v21222_v8  ;;  %v21290_v7 = vld [vmem:[%s25164_s3 + $0xd0] ss:$8 sps:$4 sm:$0xff]  }
 0x425   :  { %11754 = vmatpush1.bf16.msra.mxu1 %v21215_v6  ;;  %11622 = vmatprep.mubr.bf16.mxu1 %v25174_v1  ;;  %v21292_v6 = vld [vmem:[%s25164_s3 + $0xd4] ss:$8 sps:$4 sm:$0xff]  }
 0x426   :  { %11755 = vmatprep.subr.bf16.mxu1 %v21222_v8  ;;  %v21295_v8 = vld [vmem:[%s25164_s3 + $0xe4] ss:$8 sps:$4 sm:$0xff]  }
 0x427   :  { %10903 = vmatpush1.bf16.msra.mxu0 %v21220_v9 }
 0x428   :  { %10904 = vmatprep.subr.bf16.mxu0 %v21225_v10 }
 0x429   :  { %11756 = vmatpush1.bf16.msra.mxu1 %v21220_v9  ;;  %v21293_v9 = vld [vmem:[%s25164_s3 + $0xe0] ss:$8 sps:$4 sm:$0xff]  }
 0x42a   :  { %11757 = vmatprep.subr.bf16.mxu1 %v21225_v10  ;;  %10770 = vmatmul.mubr.bf16.gmra.mrb[52].mxu0 %v21238_v13  ;;  %v21298_v10 = vld [vmem:[%s25164_s3 + $0xf4] ss:$8 sps:$4 sm:$0xff]   ;;  %v21299_v13 = vld [vmem:[%s25164_s3] ss:$8 sps:$4 sm:$0xff]  }
 0x42b   :  { %10905 = vmatpush1.bf16.msra.mxu0 %v21223_v11  ;;  %10932 = vmatprep.mubr.bf16.mxu0 %v25174_v1 }
 0x42c   :  { %10906 = vmatprep.subr.bf16.mxu0 %v21228_v12  ;;  %11623 = vmatmul.mubr.bf16.gmra.mrb[52].mxu1 %v21239_v14  ;;  %v21304_v14 = vld [vmem:[%s25164_s3 + $0x14] ss:$8 sps:$4 sm:$0xff]  }
 0x42d   :  { %11758 = vmatpush1.bf16.msra.mxu1 %v21223_v11  ;;  %11785 = vmatprep.mubr.bf16.mxu1 %v25174_v1  ;;  %v21296_v11 = vld [vmem:[%s25164_s3 + $0xf0] ss:$8 sps:$4 sm:$0xff]  }
 0x42e   :  { %11759 = vmatprep.subr.bf16.mxu1 %v21228_v12  ;;  %v21301_v12 = vld [vmem:[%s25164_s3 + $0x4] ss:$8 sps:$4 sm:$0xff]  }
 0x42f   :  { %10907 = vmatpush1.bf16.msra.mxu0 %v21226_v16 }
 0x430   :  { %10908 = vmatprep.subr.bf16.mxu0 %v21231_v18 }
 0x431   :  { %11760 = vmatpush1.bf16.msra.mxu1 %v21226_v16  ;;  %v21302_v16 = vld [vmem:[%s25164_s3 + $0x10] ss:$8 sps:$4 sm:$0xff]  }
 0x432   :  { %11761 = vmatprep.subr.bf16.mxu1 %v21231_v18  ;;  %v21307_v18 = vld [vmem:[%s25164_s3 + $0x24] ss:$8 sps:$4 sm:$0xff]  }
 0x433   :  { %10909 = vmatpush1.bf16.msra.mxu0 %v21229_v19 }
 0x434   :  { %10910 = vmatprep.subr.bf16.mxu0 %v21234_v20 }
 0x435   :  { %11762 = vmatpush1.bf16.msra.mxu1 %v21229_v19  ;;  %v21305_v19 = vld [vmem:[%s25164_s3 + $0x20] ss:$8 sps:$4 sm:$0xff]  }
 0x436   :  { %11763 = vmatprep.subr.bf16.mxu1 %v21234_v20  ;;  %v21310_v20 = vld [vmem:[%s25164_s3 + $0x34] ss:$8 sps:$4 sm:$0xff]  }
 0x437   :  { %10911 = vmatpush1.bf16.msra.mxu0 %v21232_v21 }
 0x438   :  { %10912 = vmatprep.subr.bf16.mxu0 %v21237_v22 }
 0x439   :  { %11764 = vmatpush1.bf16.msra.mxu1 %v21232_v21  ;;  %v21308_v21 = vld [vmem:[%s25164_s3 + $0x30] ss:$8 sps:$4 sm:$0xff]  }
 0x43a   :  { %11765 = vmatprep.subr.bf16.mxu1 %v21237_v22  ;;  %v21313_v22 = vld [vmem:[%s25164_s3 + $0x44] ss:$8 sps:$4 sm:$0xff]  }
 0x43b   :  { %10913 = vmatpush1.bf16.msra.mxu0 %v21235_v23 }
 0x43c   :  { %10914 = vmatprep.subr.bf16.mxu0 %v21242_v27 }
 0x43d   :  { %11766 = vmatpush1.bf16.msra.mxu1 %v21235_v23  ;;  %v21311_v23 = vld [vmem:[%s25164_s3 + $0x40] ss:$8 sps:$4 sm:$0xff]  }
 0x43e   :  { %11767 = vmatprep.subr.bf16.mxu1 %v21242_v27  ;;  %v21316_v27 = vld [vmem:[%s25164_s3 + $0x54] ss:$8 sps:$4 sm:$0xff]  }
 0x43f   :  { %10915 = vmatpush1.bf16.msra.mxu0 %v21240_v39 }
 0x440   :  { %11073 = vmatprep.subr.bf16.mxu0 %v21245_v31 }
 0x441   :  { %11768 = vmatpush1.bf16.msra.mxu1 %v21240_v39  ;;  %v21314_v39 = vld [vmem:[%s25164_s3 + $0x50] ss:$8 sps:$4 sm:$0xff]  }
 0x442   :  { %11926 = vmatprep.subr.bf16.mxu1 %v21245_v31  ;;  %10933 = vmatmul.mubr.bf16.vlgmr.msra.gmra.mrb[48].mxu0 %v21246_v15  ;;  %v21319_v31 = vld [vmem:[%s25164_s3 + $0x64] ss:$8 sps:$4 sm:$0xff]  }
 0x443   :  { %11074 = vmatpush1.bf16.msra.mxu0 %v21243_v32  ;;  %10942 = vmatprep.mubr.bf16.mxu0 %v25174_v1 }
 0x444   :  { %11786 = vmatmul.mubr.bf16.vlgmr.msra.gmra.mrb[48].mxu1 %v21247_v17  ;;  %11075 = vmatprep.subr.bf16.mxu0 %v21250_v25 }
 0x445   :  { %11927 = vmatpush1.bf16.msra.mxu1 %v21243_v32  ;;  %11795 = vmatprep.mubr.bf16.mxu1 %v25174_v1 }
 0x446   :  { %11928 = vmatprep.subr.bf16.mxu1 %v21250_v25 }
 0x447   :  { %11076 = vmatpush1.bf16.msra.mxu0 %v21248_v26 }
 0x448   :  { %11077 = vmatprep.subr.bf16.mxu0 %v21253_v33 }
 0x449   :  { %11929 = vmatpush1.bf16.msra.mxu1 %v21248_v26 }
 0x44a   :  { %11930 = vmatprep.subr.bf16.mxu1 %v21253_v33  ;;  %10943 = vmatmul.mubr.bf16.gmra.mrb[52].mxu0 %v21263_v34  ;;  %v21317_v33 = vld [vmem:[%s25164_s3 + $0x60] ss:$8 sps:$4 sm:$0xff]  }
 0x44b   :  { %11078 = vmatpush1.bf16.msra.mxu0 %v21251_v35  ;;  %11105 = vmatprep.mubr.bf16.mxu0 %v25174_v1 }
 0x44c   :  { %11079 = vmatprep.subr.bf16.mxu0 %v21256_v37  ;;  %11796 = vmatmul.mubr.bf16.gmra.mrb[52].mxu1 %v21267_v38 }
 0x44d   :  { %11931 = vmatpush1.bf16.msra.mxu1 %v21251_v35  ;;  %11958 = vmatprep.mubr.bf16.mxu1 %v25174_v1 }
 0x44e   :  { %11932 = vmatprep.subr.bf16.mxu1 %v21256_v37  ;;  %v21322_v37 = vld [vmem:[%s25164_s3 + $0x74] ss:$8 sps:$4 sm:$0xff]  }
 0x44f   :  { %11080 = vmatpush1.bf16.msra.mxu0 %v21254_v40 }
 0x450   :  { %11081 = vmatprep.subr.bf16.mxu0 %v21259_v42 }
 0x451   :  { %11933 = vmatpush1.bf16.msra.mxu1 %v21254_v40 }
 0x452   :  { %11934 = vmatprep.subr.bf16.mxu1 %v21259_v42 }
 0x453   :  { %11082 = vmatpush1.bf16.msra.mxu0 %v21257_v5 }
 0x454   :  { %11083 = vmatprep.subr.bf16.mxu0 %v21262_v47 }
 0x455   :  { %11935 = vmatpush1.bf16.msra.mxu1 %v21257_v5 }
 0x456   :  { %11936 = vmatprep.subr.bf16.mxu1 %v21262_v47 }
 0x457   :  { %11084 = vmatpush1.bf16.msra.mxu0 %v21260_v48 }
 0x458   :  { %11085 = vmatprep.subr.bf16.mxu0 %v21266_v41 }
 0x459   :  { %11937 = vmatpush1.bf16.msra.mxu1 %v21260_v48  ;;  %v21320_v48 = vld [vmem:[%s25164_s3 + $0x70] ss:$8 sps:$4 sm:$0xff]  }
 0x45a   :  { %11938 = vmatprep.subr.bf16.mxu1 %v21266_v41  ;;  %v21325_v41 = vld [vmem:[%s25164_s3 + $0x104] ss:$8 sps:$4 sm:$0xff]  }
 0x45b   :  { %11086 = vmatpush1.bf16.msra.mxu0 %v21264_v49 }
 0x45c   :  { %11087 = vmatprep.subr.bf16.mxu0 %v21270_v50 }
 0x45d   :  { %11939 = vmatpush1.bf16.msra.mxu1 %v21264_v49 }
 0x45e   :  { %11940 = vmatprep.subr.bf16.mxu1 %v21270_v50 }
 0x45f   :  { %11088 = vmatpush1.bf16.msra.mxu0 %v21268_v51 }
 0x460   :  { %12115 = vmatprep.subr.bf16.mxu0 %v21275_v52 }
 0x461   :  { %11941 = vmatpush1.bf16.msra.mxu1 %v21268_v51 }
 0x462   :  { %11106 = vmatmul.mubr.bf16.vlgmr.msra.gmra.mrb[48].mxu0 %v21271_v53  ;;  %12908 = vmatprep.subr.bf16.mxu1 %v21275_v52 }
 0x463   :  { %12116 = vmatpush1.bf16.msra.mxu0 %v21273_v56  ;;  %11115 = vmatprep.mubr.bf16.mxu0 %v25174_v1 }
 0x464   :  { %11959 = vmatmul.mubr.bf16.vlgmr.msra.gmra.mrb[48].mxu1 %v21272_v58  ;;  %12117 = vmatprep.subr.bf16.mxu0 %v21278_v59 }
 0x465   :  { %12909 = vmatpush1.bf16.msra.mxu1 %v21273_v56  ;;  %11968 = vmatprep.mubr.bf16.mxu1 %v25174_v1  ;;  %v21323_v56 = vld [vmem:[%s25164_s3 + $0x100] ss:$8 sps:$4 sm:$0xff]  }
 0x466   :  { %12910 = vmatprep.subr.bf16.mxu1 %v21278_v59 }
 0x467   :  { %12118 = vmatpush1.bf16.msra.mxu0 %v21276_v61 }
 0x468   :  { %12119 = vmatprep.subr.bf16.mxu0 %v21283_v43 }
 0x469   :  { %12911 = vmatpush1.bf16.msra.mxu1 %v21276_v61  ;;  %v21328_v61 = vld [vmem:[%s25164_s3 + $0x114] ss:$8 sps:$4 sm:$0xff]  }
 0x46a   :  { %11116 = vmatmul.mubr.bf16.gmra.mrb[52].mxu0 %v21279_v62  ;;  %12912 = vmatprep.subr.bf16.mxu1 %v21283_v43 }
 0x46b   :  { %12120 = vmatpush1.bf16.msra.mxu0 %v21281_v46  ;;  %12147 = vmatprep.mubr.bf16.mxu0 %v25174_v1 }
 0x46c   :  { %11969 = vmatmul.mubr.bf16.gmra.mrb[52].mxu1 %v21280_v2  ;;  %12121 = vmatprep.subr.bf16.mxu0 %v21286_v3 }
 0x46d   :  { %12913 = vmatpush1.bf16.msra.mxu1 %v21281_v46  ;;  %12940 = vmatprep.mubr.bf16.mxu1 %v25174_v1 }
 0x46e   :  { %12914 = vmatprep.subr.bf16.mxu1 %v21286_v3 }
 0x46f   :  { %12122 = vmatpush1.bf16.msra.mxu0 %v21284_v55 }
 0x470   :  { %12123 = vmatprep.subr.bf16.mxu0 %v21289_v4 }
 0x471   :  { %12915 = vmatpush1.bf16.msra.mxu1 %v21284_v55 }
 0x472   :  { %12916 = vmatprep.subr.bf16.mxu1 %v21289_v4 }
 0x473   :  { %12124 = vmatpush1.bf16.msra.mxu0 %v21287_v57 }
 0x474   :  { %12125 = vmatprep.subr.bf16.mxu0 %v21292_v6 }
 0x475   :  { %12917 = vmatpush1.bf16.msra.mxu1 %v21287_v57 }
 0x476   :  { %12918 = vmatprep.subr.bf16.mxu1 %v21292_v6 }
 0x477   :  { %12126 = vmatpush1.bf16.msra.mxu0 %v21290_v7 }
 0x478   :  { %12127 = vmatprep.subr.bf16.mxu0 %v21295_v8 }
 0x479   :  { %12919 = vmatpush1.bf16.msra.mxu1 %v21290_v7  ;;  %v21326_v7 = vld [vmem:[%s25164_s3 + $0x110] ss:$8 sps:$4 sm:$0xff]  }
 0x47a   :  { %12920 = vmatprep.subr.bf16.mxu1 %v21295_v8  ;;  %v21331_v8 = vld [vmem:[%s25164_s3 + $0x124] ss:$8 sps:$4 sm:$0xff]  }
 0x47b   :  { %12128 = vmatpush1.bf16.msra.mxu0 %v21293_v9 }
 0x47c   :  { %12129 = vmatprep.subr.bf16.mxu0 %v21298_v10 }
 0x47d   :  { %12921 = vmatpush1.bf16.msra.mxu1 %v21293_v9 }
 0x47e   :  { %12922 = vmatprep.subr.bf16.mxu1 %v21298_v10 }
 0x47f   :  { %12130 = vmatpush1.bf16.msra.mxu0 %v21296_v11 }
 0x480   :  { %12248 = vmatprep.subr.bf16.mxu0 %v21301_v12 }
 0x481   :  { %12923 = vmatpush1.bf16.msra.mxu1 %v21296_v11 }
 0x482   :  { %12148 = vmatmul.mubr.bf16.vlgmr.msra.gmra.mrb[56].mxu0 %v22465_v30  ;;  %13041 = vmatprep.subr.bf16.mxu1 %v21301_v12 }
 0x483   :  { %12249 = vmatpush1.bf16.msra.mxu0 %v21299_v13  ;;  %12157 = vmatprep.mubr.bf16.mxu0 %v25174_v1 }
 0x484   :  { %12941 = vmatmul.mubr.bf16.vlgmr.msra.gmra.mrb[56].mxu1 %v22793_v44  ;;  %12250 = vmatprep.subr.bf16.mxu0 %v21304_v14 }
 0x485   :  { %13042 = vmatpush1.bf16.msra.mxu1 %v21299_v13  ;;  %12950 = vmatprep.mubr.bf16.mxu1 %v25174_v1 }
 0x486   :  { %13043 = vmatprep.subr.bf16.mxu1 %v21304_v14  ;;  %v21329_v14 = vld [vmem:[%s25164_s3 + $0x120] ss:$8 sps:$4 sm:$0xff]  }
 0x487   :  { %12251 = vmatpush1.bf16.msra.mxu0 %v21302_v16 }
 0x488   :  { %12252 = vmatprep.subr.bf16.mxu0 %v21307_v18 }
 0x489   :  { %13044 = vmatpush1.bf16.msra.mxu1 %v21302_v16  ;;  %v21334_v16 = vld [vmem:[%s25164_s3 + $0x134] ss:$8 sps:$4 sm:$0xff]  }
 0x48a   :  { %12158 = vmatmul.mubr.bf16.gmra.mrb[60].mxu0 %v22795_v45  ;;  %13045 = vmatprep.subr.bf16.mxu1 %v21307_v18 }
 0x48b   :  { %12253 = vmatpush1.bf16.msra.mxu0 %v21305_v19  ;;  %12280 = vmatprep.mubr.bf16.mxu0 %v25174_v1 }
 0x48c   :  { %12951 = vmatmul.mubr.bf16.gmra.mrb[60].mxu1 %v23128_v63  ;;  %12254 = vmatprep.subr.bf16.mxu0 %v21310_v20 }
 0x48d   :  { %13046 = vmatpush1.bf16.msra.mxu1 %v21305_v19  ;;  %13073 = vmatprep.mubr.bf16.mxu1 %v25174_v1 }
 0x48e   :  { %13047 = vmatprep.subr.bf16.mxu1 %v21310_v20 }
 0x48f   :  { %12255 = vmatpush1.bf16.msra.mxu0 %v21308_v21 }
 0x490   :  { %12256 = vmatprep.subr.bf16.mxu0 %v21313_v22 }
 0x491   :  { %13048 = vmatpush1.bf16.msra.mxu1 %v21308_v21 }
 0x492   :  { %13049 = vmatprep.subr.bf16.mxu1 %v21313_v22  ;;  %v21337_v22 = vld [vmem:[%s25164_s3 + $0x144] ss:$8 sps:$4 sm:$0xff]  }
 0x493   :  { %12257 = vmatpush1.bf16.msra.mxu0 %v21311_v23 }
 0x494   :  { %12258 = vmatprep.subr.bf16.mxu0 %v21316_v27 }
 0x495   :  { %13050 = vmatpush1.bf16.msra.mxu1 %v21311_v23  ;;  %v9401_v15 = vpop.f32.mrb[40].mxu0  ;;  %v21340_v23 = vld [vmem:[%s25164_s3 + $0x154] ss:$8 sps:$4 sm:$0xff]  }
 0x496   :  { %v9403_v32 = vpop.f32.mrb[41].mxu0  ;;  %13051 = vmatprep.subr.bf16.mxu1 %v21316_v27  ;;  %v21338_v27 = vld [vmem:[%s25164_s3 + $0x150] ss:$8 sps:$4 sm:$0xff]  }
 0x497   :  { %v10254_v17 = vpop.f32.mrb[40].mxu1  ;;  %v9428_v25 = vmax.f32 %v9401_v15, %v9403_v32  ;;  %v9405_v26 = vpop.f32.mrb[42].mxu0  ;;  %12259 = vmatpush1.bf16.msra.mxu0 %v21314_v39  ;;  %v21346_v15 = vld [vmem:[%s25164_s3 + $0x174] ss:$8 sps:$4 sm:$0xff]   ;;  %v21344_v32 = vld [vmem:[%s25164_s3 + $0x170] ss:$8 sps:$4 sm:$0xff]  }
 0x498   :  { %v10256_v34 = vpop.f32.mrb[41].mxu1  ;;  %v9407_v35 = vpop.f32.mrb[43].mxu0  ;;  %12260 = vmatprep.subr.bf16.mxu0 %v21319_v31 }
 0x499   :  { %v10281_v38 = vmax.f32 %v10254_v17, %v10256_v34  ;;  %v10258_v40 = vpop.f32.mrb[42].mxu1  ;;  %13052 = vmatpush1.bf16.msra.mxu1 %v21314_v39  ;;  %v9429_v42 = vmax.f32 %v9405_v26, %v9407_v35  ;;  %v21343_v39 = vld [vmem:[%s25164_s3 + $0x164] ss:$8 sps:$4 sm:$0xff]   ;;  %v21352_v26 = vld [vmem:[%s25164_s3 + $0x194] ss:$8 sps:$4 sm:$0xff]  }
 0x49a   :  { %v10260_v5 = vpop.f32.mrb[43].mxu1  ;;  %13053 = vmatprep.subr.bf16.mxu1 %v21319_v31  ;;  %v21341_v31 = vld [vmem:[%s25164_s3 + $0x160] ss:$8 sps:$4 sm:$0xff]   ;;  %v21349_v17 = vld [vmem:[%s25164_s3 + $0x184] ss:$8 sps:$4 sm:$0xff]  }
 0x49b   :  { %v10282_v47 = vmax.f32 %v10258_v40, %v10260_v5  ;;  %12261 = vmatpush1.bf16.msra.mxu0 %v21317_v33  ;;  %v21355_v34 = vld [vmem:[%s25164_s3 + $0x1a4] ss:$8 sps:$4 sm:$0xff]   ;;  %v21358_v35 = vld [vmem:[%s25164_s3 + $0x1b4] ss:$8 sps:$4 sm:$0xff]   ;;  %v21359_v40 = vld [vmem:[%s25164_s3 + $0x1c0] ss:$8 sps:$4 sm:$0xff]  }
 0x49c   :  { %12262 = vmatprep.subr.bf16.mxu0 %v21322_v37  ;;  %v21362_v5 = vld [vmem:[%s25164_s3 + $0x1d0] ss:$8 sps:$4 sm:$0xff]  }
 0x49d   :  { %13054 = vmatpush1.bf16.msra.mxu1 %v21317_v33  ;;  %v9411_v49 = vpop.f32.mrb[44].mxu0  ;;  %v21350_v33 = vld [vmem:[%s25164_s3 + $0x190] ss:$8 sps:$4 sm:$0xff]  }
 0x49e   :  { %v9413_v50 = vpop.f32.mrb[45].mxu0  ;;  %13055 = vmatprep.subr.bf16.mxu1 %v21322_v37  ;;  %v21356_v37 = vld [vmem:[%s25164_s3 + $0x1b0] ss:$8 sps:$4 sm:$0xff]  }
 0x49f   :  { %v10264_v51 = vpop.f32.mrb[44].mxu1  ;;  %v9430_v52 = vmax.f32 %v9411_v49, %v9413_v50  ;;  %v9415_v53 = vpop.f32.mrb[46].mxu0  ;;  %12263 = vmatpush1.bf16.msra.mxu0 %v21320_v48  ;;  %v21368_v49 = vld [vmem:[%s25164_s3 + $0x1f0] ss:$8 sps:$4 sm:$0xff]   ;;  %v21373_v50 = vld [vmem:[%s25164_s3 + $0x204] ss:$8 sps:$4 sm:$0xff]  }
 0x4a0   :  { %v10266_v58 = vpop.f32.mrb[45].mxu1  ;;  %v9417_v59 = vpop.f32.mrb[47].mxu0  ;;  %12400 = vmatprep.subr.bf16.mxu0 %v21325_v41 }
 0x4a1   :  { %v9432_v43 = vmax.f32 %v9428_v25, %v9430_v52  ;;  %v10283_v62 = vmax.f32 %v10264_v51, %v10266_v58  ;;  %v10268_v46 = vpop.f32.mrb[46].mxu1  ;;  %13056 = vmatpush1.bf16.msra.mxu1 %v21320_v48  ;;  %v9431_v2 = vmax.f32 %v9415_v53, %v9417_v59  ;;  %v21347_v25 = vld [vmem:[%s25164_s3 + $0x180] ss:$8 sps:$4 sm:$0xff]   ;;  %v21376_v52 = vld [vmem:[%s25164_s3 + $0x214] ss:$8 sps:$4 sm:$0xff]  }
 0x4a2   :  { %v10270_v3 = vpop.f32.mrb[47].mxu1  ;;  %12281 = vmatmul.mubr.bf16.vlgmr.msra.gmra.mrb[56].mxu0 %v22463_v29  ;;  %13192 = vmatprep.subr.bf16.mxu1 %v21325_v41  ;;  %v21365_v48 = vld [vmem:[%s25164_s3 + $0x1e0] ss:$8 sps:$4 sm:$0xff]   ;;  %v21370_v41 = vld [vmem:[%s25164_s3 + $0x1f4] ss:$8 sps:$4 sm:$0xff]  }
 0x4a3   :  { %v9434_v55 = vadd.f32 %v23779_v36, %v9432_v43  ;;  %v10285_v4 = vmax.f32 %v10281_v38, %v10283_v62  ;;  %v9433_v57 = vmax.f32 %v9429_v42, %v9431_v2  ;;  %v10284_v6 = vmax.f32 %v10268_v46, %v10270_v3  ;;  %12401 = vmatpush1.bf16.msra.mxu0 %v21323_v56  ;;  %v21361_v38 = vld [vmem:[%s25164_s3 + $0x1c4] ss:$8 sps:$4 sm:$0xff]   ;;  %v21364_v42 = vld [vmem:[%s25164_s3 + $0x1d4] ss:$8 sps:$4 sm:$0xff]   ;;  %v21371_v51 = vld [vmem:[%s25164_s3 + $0x200] ss:$8 sps:$4 sm:$0xff]  }
 0x4a4   :  { %13074 = vmatmul.mubr.bf16.vlgmr.msra.gmra.mrb[56].mxu1 %v22795_v45  ;;  %12402 = vmatprep.subr.bf16.mxu0 %v21328_v61  ;;  %v21374_v53 = vld [vmem:[%s25164_s3 + $0x210] ss:$8 sps:$4 sm:$0xff]   ;;  %v21382_v58 = vld [vmem:[%s25164_s3 + $0x234] ss:$8 sps:$4 sm:$0xff]   ;;  %v21383_v43 = vld [vmem:[%s25164_s3 + $0x240] ss:$8 sps:$4 sm:$0xff]  }
 0x4a5   :  { %v10287_v29 = vadd.f32 %v23779_v36, %v10285_v4  ;;  %v9435_v9 = vadd.f32 %v23779_v36, %v9433_v57  ;;  %v10286_v10 = vmax.f32 %v10282_v47, %v10284_v6  ;;  %13193 = vmatpush1.bf16.msra.mxu1 %v21323_v56  ;;  %12290 = vmatprep.mubr.bf16.mxu0 %v25174_v1  ;;  %v9436_v11 = vmax.f32 %v9434_v55, 0.0  ;;  %v21367_v47 = vld [vmem:[%s25164_s3 + $0x1e4] ss:$8 sps:$4 sm:$0xff]   ;;  %v21380_v59 = vld [vmem:[%s25164_s3 + $0x230] ss:$8 sps:$4 sm:$0xff]  }
 0x4a6   :  { %13194 = vmatprep.subr.bf16.mxu1 %v21328_v61  ;;  %13083 = vmatprep.mubr.bf16.mxu1 %v25174_v1  ;;  %v21379_v56 = vld [vmem:[%s25164_s3 + $0x224] ss:$8 sps:$4 sm:$0xff]   ;;  %v21388_v62 = vld [vmem:[%s25164_s3 + $0x254] ss:$8 sps:$4 sm:$0xff]   ;;  %v21386_v46 = vld [vmem:[%s25164_s3 + $0x250] ss:$8 sps:$4 sm:$0xff]  }
 0x4a7   :  { %v9437_v12 = vmax.f32 %v9435_v9, 0.0  ;;  %v10288_v13 = vadd.f32 %v23779_v36, %v10286_v10  ;;  %12403 = vmatpush1.bf16.msra.mxu0 %v21326_v7  ;;  %v10289_v18 = vmax.f32 %v10287_v29, 0.0  ;;  %v21332_v36 = vld [vmem:[%s25164_s3 + $0x130] ss:$8 sps:$4 sm:$0xff]   ;;  %v21385_v61 = vld [vmem:[%s25164_s3 + $0x244] ss:$8 sps:$4 sm:$0xff]  }
 0x4a8   :  { %12404 = vmatprep.subr.bf16.mxu0 %v21331_v8  ;;  %v21391_v2 = vld [vmem:[%s25164_s3 + $0x264] ss:$8 sps:$4 sm:$0xff]   ;;  %v21389_v3 = vld [vmem:[%s25164_s3 + $0x260] ss:$8 sps:$4 sm:$0xff]   ;;  %v21394_v55 = vld [vmem:[%s25164_s3 + $0x274] ss:$8 sps:$4 sm:$0xff]  }
 0x4a9   :  { %v24105_v19 = vpack.c.bf16 %v9437_v12, %v9436_v11  ;;  %v10290_v20 = vmax.f32 %v10288_v13, 0.0  ;;  %13195 = vmatpush1.bf16.msra.mxu1 %v21326_v7  ;;  %v21392_v4 = vld [vmem:[%s25164_s3 + $0x270] ss:$8 sps:$4 sm:$0xff]   ;;  %v21397_v57 = vld [vmem:[%s25164_s3 + $0x84] ss:$8 sps:$4 sm:$0xff]  }
 0x4aa   :  { %12291 = vmatmul.mubr.bf16.gmra.mrb[60].mxu0 %v22465_v30  ;;  %13196 = vmatprep.subr.bf16.mxu1 %v21331_v8  ;;  %v21335_v30 = vld [vmem:[%s25164_s3 + $0x140] ss:$8 sps:$4 sm:$0xff]   ;;  %v21400_v7 = vld [vmem:[%s25164_s3 + $0x94] ss:$8 sps:$4 sm:$0xff]   ;;  %v21398_v8 = vld [vmem:[%s25164_s3 + $0x90] ss:$8 sps:$4 sm:$0xff]  }
 0x4ab   :  { %12405 = vmatpush1.bf16.msra.mxu0 %v21329_v14  ;;  %12432 = vmatprep.mubr.bf16.mxu0 %v25174_v1  ;;  %v24112_v21 = vpack.c.bf16 %v10290_v20, %v10289_v18  ;;  %v21395_v6 = vld [vmem:[%s25164_s3 + $0x80] ss:$8 sps:$4 sm:$0xff]   ;;  %v21403_v29 = vld [vmem:[%s25164_s3 + $0xa4] ss:$8 sps:$4 sm:$0xff]   ;;  %v21406_v10 = vld [vmem:[%s25164_s3 + $0xb4] ss:$8 sps:$4 sm:$0xff]  }
 0x4ac   :  { %13084 = vmatmul.mubr.bf16.gmra.mrb[60].mxu1 %v22793_v44  ;;  %12406 = vmatprep.subr.bf16.mxu0 %v21334_v16  ;;  %v21401_v9 = vld [vmem:[%s25164_s3 + $0xa0] ss:$8 sps:$4 sm:$0xff]   ;;  %v21404_v11 = vld [vmem:[%s25164_s3 + $0xb0] ss:$8 sps:$4 sm:$0xff]   ;;  %v21409_v12 = vld [vmem:[%s25164_s3 + $0xc4] ss:$8 sps:$4 sm:$0xff]  }
 0x4ad   :  { %13197 = vmatpush1.bf16.msra.mxu1 %v21329_v14  ;;  %13224 = vmatprep.mubr.bf16.mxu1 %v25174_v1  ;;  %v21407_v13 = vld [vmem:[%s25164_s3 + $0xc0] ss:$8 sps:$4 sm:$0xff]   ;;  %v21412_v14 = vld [vmem:[%s25164_s3 + $0xd4] ss:$8 sps:$4 sm:$0xff]   ;;  %v21415_v18 = vld [vmem:[%s25164_s3 + $0xe4] ss:$8 sps:$4 sm:$0xff]  }
 0x4ae   :  { %13198 = vmatprep.subr.bf16.mxu1 %v21334_v16  ;;  %v21410_v16 = vld [vmem:[%s25164_s3 + $0xd0] ss:$8 sps:$4 sm:$0xff]   ;;  %v21413_v20 = vld [vmem:[%s25164_s3 + $0xe0] ss:$8 sps:$4 sm:$0xff]  }
 0x4af   :  { %12407 = vmatpush1.bf16.msra.mxu0 %v21332_v36 }
 0x4b0   :  { %12408 = vmatprep.subr.bf16.mxu0 %v21337_v22 }
 0x4b1   :  { %13199 = vmatpush1.bf16.msra.mxu1 %v21332_v36  ;;  %v21418_v36 = vld [vmem:[%s25164_s3 + $0xf4] ss:$8 sps:$4 sm:$0xff]  }
 0x4b2   :  { %13200 = vmatprep.subr.bf16.mxu1 %v21337_v22  ;;  %v21416_v22 = vld [vmem:[%s25164_s3 + $0xf0] ss:$8 sps:$4 sm:$0xff]  }
 0x4b3   :  { %12409 = vmatpush1.bf16.msra.mxu0 %v21335_v30 }
 0x4b4   :  { %12410 = vmatprep.subr.bf16.mxu0 %v21340_v23 }
 0x4b5   :  { %13201 = vmatpush1.bf16.msra.mxu1 %v21335_v30  ;;  %v24311_v30 = vld [vmem:[%s25164_s3 + $0x4] ss:$8 sps:$4 sm:$0xff]  }
 0x4b6   :  { %13202 = vmatprep.subr.bf16.mxu1 %v21340_v23  ;;  %v24316_v23 = vld [vmem:[%s25164_s3] ss:$8 sps:$4 sm:$0xff]  }
 0x4b7   :  { %12411 = vmatpush1.bf16.msra.mxu0 %v21338_v27 }
 0x4b8   :  { %12412 = vmatprep.subr.bf16.mxu0 %v21343_v39 }
 0x4b9   :  { %13203 = vmatpush1.bf16.msra.mxu1 %v21338_v27  ;;  %v24322_v27 = vld [vmem:[%s25164_s3 + $0x14] ss:$8 sps:$4 sm:$0xff]  }
 0x4ba   :  { %13204 = vmatprep.subr.bf16.mxu1 %v21343_v39  ;;  %v24330_v39 = vld [vmem:[%s25164_s3 + $0x10] ss:$8 sps:$4 sm:$0xff]  }
 0x4bb   :  { %12413 = vmatpush1.bf16.msra.mxu0 %v21341_v31 }
 0x4bc   :  { %12414 = vmatprep.subr.bf16.mxu0 %v21346_v15 }
 0x4bd   :  { %13205 = vmatpush1.bf16.msra.mxu1 %v21341_v31  ;;  %v24338_v31 = vld [vmem:[%s25164_s3 + $0x24] ss:$8 sps:$4 sm:$0xff]  }
 0x4be   :  { %13206 = vmatprep.subr.bf16.mxu1 %v21346_v15  ;;  %v24347_v15 = vld [vmem:[%s25164_s3 + $0x20] ss:$8 sps:$4 sm:$0xff]  }
 0x4bf   :  { %12415 = vmatpush1.bf16.msra.mxu0 %v21344_v32 }
 0x4c0   :  { %12560 = vmatprep.subr.bf16.mxu0 %v21349_v17 }
 0x4c1   :  { %13207 = vmatpush1.bf16.msra.mxu1 %v21344_v32  ;;  %v24353_v32 = vld [vmem:[%s25164_s3 + $0x34] ss:$8 sps:$4 sm:$0xff]  }
 0x4c2   :  { %12433 = vmatmul.mubr.bf16.vlgmr.msra.gmra.mrb[56].mxu0 %v22795_v45  ;;  %13351 = vmatprep.subr.bf16.mxu1 %v21349_v17  ;;  %v21353_v45 = vld [vmem:[%s25164_s3 + $0x1a0] ss:$8 sps:$4 sm:$0xff]   ;;  %v24362_v17 = vld [vmem:[%s25164_s3 + $0x30] ss:$8 sps:$4 sm:$0xff]  }
 0x4c3   :  { %12561 = vmatpush1.bf16.msra.mxu0 %v21347_v25  ;;  %12442 = vmatprep.mubr.bf16.mxu0 %v25174_v1 }
 0x4c4   :  { %13225 = vmatmul.mubr.bf16.vlgmr.msra.gmra.mrb[56].mxu1 %v23128_v63  ;;  %12562 = vmatprep.subr.bf16.mxu0 %v21352_v26 }
 0x4c5   :  { %13352 = vmatpush1.bf16.msra.mxu1 %v21347_v25  ;;  %13234 = vmatprep.mubr.bf16.mxu1 %v25174_v1  ;;  %v24370_v25 = vld [vmem:[%s25164_s3 + $0x44] ss:$8 sps:$4 sm:$0xff]  }
 0x4c6   :  { %13353 = vmatprep.subr.bf16.mxu1 %v21352_v26  ;;  %v24379_v26 = vld [vmem:[%s25164_s3 + $0x40] ss:$8 sps:$4 sm:$0xff]  }
 0x4c7   :  { %12563 = vmatpush1.bf16.msra.mxu0 %v21350_v33 }
 0x4c8   :  { %12564 = vmatprep.subr.bf16.mxu0 %v21355_v34 }
 0x4c9   :  { %13354 = vmatpush1.bf16.msra.mxu1 %v21350_v33  ;;  %v24385_v33 = vld [vmem:[%s25164_s3 + $0x54] ss:$8 sps:$4 sm:$0xff]  }
 0x4ca   :  { %12443 = vmatmul.mubr.bf16.gmra.mrb[60].mxu0 %v22793_v44  ;;  %13355 = vmatprep.subr.bf16.mxu1 %v21355_v34  ;;  %v24393_v34 = vld [vmem:[%s25164_s3 + $0x50] ss:$8 sps:$4 sm:$0xff]  }
 0x4cb   :  { %12565 = vmatpush1.bf16.msra.mxu0 %v21353_v45  ;;  %12592 = vmatprep.mubr.bf16.mxu0 %v25174_v1 }
 0x4cc   :  { %13235 = vmatmul.mubr.bf16.gmra.mrb[60].mxu1 %v23130_v0  ;;  %12566 = vmatprep.subr.bf16.mxu0 %v21358_v35 }
 0x4cd   :  { %13356 = vmatpush1.bf16.msra.mxu1 %v21353_v45  ;;  %13383 = vmatprep.mubr.bf16.mxu1 %v25174_v1  ;;  %v24399_v45 = vld [vmem:[%s25164_s3 + $0x64] ss:$8 sps:$4 sm:$0xff]  }
 0x4ce   :  { %13357 = vmatprep.subr.bf16.mxu1 %v21358_v35 }
 0x4cf   :  { %12567 = vmatpush1.bf16.msra.mxu0 %v21356_v37 }
 0x4d0   :  { %12568 = vmatprep.subr.bf16.mxu0 %v21361_v38 }
 0x4d1   :  { %13358 = vmatpush1.bf16.msra.mxu1 %v21356_v37 }
 0x4d2   :  { %13359 = vmatprep.subr.bf16.mxu1 %v21361_v38 }
 0x4d3   :  { %12569 = vmatpush1.bf16.msra.mxu0 %v21359_v40 }
 0x4d4   :  { %12570 = vmatprep.subr.bf16.mxu0 %v21364_v42 }
 0x4d5   :  { %13360 = vmatpush1.bf16.msra.mxu1 %v21359_v40 }
 0x4d6   :  { %13361 = vmatprep.subr.bf16.mxu1 %v21364_v42 }
 0x4d7   :  { %12571 = vmatpush1.bf16.msra.mxu0 %v21362_v5 }
 0x4d8   :  { %12572 = vmatprep.subr.bf16.mxu0 %v21367_v47 }
 0x4d9   :  { %13362 = vmatpush1.bf16.msra.mxu1 %v21362_v5  ;;  %v24407_v5 = vld [vmem:[%s25164_s3 + $0x60] ss:$8 sps:$4 sm:$0xff]  }
 0x4da   :  { %13363 = vmatprep.subr.bf16.mxu1 %v21367_v47 }
 0x4db   :  { %12573 = vmatpush1.bf16.msra.mxu0 %v21365_v48 }
 0x4dc   :  { %12574 = vmatprep.subr.bf16.mxu0 %v21370_v41 }
 0x4dd   :  { %13364 = vmatpush1.bf16.msra.mxu1 %v21365_v48 }
 0x4de   :  { %13365 = vmatprep.subr.bf16.mxu1 %v21370_v41  ;;  %v24413_v41 = vld [vmem:[%s25164_s3 + $0x74] ss:$8 sps:$4 sm:$0xff]  }
 0x4df   :  { %12575 = vmatpush1.bf16.msra.mxu0 %v21368_v49 }
 0x4e0   :  { %12720 = vmatprep.subr.bf16.mxu0 %v21373_v50 }
 0x4e1   :  { %13366 = vmatpush1.bf16.msra.mxu1 %v21368_v49 }
 0x4e2   :  { %12593 = vmatmul.mubr.bf16.vlgmr.msra.gmra.mrb[56].mxu0 %v22793_v44  ;;  %13510 = vmatprep.subr.bf16.mxu1 %v21373_v50  ;;  %v21377_v44 = vld [vmem:[%s25164_s3 + $0x220] ss:$8 sps:$4 sm:$0xff]  }
 0x4e3   :  { %12721 = vmatpush1.bf16.msra.mxu0 %v21371_v51  ;;  %12602 = vmatprep.mubr.bf16.mxu0 %v25174_v1 }
 0x4e4   :  { %13384 = vmatmul.mubr.bf16.vlgmr.msra.gmra.mrb[56].mxu1 %v23130_v0  ;;  %12722 = vmatprep.subr.bf16.mxu0 %v21376_v52 }
 0x4e5   :  { %13511 = vmatpush1.bf16.msra.mxu1 %v21371_v51  ;;  %13393 = vmatprep.mubr.bf16.mxu1 %v25174_v1 }
 0x4e6   :  { %13512 = vmatprep.subr.bf16.mxu1 %v21376_v52 }
 0x4e7   :  { %12723 = vmatpush1.bf16.msra.mxu0 %v21374_v53 }
 0x4e8   :  { %12724 = vmatprep.subr.bf16.mxu0 %v21379_v56 }
 0x4e9   :  { %13513 = vmatpush1.bf16.msra.mxu1 %v21374_v53 }
 0x4ea   :  { %12603 = vmatmul.mubr.bf16.gmra.mrb[60].mxu0 %v23128_v63  ;;  %13514 = vmatprep.subr.bf16.mxu1 %v21379_v56  ;;  %v24421_v56 = vld [vmem:[%s25164_s3 + $0x70] ss:$8 sps:$4 sm:$0xff]  }
 0x4eb   :  { %12725 = vmatpush1.bf16.msra.mxu0 %v21377_v44  ;;  %12752 = vmatprep.mubr.bf16.mxu0 %v25174_v1 }
 0x4ec   :  { %13394 = vmatmul.mubr.bf16.gmra.mrb[60].mxu1 %v23458_v24  ;;  %12726 = vmatprep.subr.bf16.mxu0 %v21382_v58 }
 0x4ed   :  { %13515 = vmatpush1.bf16.msra.mxu1 %v21377_v44  ;;  %13542 = vmatprep.mubr.bf16.mxu1 %v25174_v1  ;;  %v24427_v44 = vld [vmem:[%s25164_s3 + $0x104] ss:$8 sps:$4 sm:$0xff]  }
 0x4ee   :  { %13516 = vmatprep.subr.bf16.mxu1 %v21382_v58 }
 0x4ef   :  { %12727 = vmatpush1.bf16.msra.mxu0 %v21380_v59 }
 0x4f0   :  { %12728 = vmatprep.subr.bf16.mxu0 %v21385_v61 }
 0x4f1   :  { %13517 = vmatpush1.bf16.msra.mxu1 %v21380_v59 }
 0x4f2   :  { %13518 = vmatprep.subr.bf16.mxu1 %v21385_v61 }
 0x4f3   :  { %12729 = vmatpush1.bf16.msra.mxu0 %v21383_v43 }
 0x4f4   :  { %12730 = vmatprep.subr.bf16.mxu0 %v21388_v62 }
 0x4f5   :  { %13519 = vmatpush1.bf16.msra.mxu1 %v21383_v43 }
 0x4f6   :  { %13520 = vmatprep.subr.bf16.mxu1 %v21388_v62 }
 0x4f7   :  { %12731 = vmatpush1.bf16.msra.mxu0 %v21386_v46 }
 0x4f8   :  { %12732 = vmatprep.subr.bf16.mxu0 %v21391_v2 }
 0x4f9   :  { %13521 = vmatpush1.bf16.msra.mxu1 %v21386_v46  ;;  %v24435_v46 = vld [vmem:[%s25164_s3 + $0x100] ss:$8 sps:$4 sm:$0xff]  }
 0x4fa   :  { %13522 = vmatprep.subr.bf16.mxu1 %v21391_v2 }
 0x4fb   :  { %12733 = vmatpush1.bf16.msra.mxu0 %v21389_v3 }
 0x4fc   :  { %12734 = vmatprep.subr.bf16.mxu0 %v21394_v55 }
 0x4fd   :  { %13523 = vmatpush1.bf16.msra.mxu1 %v21389_v3 }
 0x4fe   :  { %13524 = vmatprep.subr.bf16.mxu1 %v21394_v55  ;;  %v24441_v55 = vld [vmem:[%s25164_s3 + $0x114] ss:$8 sps:$4 sm:$0xff]  }
 0x4ff   :  { %12735 = vmatpush1.bf16.msra.mxu0 %v21392_v4 }
 0x500   :  { %13698 = vmatprep.subr.bf16.mxu0 %v21397_v57 }
 0x501   :  { %13525 = vmatpush1.bf16.msra.mxu1 %v21392_v4 }
 0x502   :  { %12753 = vmatmul.mubr.bf16.vlgmr.msra.gmra.mrb[56].mxu0 %v23128_v63  ;;  %14488 = vmatprep.subr.bf16.mxu1 %v21397_v57 }
 0x503   :  { %13699 = vmatpush1.bf16.msra.mxu0 %v21395_v6  ;;  %12762 = vmatprep.mubr.bf16.mxu0 %v25174_v1 }
 0x504   :  { %13543 = vmatmul.mubr.bf16.vlgmr.msra.gmra.mrb[56].mxu1 %v23458_v24  ;;  %13700 = vmatprep.subr.bf16.mxu0 %v21400_v7 }
 0x505   :  { %14489 = vmatpush1.bf16.msra.mxu1 %v21395_v6  ;;  %13552 = vmatprep.mubr.bf16.mxu1 %v25174_v1 }
 0x506   :  { %14490 = vmatprep.subr.bf16.mxu1 %v21400_v7 }
 0x507   :  { %13701 = vmatpush1.bf16.msra.mxu0 %v21398_v8 }
 0x508   :  { %13702 = vmatprep.subr.bf16.mxu0 %v21403_v29 }
 0x509   :  { %14491 = vmatpush1.bf16.msra.mxu1 %v21398_v8 }
 0x50a   :  { %12763 = vmatmul.mubr.bf16.gmra.mrb[60].mxu0 %v23130_v0  ;;  %14492 = vmatprep.subr.bf16.mxu1 %v21403_v29  ;;  %v21597_v29 = vld [vmem:[%s25163_s2] ss:$0 sm:$0xff] }
 0x50b   :  { %13703 = vmatpush1.bf16.msra.mxu0 %v21401_v9  ;;  %13730 = vmatprep.mubr.bf16.mxu0 %v25174_v1 }
 0x50c   :  { %13553 = vmatmul.mubr.bf16.gmra.mrb[60].mxu1 %v23461_v28  ;;  %13704 = vmatprep.subr.bf16.mxu0 %v21406_v10 }
 0x50d   :  { %14493 = vmatpush1.bf16.msra.mxu1 %v21401_v9  ;;  %14520 = vmatprep.mubr.bf16.mxu1 %v25174_v1 }
 0x50e   :  { %14494 = vmatprep.subr.bf16.mxu1 %v21406_v10 }
 0x50f   :  { %13705 = vmatpush1.bf16.msra.mxu0 %v21404_v11 }
 0x510   :  { %13706 = vmatprep.subr.bf16.mxu0 %v21409_v12 }
 0x511   :  { %14495 = vmatpush1.bf16.msra.mxu1 %v21404_v11 }
 0x512   :  { %14496 = vmatprep.subr.bf16.mxu1 %v21409_v12 }
 0x513   :  { %13707 = vmatpush1.bf16.msra.mxu0 %v21407_v13 }
 0x514   :  { %13708 = vmatprep.subr.bf16.mxu0 %v21412_v14 }
 0x515   :  { %14497 = vmatpush1.bf16.msra.mxu1 %v21407_v13  ;;  %v24453_v13 = vld [vmem:[%s25164_s3 + $0x110] ss:$8 sps:$4 sm:$0xff]  }
 0x516   :  { %14498 = vmatprep.subr.bf16.mxu1 %v21412_v14 }
 0x517   :  { %13709 = vmatpush1.bf16.msra.mxu0 %v21410_v16 }
 0x518   :  { %13710 = vmatprep.subr.bf16.mxu0 %v21415_v18 }
 0x519   :  { %14499 = vmatpush1.bf16.msra.mxu1 %v21410_v16 }
 0x51a   :  { %14500 = vmatprep.subr.bf16.mxu1 %v21415_v18 }
 0x51b   :  { %13711 = vmatpush1.bf16.msra.mxu0 %v21413_v20 }
 0x51c   :  { %13712 = vmatprep.subr.bf16.mxu0 %v21418_v36 }
 0x51d   :  { %14501 = vmatpush1.bf16.msra.mxu1 %v21413_v20 }
 0x51e   :  { %14502 = vmatprep.subr.bf16.mxu1 %v21418_v36 }
 0x51f   :  { %13713 = vmatpush1.bf16.msra.mxu0 %v21416_v22 }
 0x520   :  { %13831 = vmatprep.subr.bf16.mxu0 %v24311_v30 }
 0x521   :  { %14503 = vmatpush1.bf16.msra.mxu1 %v21416_v22 }
 0x522   :  { %13731 = vmatmul.mubr.bf16.vlgmr.msra.gmra.mrb[64].mxu0 %v23130_v0  ;;  %14621 = vmatprep.subr.bf16.mxu1 %v24311_v30 }
 0x523   :  { %13832 = vmatpush1.bf16.msra.mxu0 %v24316_v23  ;;  %13740 = vmatprep.mubr.bf16.mxu0 %v25174_v1 }
 0x524   :  { %14521 = vmatmul.mubr.bf16.vlgmr.msra.gmra.mrb[64].mxu1 %v23461_v28  ;;  %13833 = vmatprep.subr.bf16.mxu0 %v24322_v27 }
 0x525   :  { %14622 = vmatpush1.bf16.msra.mxu1 %v24316_v23  ;;  %14530 = vmatprep.mubr.bf16.mxu1 %v25174_v1 }
 0x526   :  { %14623 = vmatprep.subr.bf16.mxu1 %v24322_v27 }
 0x527   :  { %13834 = vmatpush1.bf16.msra.mxu0 %v24330_v39 }
 0x528   :  { %13835 = vmatprep.subr.bf16.mxu0 %v24338_v31 }
 0x529   :  { %14624 = vmatpush1.bf16.msra.mxu1 %v24330_v39 }
 0x52a   :  { %13741 = vmatmul.mubr.bf16.gmra.mrb[68].mxu0 %v23458_v24  ;;  %14625 = vmatprep.subr.bf16.mxu1 %v24338_v31 }
 0x52b   :  { %13836 = vmatpush1.bf16.msra.mxu0 %v24347_v15  ;;  %13863 = vmatprep.mubr.bf16.mxu0 %v25174_v1 }
 0x52c   :  { %14531 = vmatmul.mubr.bf16.gmra.mrb[68].mxu1 %v23793_v54  ;;  %13837 = vmatprep.subr.bf16.mxu0 %v24353_v32 }
 0x52d   :  { %14626 = vmatpush1.bf16.msra.mxu1 %v24347_v15  ;;  %14653 = vmatprep.mubr.bf16.mxu1 %v25174_v1 }
 0x52e   :  { %14627 = vmatprep.subr.bf16.mxu1 %v24353_v32 }
 0x52f   :  { %13838 = vmatpush1.bf16.msra.mxu0 %v24362_v17 }
 0x530   :  { %13839 = vmatprep.subr.bf16.mxu0 %v24370_v25 }
 0x531   :  { %14628 = vmatpush1.bf16.msra.mxu1 %v24362_v17 }
 0x532   :  { %14629 = vmatprep.subr.bf16.mxu1 %v24370_v25 }
 0x533   :  { %13840 = vmatpush1.bf16.msra.mxu0 %v24379_v26 }
 0x534   :  { %13841 = vmatprep.subr.bf16.mxu0 %v24385_v33 }
 0x535   :  { %14630 = vmatpush1.bf16.msra.mxu1 %v24379_v26  ;;  %v11107_v35 = vpop.f32.mrb[48].mxu0 }
 0x536   :  { %v11109_v37 = vpop.f32.mrb[49].mxu0  ;;  %14631 = vmatprep.subr.bf16.mxu1 %v24385_v33 }
 0x537   :  { %v11960_v38 = vpop.f32.mrb[48].mxu1  ;;  %v11134_v40 = vmax.f32 %v11107_v35, %v11109_v37  ;;  %v11111_v42 = vpop.f32.mrb[50].mxu0  ;;  %13842 = vmatpush1.bf16.msra.mxu0 %v24393_v34  ;;  %v24470_v35 = vld [vmem:[%s25164_s3 + $0x120] ss:$8 sps:$4 sm:$0xff]   ;;  %v24476_v37 = vld [vmem:[%s25164_s3 + $0x134] ss:$8 sps:$4 sm:$0xff]  }
 0x538   :  { %v11962_v47 = vpop.f32.mrb[49].mxu1  ;;  %v11113_v48 = vpop.f32.mrb[51].mxu0  ;;  %13843 = vmatprep.subr.bf16.mxu0 %v24399_v45 }
 0x539   :  { %v11987_v49 = vmax.f32 %v11960_v38, %v11962_v47  ;;  %v11964_v50 = vpop.f32.mrb[50].mxu1  ;;  %14632 = vmatpush1.bf16.msra.mxu1 %v24393_v34  ;;  %v11135_v51 = vmax.f32 %v11111_v42, %v11113_v48  ;;  %v24487_v47 = vld [vmem:[%s25164_s3 + $0x130] ss:$8 sps:$4 sm:$0xff]  }
 0x53a   :  { %v11966_v52 = vpop.f32.mrb[51].mxu1  ;;  %14633 = vmatprep.subr.bf16.mxu1 %v24399_v45 }
 0x53b   :  { %v11988_v53 = vmax.f32 %v11964_v50, %v11966_v52  ;;  %13844 = vmatpush1.bf16.msra.mxu0 %v24407_v5  ;;  %v24511_v50 = vld [vmem:[%s25164_s3 + $0x154] ss:$8 sps:$4 sm:$0xff]   ;;  %v24525_v52 = vld [vmem:[%s25164_s3 + $0x164] ss:$8 sps:$4 sm:$0xff]  }
 0x53c   :  { %13845 = vmatprep.subr.bf16.mxu0 %v24413_v41 }
 0x53d   :  { %14634 = vmatpush1.bf16.msra.mxu1 %v24407_v5  ;;  %v11117_v58 = vpop.f32.mrb[52].mxu0 }
 0x53e   :  { %v11119_v59 = vpop.f32.mrb[53].mxu0  ;;  %14635 = vmatprep.subr.bf16.mxu1 %v24413_v41 }
 0x53f   :  { %v11970_v61 = vpop.f32.mrb[52].mxu1  ;;  %v11136_v43 = vmax.f32 %v11117_v58, %v11119_v59  ;;  %v11121_v62 = vpop.f32.mrb[54].mxu0  ;;  %13846 = vmatpush1.bf16.msra.mxu0 %v24421_v56  ;;  %v24540_v58 = vld [vmem:[%s25164_s3 + $0x174] ss:$8 sps:$4 sm:$0xff]   ;;  %v24546_v59 = vld [vmem:[%s25164_s3 + $0x170] ss:$8 sps:$4 sm:$0xff]  }
 0x540   :  { %v11972_v2 = vpop.f32.mrb[53].mxu1  ;;  %v11123_v3 = vpop.f32.mrb[55].mxu0  ;;  %13982 = vmatprep.subr.bf16.mxu0 %v24427_v44 }
 0x541   :  { %v11138_v4 = vmax.f32 %v11134_v40, %v11136_v43  ;;  %v11989_v57 = vmax.f32 %v11970_v61, %v11972_v2  ;;  %v11974_v6 = vpop.f32.mrb[54].mxu1  ;;  %14636 = vmatpush1.bf16.msra.mxu1 %v24421_v56  ;;  %v11137_v7 = vmax.f32 %v11121_v62, %v11123_v3  ;;  %v24553_v61 = vld [vmem:[%s25164_s3 + $0x184] ss:$8 sps:$4 sm:$0xff]   ;;  %v24560_v43 = vld [vmem:[%s25164_s3 + $0x180] ss:$8 sps:$4 sm:$0xff]  }
 0x542   :  { %v11976_v8 = vpop.f32.mrb[55].mxu1  ;;  %13864 = vmatmul.mubr.bf16.vlgmr.msra.gmra.mrb[64].mxu0 %v23128_v63  ;;  %14772 = vmatprep.subr.bf16.mxu1 %v24427_v44  ;;  %v24460_v63 = vld [vmem:[%s25164_s3 + $0x124] ss:$8 sps:$4 sm:$0xff]   ;;  %v24568_v62 = vld [vmem:[%s25164_s3 + $0x194] ss:$8 sps:$4 sm:$0xff]  }
 0x543   :  { %v11140_v9 = vadd.f32 %v21597_v29, %v11138_v4  ;;  %v11991_v10 = vmax.f32 %v11987_v49, %v11989_v57  ;;  %v11139_v11 = vmax.f32 %v11135_v51, %v11137_v7  ;;  %v11990_v12 = vmax.f32 %v11974_v6, %v11976_v8  ;;  %13983 = vmatpush1.bf16.msra.mxu0 %v24435_v46  ;;  %v24506_v49 = vld [vmem:[%s25164_s3 + $0x140] ss:$8 sps:$4 sm:$0xff]   ;;  %v24518_v51 = vld [vmem:[%s25164_s3 + $0x150] ss:$8 sps:$4 sm:$0xff]   ;;  %v24585_v3 = vld [vmem:[%s25164_s3 + $0x1a4] ss:$8 sps:$4 sm:$0xff]  }
 0x544   :  { %14654 = vmatmul.mubr.bf16.vlgmr.msra.gmra.mrb[64].mxu1 %v23458_v24  ;;  %13984 = vmatprep.subr.bf16.mxu0 %v24441_v55  ;;  %v24574_v2 = vld [vmem:[%s25164_s3 + $0x190] ss:$8 sps:$4 sm:$0xff]   ;;  %v24600_v4 = vld [vmem:[%s25164_s3 + $0x1b4] ss:$8 sps:$4 sm:$0xff]   ;;  %v24617_v6 = vld [vmem:[%s25164_s3 + $0x1c4] ss:$8 sps:$4 sm:$0xff]  }
 0x545   :  { %v11993_v14 = vadd.f32 %v21597_v29, %v11991_v10  ;;  %v11141_v16 = vadd.f32 %v21597_v29, %v11139_v11  ;;  %v11992_v18 = vmax.f32 %v11988_v53, %v11990_v12  ;;  %14773 = vmatpush1.bf16.msra.mxu1 %v24435_v46  ;;  %13873 = vmatprep.mubr.bf16.mxu0 %v25174_v1  ;;  %v11142_v20 = vmax.f32 %v11140_v9, 0.0  ;;  %v24532_v53 = vld [vmem:[%s25164_s3 + $0x160] ss:$8 sps:$4 sm:$0xff]   ;;  %v24606_v57 = vld [vmem:[%s25164_s3 + $0x1b0] ss:$8 sps:$4 sm:$0xff]  }
 0x546   :  { %14774 = vmatprep.subr.bf16.mxu1 %v24441_v55  ;;  %14663 = vmatprep.mubr.bf16.mxu1 %v25174_v1  ;;  %v24626_v7 = vld [vmem:[%s25164_s3 + $0x1c0] ss:$8 sps:$4 sm:$0xff]   ;;  %v24632_v8 = vld [vmem:[%s25164_s3 + $0x1d4] ss:$8 sps:$4 sm:$0xff]   ;;  %v24646_v9 = vld [vmem:[%s25164_s3 + $0x1e4] ss:$8 sps:$4 sm:$0xff]  }
 0x547   :  { %v11143_v36 = vmax.f32 %v11141_v16, 0.0  ;;  %v11994_v22 = vadd.f32 %v21597_v29, %v11992_v18  ;;  %13985 = vmatpush1.bf16.msra.mxu0 %v24453_v13  ;;  %v11995_v38 = vmax.f32 %v11993_v14, 0.0  ;;  %v24640_v29 = vld [vmem:[%s25164_s3 + $0x1d0] ss:$8 sps:$4 sm:$0xff]   ;;  %v24654_v10 = vld [vmem:[%s25164_s3 + $0x1e0] ss:$8 sps:$4 sm:$0xff]  }
 0x548   :  { %13986 = vmatprep.subr.bf16.mxu0 %v24460_v63  ;;  %v24660_v11 = vld [vmem:[%s25164_s3 + $0x1f4] ss:$8 sps:$4 sm:$0xff]   ;;  %v24668_v12 = vld [vmem:[%s25164_s3 + $0x1f0] ss:$8 sps:$4 sm:$0xff]   ;;  %v24674_v14 = vld [vmem:[%s25164_s3 + $0x204] ss:$8 sps:$4 sm:$0xff]  }
 0x549   :  { %v11996_v40 = vmax.f32 %v11994_v22, 0.0  ;;  %14775 = vmatpush1.bf16.msra.mxu1 %v24453_v13  ;;  %v24479_v42 = vpack.c.bf16 %v11143_v36, %v11142_v20  ;;  %v24682_v16 = vld [vmem:[%s25164_s3 + $0x200] ss:$8 sps:$4 sm:$0xff]   ;;  %v24688_v18 = vld [vmem:[%s25164_s3 + $0x214] ss:$8 sps:$4 sm:$0xff]  }
 0x54a   :  { %13874 = vmatmul.mubr.bf16.gmra.mrb[68].mxu0 %v23130_v0  ;;  %14776 = vmatprep.subr.bf16.mxu1 %v24460_v63  ;;  %v24497_v0 = vld [vmem:[%s25164_s3 + $0x144] ss:$8 sps:$4 sm:$0xff]   ;;  %v24697_v20 = vld [vmem:[%s25164_s3 + $0x210] ss:$8 sps:$4 sm:$0xff]   ;;  %v24720_v22 = vld [vmem:[%s25164_s3 + $0x234] ss:$8 sps:$4 sm:$0xff]  }
 0x54b   :  { %25189 = vst [vmem:[#allocation4_spill] sm:$0xff] %v24479_v42  ;;  %13987 = vmatpush1.bf16.msra.mxu0 %v24470_v35  ;;  %14014 = vmatprep.mubr.bf16.mxu0 %v25174_v1  ;;  %v24490_v48 = vpack.c.bf16 %v11996_v40, %v11995_v38  ;;  %25191 = vst [vmem:[#allocation6_spill] sm:$0xff] %v24697_v20  ;;  %v24705_v36 = vld [vmem:[%s25164_s3 + $0x224] ss:$8 sps:$4 sm:$0xff]   ;;  %v24729_v38 = vld [vmem:[%s25164_s3 + $0x230] ss:$8 sps:$4 sm:$0xff]  }
 0x54c   :  { %14664 = vmatmul.mubr.bf16.gmra.mrb[68].mxu1 %v23461_v28  ;;  %13988 = vmatprep.subr.bf16.mxu0 %v24476_v37  ;;  %25192 = vst [vmem:[#allocation7_spill] sm:$0xff] %v24705_v36  ;;  %25194 = vst [vmem:[#allocation9_spill] sm:$0xff] %v24720_v22  ;;  %v24737_v40 = vld [vmem:[%s25164_s3 + $0x244] ss:$8 sps:$4 sm:$0xff]   ;;  %v24752_v42 = vld [vmem:[%s25164_s3 + $0x254] ss:$8 sps:$4 sm:$0xff]  }
 0x54d   :  { %25190 = vst [vmem:[#allocation5_spill] sm:$0xff] %v24490_v48  ;;  %14777 = vmatpush1.bf16.msra.mxu1 %v24470_v35  ;;  %14804 = vmatprep.mubr.bf16.mxu1 %v25174_v1  ;;  %25195 = vst [vmem:[#allocation10_spill] sm:$0xff] %v24729_v38  ;;  %v24746_v48 = vld [vmem:[%s25164_s3 + $0x240] ss:$8 sps:$4 sm:$0xff]  }
 0x54e   :  { %14778 = vmatprep.subr.bf16.mxu1 %v24476_v37  ;;  %25196 = vst [vmem:[#allocation11_spill] sm:$0xff] %v24737_v40  ;;  %25197 = vst [vmem:[#allocation12_spill] sm:$0xff] %v24746_v48 }
 0x54f   :  { %13989 = vmatpush1.bf16.msra.mxu0 %v24487_v47  ;;  %25198 = vst [vmem:[#allocation13_spill] sm:$0xff] %v24752_v42 }
 0x550   :  { %13990 = vmatprep.subr.bf16.mxu0 %v24497_v0 }
 0x551   :  { %14779 = vmatpush1.bf16.msra.mxu1 %v24487_v47 }
 0x552   :  { %14780 = vmatprep.subr.bf16.mxu1 %v24497_v0 }
 0x553   :  { %13991 = vmatpush1.bf16.msra.mxu0 %v24506_v49 }
 0x554   :  { %13992 = vmatprep.subr.bf16.mxu0 %v24511_v50 }
 0x555   :  { %14781 = vmatpush1.bf16.msra.mxu1 %v24506_v49 }
 0x556   :  { %14782 = vmatprep.subr.bf16.mxu1 %v24511_v50 }
 0x557   :  { %13993 = vmatpush1.bf16.msra.mxu0 %v24518_v51 }
 0x558   :  { %13994 = vmatprep.subr.bf16.mxu0 %v24525_v52 }
 0x559   :  { %14783 = vmatpush1.bf16.msra.mxu1 %v24518_v51 }
 0x55a   :  { %14784 = vmatprep.subr.bf16.mxu1 %v24525_v52 }
 0x55b   :  { %13995 = vmatpush1.bf16.msra.mxu0 %v24532_v53 }
 0x55c   :  { %13996 = vmatprep.subr.bf16.mxu0 %v24540_v58 }
 0x55d   :  { %14785 = vmatpush1.bf16.msra.mxu1 %v24532_v53 }
 0x55e   :  { %14786 = vmatprep.subr.bf16.mxu1 %v24540_v58 }
 0x55f   :  { %13997 = vmatpush1.bf16.msra.mxu0 %v24546_v59 }
 0x560   :  { %14141 = vmatprep.subr.bf16.mxu0 %v24553_v61 }
 0x561   :  { %14787 = vmatpush1.bf16.msra.mxu1 %v24546_v59 }
 0x562   :  { %14015 = vmatmul.mubr.bf16.vlgmr.msra.gmra.mrb[64].mxu0 %v23458_v24  ;;  %14931 = vmatprep.subr.bf16.mxu1 %v24553_v61  ;;  %v24592_v24 = vld [vmem:[%s25164_s3 + $0x1a0] ss:$8 sps:$4 sm:$0xff]  }
 0x563   :  { %14142 = vmatpush1.bf16.msra.mxu0 %v24560_v43  ;;  %14024 = vmatprep.mubr.bf16.mxu0 %v25174_v1 }
 0x564   :  { %14805 = vmatmul.mubr.bf16.vlgmr.msra.gmra.mrb[64].mxu1 %v23793_v54  ;;  %14143 = vmatprep.subr.bf16.mxu0 %v24568_v62 }
 0x565   :  { %14932 = vmatpush1.bf16.msra.mxu1 %v24560_v43  ;;  %14814 = vmatprep.mubr.bf16.mxu1 %v25174_v1 }
 0x566   :  { %14933 = vmatprep.subr.bf16.mxu1 %v24568_v62 }
 0x567   :  { %14144 = vmatpush1.bf16.msra.mxu0 %v24574_v2 }
 0x568   :  { %14145 = vmatprep.subr.bf16.mxu0 %v24585_v3 }
 0x569   :  { %14934 = vmatpush1.bf16.msra.mxu1 %v24574_v2 }
 0x56a   :  { %14025 = vmatmul.mubr.bf16.gmra.mrb[68].mxu0 %v23461_v28  ;;  %14935 = vmatprep.subr.bf16.mxu1 %v24585_v3 }
 0x56b   :  { %14146 = vmatpush1.bf16.msra.mxu0 %v24592_v24  ;;  %14173 = vmatprep.mubr.bf16.mxu0 %v25174_v1 }
 0x56c   :  { %14815 = vmatmul.mubr.bf16.gmra.mrb[68].mxu1 %v23802_v60  ;;  %14147 = vmatprep.subr.bf16.mxu0 %v24600_v4 }
 0x56d   :  { %14936 = vmatpush1.bf16.msra.mxu1 %v24592_v24  ;;  %14963 = vmatprep.mubr.bf16.mxu1 %v25174_v1 }
 0x56e   :  { %14937 = vmatprep.subr.bf16.mxu1 %v24600_v4 }
 0x56f   :  { %14148 = vmatpush1.bf16.msra.mxu0 %v24606_v57 }
 0x570   :  { %14149 = vmatprep.subr.bf16.mxu0 %v24617_v6 }
 0x571   :  { %14938 = vmatpush1.bf16.msra.mxu1 %v24606_v57 }
 0x572   :  { %14939 = vmatprep.subr.bf16.mxu1 %v24617_v6 }
 0x573   :  { %14150 = vmatpush1.bf16.msra.mxu0 %v24626_v7 }
 0x574   :  { %14151 = vmatprep.subr.bf16.mxu0 %v24632_v8 }
 0x575   :  { %14940 = vmatpush1.bf16.msra.mxu1 %v24626_v7 }
 0x576   :  { %14941 = vmatprep.subr.bf16.mxu1 %v24632_v8 }
 0x577   :  { %14152 = vmatpush1.bf16.msra.mxu0 %v24640_v29 }
 0x578   :  { %14153 = vmatprep.subr.bf16.mxu0 %v24646_v9 }
 0x579   :  { %14942 = vmatpush1.bf16.msra.mxu1 %v24640_v29 }
 0x57a   :  { %14943 = vmatprep.subr.bf16.mxu1 %v24646_v9 }
 0x57b   :  { %14154 = vmatpush1.bf16.msra.mxu0 %v24654_v10 }
 0x57c   :  { %14155 = vmatprep.subr.bf16.mxu0 %v24660_v11 }
 0x57d   :  { %14944 = vmatpush1.bf16.msra.mxu1 %v24654_v10 }
 0x57e   :  { %14945 = vmatprep.subr.bf16.mxu1 %v24660_v11 }
 0x57f   :  { %14156 = vmatpush1.bf16.msra.mxu0 %v24668_v12 }
 0x580   :  { %14300 = vmatprep.subr.bf16.mxu0 %v24674_v14 }
 0x581   :  { %14946 = vmatpush1.bf16.msra.mxu1 %v24668_v12 }
 0x582   :  { %14174 = vmatmul.mubr.bf16.vlgmr.msra.gmra.mrb[64].mxu0 %v23461_v28  ;;  %15090 = vmatprep.subr.bf16.mxu1 %v24674_v14  ;;  %v24714_v28 = vld [vmem:[%s25164_s3 + $0x220] ss:$8 sps:$4 sm:$0xff]  }
 0x583   :  { %14301 = vmatpush1.bf16.msra.mxu0 %v24682_v16  ;;  %14183 = vmatprep.mubr.bf16.mxu0 %v25174_v1  ;;  %25193 = vst [vmem:[#allocation8_spill] sm:$0xff] %v24714_v28 }
 0x584   :  { %14964 = vmatmul.mubr.bf16.vlgmr.msra.gmra.mrb[64].mxu1 %v23802_v60  ;;  %14302 = vmatprep.subr.bf16.mxu0 %v24688_v18 }
 0x585   :  { %15091 = vmatpush1.bf16.msra.mxu1 %v24682_v16  ;;  %14973 = vmatprep.mubr.bf16.mxu1 %v25174_v1 }
 0x586   :  { %15092 = vmatprep.subr.bf16.mxu1 %v24688_v18 }
 0x587   :  { %14303 = vmatpush1.bf16.msra.mxu0 %v24697_v20 }
 0x588   :  { %14304 = vmatprep.subr.bf16.mxu0 %v24705_v36 }
 0x589   :  { %15093 = vmatpush1.bf16.msra.mxu1 %v24697_v20  ;;  %v21526_v20 = vld [vmem:[%s25164_s3 + $0xb4] ss:$8 sps:$4 sm:$0xff]  }
 0x58a   :  { %14184 = vmatmul.mubr.bf16.gmra.mrb[68].mxu0 %v23793_v54  ;;  %15094 = vmatprep.subr.bf16.mxu1 %v24705_v36  ;;  %v25204_v36 = vmov 0  }
 0x58b   :  { %14305 = vmatpush1.bf16.msra.mxu0 %v24714_v28  ;;  %14332 = vmatprep.mubr.bf16.mxu0 %v25174_v1 }
 0x58c   :  { %14974 = vmatmul.mubr.bf16.gmra.mrb[68].mxu1 %v24105_v19  ;;  %14306 = vmatprep.subr.bf16.mxu0 %v24720_v22 }
 0x58d   :  { %15095 = vmatpush1.bf16.msra.mxu1 %v24714_v28  ;;  %15122 = vmatprep.mubr.bf16.mxu1 %v25174_v1  ;;  %v24760_v1 = vld [vmem:[%s25164_s3 + $0x250] ss:$8 sps:$4 sm:$0xff]   ;;  %v21520_v28 = vld [vmem:[%s25164_s3 + $0x94] ss:$8 sps:$4 sm:$0xff]  }
 0x58e   :  { %15096 = vmatprep.subr.bf16.mxu1 %v24720_v22  ;;  %25199 = vst [vmem:[#allocation14_spill] sm:$0xff] %v24760_v1  ;;  %v24766_v22 = vld [vmem:[%s25164_s3 + $0x264] ss:$8 sps:$4 sm:$0xff]  }
 0x58f   :  { %14307 = vmatpush1.bf16.msra.mxu0 %v24729_v38  ;;  %25200 = vst [vmem:[#allocation15_spill] sm:$0xff] %v24766_v22 }
 0x590   :  { %14308 = vmatprep.subr.bf16.mxu0 %v24737_v40 }
 0x591   :  { %15097 = vmatpush1.bf16.msra.mxu1 %v24729_v38  ;;  %v24780_v38 = vld [vmem:[%s25164_s3 + $0x274] ss:$8 sps:$4 sm:$0xff]  }
 0x592   :  { %15098 = vmatprep.subr.bf16.mxu1 %v24737_v40  ;;  %v24774_v40 = vld [vmem:[%s25164_s3 + $0x260] ss:$8 sps:$4 sm:$0xff]   ;;  %25202 = vst [vmem:[#allocation17_spill] sm:$0xff] %v24780_v38 }
 0x593   :  { %14309 = vmatpush1.bf16.msra.mxu0 %v24746_v48  ;;  %25201 = vst [vmem:[#allocation16_spill] sm:$0xff] %v24774_v40 }
 0x594   :  { %14310 = vmatprep.subr.bf16.mxu0 %v24752_v42 }
 0x595   :  { %15099 = vmatpush1.bf16.msra.mxu1 %v24746_v48  ;;  %v21517_v48 = vld [vmem:[%s25164_s3 + $0x84] ss:$8 sps:$4 sm:$0xff]  }
 0x596   :  { %15100 = vmatprep.subr.bf16.mxu1 %v24752_v42  ;;  %v24788_v42 = vld [vmem:[%s25164_s3 + $0x270] ss:$8 sps:$4 sm:$0xff]  }
 0x597   :  { %14311 = vmatpush1.bf16.msra.mxu0 %v24760_v1  ;;  %25203 = vst [vmem:[#allocation18_spill] sm:$0xff] %v24788_v42 }
 0x598   :  { %14312 = vmatprep.subr.bf16.mxu0 %v24766_v22 }
 0x599   :  { %15101 = vmatpush1.bf16.msra.mxu1 %v24760_v1  ;;  %v21515_v1 = vld [vmem:[%s25164_s3 + $0x80] ss:$8 sps:$4 sm:$0xff]  }
 0x59a   :  { %15102 = vmatprep.subr.bf16.mxu1 %v24766_v22  ;;  %v21539_v22 = vld [vmem:[%s25165_s5 + $0x40] sm:$0xff]  }
 0x59b   :  { %14313 = vmatpush1.bf16.msra.mxu0 %v24774_v40 }
 0x59c   :  { %14314 = vmatprep.subr.bf16.mxu0 %v24780_v38 }
 0x59d   :  { %15103 = vmatpush1.bf16.msra.mxu1 %v24774_v40  ;;  %v21541_v40 = vld [vmem:[%s25165_s5 + $0x48] sm:$0xff]  }
 0x59e   :  { %15104 = vmatprep.subr.bf16.mxu1 %v24780_v38  ;;  %v21540_v38 = vld [vmem:[%s25165_s5] sm:$0xff]  }
 0x59f   :  { %14315 = vmatpush1.bf16.msra.mxu0 %v24788_v42 }
 0x5a0   :  { %15278 = vmatprep.subr.bf16.mxu0 %v21517_v48  ;;  %v21518_v48 = vld [vmem:[%s25164_s3 + $0x90] ss:$8 sps:$4 sm:$0xff]  }
 0x5a1   :  { %15105 = vmatpush1.bf16.msra.mxu1 %v24788_v42  ;;  %v21523_v42 = vld [vmem:[%s25164_s3 + $0xa4] ss:$8 sps:$4 sm:$0xff]  }
 0x5a2   :  { %14333 = vmatmul.mubr.bf16.vlgmr.msra.gmra.mrb[64].mxu0 %v23793_v54  ;;  %19567 = vmatprep.subr.bf16.mxu1 %v21539_v22  ;;  %v21543_v22 = vld [vmem:[%s25165_s5 + $0x50] sm:$0xff]  }
 0x5a3   :  { %15279 = vmatpush1.bf16.msra.mxu0 %v21515_v1  ;;  %14342 = vmatprep.mubr.bf16.mxu0 %v25204_v36  ;;  %v21542_v1 = vld [vmem:[%s25165_s5 + $0x8] sm:$0xff]  }
 0x5a4   :  { %15123 = vmatmul.mubr.bf16.vlgmr.msra.gmra.mrb[64].mxu1 %v24105_v19  ;;  %15280 = vmatprep.subr.bf16.mxu0 %v21520_v28  ;;  %v21521_v28 = vld [vmem:[%s25164_s3 + $0xa0] ss:$8 sps:$4 sm:$0xff]  }
 0x5a5   :  { %15132 = vmatprep.mubr.bf16.mxu1 %v25204_v36  ;;  %19568 = vmatpush3.bf16.msra.mxu1 %v21540_v38  ;;  %v21544_v38 = vld [vmem:[%s25165_s5 + $0x10] sm:$0xff]  }
 0x5a6   :  { %19569 = vmatprep.subr.bf16.mxu1 %v21541_v40  ;;  %v21545_v40 = vld [vmem:[%s25165_s5 + $0x58] sm:$0xff]  }
 0x5a7   :  { %15281 = vmatpush1.bf16.msra.mxu0 %v21518_v48  ;;  %v21529_v48 = vld [vmem:[%s25164_s3 + $0xc4] ss:$8 sps:$4 sm:$0xff]  }
 0x5a8   :  { %15282 = vmatprep.subr.bf16.mxu0 %v21523_v42  ;;  %v21524_v42 = vld [vmem:[%s25164_s3 + $0xb0] ss:$8 sps:$4 sm:$0xff]  }
 0x5a9   :  { %19570 = vmatpush3.bf16.msra.mxu1 %v21542_v1  ;;  %v21546_v1 = vld [vmem:[%s25165_s5 + $0x18] sm:$0xff]  }
 0x5aa   :  { %14343 = vmatmul.mubr.bf16.gmra.mrb[68].mxu0 %v23802_v60  ;;  %19571 = vmatprep.subr.bf16.mxu1 %v21543_v22  ;;  %v21547_v22 = vld [vmem:[%s25165_s5 + $0x60] sm:$0xff]  }
 0x5ab   :  { %15283 = vmatpush1.bf16.msra.mxu0 %v21521_v28  ;;  %15310 = vmatprep.mubr.bf16.mxu0 %v25204_v36  ;;  %v21527_v28 = vld [vmem:[%s25164_s3 + $0xc0] ss:$8 sps:$4 sm:$0xff]  }
 0x5ac   :  { %15133 = vmatmul.mubr.bf16.gmra.mrb[68].mxu1 %v24112_v21  ;;  %15284 = vmatprep.subr.bf16.mxu0 %v21526_v20  ;;  %v21532_v20 = vld [vmem:[%s25164_s3 + $0xd4] ss:$8 sps:$4 sm:$0xff]  }
 0x5ad   :  { %19572 = vmatpush3.bf16.msra.mxu1 %v21544_v38  ;;  %v21548_v38 = vld [vmem:[%s25165_s5 + $0x20] sm:$0xff]  }
 0x5ae   :  { %19573 = vmatprep.subr.bf16.mxu1 %v21545_v40  ;;  %v21549_v40 = vld [vmem:[%s25165_s5 + $0x68] sm:$0xff]  }
 0x5af   :  { %15285 = vmatpush1.bf16.msra.mxu0 %v21524_v42  ;;  %v21530_v42 = vld [vmem:[%s25164_s3 + $0xd0] ss:$8 sps:$4 sm:$0xff]  }
 0x5b0   :  { %15286 = vmatprep.subr.bf16.mxu0 %v21529_v48  ;;  %v21535_v48 = vld [vmem:[%s25164_s3 + $0xe4] ss:$8 sps:$4 sm:$0xff]  }
 0x5b1   :  { %19574 = vmatpush3.bf16.msra.mxu1 %v21546_v1  ;;  %v21550_v1 = vld [vmem:[%s25165_s5 + $0x28] sm:$0xff]  }
 0x5b2   :  { %19575 = vmatprep.subr.bf16.mxu1 %v21547_v22  ;;  %v21551_v22 = vld [vmem:[%s25165_s5 + $0x70] sm:$0xff]  }
 0x5b3   :  { %15287 = vmatpush1.bf16.msra.mxu0 %v21527_v28  ;;  %v21533_v28 = vld [vmem:[%s25164_s3 + $0xe0] ss:$8 sps:$4 sm:$0xff]  }
 0x5b4   :  { %15288 = vmatprep.subr.bf16.mxu0 %v21532_v20  ;;  %v21538_v20 = vld [vmem:[%s25164_s3 + $0xf4] ss:$8 sps:$4 sm:$0xff]  }
 0x5b5   :  { %19576 = vmatpush3.bf16.msra.mxu1 %v21548_v38  ;;  %v21552_v38 = vld [vmem:[%s25165_s5 + $0x30] sm:$0xff]  }
 0x5b6   :  { %19577 = vmatprep.subr.bf16.mxu1 %v21549_v40  ;;  %v21553_v40 = vld [vmem:[%s25165_s5 + $0x78] sm:$0xff]  }
 0x5b7   :  { %15289 = vmatpush1.bf16.msra.mxu0 %v21530_v42  ;;  %v21536_v42 = vld [vmem:[%s25164_s3 + $0xf0] ss:$8 sps:$4 sm:$0xff]  }
 0x5b8   :  { %15290 = vmatprep.subr.bf16.mxu0 %v21535_v48  ;;  %v21554_v48 = vld [vmem:[%s25165_s5 + $0x38] sm:$0xff]  }
 0x5b9   :  { %19578 = vmatpush3.bf16.msra.mxu1 %v21550_v1  ;;  %v21555_v1 = vld [vmem:[%s25165_s5 + $0xc0] sm:$0xff]  }
 0x5ba   :  { %19579 = vmatprep.subr.bf16.mxu1 %v21551_v22 }
 0x5bb   :  { %15291 = vmatpush1.bf16.msra.mxu0 %v21533_v28 }
 0x5bc   :  { %15292 = vmatprep.subr.bf16.mxu0 %v21538_v20 }
 0x5bd   :  { %19580 = vmatpush3.bf16.msra.mxu1 %v21552_v38 }
 0x5be   :  { %19581 = vmatprep.subr.bf16.mxu1 %v21553_v40 }
 0x5bf   :  { %15293 = vmatpush1.bf16.msra.mxu0 %v21536_v42 }
 0x5c0   :  { %15411 = vmatprep.subr.bf16.mxu0 %v24311_v30 }
 0x5c1   :  { %19582 = vmatpush3.bf16.msra.mxu1 %v21554_v48 }
 0x5c2   :  { %15311 = vmatmul.mubr.bf16.vlgmr.msra.gmra.mrb[72].mxu0 %v23802_v60  ;;  %19589 = vmatprep.subr.bf16.mxu1 %v21555_v1 }
 0x5c3   :  { %15412 = vmatpush1.bf16.msra.mxu0 %v24316_v23  ;;  %15320 = vmatprep.mubr.bf16.mxu0 %v25204_v36 }
 0x5c4   :  { %15413 = vmatprep.subr.bf16.mxu0 %v24322_v27 }
 0x5c7   :  { %15414 = vmatpush1.bf16.msra.mxu0 %v24330_v39 }
 0x5c8   :  { %15415 = vmatprep.subr.bf16.mxu0 %v24338_v31 }
 0x5ca   :  { %15321 = vmatmul.mubr.bf16.gmra.mrb[76].mxu0 %v24105_v19 }
 0x5cb   :  { %15416 = vmatpush1.bf16.msra.mxu0 %v24347_v15  ;;  %15443 = vmatprep.mubr.bf16.mxu0 %v25204_v36 }
 0x5cc   :  { %15417 = vmatprep.subr.bf16.mxu0 %v24353_v32 }
 0x5cf   :  { %15418 = vmatpush1.bf16.msra.mxu0 %v24362_v17 }
 0x5d0   :  { %15419 = vmatprep.subr.bf16.mxu0 %v24370_v25 }
 0x5d3   :  { %15420 = vmatpush1.bf16.msra.mxu0 %v24379_v26 }
 0x5d4   :  { %15421 = vmatprep.subr.bf16.mxu0 %v24385_v33 }
 0x5d5   :  { %v12754_v30 = vpop.f32.mrb[56].mxu0 }
 0x5d6   :  { %v12756_v23 = vpop.f32.mrb[57].mxu0 }
 0x5d7   :  { %v13544_v27 = vpop.f32.mrb[56].mxu1  ;;  %v12781_v39 = vmax.f32 %v12754_v30, %v12756_v23  ;;  %v12758_v31 = vpop.f32.mrb[58].mxu0  ;;  %15422 = vmatpush1.bf16.msra.mxu0 %v24393_v34  ;;  %v24924_v34 = vld [vmem:[%s25166_s4] ss:$0 sm:$0xff] }
 0x5d8   :  { %v13546_v15 = vpop.f32.mrb[57].mxu1  ;;  %v12760_v22 = vpop.f32.mrb[59].mxu0  ;;  %15423 = vmatprep.subr.bf16.mxu0 %v24399_v45 }
 0x5d9   :  { %v13571_v32 = vmax.f32 %v13544_v27, %v13546_v15  ;;  %v13548_v28 = vpop.f32.mrb[58].mxu1  ;;  %v12782_v17 = vmax.f32 %v12758_v31, %v12760_v22 }
 0x5da   :  { %v13550_v20 = vpop.f32.mrb[59].mxu1 }
 0x5db   :  { %v13572_v25 = vmax.f32 %v13548_v28, %v13550_v20  ;;  %15424 = vmatpush1.bf16.msra.mxu0 %v24407_v5 }
 0x5dc   :  { %15425 = vmatprep.subr.bf16.mxu0 %v24413_v41 }
 0x5dd   :  { %v12764_v26 = vpop.f32.mrb[60].mxu0 }
 0x5de   :  { %v12766_v33 = vpop.f32.mrb[61].mxu0 }
 0x5df   :  { %v13554_v38 = vpop.f32.mrb[60].mxu1  ;;  %v12783_v40 = vmax.f32 %v12764_v26, %v12766_v33  ;;  %v12768_v42 = vpop.f32.mrb[62].mxu0  ;;  %15426 = vmatpush1.bf16.msra.mxu0 %v24421_v56 }
 0x5e0   :  { %v13556_v45 = vpop.f32.mrb[61].mxu1  ;;  %v12770_v48 = vpop.f32.mrb[63].mxu0  ;;  %15562 = vmatprep.subr.bf16.mxu0 %v24427_v44 }
 0x5e1   :  { %v12785_v1 = vmax.f32 %v12781_v39, %v12783_v40  ;;  %v13573_v5 = vmax.f32 %v13554_v38, %v13556_v45  ;;  %v13558_v30 = vpop.f32.mrb[62].mxu1  ;;  %v12784_v41 = vmax.f32 %v12768_v42, %v12770_v48 }
 0x5e2   :  { %v13560_v23 = vpop.f32.mrb[63].mxu1  ;;  %15444 = vmatmul.mubr.bf16.vlgmr.msra.gmra.mrb[72].mxu0 %v23793_v54 }
 0x5e3   :  { %v12787_v27 = vadd.f32 %v24924_v34, %v12785_v1  ;;  %v13575_v31 = vmax.f32 %v13571_v32, %v13573_v5  ;;  %v12786_v56 = vmax.f32 %v12782_v17, %v12784_v41  ;;  %v13574_v15 = vmax.f32 %v13558_v30, %v13560_v23  ;;  %15563 = vmatpush1.bf16.msra.mxu0 %v24435_v46 }
 0x5e4   :  { %15564 = vmatprep.subr.bf16.mxu0 %v24441_v55  ;;  %15453 = vmatprep.mubr.bf16.mxu0 %v25204_v36 }
 0x5e5   :  { %v13577_v44 = vadd.f32 %v24924_v34, %v13575_v31  ;;  %v12788_v39 = vadd.f32 %v24924_v34, %v12786_v56  ;;  %v13576_v22 = vmax.f32 %v13572_v25, %v13574_v15  ;;  %v12789_v28 = vmax.f32 %v12787_v27, 0.0  ;;  %v21556_v25 = vld [vmem:[%s25165_s5 + $0x80] sm:$0xff]  }
 0x5e7   :  { %v12790_v20 = vmax.f32 %v12788_v39, 0.0  ;;  %v13578_v54 = vadd.f32 %v24924_v34, %v13576_v22  ;;  %15565 = vmatpush1.bf16.msra.mxu0 %v24453_v13  ;;  %v13579_v32 = vmax.f32 %v13577_v44, 0.0  ;;  %v21557_v13 = vld [vmem:[%s25165_s5 + $0xc8] sm:$0xff]  }
 0x5e8   :  { %15566 = vmatprep.subr.bf16.mxu0 %v24460_v63  ;;  %v21559_v63 = vld [vmem:[%s25165_s5 + $0xd0] sm:$0xff]  }
 0x5e9   :  { %v12791_v17 = vpack.c.bf16 %v12790_v20, %v12789_v28  ;;  %v13580_v46 = vmax.f32 %v13578_v54, 0.0 }
 0x5ea   :  { %15454 = vmatmul.mubr.bf16.gmra.mrb[76].mxu0 %v23802_v60  ;;  %v21558_v60 = vld [vmem:[%s25165_s5 + $0x88] sm:$0xff]  }
 0x5eb   :  { %15567 = vmatpush1.bf16.msra.mxu0 %v24470_v35  ;;  %v13581_v55 = vpack.c.bf16 %v13580_v46, %v13579_v32  ;;  %15594 = vmatprep.mubr.bf16.mxu0 %v25204_v36  ;;  %v21560_v35 = vld [vmem:[%s25165_s5 + $0x90] sm:$0xff]  }
 0x5ec   :  { %15568 = vmatprep.subr.bf16.mxu0 %v24476_v37  ;;  %v21561_v37 = vld [vmem:[%s25165_s5 + $0xd8] sm:$0xff]  }
 0x5ed   :  { %16317 = vmatprep.mubr.bf16.mxu1 %v13581_v55 }
 0x5ee   :  { %16318 = vmatmul.mubr.bf16.vlgmr.msra.gmra.mrb[72].mxu1 %v12791_v17 }
 0x5ef   :  { %15569 = vmatpush1.bf16.msra.mxu0 %v24487_v47  ;;  %19590 = vmatpush3.bf16.msra.mxu1 %v21556_v25  ;;  %v21562_v47 = vld [vmem:[%s25165_s5 + $0x98] sm:$0xff]  }
 0x5f0   :  { %15570 = vmatprep.subr.bf16.mxu0 %v24497_v0  ;;  %19591 = vmatprep.subr.bf16.mxu1 %v21557_v13  ;;  %v21563_v0 = vld [vmem:[%s25165_s5 + $0xe0] sm:$0xff]  }
 0x5f3   :  { %15571 = vmatpush1.bf16.msra.mxu0 %v24506_v49  ;;  %19592 = vmatpush3.bf16.msra.mxu1 %v21558_v60  ;;  %v21564_v49 = vld [vmem:[%s25165_s5 + $0xa0] sm:$0xff]  }
 0x5f4   :  { %15572 = vmatprep.subr.bf16.mxu0 %v24511_v50  ;;  %19593 = vmatprep.subr.bf16.mxu1 %v21559_v63  ;;  %v21565_v50 = vld [vmem:[%s25165_s5 + $0xe8] sm:$0xff]  }
 0x5f7   :  { %15573 = vmatpush1.bf16.msra.mxu0 %v24518_v51  ;;  %19594 = vmatpush3.bf16.msra.mxu1 %v21560_v35  ;;  %v21566_v51 = vld [vmem:[%s25165_s5 + $0xa8] sm:$0xff]  }
 0x5f8   :  { %15574 = vmatprep.subr.bf16.mxu0 %v24525_v52  ;;  %19595 = vmatprep.subr.bf16.mxu1 %v21561_v37  ;;  %v21567_v52 = vld [vmem:[%s25165_s5 + $0xf0] sm:$0xff]  }
 0x5fb   :  { %15575 = vmatpush1.bf16.msra.mxu0 %v24532_v53  ;;  %19596 = vmatpush3.bf16.msra.mxu1 %v21562_v47  ;;  %v21568_v53 = vld [vmem:[%s25165_s5 + $0xb0] sm:$0xff]   ;;  %v21571_v47 = vld [vmem:[%s25165_s5 + $0x100] sm:$0xff]  }
 0x5fc   :  { %15576 = vmatprep.subr.bf16.mxu0 %v24540_v58  ;;  %19597 = vmatprep.subr.bf16.mxu1 %v21563_v0  ;;  %v21570_v58 = vld [vmem:[%s25165_s5 + $0xb8] sm:$0xff]   ;;  %v21572_v0 = vld [vmem:[%s25165_s5 + $0x108] sm:$0xff]  }
 0x5ff   :  { %15577 = vmatpush1.bf16.msra.mxu0 %v24546_v59  ;;  %19598 = vmatpush3.bf16.msra.mxu1 %v21564_v49  ;;  %v25205_v59 = vld [vmem:[#allocation6_spill] sm:$0xff] }
 0x600   :  { %15721 = vmatprep.subr.bf16.mxu0 %v24553_v61  ;;  %19599 = vmatprep.subr.bf16.mxu1 %v21565_v50  ;;  %v25206_v61 = vld [vmem:[#allocation7_spill] sm:$0xff]  ;;  %v21573_v49 = vld [vmem:[%s25165_s5 + $0x110] sm:$0xff]  }
 0x601   :  { %v21574_v50 = vld [vmem:[%s25165_s5 + $0x118] sm:$0xff]  }
 0x602   :  { %15595 = vmatmul.mubr.bf16.vlgmr.msra.gmra.mrb[72].mxu0 %v24105_v19  ;;  %v21569_v19 = vld [vmem:[%s25165_s5 + $0xf8] sm:$0xff]  }
 0x603   :  { %15722 = vmatpush1.bf16.msra.mxu0 %v24560_v43  ;;  %15604 = vmatprep.mubr.bf16.mxu0 %v25204_v36  ;;  %v25207_v43 = vld [vmem:[#allocation4_spill] sm:$0xff] }
 0x604   :  { %15723 = vmatprep.subr.bf16.mxu0 %v24568_v62  ;;  %19600 = vmatpush3.bf16.msra.mxu1 %v21566_v51  ;;  %v25208_v62 = vld [vmem:[#allocation8_spill] sm:$0xff] }
 0x605   :  { %19601 = vmatprep.subr.bf16.mxu1 %v21567_v52  ;;  %v21575_v51 = vld [vmem:[%s25165_s5 + $0x120] sm:$0xff]   ;;  %v21576_v52 = vld [vmem:[%s25165_s5 + $0x128] sm:$0xff]  }
 0x607   :  { %15724 = vmatpush1.bf16.msra.mxu0 %v24574_v2  ;;  %v25209_v2 = vld [vmem:[#allocation9_spill] sm:$0xff] }
 0x608   :  { %15725 = vmatprep.subr.bf16.mxu0 %v24585_v3  ;;  %19602 = vmatpush3.bf16.msra.mxu1 %v21568_v53  ;;  %v25210_v3 = vld [vmem:[#allocation10_spill] sm:$0xff] }
 0x609   :  { %19603 = vmatprep.subr.bf16.mxu1 %v21569_v19  ;;  %v21577_v53 = vld [vmem:[%s25165_s5 + $0x130] sm:$0xff]   ;;  %v21578_v19 = vld [vmem:[%s25165_s5 + $0x138] sm:$0xff]  }
 0x60a   :  { %15605 = vmatmul.mubr.bf16.gmra.mrb[76].mxu0 %v24112_v21 }
 0x60b   :  { %15726 = vmatpush1.bf16.msra.mxu0 %v24592_v24  ;;  %15753 = vmatprep.mubr.bf16.mxu0 %v25204_v36  ;;  %v25212_v24 = vld [vmem:[#allocation12_spill] sm:$0xff] }
 0x60c   :  { %15727 = vmatprep.subr.bf16.mxu0 %v24600_v4  ;;  %19604 = vmatpush3.bf16.msra.mxu1 %v21570_v58  ;;  %v25213_v4 = vld [vmem:[#allocation13_spill] sm:$0xff] }
 0x60f   :  { %15728 = vmatpush1.bf16.msra.mxu0 %v24606_v57  ;;  %v25214_v57 = vld [vmem:[#allocation14_spill] sm:$0xff] }
 0x610   :  { %15729 = vmatprep.subr.bf16.mxu0 %v24617_v6  ;;  %v25215_v6 = vld [vmem:[#allocation15_spill] sm:$0xff] }
 0x613   :  { %15730 = vmatpush1.bf16.msra.mxu0 %v24626_v7  ;;  %v25216_v7 = vld [vmem:[#allocation16_spill] sm:$0xff] }
 0x614   :  { %15731 = vmatprep.subr.bf16.mxu0 %v24632_v8  ;;  %v25217_v8 = vld [vmem:[#allocation17_spill] sm:$0xff] }
 0x617   :  { %15732 = vmatpush1.bf16.msra.mxu0 %v24640_v29  ;;  %v25218_v29 = vld [vmem:[#allocation18_spill] sm:$0xff] }
 0x618   :  { %15733 = vmatprep.subr.bf16.mxu0 %v24646_v9  ;;  %v21599_v9 = vmov 0.0  }
 0x619   :  { %19638 = vmatprep.subr.bf16.mxu1 %v21599_v9 }
 0x61b   :  { %15734 = vmatpush1.bf16.msra.mxu0 %v24654_v10  ;;  %v25219_v10 = vld [vmem:[#allocation5_spill] sm:$0xff] }
 0x61c   :  { %15735 = vmatprep.subr.bf16.mxu0 %v24660_v11 }
 0x61f   :  { %15736 = vmatpush1.bf16.msra.mxu0 %v24668_v12 }
 0x620   :  { %15880 = vmatprep.subr.bf16.mxu0 %v24674_v14 }
 0x622   :  { %15754 = vmatmul.mubr.bf16.vlgmr.msra.gmra.mrb[72].mxu0 %v24112_v21  ;;  %v25211_v21 = vld [vmem:[#allocation11_spill] sm:$0xff] }
 0x623   :  { %15881 = vmatpush1.bf16.msra.mxu0 %v24682_v16  ;;  %15763 = vmatprep.mubr.bf16.mxu0 %v25204_v36 }
 0x624   :  { %15882 = vmatprep.subr.bf16.mxu0 %v24688_v18 }
 0x627   :  { %15883 = vmatpush1.bf16.msra.mxu0 %v25205_v59 }
 0x628   :  { %15884 = vmatprep.subr.bf16.mxu0 %v25206_v61 }
 0x62a   :  { %15764 = vmatmul.mubr.bf16.gmra.mrb[76].mxu0 %v25207_v43 }
 0x62b   :  { %15885 = vmatpush1.bf16.msra.mxu0 %v25208_v62  ;;  %15912 = vmatprep.mubr.bf16.mxu0 %v25204_v36 }
 0x62c   :  { %15886 = vmatprep.subr.bf16.mxu0 %v25209_v2 }
 0x62f   :  { %15887 = vmatpush1.bf16.msra.mxu0 %v25210_v3 }
 0x630   :  { %15888 = vmatprep.subr.bf16.mxu0 %v25211_v21 }
 0x633   :  { %15889 = vmatpush1.bf16.msra.mxu0 %v25212_v24 }
 0x634   :  { %15890 = vmatprep.subr.bf16.mxu0 %v25213_v4 }
 0x637   :  { %15891 = vmatpush1.bf16.msra.mxu0 %v25214_v57 }
 0x638   :  { %15892 = vmatprep.subr.bf16.mxu0 %v25215_v6 }
 0x63b   :  { %15893 = vmatpush1.bf16.msra.mxu0 %v25216_v7 }
 0x63c   :  { %15894 = vmatprep.subr.bf16.mxu0 %v25217_v8 }
 0x63f   :  { %15895 = vmatpush1.bf16.msra.mxu0 %v25218_v29 }
 0x642   :  { %15913 = vmatmul.mubr.bf16.vlgmr.msra.gmra.mrb[72].mxu0 %v25207_v43 }
 0x643   :  { %15922 = vmatprep.mubr.bf16.mxu0 %v25204_v36 }
 0x64a   :  { %15923 = vmatmul.mubr.bf16.gmra.mrb[76].mxu0 %v25219_v10 }
 0x675   :  { %v14334_v11 = vpop.f32.mrb[64].mxu0 }
 0x676   :  { %v14336_v12 = vpop.f32.mrb[65].mxu0 }
 0x677   :  { %v15124_v14 = vpop.f32.mrb[64].mxu1  ;;  %v14361_v16 = vmax.f32 %v14334_v11, %v14336_v12  ;;  %v14338_v18 = vpop.f32.mrb[66].mxu0 }
 0x678   :  { %v15126_v26 = vpop.f32.mrb[65].mxu1  ;;  %v14340_v33 = vpop.f32.mrb[67].mxu0 }
 0x679   :  { %v15151_v38 = vmax.f32 %v15124_v14, %v15126_v26  ;;  %v15128_v40 = vpop.f32.mrb[66].mxu1  ;;  %v14362_v42 = vmax.f32 %v14338_v18, %v14340_v33 }
 0x67a   :  { %v15130_v45 = vpop.f32.mrb[67].mxu1 }
 0x67b   :  { %v15152_v48 = vmax.f32 %v15128_v40, %v15130_v45  ;;  %v21579_v40 = vld [vmem:[%s25167_s7] sm:$0xff]   ;;  %v21580_v45 = vld [vmem:[%s25167_s7 + $0x8] sm:$0xff]  }
 0x67d   :  { %v14344_v1 = vpop.f32.mrb[68].mxu0 }
 0x67e   :  { %v14346_v5 = vpop.f32.mrb[69].mxu0 }
 0x67f   :  { %v15134_v36 = vpop.f32.mrb[68].mxu1  ;;  %v14363_v30 = vmax.f32 %v14344_v1, %v14346_v5  ;;  %v14348_v41 = vpop.f32.mrb[70].mxu0  ;;  %v21583_v1 = vld [vmem:[%s25167_s7 + $0x20] sm:$0xff]   ;;  %v21584_v5 = vld [vmem:[%s25167_s7 + $0x28] sm:$0xff]  }
 0x680   :  { %v15136_v23 = vpop.f32.mrb[69].mxu1  ;;  %v14350_v27 = vpop.f32.mrb[71].mxu0 }
 0x681   :  { %v14365_v31 = vmax.f32 %v14361_v16, %v14363_v30  ;;  %v15153_v56 = vmax.f32 %v15134_v36, %v15136_v23  ;;  %v15138_v15 = vpop.f32.mrb[70].mxu1  ;;  %v14364_v44 = vmax.f32 %v14348_v41, %v14350_v27  ;;  %v19508_v36 = vld [vmem:[%s25168_s6] ss:$0 sm:$0xff] }
 0x682   :  { %v15140_v39 = vpop.f32.mrb[71].mxu1 }
 0x683   :  { %v14367_v22 = vadd.f32 %v24924_v34, %v14365_v31  ;;  %v15155_v28 = vmax.f32 %v15151_v38, %v15153_v56  ;;  %v14366_v20 = vmax.f32 %v14362_v42, %v14364_v44  ;;  %v15154_v54 = vmax.f32 %v15138_v15, %v15140_v39 }
 0x685   :  { %v15157_v32 = vadd.f32 %v24924_v34, %v15155_v28  ;;  %v14368_v17 = vadd.f32 %v24924_v34, %v14366_v20  ;;  %v15156_v46 = vmax.f32 %v15152_v48, %v15154_v54  ;;  %v14369_v55 = vmax.f32 %v14367_v22, 0.0  ;;  %v21582_v48 = vld [vmem:[%s25167_s7 + $0x18] sm:$0xff]   ;;  %v21585_v28 = vld [vmem:[%s25167_s7 + $0x30] sm:$0xff]  }
 0x686   :  { %v21586_v20 = vld [vmem:[%s25167_s7 + $0x38] sm:$0xff]  }
 0x687   :  { %v14370_v25 = vmax.f32 %v14368_v17, 0.0  ;;  %v15158_v13 = vadd.f32 %v24924_v34, %v15156_v46  ;;  %v15159_v60 = vmax.f32 %v15157_v32, 0.0 }
 0x689   :  { %v14371_v63 = vpack.c.bf16 %v14370_v25, %v14369_v55  ;;  %v15160_v35 = vmax.f32 %v15158_v13, 0.0 }
 0x68b   :  { %v15161_v37 = vpack.c.bf16 %v15160_v35, %v15159_v60 }
 0x68d   :  { %16358 = vmatprep.mubr.bf16.mxu1 %v15161_v37  ;;  %v21588_v37 = vld [vmem:[%s25169_s9 + $0x8] sm:$0xff]  }
 0x68e   :  { %16359 = vmatmul.mubr.bf16.vlgmr.msra.gmra.mrb[76].mxu1 %v14371_v63  ;;  %v21587_v63 = vld [vmem:[%s25169_s9] sm:$0xff]  }
 0x68f   :  { %19639 = vmatpush3.bf16.msra.mxu1 %v21571_v47  ;;  %19654 = vmatprep.mubr.msk.bf16.mxu1 %vm21600_vm0, %v21599_v9  ;;  %v21589_v47 = vld [vmem:[%s25169_s9 + $0x10] sm:$0xff]  }
 0x690   :  { %19640 = vmatprep.subr.bf16.mxu1 %v21599_v9 }
 0x693   :  { %19641 = vmatpush3.bf16.msra.mxu1 %v21572_v0  ;;  %v21590_v0 = vld [vmem:[%s25169_s9 + $0x18] sm:$0xff]  }
 0x694   :  { %19642 = vmatprep.subr.bf16.mxu1 %v21599_v9 }
 0x697   :  { %19643 = vmatpush3.bf16.msra.mxu1 %v21573_v49  ;;  %v21591_v49 = vld [vmem:[%s25169_s9 + $0x20] sm:$0xff]  }
 0x698   :  { %19644 = vmatprep.subr.bf16.mxu1 %v21599_v9 }
 0x69b   :  { %19645 = vmatpush3.bf16.msra.mxu1 %v21574_v50  ;;  %v21592_v50 = vld [vmem:[%s25169_s9 + $0x28] sm:$0xff]  }
 0x69c   :  { %19646 = vmatprep.subr.bf16.mxu1 %v21599_v9 }
 0x69f   :  { %19647 = vmatpush3.bf16.msra.mxu1 %v21575_v51  ;;  %v21593_v51 = vld [vmem:[%s25169_s9 + $0x30] sm:$0xff]  }
 0x6a0   :  { %19648 = vmatprep.subr.bf16.mxu1 %v21599_v9 }
 0x6a3   :  { %19649 = vmatpush3.bf16.msra.mxu1 %v21576_v52  ;;  %v21594_v52 = vld [vmem:[%s25169_s9 + $0x38] sm:$0xff]  }
 0x6a4   :  { %19650 = vmatprep.subr.bf16.mxu1 %v21599_v9 }
 0x6a7   :  { %19651 = vmatpush3.bf16.msra.mxu1 %v21577_v53  ;;  %v19549_v53 = vld [vmem:[%s25170_s8] ss:$0 sm:$0xff] }
 0x6a8   :  { %19652 = vmatprep.subr.bf16.mxu1 %v21599_v9 }
 0x6ab   :  { %19653 = vmatpush3.bf16.msra.mxu1 %v21578_v19 }
 0x6ac   :  { %19658 = vmatprep.subr.bf16.mxu1 %v21599_v9 }
 0x6c1   :  { %v19583_v58 = vpop.f32.mrb[72].mxu1 }
 0x6c2   :  { %v19584_v59 = vpop.f32.mrb[73].mxu1 }
 0x6c3   :  { %v19585_v61 = vadd.f32 %v19584_v59, %v19583_v58  ;;  %v19586_v43 = vpop.f32.mrb[74].mxu1 }
 0x6c4   :  { %v19587_v62 = vpop.f32.mrb[75].mxu1 }
 0x6c5   :  { %v19588_v2 = vadd.f32 %v19587_v62, %v19586_v43  ;;  %v16320_v23 = vadd.f32 %v19585_v61, %v19508_v36 }
 0x6c7   :  { %v16323_v15 = vadd.f32 %v19588_v2, %v19508_v36 }
 0x715   :  { %v15914_v3 = vpop.f32.mrb[72].mxu0 }
 0x716   :  { %v15916_v21 = vpop.f32.mrb[73].mxu0 }
 0x717   :  { %v15941_v24 = vmax.f32 %v15914_v3, %v15916_v21  ;;  %v15918_v4 = vpop.f32.mrb[74].mxu0 }
 0x718   :  { %v15920_v57 = vpop.f32.mrb[75].mxu0 }
 0x719   :  { %v15942_v6 = vmax.f32 %v15918_v4, %v15920_v57 }
 0x71d   :  { %v15924_v7 = vpop.f32.mrb[76].mxu0 }
 0x71e   :  { %v15926_v8 = vpop.f32.mrb[77].mxu0 }
 0x71f   :  { %v15943_v29 = vmax.f32 %v15924_v7, %v15926_v8  ;;  %v15928_v10 = vpop.f32.mrb[78].mxu0 }
 0x720   :  { %v15930_v11 = vpop.f32.mrb[79].mxu0 }
 0x721   :  { %v15945_v12 = vmax.f32 %v15941_v24, %v15943_v29  ;;  %v15944_v14 = vmax.f32 %v15928_v10, %v15930_v11 }
 0x723   :  { %v15947_v16 = vadd.f32 %v24924_v34, %v15945_v12  ;;  %v15946_v18 = vmax.f32 %v15942_v6, %v15944_v14 }
 0x725   :  { %v15948_v26 = vadd.f32 %v24924_v34, %v15946_v18  ;;  %v15949_v33 = vmax.f32 %v15947_v16, 0.0  ;;  %v21581_v34 = vld [vmem:[%s25167_s7 + $0x10] sm:$0xff]  }
 0x727   :  { %v15950_v38 = vmax.f32 %v15948_v26, 0.0 }
 0x729   :  { %v15951_v42 = vpack.c.bf16 %v15950_v38, %v15949_v33 }
 0x72b   :  { %19655 = vmatmul.mubr.bf16.vlgmr.msra.gmra.mrb[80].mxu1 %v15951_v42 }
 0x72c   :  { %19659 = vmatpush3.bf16.msra.mxu1 %v21579_v40  ;;  %19674 = vmatprep.mubr.msk.bf16.mxu1 %vm21600_vm0, %v21599_v9 }
 0x72d   :  { %19660 = vmatprep.subr.bf16.mxu1 %v21599_v9 }
 0x730   :  { %19661 = vmatpush3.bf16.msra.mxu1 %v21580_v45 }
 0x731   :  { %19662 = vmatprep.subr.bf16.mxu1 %v21599_v9 }
 0x734   :  { %19663 = vmatpush3.bf16.msra.mxu1 %v21581_v34 }
 0x735   :  { %19664 = vmatprep.subr.bf16.mxu1 %v21599_v9 }
 0x738   :  { %19665 = vmatpush3.bf16.msra.mxu1 %v21582_v48 }
 0x739   :  { %19666 = vmatprep.subr.bf16.mxu1 %v21599_v9 }
 0x73c   :  { %19667 = vmatpush3.bf16.msra.mxu1 %v21583_v1 }
 0x73d   :  { %19668 = vmatprep.subr.bf16.mxu1 %v21599_v9 }
 0x740   :  { %19669 = vmatpush3.bf16.msra.mxu1 %v21584_v5 }
 0x741   :  { %19670 = vmatprep.subr.bf16.mxu1 %v21599_v9 }
 0x744   :  { %19671 = vmatpush3.bf16.msra.mxu1 %v21585_v28 }
 0x745   :  { %19672 = vmatprep.subr.bf16.mxu1 %v21599_v9 }
 0x748   :  { %19673 = vmatpush3.bf16.msra.mxu1 %v21586_v20 }
 0x749   :  { %19678 = vmatprep.subr.bf16.mxu1 %v21599_v9 }
 0x761   :  { %v19605_v30 = vpop.f32.mrb[76].mxu1 }
 0x762   :  { %v19606_v41 = vpop.f32.mrb[77].mxu1 }
 0x763   :  { %v19607_v27 = vadd.f32 %v19606_v41, %v19605_v30  ;;  %v19608_v31 = vpop.f32.mrb[78].mxu1 }
 0x764   :  { %v19609_v56 = vpop.f32.mrb[79].mxu1 }
 0x765   :  { %v19610_v44 = vadd.f32 %v19609_v56, %v19608_v31  ;;  %v16361_v39 = vadd.f32 %v19607_v27, %v16320_v23 }
 0x767   :  { %v16364_v22 = vadd.f32 %v19610_v44, %v16323_v15 }
 0x7fe   :  { %v16401_v54 = vpop.f32.mrb[80].mxu1 }
 0x7ff   :  { %v16402_v32 = vadd.f32 %v16401_v54, %v16361_v39  ;;  %v19656_v17 = vpop.f32.mrb[81].mxu1 }
 0x800   :  { %v16404_v46 = vpop.f32.mrb[82].mxu1 }
 0x801   :  { %v16405_v55 = vadd.f32 %v16404_v46, %v16364_v22  ;;  %v19657_v25 = vpop.f32.mrb[83].mxu1  ;;  %v16408_v13 = vmax.f32 %v16402_v32, 0.0 }
 0x803   :  { %v16409_v60 = vmax.f32 %v16405_v55, 0.0 }
 0x805   :  { %v16410_v35 = vpack.c.bf16 %v16409_v60, %v16408_v13 }
 0x807   :  { %19675 = vmatmul.mubr.bf16.vlgmr.msra.gmra.mrb[84].mxu1 %v16410_v35 }
 0x808   :  { %19679 = vmatpush3.bf16.msra.mxu1 %v21587_v63  ;;  %19694 = vmatprep.mubr.msk.bf16.mxu1 %vm21600_vm0, %v21599_v9 }
 0x809   :  { %19680 = vmatprep.subr.bf16.mxu1 %v21599_v9 }
 0x80c   :  { %19681 = vmatpush3.bf16.msra.mxu1 %v21588_v37 }
 0x80d   :  { %19682 = vmatprep.subr.bf16.mxu1 %v21599_v9 }
 0x810   :  { %19683 = vmatpush3.bf16.msra.mxu1 %v21589_v47 }
 0x811   :  { %19684 = vmatprep.subr.bf16.mxu1 %v21599_v9 }
 0x814   :  { %19685 = vmatpush3.bf16.msra.mxu1 %v21590_v0 }
 0x815   :  { %19686 = vmatprep.subr.bf16.mxu1 %v21599_v9 }
 0x818   :  { %19687 = vmatpush3.bf16.msra.mxu1 %v21591_v49 }
 0x819   :  { %19688 = vmatprep.subr.bf16.mxu1 %v21599_v9 }
 0x81c   :  { %19689 = vmatpush3.bf16.msra.mxu1 %v21592_v50 }
 0x81d   :  { %19690 = vmatprep.subr.bf16.mxu1 %v21599_v9 }
 0x820   :  { %19691 = vmatpush3.bf16.msra.mxu1 %v21593_v51 }
 0x821   :  { %19692 = vmatprep.subr.bf16.mxu1 %v21599_v9  ;;  %v19558_v9 = vld [vmem:[%s25171_s10] ss:$0 sm:$0xff] }
 0x824   :  { %19693 = vmatpush3.bf16.msra.mxu1 %v21594_v52 }
 0x8da   :  { %v16516_v19 = vpop.f32.mrb[84].mxu1 }
 0x8db   :  { %v16517_v58 = vadd.f32 %v19549_v53, %v16516_v19  ;;  %v19676_v59 = vpop.f32.mrb[85].mxu1 }
 0x8dc   :  { %v16519_v61 = vpop.f32.mrb[86].mxu1 }
 0x8dd   :  { %v16520_v43 = vadd.f32 %v19549_v53, %v16519_v61  ;;  %v19677_v62 = vpop.f32.mrb[87].mxu1  ;;  %v16523_v2 = vmax.f32 %v16517_v58, 0.0 }
 0x8df   :  { %v16524_v3 = vmax.f32 %v16520_v43, 0.0 }
 0x8e1   :  { %v16525_v21 = vpack.c.bf16 %v16524_v3, %v16523_v2 }
 0x8e3   :  { %19695 = vmatmul.mubr.bf16.vlgmr.msra.gmra.mrb[88].mxu1 %v16525_v21 }
 0x9b6   :  { %v16631_v24 = vpop.f32.mrb[88].mxu1 }
 0x9b7   :  { %v16632_v4 = vadd.f32 %v19558_v9, %v16631_v24  ;;  %v19696_v57 = vpop.f32.mrb[89].mxu1 }
 0x9b8   :  { %v16634_v6 = vpop.f32.mrb[90].mxu1 }
 0x9b9   :  { %16638 = vst [vmem:[%s25172_s11] sm:$0xff] %v16632_v4  ;;  %v16635_v7 = vadd.f32 %v19558_v9, %v16634_v6  ;;  %v19697_v8 = vpop.f32.mrb[91].mxu1 }
 0x9bb   :  { %16639 = vst [vmem:[%s25172_s11 + $0x8] sm:$0xff] %v16635_v7 }

</bundles_post_ra>
